<compile_context>
chip_gen: v7x
topology: tpu7x:2x2x1
jax: 0.10.0
libtpu: 0.0.40
codegen_flags: <defaults>
</compile_context>

<pallas_src>
import functools

import jax
import jax.numpy as jnp
from jax.experimental import pallas as pl
from jax.experimental.pallas import tpu as pltpu


def _zero_border(ref):
    """Zero only the 1-pixel spatial border of a (Hp, Wp, C) VMEM scratch.

    The interior is fully overwritten every grid step, so the full-buffer
    zero-fill of the old version is unnecessary. The border is re-zeroed each
    step (cost ~ perimeter) instead of only at program_id == 0 so the kernel
    stays correct when the 'parallel' batch axis is split across TensorCores
    (each core owns a private scratch and may never run step 0).
    """
    Hp, Wp, C = ref.shape
    zrow = jnp.zeros((1, Wp, C), jnp.float32)
    zcol = jnp.zeros((Hp, 1, C), jnp.float32)
    ref[0:1, :, :] = zrow
    ref[Hp - 1:Hp, :, :] = zrow
    ref[:, 0:1, :] = zcol
    ref[:, Wp - 1:Wp, :] = zcol


def _conv3x3(src_ref, w_ref, b_ref, H, W, pack_taps):
    """3x3 stride-1 conv over a zero-padded (H+2, W+2, Cin) VMEM buffer.

    w_ref is the packed (9*Cin, Cout) weight matrix, tap-major (k = kh*3 + kw).
    Returns the (H*W, Cout) f32 pre-activation with bias already added.
    """
    Cout = w_ref.shape[1]
    Cin = w_ref.shape[0] // 9
    src = src_ref[...]                                   # (H+2, W+2, Cin)
    taps = [src[kh:kh + H, kw:kw + W, :]                 # 9 shifted (H, W, Cin) views
            for kh in range(3) for kw in range(3)]
    if pack_taps:
        # One wide MXU contraction: K = 9*Cin instead of 9 matmuls with K = Cin.
        pm = jnp.concatenate(taps, axis=-1).reshape(H * W, 9 * Cin)
        acc = jnp.dot(pm.astype(w_ref.dtype), w_ref[...],
                      preferred_element_type=jnp.float32)
    else:
        # Fallback: 9 narrow matmuls, slicing the packed weight per tap.
        acc = jnp.zeros((H * W, Cout), jnp.float32)
        for k in range(9):
            acc = acc + jnp.dot(
                taps[k].reshape(H * W, Cin).astype(w_ref.dtype),
                w_ref[k * Cin:(k + 1) * Cin, :],
                preferred_element_type=jnp.float32)
    return acc + b_ref[...]                              # (1, Cout) broadcasts


def _basic_block_kernel(x_ref, w1_ref, b1_ref, w2_ref, b2_ref, skip_ref,
                        xpad_ref, h1pad_ref, *, pack_taps):
    """One batch element per grid step (NHWC, channels in the lane dim).

    x_ref    : (1, H, W, Cin)       single input block (also the residual)
    w1_ref   : (9*Cin, Cout)        packed conv1 weights
    b1_ref   : (1, Cout)
    w2_ref   : (9*Cout, Cout)       packed conv2 weights
    b2_ref   : (1, Cout)
    skip_ref : (1, H, W, Cout)      only output: pre-activation residual sum
    xpad_ref : (H+2, W+2, Cin)      VMEM scratch, zero-bordered input
    h1pad_ref: (H+2, W+2, Cout)     VMEM scratch, zero-bordered conv1 act
    """
    _, H, W, _ = x_ref.shape
    Cout = skip_ref.shape[3]

    # Halo-only zeroing of the padded scratches.
    _zero_border(xpad_ref)
    _zero_border(h1pad_ref)

    # Stage input into the zero-padded scratch (pad=1 for conv1).
    xpad_ref[1:H + 1, 1:W + 1, :] = x_ref[0]

    # conv1 + ReLU, written straight into the padded scratch used by conv2.
    h1 = jnp.maximum(_conv3x3(xpad_ref, w1_ref, b1_ref, H, W, pack_taps), 0.0)
    h1pad_ref[1:H + 1, 1:W + 1, :] = h1.reshape(H, W, Cout)

    # conv2 + residual add; residual comes from the already-resident x block.
    c2 = _conv3x3(h1pad_ref, w2_ref, b2_ref, H, W, pack_taps)
    skip_ref[0] = c2.reshape(H, W, Cout) + x_ref[0]
    # relu(skip) is intentionally NOT written here (done in the wrapper/XLA).


def pack_basic_block_params(w1, b1, w2, b2, compute_dtype=jnp.float32):
    """OIHW conv weights -> tap-major (9*Cin, Cout) matrices.

    Do this ONCE at model init, not per forward call. Use
    compute_dtype=jnp.bfloat16 on v6e/v7x to feed the MXU bf16 (accumulation
    stays f32 in the kernel); default f32 keeps exact parity with PyTorch.
    """
    Cout, Cin = w1.shape[0], w1.shape[1]
    w1k = jnp.transpose(w1, (2, 3, 1, 0)).reshape(9 * Cin, Cout).astype(compute_dtype)
    w2k = jnp.transpose(w2, (2, 3, 1, 0)).reshape(9 * Cout, Cout).astype(compute_dtype)
    b1k = b1.reshape(1, Cout).astype(jnp.float32)
    b2k = b2.reshape(1, Cout).astype(jnp.float32)
    return w1k, b1k, w2k, b2k


def _pallas_forward(x_nhwc, w1k, b1k, w2k, b2k, *, pack_taps):
    N, H, W, C = x_nhwc.shape
    Cout = w1k.shape[1]
    kernel = functools.partial(_basic_block_kernel, pack_taps=pack_taps)
    return pl.pallas_call(
        kernel,
        out_shape=jax.ShapeDtypeStruct((N, H, W, Cout), jnp.float32),
        grid=(N,),
        in_specs=[
            pl.BlockSpec((1, H, W, C), lambda b: (b, 0, 0, 0)),
            pl.BlockSpec((9 * C, Cout), lambda b: (0, 0)),
            pl.BlockSpec((1, Cout), lambda b: (0, 0)),
            pl.BlockSpec((9 * Cout, Cout), lambda b: (0, 0)),
            pl.BlockSpec((1, Cout), lambda b: (0, 0)),
        ],
        out_specs=pl.BlockSpec((1, H, W, Cout), lambda b: (b, 0, 0, 0)),
        scratch_shapes=[
            pltpu.VMEM((H + 2, W + 2, C), jnp.float32),
            pltpu.VMEM((H + 2, W + 2, Cout), jnp.float32),
        ],
        compiler_params=pltpu.CompilerParams(dimension_semantics=("parallel",)),
    )(x_nhwc, w1k, b1k, w2k, b2k)


def basic_block_forward(x_nchw, w1k, b1k, w2k, b2k):
    """BasicBlock forward. x_nchw: (N, C, H, W); params from pack_basic_block_params.

    Returns (skip, out) in NCHW, matching the PyTorch module.
    """
    N, C, H, W = x_nchw.shape
    Cout = w1k.shape[1]
    assert C == Cout and w1k.shape[0] == 9 * C, (
        "residual add requires in_dim == out_dim (stride=1, downsample=None)")

    # TODO(synk): if the surrounding model is JAX-side, keep activations NHWC
    # end-to-end and drop these boundary transposes (they exist only to match
    # the PyTorch NCHW interface).
    x_nhwc = jnp.transpose(x_nchw, (0, 2, 3, 1)).astype(jnp.float32)

    try:
        skip = _pallas_forward(x_nhwc, w1k, b1k, w2k, b2k, pack_taps=True)
        skip = jax.block_until_ready(skip)
    except Exception:
        # Guard for Mosaic versions without unaligned lane-dim concatenation:
        # fall back to the 9-narrow-matmul formulation (same numerics).
        skip = _pallas_forward(x_nhwc, w1k, b1k, w2k, b2k, pack_taps=False)

    skip_nchw = jnp.transpose(skip, (0, 3, 1, 2))
    # relu(skip) is one fusable VPU pass; doing it here halves kernel writeback.
    out_nchw = jnp.maximum(skip_nchw, 0.0)
    return skip_nchw, out_nchw


def _reference_forward(x, w1, b1, w2, b2):
    """Pure-JAX reference (NCHW, OIHW) for the correctness check."""
    dn = ("NCHW", "OIHW", "NCHW")
    c1 = jax.lax.conv_general_dilated(x, w1, (1, 1), "SAME", dimension_numbers=dn)
    c1 = c1 + b1.reshape(1, -1, 1, 1)
    h1 = jnp.maximum(c1, 0.0)
    c2 = jax.lax.conv_general_dilated(h1, w2, (1, 1), "SAME", dimension_numbers=dn)
    c2 = c2 + b2.reshape(1, -1, 1, 1)
    skip = c2 + x
    return skip, jnp.maximum(skip, 0.0)


if __name__ == "__main__":
    N, C, H, W = 2, 4, 16, 16
    key = jax.random.PRNGKey(0)
    kx, kw1, kb1, kw2, kb2 = jax.random.split(key, 5)

    x = jax.random.normal(kx, (N, C, H, W), dtype=jnp.float32)
    # nn.Conv2d parameter shapes: weight (out, in, 3, 3), bias (out,)
    w1 = jax.random.normal(kw1, (C, C, 3, 3), dtype=jnp.float32) * 0.1
    b1 = jax.random.normal(kb1, (C,), dtype=jnp.float32) * 0.1
    w2 = jax.random.normal(kw2, (C, C, 3, 3), dtype=jnp.float32) * 0.1
    b2 = jax.random.normal(kb2, (C,), dtype=jnp.float32) * 0.1

    params = pack_basic_block_params(w1, b1, w2, b2)   # once, at init
    skip, out = basic_block_forward(x, *params)
    jax.block_until_ready((skip, out))

    skip_ref, out_ref = _reference_forward(x, w1, b1, w2, b2)
    assert jnp.allclose(skip, skip_ref, rtol=1e-4, atol=1e-4), \
        float(jnp.max(jnp.abs(skip - skip_ref)))
    assert jnp.allclose(out, out_ref, rtol=1e-4, atol=1e-4)

    print("KERNEL_OK")
</pallas_src>

<mosaic_0001>
module attributes {stable_mosaic.version = 11 : i64} {
  func.func @_basic_block_kernel(%arg0: i32, %arg1: memref<1x16x16x4xf32, #tpu.memory_space<vmem>>, %arg2: memref<36x4xf32, #tpu.memory_space<vmem>>, %arg3: memref<1x4xf32, #tpu.memory_space<vmem>>, %arg4: memref<36x4xf32, #tpu.memory_space<vmem>>, %arg5: memref<1x4xf32, #tpu.memory_space<vmem>>, %arg6: memref<1x16x16x4xf32, #tpu.memory_space<vmem>>, %arg7: memref<18x18x4xf32, #tpu.memory_space<vmem>>, %arg8: memref<18x18x4xf32, #tpu.memory_space<vmem>>) attributes {dimension_semantics = [#tpu.dimension_semantics<parallel>], iteration_bounds = array<i64: 2>, scalar_prefetch = 0 : i64, scratch_operands = 2 : i64, tpu.core_type = #tpu.core_type<tc>, window_params = [{transform_indices = @transform_0, window_bounds = array<i64: 1, 16, 16, 4>}, {pipeline_mode = #tpu.pipeline_mode<synchronous>, transform_indices = @transform_1, window_bounds = array<i64: 36, 4>}, {pipeline_mode = #tpu.pipeline_mode<synchronous>, transform_indices = @transform_2, window_bounds = array<i64: 1, 4>}, {pipeline_mode = #tpu.pipeline_mode<synchronous>, transform_indices = @transform_3, window_bounds = array<i64: 36, 4>}, {pipeline_mode = #tpu.pipeline_mode<synchronous>, transform_indices = @transform_4, window_bounds = array<i64: 1, 4>}, {transform_indices = @transform_5, window_bounds = array<i64: 1, 16, 16, 4>}]} {
    %cst = arith.constant 0.000000e+00 : f32
    %0 = vector.broadcast %cst : f32 to vector<1x18x4xf32>
    %cst_0 = arith.constant 0.000000e+00 : f32
    %1 = vector.broadcast %cst_0 : f32 to vector<18x1x4xf32>
    %c0 = arith.constant 0 : index
    %c0_1 = arith.constant 0 : index
    %c0_2 = arith.constant 0 : index
    %2 = vector.load %arg7[%c0, %c0_1, %c0_2] : memref<18x18x4xf32, #tpu.memory_space<vmem>>, vector<1x18x4xf32>
    tpu.vector_store %arg7[%c0, %c0_1, %c0_2], %0 {strides = array<i32>} : memref<18x18x4xf32, #tpu.memory_space<vmem>>, vector<1x18x4xf32>,
    %c17 = arith.constant 17 : index
    %c0_3 = arith.constant 0 : index
    %c0_4 = arith.constant 0 : index
    %3 = vector.load %arg7[%c17, %c0_3, %c0_4] : memref<18x18x4xf32, #tpu.memory_space<vmem>>, vector<1x18x4xf32>
    tpu.vector_store %arg7[%c17, %c0_3, %c0_4], %0 {strides = array<i32>} : memref<18x18x4xf32, #tpu.memory_space<vmem>>, vector<1x18x4xf32>,
    %c0_5 = arith.constant 0 : index
    %c0_6 = arith.constant 0 : index
    %c0_7 = arith.constant 0 : index
    %4 = vector.load %arg7[%c0_5, %c0_6, %c0_7] : memref<18x18x4xf32, #tpu.memory_space<vmem>>, vector<18x1x4xf32>
    tpu.vector_store %arg7[%c0_5, %c0_6, %c0_7], %1 {strides = array<i32>} : memref<18x18x4xf32, #tpu.memory_space<vmem>>, vector<18x1x4xf32>,
    %c0_8 = arith.constant 0 : index
    %c17_9 = arith.constant 17 : index
    %c0_10 = arith.constant 0 : index
    %5 = vector.load %arg7[%c0_8, %c17_9, %c0_10] : memref<18x18x4xf32, #tpu.memory_space<vmem>>, vector<18x1x4xf32>
    tpu.vector_store %arg7[%c0_8, %c17_9, %c0_10], %1 {strides = array<i32>} : memref<18x18x4xf32, #tpu.memory_space<vmem>>, vector<18x1x4xf32>,
    %cst_11 = arith.constant 0.000000e+00 : f32
    %6 = vector.broadcast %cst_11 : f32 to vector<1x18x4xf32>
    %cst_12 = arith.constant 0.000000e+00 : f32
    %7 = vector.broadcast %cst_12 : f32 to vector<18x1x4xf32>
    %c0_13 = arith.constant 0 : index
    %c0_14 = arith.constant 0 : index
    %c0_15 = arith.constant 0 : index
    %8 = vector.load %arg8[%c0_13, %c0_14, %c0_15] : memref<18x18x4xf32, #tpu.memory_space<vmem>>, vector<1x18x4xf32>
    tpu.vector_store %arg8[%c0_13, %c0_14, %c0_15], %6 {strides = array<i32>} : memref<18x18x4xf32, #tpu.memory_space<vmem>>, vector<1x18x4xf32>,
    %c17_16 = arith.constant 17 : index
    %c0_17 = arith.constant 0 : index
    %c0_18 = arith.constant 0 : index
    %9 = vector.load %arg8[%c17_16, %c0_17, %c0_18] : memref<18x18x4xf32, #tpu.memory_space<vmem>>, vector<1x18x4xf32>
    tpu.vector_store %arg8[%c17_16, %c0_17, %c0_18], %6 {strides = array<i32>} : memref<18x18x4xf32, #tpu.memory_space<vmem>>, vector<1x18x4xf32>,
    %c0_19 = arith.constant 0 : index
    %c0_20 = arith.constant 0 : index
    %c0_21 = arith.constant 0 : index
    %10 = vector.load %arg8[%c0_19, %c0_20, %c0_21] : memref<18x18x4xf32, #tpu.memory_space<vmem>>, vector<18x1x4xf32>
    tpu.vector_store %arg8[%c0_19, %c0_20, %c0_21], %7 {strides = array<i32>} : memref<18x18x4xf32, #tpu.memory_space<vmem>>, vector<18x1x4xf32>,
    %c0_22 = arith.constant 0 : index
    %c17_23 = arith.constant 17 : index
    %c0_24 = arith.constant 0 : index
    %11 = vector.load %arg8[%c0_22, %c17_23, %c0_24] : memref<18x18x4xf32, #tpu.memory_space<vmem>>, vector<18x1x4xf32>
    tpu.vector_store %arg8[%c0_22, %c17_23, %c0_24], %7 {strides = array<i32>} : memref<18x18x4xf32, #tpu.memory_space<vmem>>, vector<18x1x4xf32>,
    %c0_25 = arith.constant 0 : index
    %c0_26 = arith.constant 0 : index
    %c0_27 = arith.constant 0 : index
    %c0_28 = arith.constant 0 : index
    %12 = vector.load %arg1[%c0_25, %c0_26, %c0_27, %c0_28] : memref<1x16x16x4xf32, #tpu.memory_space<vmem>>, vector<1x16x16x4xf32>
    %13 = vector.shape_cast %12 : vector<1x16x16x4xf32> to vector<16x16x4xf32>
    %c1 = arith.constant 1 : index
    %c1_29 = arith.constant 1 : index
    %c0_30 = arith.constant 0 : index
    %14 = vector.load %arg7[%c1, %c1_29, %c0_30] : memref<18x18x4xf32, #tpu.memory_space<vmem>>, vector<16x16x4xf32>
    tpu.vector_store %arg7[%c1, %c1_29, %c0_30], %13 {strides = array<i32>} : memref<18x18x4xf32, #tpu.memory_space<vmem>>, vector<16x16x4xf32>,
    %c0_31 = arith.constant 0 : index
    %c0_32 = arith.constant 0 : index
    %c0_33 = arith.constant 0 : index
    %15 = vector.load %arg7[%c0_31, %c0_32, %c0_33] : memref<18x18x4xf32, #tpu.memory_space<vmem>>, vector<18x18x4xf32>
    %16 = vector.extract_strided_slice %15 {offsets = [0, 0, 0], sizes = [16, 16, 4], strides = [1, 1, 1]} : vector<18x18x4xf32> to vector<16x16x4xf32>
    %17 = vector.extract_strided_slice %15 {offsets = [0, 1, 0], sizes = [16, 16, 4], strides = [1, 1, 1]} : vector<18x18x4xf32> to vector<16x16x4xf32>
    %18 = vector.extract_strided_slice %15 {offsets = [0, 2, 0], sizes = [16, 16, 4], strides = [1, 1, 1]} : vector<18x18x4xf32> to vector<16x16x4xf32>
    %19 = vector.extract_strided_slice %15 {offsets = [1, 0, 0], sizes = [16, 16, 4], strides = [1, 1, 1]} : vector<18x18x4xf32> to vector<16x16x4xf32>
    %20 = vector.extract_strided_slice %15 {offsets = [1, 1, 0], sizes = [16, 16, 4], strides = [1, 1, 1]} : vector<18x18x4xf32> to vector<16x16x4xf32>
    %21 = vector.extract_strided_slice %15 {offsets = [1, 2, 0], sizes = [16, 16, 4], strides = [1, 1, 1]} : vector<18x18x4xf32> to vector<16x16x4xf32>
    %22 = vector.extract_strided_slice %15 {offsets = [2, 0, 0], sizes = [16, 16, 4], strides = [1, 1, 1]} : vector<18x18x4xf32> to vector<16x16x4xf32>
    %23 = vector.extract_strided_slice %15 {offsets = [2, 1, 0], sizes = [16, 16, 4], strides = [1, 1, 1]} : vector<18x18x4xf32> to vector<16x16x4xf32>
    %24 = vector.extract_strided_slice %15 {offsets = [2, 2, 0], sizes = [16, 16, 4], strides = [1, 1, 1]} : vector<18x18x4xf32> to vector<16x16x4xf32>
    %25 = tpu.concatenate %16, %17, %18, %19, %20, %21, %22, %23, %24 in 2 : vector<16x16x4xf32>, vector<16x16x4xf32>, vector<16x16x4xf32>, vector<16x16x4xf32>, vector<16x16x4xf32>, vector<16x16x4xf32>, vector<16x16x4xf32>, vector<16x16x4xf32>, vector<16x16x4xf32> -> vector<16x16x36xf32>
    %26 = vector.shape_cast %25 : vector<16x16x36xf32> to vector<256x36xf32>
    %c0_34 = arith.constant 0 : index
    %c0_35 = arith.constant 0 : index
    %27 = vector.load %arg2[%c0_34, %c0_35] : memref<36x4xf32, #tpu.memory_space<vmem>>, vector<36x4xf32>
    %cst_36 = arith.constant dense<0.000000e+00> : vector<256x4xf32>
    %28 = tpu.matmul %26, %27, %cst_36 {dimension_numbers = #tpu.dot_dimension_numbers<[1], [0], [0], [1], [0, 0, 1, 1], [], []>} : vector<256x36xf32>, vector<36x4xf32>, vector<256x4xf32> -> vector<256x4xf32>
    %c0_37 = arith.constant 0 : index
    %c0_38 = arith.constant 0 : index
    %29 = vector.load %arg3[%c0_37, %c0_38] : memref<1x4xf32, #tpu.memory_space<vmem>>, vector<1x4xf32>
    %30 = vector.broadcast %29 : vector<1x4xf32> to vector<256x4xf32>
    %31 = arith.addf %28, %30 : vector<256x4xf32>
    %cst_39 = arith.constant 0.000000e+00 : f32
    %32 = vector.broadcast %cst_39 : f32 to vector<256x4xf32>
    %33 = arith.maximumf %31, %32 : vector<256x4xf32>
    %34 = vector.shape_cast %33 : vector<256x4xf32> to vector<16x16x4xf32>
    %c1_40 = arith.constant 1 : index
    %c1_41 = arith.constant 1 : index
    %c0_42 = arith.constant 0 : index
    %35 = vector.load %arg8[%c1_40, %c1_41, %c0_42] : memref<18x18x4xf32, #tpu.memory_space<vmem>>, vector<16x16x4xf32>
    tpu.vector_store %arg8[%c1_40, %c1_41, %c0_42], %34 {strides = array<i32>} : memref<18x18x4xf32, #tpu.memory_space<vmem>>, vector<16x16x4xf32>,
    %c0_43 = arith.constant 0 : index
    %c0_44 = arith.constant 0 : index
    %c0_45 = arith.constant 0 : index
    %36 = vector.load %arg8[%c0_43, %c0_44, %c0_45] : memref<18x18x4xf32, #tpu.memory_space<vmem>>, vector<18x18x4xf32>
    %37 = vector.extract_strided_slice %36 {offsets = [0, 0, 0], sizes = [16, 16, 4], strides = [1, 1, 1]} : vector<18x18x4xf32> to vector<16x16x4xf32>
    %38 = vector.extract_strided_slice %36 {offsets = [0, 1, 0], sizes = [16, 16, 4], strides = [1, 1, 1]} : vector<18x18x4xf32> to vector<16x16x4xf32>
    %39 = vector.extract_strided_slice %36 {offsets = [0, 2, 0], sizes = [16, 16, 4], strides = [1, 1, 1]} : vector<18x18x4xf32> to vector<16x16x4xf32>
    %40 = vector.extract_strided_slice %36 {offsets = [1, 0, 0], sizes = [16, 16, 4], strides = [1, 1, 1]} : vector<18x18x4xf32> to vector<16x16x4xf32>
    %41 = vector.extract_strided_slice %36 {offsets = [1, 1, 0], sizes = [16, 16, 4], strides = [1, 1, 1]} : vector<18x18x4xf32> to vector<16x16x4xf32>
    %42 = vector.extract_strided_slice %36 {offsets = [1, 2, 0], sizes = [16, 16, 4], strides = [1, 1, 1]} : vector<18x18x4xf32> to vector<16x16x4xf32>
    %43 = vector.extract_strided_slice %36 {offsets = [2, 0, 0], sizes = [16, 16, 4], strides = [1, 1, 1]} : vector<18x18x4xf32> to vector<16x16x4xf32>
    %44 = vector.extract_strided_slice %36 {offsets = [2, 1, 0], sizes = [16, 16, 4], strides = [1, 1, 1]} : vector<18x18x4xf32> to vector<16x16x4xf32>
    %45 = vector.extract_strided_slice %36 {offsets = [2, 2, 0], sizes = [16, 16, 4], strides = [1, 1, 1]} : vector<18x18x4xf32> to vector<16x16x4xf32>
    %46 = tpu.concatenate %37, %38, %39, %40, %41, %42, %43, %44, %45 in 2 : vector<16x16x4xf32>, vector<16x16x4xf32>, vector<16x16x4xf32>, vector<16x16x4xf32>, vector<16x16x4xf32>, vector<16x16x4xf32>, vector<16x16x4xf32>, vector<16x16x4xf32>, vector<16x16x4xf32> -> vector<16x16x36xf32>
    %47 = vector.shape_cast %46 : vector<16x16x36xf32> to vector<256x36xf32>
    %c0_46 = arith.constant 0 : index
    %c0_47 = arith.constant 0 : index
    %48 = vector.load %arg4[%c0_46, %c0_47] : memref<36x4xf32, #tpu.memory_space<vmem>>, vector<36x4xf32>
    %cst_48 = arith.constant dense<0.000000e+00> : vector<256x4xf32>
    %49 = tpu.matmul %47, %48, %cst_48 {dimension_numbers = #tpu.dot_dimension_numbers<[1], [0], [0], [1], [0, 0, 1, 1], [], []>} : vector<256x36xf32>, vector<36x4xf32>, vector<256x4xf32> -> vector<256x4xf32>
    %c0_49 = arith.constant 0 : index
    %c0_50 = arith.constant 0 : index
    %50 = vector.load %arg5[%c0_49, %c0_50] : memref<1x4xf32, #tpu.memory_space<vmem>>, vector<1x4xf32>
    %51 = vector.broadcast %50 : vector<1x4xf32> to vector<256x4xf32>
    %52 = arith.addf %49, %51 : vector<256x4xf32>
    %53 = vector.shape_cast %52 : vector<256x4xf32> to vector<16x16x4xf32>
    %c0_51 = arith.constant 0 : index
    %c0_52 = arith.constant 0 : index
    %c0_53 = arith.constant 0 : index
    %c0_54 = arith.constant 0 : index
    %54 = vector.load %arg1[%c0_51, %c0_52, %c0_53, %c0_54] : memref<1x16x16x4xf32, #tpu.memory_space<vmem>>, vector<1x16x16x4xf32>
    %55 = vector.shape_cast %54 : vector<1x16x16x4xf32> to vector<16x16x4xf32>
    %56 = arith.addf %53, %55 : vector<16x16x4xf32>
    %c0_55 = arith.constant 0 : index
    %c0_56 = arith.constant 0 : index
    %c0_57 = arith.constant 0 : index
    %c0_58 = arith.constant 0 : index
    %57 = vector.load %arg6[%c0_55, %c0_56, %c0_57, %c0_58] : memref<1x16x16x4xf32, #tpu.memory_space<vmem>>, vector<1x16x16x4xf32>
    %58 = vector.shape_cast %57 : vector<1x16x16x4xf32> to vector<16x16x4xf32>
    %59 = vector.shape_cast %56 : vector<16x16x4xf32> to vector<1x16x16x4xf32>
    tpu.vector_store %arg6[%c0_55, %c0_56, %c0_57, %c0_58], %59 {strides = array<i32>} : memref<1x16x16x4xf32, #tpu.memory_space<vmem>>, vector<1x16x16x4xf32>,
    return
  }
  func.func @transform_0(%arg0: i32) -> (i32, i32, i32, i32) {
    %c0_i32 = arith.constant 0 : i32
    %c0_i32_0 = arith.constant 0 : i32
    %c0_i32_1 = arith.constant 0 : i32
    %c0_i32_2 = arith.constant 0 : i32
    return %arg0, %c0_i32, %c0_i32_0, %c0_i32_1 : i32, i32, i32, i32
  }
  func.func @transform_1(%arg0: i32) -> (i32, i32) {
    %c0_i32 = arith.constant 0 : i32
    %c0_i32_0 = arith.constant 0 : i32
    %c0_i32_1 = arith.constant 0 : i32
    return %c0_i32, %c0_i32_0 : i32, i32
  }
  func.func @transform_2(%arg0: i32) -> (i32, i32) {
    %c0_i32 = arith.constant 0 : i32
    %c0_i32_0 = arith.constant 0 : i32
    %c0_i32_1 = arith.constant 0 : i32
    return %c0_i32, %c0_i32_0 : i32, i32
  }
  func.func @transform_3(%arg0: i32) -> (i32, i32) {
    %c0_i32 = arith.constant 0 : i32
    %c0_i32_0 = arith.constant 0 : i32
    %c0_i32_1 = arith.constant 0 : i32
    return %c0_i32, %c0_i32_0 : i32, i32
  }
  func.func @transform_4(%arg0: i32) -> (i32, i32) {
    %c0_i32 = arith.constant 0 : i32
    %c0_i32_0 = arith.constant 0 : i32
    %c0_i32_1 = arith.constant 0 : i32
    return %c0_i32, %c0_i32_0 : i32, i32
  }
  func.func @transform_5(%arg0: i32) -> (i32, i32, i32, i32) {
    %c0_i32 = arith.constant 0 : i32
    %c0_i32_0 = arith.constant 0 : i32
    %c0_i32_1 = arith.constant 0 : i32
    %c0_i32_2 = arith.constant 0 : i32
    return %arg0, %c0_i32, %c0_i32_0, %c0_i32_1 : i32, i32, i32, i32
  }
}

module attributes {stable_mosaic.version = 11 : i64} {
  func.func @_basic_block_kernel(%arg0: i32, %arg1: memref<1x16x16x4xf32, #tpu.memory_space<vmem>>, %arg2: memref<36x4xf32, #tpu.memory_space<vmem>>, %arg3: memref<1x4xf32, #tpu.memory_space<vmem>>, %arg4: memref<36x4xf32, #tpu.memory_space<vmem>>, %arg5: memref<1x4xf32, #tpu.memory_space<vmem>>, %arg6: memref<1x16x16x4xf32, #tpu.memory_space<vmem>>, %arg7: memref<18x18x4xf32, #tpu.memory_space<vmem>>, %arg8: memref<18x18x4xf32, #tpu.memory_space<vmem>>) attributes {dimension_semantics = [#tpu.dimension_semantics<parallel>], iteration_bounds = array<i64: 2>, scalar_prefetch = 0 : i64, scratch_operands = 2 : i64, tpu.core_type = #tpu.core_type<tc>, window_params = [{transform_indices = @transform_0, window_bounds = array<i64: 1, 16, 16, 4>}, {pipeline_mode = #tpu.pipeline_mode<synchronous>, transform_indices = @transform_1, window_bounds = array<i64: 36, 4>}, {pipeline_mode = #tpu.pipeline_mode<synchronous>, transform_indices = @transform_2, window_bounds = array<i64: 1, 4>}, {pipeline_mode = #tpu.pipeline_mode<synchronous>, transform_indices = @transform_3, window_bounds = array<i64: 36, 4>}, {pipeline_mode = #tpu.pipeline_mode<synchronous>, transform_indices = @transform_4, window_bounds = array<i64: 1, 4>}, {transform_indices = @transform_5, window_bounds = array<i64: 1, 16, 16, 4>}]} {
    %cst = arith.constant 0.000000e+00 : f32
    %0 = vector.broadcast %cst : f32 to vector<1x18x4xf32>
    %cst_0 = arith.constant 0.000000e+00 : f32
    %1 = vector.broadcast %cst_0 : f32 to vector<18x1x4xf32>
    %c0 = arith.constant 0 : index
    %c0_1 = arith.constant 0 : index
    %c0_2 = arith.constant 0 : index
    %2 = vector.load %arg7[%c0, %c0_1, %c0_2] : memref<18x18x4xf32, #tpu.memory_space<vmem>>, vector<1x18x4xf32>
    tpu.vector_store %arg7[%c0, %c0_1, %c0_2], %0 {strides = array<i32>} : memref<18x18x4xf32, #tpu.memory_space<vmem>>, vector<1x18x4xf32>,
    %c17 = arith.constant 17 : index
    %c0_3 = arith.constant 0 : index
    %c0_4 = arith.constant 0 : index
    %3 = vector.load %arg7[%c17, %c0_3, %c0_4] : memref<18x18x4xf32, #tpu.memory_space<vmem>>, vector<1x18x4xf32>
    tpu.vector_store %arg7[%c17, %c0_3, %c0_4], %0 {strides = array<i32>} : memref<18x18x4xf32, #tpu.memory_space<vmem>>, vector<1x18x4xf32>,
    %c0_5 = arith.constant 0 : index
    %c0_6 = arith.constant 0 : index
    %c0_7 = arith.constant 0 : index
    %4 = vector.load %arg7[%c0_5, %c0_6, %c0_7] : memref<18x18x4xf32, #tpu.memory_space<vmem>>, vector<18x1x4xf32>
    tpu.vector_store %arg7[%c0_5, %c0_6, %c0_7], %1 {strides = array<i32>} : memref<18x18x4xf32, #tpu.memory_space<vmem>>, vector<18x1x4xf32>,
    %c0_8 = arith.constant 0 : index
    %c17_9 = arith.constant 17 : index
    %c0_10 = arith.constant 0 : index
    %5 = vector.load %arg7[%c0_8, %c17_9, %c0_10] : memref<18x18x4xf32, #tpu.memory_space<vmem>>, vector<18x1x4xf32>
    tpu.vector_store %arg7[%c0_8, %c17_9, %c0_10], %1 {strides = array<i32>} : memref<18x18x4xf32, #tpu.memory_space<vmem>>, vector<18x1x4xf32>,
    %cst_11 = arith.constant 0.000000e+00 : f32
    %6 = vector.broadcast %cst_11 : f32 to vector<1x18x4xf32>
    %cst_12 = arith.constant 0.000000e+00 : f32
    %7 = vector.broadcast %cst_12 : f32 to vector<18x1x4xf32>
    %c0_13 = arith.constant 0 : index
    %c0_14 = arith.constant 0 : index
    %c0_15 = arith.constant 0 : index
    %8 = vector.load %arg8[%c0_13, %c0_14, %c0_15] : memref<18x18x4xf32, #tpu.memory_space<vmem>>, vector<1x18x4xf32>
    tpu.vector_store %arg8[%c0_13, %c0_14, %c0_15], %6 {strides = array<i32>} : memref<18x18x4xf32, #tpu.memory_space<vmem>>, vector<1x18x4xf32>,
    %c17_16 = arith.constant 17 : index
    %c0_17 = arith.constant 0 : index
    %c0_18 = arith.constant 0 : index
    %9 = vector.load %arg8[%c17_16, %c0_17, %c0_18] : memref<18x18x4xf32, #tpu.memory_space<vmem>>, vector<1x18x4xf32>
    tpu.vector_store %arg8[%c17_16, %c0_17, %c0_18], %6 {strides = array<i32>} : memref<18x18x4xf32, #tpu.memory_space<vmem>>, vector<1x18x4xf32>,
    %c0_19 = arith.constant 0 : index
    %c0_20 = arith.constant 0 : index
    %c0_21 = arith.constant 0 : index
    %10 = vector.load %arg8[%c0_19, %c0_20, %c0_21] : memref<18x18x4xf32, #tpu.memory_space<vmem>>, vector<18x1x4xf32>
    tpu.vector_store %arg8[%c0_19, %c0_20, %c0_21], %7 {strides = array<i32>} : memref<18x18x4xf32, #tpu.memory_space<vmem>>, vector<18x1x4xf32>,
    %c0_22 = arith.constant 0 : index
    %c17_23 = arith.constant 17 : index
    %c0_24 = arith.constant 0 : index
    %11 = vector.load %arg8[%c0_22, %c17_23, %c0_24] : memref<18x18x4xf32, #tpu.memory_space<vmem>>, vector<18x1x4xf32>
    tpu.vector_store %arg8[%c0_22, %c17_23, %c0_24], %7 {strides = array<i32>} : memref<18x18x4xf32, #tpu.memory_space<vmem>>, vector<18x1x4xf32>,
    %c0_25 = arith.constant 0 : index
    %c0_26 = arith.constant 0 : index
    %c0_27 = arith.constant 0 : index
    %c0_28 = arith.constant 0 : index
    %12 = vector.load %arg1[%c0_25, %c0_26, %c0_27, %c0_28] : memref<1x16x16x4xf32, #tpu.memory_space<vmem>>, vector<1x16x16x4xf32>
    %13 = vector.shape_cast %12 : vector<1x16x16x4xf32> to vector<16x16x4xf32>
    %c1 = arith.constant 1 : index
    %c1_29 = arith.constant 1 : index
    %c0_30 = arith.constant 0 : index
    %14 = vector.load %arg7[%c1, %c1_29, %c0_30] : memref<18x18x4xf32, #tpu.memory_space<vmem>>, vector<16x16x4xf32>
    tpu.vector_store %arg7[%c1, %c1_29, %c0_30], %13 {strides = array<i32>} : memref<18x18x4xf32, #tpu.memory_space<vmem>>, vector<16x16x4xf32>,
    %c0_31 = arith.constant 0 : index
    %c0_32 = arith.constant 0 : index
    %c0_33 = arith.constant 0 : index
    %15 = vector.load %arg7[%c0_31, %c0_32, %c0_33] : memref<18x18x4xf32, #tpu.memory_space<vmem>>, vector<18x18x4xf32>
    %16 = vector.extract_strided_slice %15 {offsets = [0, 0, 0], sizes = [16, 16, 4], strides = [1, 1, 1]} : vector<18x18x4xf32> to vector<16x16x4xf32>
    %17 = vector.extract_strided_slice %15 {offsets = [0, 1, 0], sizes = [16, 16, 4], strides = [1, 1, 1]} : vector<18x18x4xf32> to vector<16x16x4xf32>
    %18 = vector.extract_strided_slice %15 {offsets = [0, 2, 0], sizes = [16, 16, 4], strides = [1, 1, 1]} : vector<18x18x4xf32> to vector<16x16x4xf32>
    %19 = vector.extract_strided_slice %15 {offsets = [1, 0, 0], sizes = [16, 16, 4], strides = [1, 1, 1]} : vector<18x18x4xf32> to vector<16x16x4xf32>
    %20 = vector.extract_strided_slice %15 {offsets = [1, 1, 0], sizes = [16, 16, 4], strides = [1, 1, 1]} : vector<18x18x4xf32> to vector<16x16x4xf32>
    %21 = vector.extract_strided_slice %15 {offsets = [1, 2, 0], sizes = [16, 16, 4], strides = [1, 1, 1]} : vector<18x18x4xf32> to vector<16x16x4xf32>
    %22 = vector.extract_strided_slice %15 {offsets = [2, 0, 0], sizes = [16, 16, 4], strides = [1, 1, 1]} : vector<18x18x4xf32> to vector<16x16x4xf32>
    %23 = vector.extract_strided_slice %15 {offsets = [2, 1, 0], sizes = [16, 16, 4], strides = [1, 1, 1]} : vector<18x18x4xf32> to vector<16x16x4xf32>
    %24 = vector.extract_strided_slice %15 {offsets = [2, 2, 0], sizes = [16, 16, 4], strides = [1, 1, 1]} : vector<18x18x4xf32> to vector<16x16x4xf32>
    %cst_34 = arith.constant 0.000000e+00 : f32
    %25 = vector.broadcast %cst_34 : f32 to vector<256x4xf32>
    %26 = vector.shape_cast %16 : vector<16x16x4xf32> to vector<256x4xf32>
    %c0_35 = arith.constant 0 : index
    %c0_36 = arith.constant 0 : index
    %27 = vector.load %arg2[%c0_35, %c0_36] : memref<36x4xf32, #tpu.memory_space<vmem>>, vector<4x4xf32>
    %cst_37 = arith.constant dense<0.000000e+00> : vector<256x4xf32>
    %28 = tpu.matmul %26, %27, %cst_37 {dimension_numbers = #tpu.dot_dimension_numbers<[1], [0], [0], [1], [0, 0, 1, 1], [], []>} : vector<256x4xf32>, vector<4x4xf32>, vector<256x4xf32> -> vector<256x4xf32>
    %29 = arith.addf %25, %28 : vector<256x4xf32>
    %30 = vector.shape_cast %17 : vector<16x16x4xf32> to vector<256x4xf32>
    %c4 = arith.constant 4 : index
    %c0_38 = arith.constant 0 : index
    %31 = vector.load %arg2[%c4, %c0_38] : memref<36x4xf32, #tpu.memory_space<vmem>>, vector<4x4xf32>
    %cst_39 = arith.constant dense<0.000000e+00> : vector<256x4xf32>
    %32 = tpu.matmul %30, %31, %cst_39 {dimension_numbers = #tpu.dot_dimension_numbers<[1], [0], [0], [1], [0, 0, 1, 1], [], []>} : vector<256x4xf32>, vector<4x4xf32>, vector<256x4xf32> -> vector<256x4xf32>
    %33 = arith.addf %29, %32 : vector<256x4xf32>
    %34 = vector.shape_cast %18 : vector<16x16x4xf32> to vector<256x4xf32>
    %c8 = arith.constant 8 : index
    %c0_40 = arith.constant 0 : index
    %35 = vector.load %arg2[%c8, %c0_40] : memref<36x4xf32, #tpu.memory_space<vmem>>, vector<4x4xf32>
    %cst_41 = arith.constant dense<0.000000e+00> : vector<256x4xf32>
    %36 = tpu.matmul %34, %35, %cst_41 {dimension_numbers = #tpu.dot_dimension_numbers<[1], [0], [0], [1], [0, 0, 1, 1], [], []>} : vector<256x4xf32>, vector<4x4xf32>, vector<256x4xf32> -> vector<256x4xf32>
    %37 = arith.addf %33, %36 : vector<256x4xf32>
    %38 = vector.shape_cast %19 : vector<16x16x4xf32> to vector<256x4xf32>
    %c12 = arith.constant 12 : index
    %c0_42 = arith.constant 0 : index
    %39 = vector.load %arg2[%c12, %c0_42] : memref<36x4xf32, #tpu.memory_space<vmem>>, vector<4x4xf32>
    %cst_43 = arith.constant dense<0.000000e+00> : vector<256x4xf32>
    %40 = tpu.matmul %38, %39, %cst_43 {dimension_numbers = #tpu.dot_dimension_numbers<[1], [0], [0], [1], [0, 0, 1, 1], [], []>} : vector<256x4xf32>, vector<4x4xf32>, vector<256x4xf32> -> vector<256x4xf32>
    %41 = arith.addf %37, %40 : vector<256x4xf32>
    %42 = vector.shape_cast %20 : vector<16x16x4xf32> to vector<256x4xf32>
    %c16 = arith.constant 16 : index
    %c0_44 = arith.constant 0 : index
    %43 = vector.load %arg2[%c16, %c0_44] : memref<36x4xf32, #tpu.memory_space<vmem>>, vector<4x4xf32>
    %cst_45 = arith.constant dense<0.000000e+00> : vector<256x4xf32>
    %44 = tpu.matmul %42, %43, %cst_45 {dimension_numbers = #tpu.dot_dimension_numbers<[1], [0], [0], [1], [0, 0, 1, 1], [], []>} : vector<256x4xf32>, vector<4x4xf32>, vector<256x4xf32> -> vector<256x4xf32>
    %45 = arith.addf %41, %44 : vector<256x4xf32>
    %46 = vector.shape_cast %21 : vector<16x16x4xf32> to vector<256x4xf32>
    %c20 = arith.constant 20 : index
    %c0_46 = arith.constant 0 : index
    %47 = vector.load %arg2[%c20, %c0_46] : memref<36x4xf32, #tpu.memory_space<vmem>>, vector<4x4xf32>
    %cst_47 = arith.constant dense<0.000000e+00> : vector<256x4xf32>
    %48 = tpu.matmul %46, %47, %cst_47 {dimension_numbers = #tpu.dot_dimension_numbers<[1], [0], [0], [1], [0, 0, 1, 1], [], []>} : vector<256x4xf32>, vector<4x4xf32>, vector<256x4xf32> -> vector<256x4xf32>
    %49 = arith.addf %45, %48 : vector<256x4xf32>
    %50 = vector.shape_cast %22 : vector<16x16x4xf32> to vector<256x4xf32>
    %c24 = arith.constant 24 : index
    %c0_48 = arith.constant 0 : index
    %51 = vector.load %arg2[%c24, %c0_48] : memref<36x4xf32, #tpu.memory_space<vmem>>, vector<4x4xf32>
    %cst_49 = arith.constant dense<0.000000e+00> : vector<256x4xf32>
    %52 = tpu.matmul %50, %51, %cst_49 {dimension_numbers = #tpu.dot_dimension_numbers<[1], [0], [0], [1], [0, 0, 1, 1], [], []>} : vector<256x4xf32>, vector<4x4xf32>, vector<256x4xf32> -> vector<256x4xf32>
    %53 = arith.addf %49, %52 : vector<256x4xf32>
    %54 = vector.shape_cast %23 : vector<16x16x4xf32> to vector<256x4xf32>
    %c28 = arith.constant 28 : index
    %c0_50 = arith.constant 0 : index
    %55 = vector.load %arg2[%c28, %c0_50] : memref<36x4xf32, #tpu.memory_space<vmem>>, vector<4x4xf32>
    %cst_51 = arith.constant dense<0.000000e+00> : vector<256x4xf32>
    %56 = tpu.matmul %54, %55, %cst_51 {dimension_numbers = #tpu.dot_dimension_numbers<[1], [0], [0], [1], [0, 0, 1, 1], [], []>} : vector<256x4xf32>, vector<4x4xf32>, vector<256x4xf32> -> vector<256x4xf32>
    %57 = arith.addf %53, %56 : vector<256x4xf32>
    %58 = vector.shape_cast %24 : vector<16x16x4xf32> to vector<256x4xf32>
    %c32 = arith.constant 32 : index
    %c0_52 = arith.constant 0 : index
    %59 = vector.load %arg2[%c32, %c0_52] : memref<36x4xf32, #tpu.memory_space<vmem>>, vector<4x4xf32>
    %cst_53 = arith.constant dense<0.000000e+00> : vector<256x4xf32>
    %60 = tpu.matmul %58, %59, %cst_53 {dimension_numbers = #tpu.dot_dimension_numbers<[1], [0], [0], [1], [0, 0, 1, 1], [], []>} : vector<256x4xf32>, vector<4x4xf32>, vector<256x4xf32> -> vector<256x4xf32>
    %61 = arith.addf %57, %60 : vector<256x4xf32>
    %c0_54 = arith.constant 0 : index
    %c0_55 = arith.constant 0 : index
    %62 = vector.load %arg3[%c0_54, %c0_55] : memref<1x4xf32, #tpu.memory_space<vmem>>, vector<1x4xf32>
    %63 = vector.broadcast %62 : vector<1x4xf32> to vector<256x4xf32>
    %64 = arith.addf %61, %63 : vector<256x4xf32>
    %cst_56 = arith.constant 0.000000e+00 : f32
    %65 = vector.broadcast %cst_56 : f32 to vector<256x4xf32>
    %66 = arith.maximumf %64, %65 : vector<256x4xf32>
    %67 = vector.shape_cast %66 : vector<256x4xf32> to vector<16x16x4xf32>
    %c1_57 = arith.constant 1 : index
    %c1_58 = arith.constant 1 : index
    %c0_59 = arith.constant 0 : index
    %68 = vector.load %arg8[%c1_57, %c1_58, %c0_59] : memref<18x18x4xf32, #tpu.memory_space<vmem>>, vector<16x16x4xf32>
    tpu.vector_store %arg8[%c1_57, %c1_58, %c0_59], %67 {strides = array<i32>} : memref<18x18x4xf32, #tpu.memory_space<vmem>>, vector<16x16x4xf32>,
    %c0_60 = arith.constant 0 : index
    %c0_61 = arith.constant 0 : index
    %c0_62 = arith.constant 0 : index
    %69 = vector.load %arg8[%c0_60, %c0_61, %c0_62] : memref<18x18x4xf32, #tpu.memory_space<vmem>>, vector<18x18x4xf32>
    %70 = vector.extract_strided_slice %69 {offsets = [0, 0, 0], sizes = [16, 16, 4], strides = [1, 1, 1]} : vector<18x18x4xf32> to vector<16x16x4xf32>
    %71 = vector.extract_strided_slice %69 {offsets = [0, 1, 0], sizes = [16, 16, 4], strides = [1, 1, 1]} : vector<18x18x4xf32> to vector<16x16x4xf32>
    %72 = vector.extract_strided_slice %69 {offsets = [0, 2, 0], sizes = [16, 16, 4], strides = [1, 1, 1]} : vector<18x18x4xf32> to vector<16x16x4xf32>
    %73 = vector.extract_strided_slice %69 {offsets = [1, 0, 0], sizes = [16, 16, 4], strides = [1, 1, 1]} : vector<18x18x4xf32> to vector<16x16x4xf32>
    %74 = vector.extract_strided_slice %69 {offsets = [1, 1, 0], sizes = [16, 16, 4], strides = [1, 1, 1]} : vector<18x18x4xf32> to vector<16x16x4xf32>
    %75 = vector.extract_strided_slice %69 {offsets = [1, 2, 0], sizes = [16, 16, 4], strides = [1, 1, 1]} : vector<18x18x4xf32> to vector<16x16x4xf32>
    %76 = vector.extract_strided_slice %69 {offsets = [2, 0, 0], sizes = [16, 16, 4], strides = [1, 1, 1]} : vector<18x18x4xf32> to vector<16x16x4xf32>
    %77 = vector.extract_strided_slice %69 {offsets = [2, 1, 0], sizes = [16, 16, 4], strides = [1, 1, 1]} : vector<18x18x4xf32> to vector<16x16x4xf32>
    %78 = vector.extract_strided_slice %69 {offsets = [2, 2, 0], sizes = [16, 16, 4], strides = [1, 1, 1]} : vector<18x18x4xf32> to vector<16x16x4xf32>
    %cst_63 = arith.constant 0.000000e+00 : f32
    %79 = vector.broadcast %cst_63 : f32 to vector<256x4xf32>
    %80 = vector.shape_cast %70 : vector<16x16x4xf32> to vector<256x4xf32>
    %c0_64 = arith.constant 0 : index
    %c0_65 = arith.constant 0 : index
    %81 = vector.load %arg4[%c0_64, %c0_65] : memref<36x4xf32, #tpu.memory_space<vmem>>, vector<4x4xf32>
    %cst_66 = arith.constant dense<0.000000e+00> : vector<256x4xf32>
    %82 = tpu.matmul %80, %81, %cst_66 {dimension_numbers = #tpu.dot_dimension_numbers<[1], [0], [0], [1], [0, 0, 1, 1], [], []>} : vector<256x4xf32>, vector<4x4xf32>, vector<256x4xf32> -> vector<256x4xf32>
    %83 = arith.addf %79, %82 : vector<256x4xf32>
    %84 = vector.shape_cast %71 : vector<16x16x4xf32> to vector<256x4xf32>
    %c4_67 = arith.constant 4 : index
    %c0_68 = arith.constant 0 : index
    %85 = vector.load %arg4[%c4_67, %c0_68] : memref<36x4xf32, #tpu.memory_space<vmem>>, vector<4x4xf32>
    %cst_69 = arith.constant dense<0.000000e+00> : vector<256x4xf32>
    %86 = tpu.matmul %84, %85, %cst_69 {dimension_numbers = #tpu.dot_dimension_numbers<[1], [0], [0], [1], [0, 0, 1, 1], [], []>} : vector<256x4xf32>, vector<4x4xf32>, vector<256x4xf32> -> vector<256x4xf32>
    %87 = arith.addf %83, %86 : vector<256x4xf32>
    %88 = vector.shape_cast %72 : vector<16x16x4xf32> to vector<256x4xf32>
    %c8_70 = arith.constant 8 : index
    %c0_71 = arith.constant 0 : index
    %89 = vector.load %arg4[%c8_70, %c0_71] : memref<36x4xf32, #tpu.memory_space<vmem>>, vector<4x4xf32>
    %cst_72 = arith.constant dense<0.000000e+00> : vector<256x4xf32>
    %90 = tpu.matmul %88, %89, %cst_72 {dimension_numbers = #tpu.dot_dimension_numbers<[1], [0], [0], [1], [0, 0, 1, 1], [], []>} : vector<256x4xf32>, vector<4x4xf32>, vector<256x4xf32> -> vector<256x4xf32>
    %91 = arith.addf %87, %90 : vector<256x4xf32>
    %92 = vector.shape_cast %73 : vector<16x16x4xf32> to vector<256x4xf32>
    %c12_73 = arith.constant 12 : index
    %c0_74 = arith.constant 0 : index
    %93 = vector.load %arg4[%c12_73, %c0_74] : memref<36x4xf32, #tpu.memory_space<vmem>>, vector<4x4xf32>
    %cst_75 = arith.constant dense<0.000000e+00> : vector<256x4xf32>
    %94 = tpu.matmul %92, %93, %cst_75 {dimension_numbers = #tpu.dot_dimension_numbers<[1], [0], [0], [1], [0, 0, 1, 1], [], []>} : vector<256x4xf32>, vector<4x4xf32>, vector<256x4xf32> -> vector<256x4xf32>
    %95 = arith.addf %91, %94 : vector<256x4xf32>
    %96 = vector.shape_cast %74 : vector<16x16x4xf32> to vector<256x4xf32>
    %c16_76 = arith.constant 16 : index
    %c0_77 = arith.constant 0 : index
    %97 = vector.load %arg4[%c16_76, %c0_77] : memref<36x4xf32, #tpu.memory_space<vmem>>, vector<4x4xf32>
    %cst_78 = arith.constant dense<0.000000e+00> : vector<256x4xf32>
    %98 = tpu.matmul %96, %97, %cst_78 {dimension_numbers = #tpu.dot_dimension_numbers<[1], [0], [0], [1], [0, 0, 1, 1], [], []>} : vector<256x4xf32>, vector<4x4xf32>, vector<256x4xf32> -> vector<256x4xf32>
    %99 = arith.addf %95, %98 : vector<256x4xf32>
    %100 = vector.shape_cast %75 : vector<16x16x4xf32> to vector<256x4xf32>
    %c20_79 = arith.constant 20 : index
    %c0_80 = arith.constant 0 : index
    %101 = vector.load %arg4[%c20_79, %c0_80] : memref<36x4xf32, #tpu.memory_space<vmem>>, vector<4x4xf32>
    %cst_81 = arith.constant dense<0.000000e+00> : vector<256x4xf32>
    %102 = tpu.matmul %100, %101, %cst_81 {dimension_numbers = #tpu.dot_dimension_numbers<[1], [0], [0], [1], [0, 0, 1, 1], [], []>} : vector<256x4xf32>, vector<4x4xf32>, vector<256x4xf32> -> vector<256x4xf32>
    %103 = arith.addf %99, %102 : vector<256x4xf32>
    %104 = vector.shape_cast %76 : vector<16x16x4xf32> to vector<256x4xf32>
    %c24_82 = arith.constant 24 : index
    %c0_83 = arith.constant 0 : index
    %105 = vector.load %arg4[%c24_82, %c0_83] : memref<36x4xf32, #tpu.memory_space<vmem>>, vector<4x4xf32>
    %cst_84 = arith.constant dense<0.000000e+00> : vector<256x4xf32>
    %106 = tpu.matmul %104, %105, %cst_84 {dimension_numbers = #tpu.dot_dimension_numbers<[1], [0], [0], [1], [0, 0, 1, 1], [], []>} : vector<256x4xf32>, vector<4x4xf32>, vector<256x4xf32> -> vector<256x4xf32>
    %107 = arith.addf %103, %106 : vector<256x4xf32>
    %108 = vector.shape_cast %77 : vector<16x16x4xf32> to vector<256x4xf32>
    %c28_85 = arith.constant 28 : index
    %c0_86 = arith.constant 0 : index
    %109 = vector.load %arg4[%c28_85, %c0_86] : memref<36x4xf32, #tpu.memory_space<vmem>>, vector<4x4xf32>
    %cst_87 = arith.constant dense<0.000000e+00> : vector<256x4xf32>
    %110 = tpu.matmul %108, %109, %cst_87 {dimension_numbers = #tpu.dot_dimension_numbers<[1], [0], [0], [1], [0, 0, 1, 1], [], []>} : vector<256x4xf32>, vector<4x4xf32>, vector<256x4xf32> -> vector<256x4xf32>
    %111 = arith.addf %107, %110 : vector<256x4xf32>
    %112 = vector.shape_cast %78 : vector<16x16x4xf32> to vector<256x4xf32>
    %c32_88 = arith.constant 32 : index
    %c0_89 = arith.constant 0 : index
    %113 = vector.load %arg4[%c32_88, %c0_89] : memref<36x4xf32, #tpu.memory_space<vmem>>, vector<4x4xf32>
    %cst_90 = arith.constant dense<0.000000e+00> : vector<256x4xf32>
    %114 = tpu.matmul %112, %113, %cst_90 {dimension_numbers = #tpu.dot_dimension_numbers<[1], [0], [0], [1], [0, 0, 1, 1], [], []>} : vector<256x4xf32>, vector<4x4xf32>, vector<256x4xf32> -> vector<256x4xf32>
    %115 = arith.addf %111, %114 : vector<256x4xf32>
    %c0_91 = arith.constant 0 : index
    %c0_92 = arith.constant 0 : index
    %116 = vector.load %arg5[%c0_91, %c0_92] : memref<1x4xf32, #tpu.memory_space<vmem>>, vector<1x4xf32>
    %117 = vector.broadcast %116 : vector<1x4xf32> to vector<256x4xf32>
    %118 = arith.addf %115, %117 : vector<256x4xf32>
    %119 = vector.shape_cast %118 : vector<256x4xf32> to vector<16x16x4xf32>
    %c0_93 = arith.constant 0 : index
    %c0_94 = arith.constant 0 : index
    %c0_95 = arith.constant 0 : index
    %c0_96 = arith.constant 0 : index
    %120 = vector.load %arg1[%c0_93, %c0_94, %c0_95, %c0_96] : memref<1x16x16x4xf32, #tpu.memory_space<vmem>>, vector<1x16x16x4xf32>
    %121 = vector.shape_cast %120 : vector<1x16x16x4xf32> to vector<16x16x4xf32>
    %122 = arith.addf %119, %121 : vector<16x16x4xf32>
    %c0_97 = arith.constant 0 : index
    %c0_98 = arith.constant 0 : index
    %c0_99 = arith.constant 0 : index
    %c0_100 = arith.constant 0 : index
    %123 = vector.load %arg6[%c0_97, %c0_98, %c0_99, %c0_100] : memref<1x16x16x4xf32, #tpu.memory_space<vmem>>, vector<1x16x16x4xf32>
    %124 = vector.shape_cast %123 : vector<1x16x16x4xf32> to vector<16x16x4xf32>
    %125 = vector.shape_cast %122 : vector<16x16x4xf32> to vector<1x16x16x4xf32>
    tpu.vector_store %arg6[%c0_97, %c0_98, %c0_99, %c0_100], %125 {strides = array<i32>} : memref<1x16x16x4xf32, #tpu.memory_space<vmem>>, vector<1x16x16x4xf32>,
    return
  }
  func.func @transform_0(%arg0: i32) -> (i32, i32, i32, i32) {
    %c0_i32 = arith.constant 0 : i32
    %c0_i32_0 = arith.constant 0 : i32
    %c0_i32_1 = arith.constant 0 : i32
    %c0_i32_2 = arith.constant 0 : i32
    return %arg0, %c0_i32, %c0_i32_0, %c0_i32_1 : i32, i32, i32, i32
  }
  func.func @transform_1(%arg0: i32) -> (i32, i32) {
    %c0_i32 = arith.constant 0 : i32
    %c0_i32_0 = arith.constant 0 : i32
    %c0_i32_1 = arith.constant 0 : i32
    return %c0_i32, %c0_i32_0 : i32, i32
  }
  func.func @transform_2(%arg0: i32) -> (i32, i32) {
    %c0_i32 = arith.constant 0 : i32
    %c0_i32_0 = arith.constant 0 : i32
    %c0_i32_1 = arith.constant 0 : i32
    return %c0_i32, %c0_i32_0 : i32, i32
  }
  func.func @transform_3(%arg0: i32) -> (i32, i32) {
    %c0_i32 = arith.constant 0 : i32
    %c0_i32_0 = arith.constant 0 : i32
    %c0_i32_1 = arith.constant 0 : i32
    return %c0_i32, %c0_i32_0 : i32, i32
  }
  func.func @transform_4(%arg0: i32) -> (i32, i32) {
    %c0_i32 = arith.constant 0 : i32
    %c0_i32_0 = arith.constant 0 : i32
    %c0_i32_1 = arith.constant 0 : i32
    return %c0_i32, %c0_i32_0 : i32, i32
  }
  func.func @transform_5(%arg0: i32) -> (i32, i32, i32, i32) {
    %c0_i32 = arith.constant 0 : i32
    %c0_i32_0 = arith.constant 0 : i32
    %c0_i32_1 = arith.constant 0 : i32
    %c0_i32_2 = arith.constant 0 : i32
    return %arg0, %c0_i32, %c0_i32_0, %c0_i32_1 : i32, i32, i32, i32
  }
}

</mosaic_0001>

<bundles_post_ra>
// kernel: tpu_custom_call.1
= control target key start
LH: loop header
LB: loop body
LE: loop exit
PB: predicated region body
PF: predicated region fallthrough
CT: control target
= control target key end

     0   :  { %s4317_s18 = smov 0   ;;  %s8055_s0 = inlined_call_operand.vmem [shape: f32[2,16,16,4], index: 0, kind: input, shape index: {}]   ;;  %s8056_s1 = inlined_call_operand.vmem [shape: f32[36,4], index: 1, kind: input, shape index: {}]   ;;  %s8057_s2 = inlined_call_operand.vmem [shape: f32[1,4], index: 2, kind: input, shape index: {}]   ;;  %s8058_s3 = inlined_call_operand.vmem [shape: f32[36,4], index: 3, kind: input, shape index: {}]   ;;  %s8059_s4 = inlined_call_operand.vmem [shape: f32[1,4], index: 4, kind: input, shape index: {}]   ;;  %s8060_s5 = inlined_call_operand.vmem [shape: f32[2,16,16,4], index: 5, kind: output, shape index: {}]  }
   0x1 LB: > { %s3902_s19 = sadd.s32 4294967295, %s4276_s18   ;;  %p3906_p0 = scmp.ge.s32.totalorder %s4276_s18, 1  ;;  %s4276_s18 = sphi %s4317_s18, %s15_s18  }
   0x2   : > { %p187_p1 = scmp.lt.s32.totalorder %s4276_s18, 3 }
   0x4   : > { %p188_p2 = pnand %p3906_p0, %p187_p1 }
   0x6   : > { %191 = sbr.rel (%p188_p2) target bundleno = 1694 (0x69e), region = 40 }
   0xd   : > { %vm225_vm0 = vcmask 31744   ;;  %vm234_vm1 = vcmask 24576   ;;  %p4327_p3 = scmp.lt.s32.totalorder %s3902_s19, 1  ;;  %v4278_v0 = vmov 0.0   ;;  %vm228_vm2 = vcmask 25600   ;;  %s4279_s25 = smov 4  }
   0xe   : > { %226 = vst.msk [vmem:[#allocation2] sm:$0xff] %vm225_vm0, %v4278_v0  ;;  %227 = vst.msk [vmem:[#allocation2 + $0x8] sm:$0xff] %vm225_vm0, %v4278_v0  ;;  %vm481_vm3 = vcmask 1046528   ;;  %vm658_vm4 = vcmask 1045504   ;;  %s4280_s26 = smov 8   ;;  %s4281_s27 = smov 12  }
   0xf   : > { %231 = vst.msk [vmem:[#allocation2 + $0x198] sm:$0xff] %vm225_vm0, %v4278_v0  ;;  %232 = vst.msk [vmem:[#allocation2 + $0x1a0] sm:$0xff] %vm225_vm0, %v4278_v0  ;;  %s8817_s19 = smov (!%p4327_p3, %s3902_s19), 1  ;;  %s4282_s28 = smov 16   ;;  %vm1809_vm5 = vcmask 1043456   ;;  %vm1469_vm6 = vcmask 64512  }
  0x10   : > { %236 = vst.msk [vmem:[#allocation2 + $0x18] sm:$0x1] %vm234_vm1, %v4278_v0  ;;  %237 = vst.msk [vmem:[#allocation2 + $0x30] sm:$0x1] %vm234_vm1, %v4278_v0  ;;  %s3981_s21 = sshll.u32 %s8817_s19, 8  ;;  %s4283_s29 = smov 20  }
  0x11   : > { %238 = vst.msk [vmem:[#allocation2 + $0x48] sm:$0x1] %vm234_vm1, %v4278_v0  ;;  %239 = vst.msk [vmem:[#allocation2 + $0x60] sm:$0x1] %vm234_vm1, %v4278_v0  ;;  %s4507_s24 = scalar_lea.vmem %s8055_s0, %s3981_s21  ;;  %s4284_s30 = smov 24   ;;  %vm1502_vm7 = vcmask 97280  }
  0x12   : > { %240 = vst.msk [vmem:[#allocation2 + $0x78] sm:$0x1] %vm234_vm1, %v4278_v0  ;;  %241 = vst.msk [vmem:[#allocation2 + $0x90] sm:$0x1] %vm234_vm1, %v4278_v0  ;;  %v314_v1 = vld [vmem:[%s4507_s24] sm:$0xff]  ;;  %v315_v2 = vld [vmem:[%s4507_s24 + $0x8] sm:$0xff]  ;;  %s7811_s13 = scalar_lea.vmem %s8060_s5, %s3981_s21 }
  0x13   : > { %242 = vst.msk [vmem:[#allocation2 + $0xa8] sm:$0x1] %vm234_vm1, %v4278_v0  ;;  %243 = vst.msk [vmem:[#allocation2 + $0xc0] sm:$0x1] %vm234_vm1, %v4278_v0  ;;  %v316_v3 = vld [vmem:[%s4507_s24 + $0x10] sm:$0xff]  ;;  %v317_v4 = vld [vmem:[%s4507_s24 + $0x18] sm:$0xff] }
  0x14   : > { %244 = vst.msk [vmem:[#allocation2 + $0xd8] sm:$0x1] %vm234_vm1, %v4278_v0  ;;  %245 = vst.msk [vmem:[#allocation2 + $0xf0] sm:$0x1] %vm234_vm1, %v4278_v0  ;;  %v318_v5 = vld [vmem:[%s4507_s24 + $0x20] sm:$0xff]  ;;  %v319_v6 = vld [vmem:[%s4507_s24 + $0x28] sm:$0xff] }
  0x15   : > { %246 = vst.msk [vmem:[#allocation2 + $0x108] sm:$0x1] %vm234_vm1, %v4278_v0  ;;  %247 = vst.msk [vmem:[#allocation2 + $0x120] sm:$0x1] %vm234_vm1, %v4278_v0  ;;  %v4518_v7 = vld [vmem:[#allocation2 + $0x8] sm:$0xff]  ;;  %v320_v8 = vld [vmem:[%s4507_s24 + $0x30] sm:$0xff] }
  0x16   : > { %248 = vst.msk [vmem:[#allocation2 + $0x138] sm:$0x1] %vm234_vm1, %v4278_v0  ;;  %249 = vst.msk [vmem:[#allocation2 + $0x150] sm:$0x1] %vm234_vm1, %v4278_v0  ;;  %v321_v9 = vld [vmem:[%s4507_s24 + $0x38] sm:$0xff]  ;;  %v483_v11 = vrot.slane %v4518_v7, 1 }
  0x17   : > { %250 = vst.msk [vmem:[#allocation2 + $0x168] sm:$0x1] %vm234_vm1, %v4278_v0  ;;  %251 = vst.msk [vmem:[#allocation2 + $0x180] sm:$0x1] %vm234_vm1, %v4278_v0  ;;  %v322_v12 = vld [vmem:[%s4507_s24 + $0x40] sm:$0xff]  ;;  %v323_v13 = vld [vmem:[%s4507_s24 + $0x48] sm:$0xff] }
  0x18   : > { %254 = vst.msk [vmem:[#allocation2 + $0x29] sm:$0x1] %vm234_vm1, %v4278_v0  ;;  %255 = vst.msk [vmem:[#allocation2 + $0x41] sm:$0x1] %vm234_vm1, %v4278_v0  ;;  %v324_v16 = vld [vmem:[%s4507_s24 + $0x50] sm:$0xff]  ;;  %v325_v17 = vld [vmem:[%s4507_s24 + $0x58] sm:$0xff] }
  0x19   : > { %256 = vst.msk [vmem:[#allocation2 + $0x59] sm:$0x1] %vm234_vm1, %v4278_v0  ;;  %257 = vst.msk [vmem:[#allocation2 + $0x71] sm:$0x1] %vm234_vm1, %v4278_v0  ;;  %v326_v19 = vld [vmem:[%s4507_s24 + $0x60] sm:$0xff]  ;;  %v327_v20 = vld [vmem:[%s4507_s24 + $0x68] sm:$0xff] }
  0x1a   : > { %258 = vst.msk [vmem:[#allocation2 + $0x89] sm:$0x1] %vm234_vm1, %v4278_v0  ;;  %259 = vst.msk [vmem:[#allocation2 + $0xa1] sm:$0x1] %vm234_vm1, %v4278_v0  ;;  %v328_v21 = vld [vmem:[%s4507_s24 + $0x70] sm:$0xff]  ;;  %v329_v23 = vld [vmem:[%s4507_s24 + $0x78] sm:$0xff] }
  0x1b   : > { %260 = vst.msk [vmem:[#allocation2 + $0xb9] sm:$0x1] %vm234_vm1, %v4278_v0  ;;  %261 = vst.msk [vmem:[#allocation2 + $0xd1] sm:$0x1] %vm234_vm1, %v4278_v0  ;;  %v330_v24 = vld [vmem:[%s4507_s24 + $0x80] sm:$0xff]  ;;  %v331_v25 = vld [vmem:[%s4507_s24 + $0x88] sm:$0xff] }
  0x1c   : > { %262 = vst.msk [vmem:[#allocation2 + $0xe9] sm:$0x1] %vm234_vm1, %v4278_v0  ;;  %263 = vst.msk [vmem:[#allocation2 + $0x101] sm:$0x1] %vm234_vm1, %v4278_v0  ;;  %v332_v26 = vld [vmem:[%s4507_s24 + $0x90] sm:$0xff]  ;;  %v333_v27 = vld [vmem:[%s4507_s24 + $0x98] sm:$0xff] }
  0x1d   : > { %264 = vst.msk [vmem:[#allocation2 + $0x119] sm:$0x1] %vm234_vm1, %v4278_v0  ;;  %265 = vst.msk [vmem:[#allocation2 + $0x131] sm:$0x1] %vm234_vm1, %v4278_v0  ;;  %v334_v28 = vld [vmem:[%s4507_s24 + $0xa0] sm:$0xff]  ;;  %v335_v60 = vld [vmem:[%s4507_s24 + $0xa8] sm:$0xff] }
  0x1e   : > { %266 = vst.msk [vmem:[#allocation2 + $0x149] sm:$0x1] %vm234_vm1, %v4278_v0  ;;  %267 = vst.msk [vmem:[#allocation2 + $0x161] sm:$0x1] %vm234_vm1, %v4278_v0  ;;  %s4285_s16 = smov 28   ;;  %s4286_s17 = smov 32  }
  0x1f   : > { %268 = vst.msk [vmem:[#allocation2 + $0x179] sm:$0x1] %vm234_vm1, %v4278_v0  ;;  %269 = vst.msk [vmem:[#allocation2 + $0x191] sm:$0x1] %vm234_vm1, %v4278_v0  ;;  %vm1535_vm8 = vcmask 130048   ;;  %vm1568_vm9 = vcmask 162816  }
  0x20   : > { %271 = vst.msk [vmem:[#allocation3] sm:$0xff] %vm225_vm0, %v4278_v0  ;;  %272 = vst.msk [vmem:[#allocation3 + $0x8] sm:$0xff] %vm225_vm0, %v4278_v0  ;;  %vm1601_vm10 = vcmask 195584   ;;  %vm1634_vm11 = vcmask 228352   ;;  %vm1667_vm12 = vcmask 261120   ;;  %vm1712_vm13 = vcmask 293888  }
  0x21   : > { %275 = vst.msk [vmem:[#allocation3 + $0x198] sm:$0xff] %vm225_vm0, %v4278_v0  ;;  %276 = vst.msk [vmem:[#allocation3 + $0x1a0] sm:$0xff] %vm225_vm0, %v4278_v0 }
  0x22   : > { %279 = vst.msk [vmem:[#allocation3 + $0x18] sm:$0x1] %vm234_vm1, %v4278_v0  ;;  %280 = vst.msk [vmem:[#allocation3 + $0x30] sm:$0x1] %vm234_vm1, %v4278_v0 }
  0x23   : > { %281 = vst.msk [vmem:[#allocation3 + $0x48] sm:$0x1] %vm234_vm1, %v4278_v0  ;;  %282 = vst.msk [vmem:[#allocation3 + $0x60] sm:$0x1] %vm234_vm1, %v4278_v0 }
  0x24   : > { %283 = vst.msk [vmem:[#allocation3 + $0x78] sm:$0x1] %vm234_vm1, %v4278_v0  ;;  %284 = vst.msk [vmem:[#allocation3 + $0x90] sm:$0x1] %vm234_vm1, %v4278_v0 }
  0x25   : > { %285 = vst.msk [vmem:[#allocation3 + $0xa8] sm:$0x1] %vm234_vm1, %v4278_v0  ;;  %286 = vst.msk [vmem:[#allocation3 + $0xc0] sm:$0x1] %vm234_vm1, %v4278_v0 }
  0x26   : > { %287 = vst.msk [vmem:[#allocation3 + $0xd8] sm:$0x1] %vm234_vm1, %v4278_v0  ;;  %288 = vst.msk [vmem:[#allocation3 + $0xf0] sm:$0x1] %vm234_vm1, %v4278_v0 }
  0x27   : > { %289 = vst.msk [vmem:[#allocation3 + $0x108] sm:$0x1] %vm234_vm1, %v4278_v0  ;;  %290 = vst.msk [vmem:[#allocation3 + $0x120] sm:$0x1] %vm234_vm1, %v4278_v0 }
  0x28   : > { %291 = vst.msk [vmem:[#allocation3 + $0x138] sm:$0x1] %vm234_vm1, %v4278_v0  ;;  %292 = vst.msk [vmem:[#allocation3 + $0x150] sm:$0x1] %vm234_vm1, %v4278_v0 }
  0x29   : > { %293 = vst.msk [vmem:[#allocation3 + $0x168] sm:$0x1] %vm234_vm1, %v4278_v0  ;;  %294 = vst.msk [vmem:[#allocation3 + $0x180] sm:$0x1] %vm234_vm1, %v4278_v0 }
  0x2a   : > { %297 = vst.msk [vmem:[#allocation3 + $0x29] sm:$0x1] %vm234_vm1, %v4278_v0  ;;  %298 = vst.msk [vmem:[#allocation3 + $0x41] sm:$0x1] %vm234_vm1, %v4278_v0 }
  0x2b   : > { %299 = vst.msk [vmem:[#allocation3 + $0x59] sm:$0x1] %vm234_vm1, %v4278_v0  ;;  %300 = vst.msk [vmem:[#allocation3 + $0x71] sm:$0x1] %vm234_vm1, %v4278_v0 }
  0x2c   : > { %301 = vst.msk [vmem:[#allocation3 + $0x89] sm:$0x1] %vm234_vm1, %v4278_v0  ;;  %302 = vst.msk [vmem:[#allocation3 + $0xa1] sm:$0x1] %vm234_vm1, %v4278_v0 }
  0x2d   : > { %303 = vst.msk [vmem:[#allocation3 + $0xb9] sm:$0x1] %vm234_vm1, %v4278_v0  ;;  %304 = vst.msk [vmem:[#allocation3 + $0xd1] sm:$0x1] %vm234_vm1, %v4278_v0 }
  0x2e   : > { %305 = vst.msk [vmem:[#allocation3 + $0xe9] sm:$0x1] %vm234_vm1, %v4278_v0  ;;  %306 = vst.msk [vmem:[#allocation3 + $0x101] sm:$0x1] %vm234_vm1, %v4278_v0 }
  0x2f   : > { %307 = vst.msk [vmem:[#allocation3 + $0x119] sm:$0x1] %vm234_vm1, %v4278_v0  ;;  %308 = vst.msk [vmem:[#allocation3 + $0x131] sm:$0x1] %vm234_vm1, %v4278_v0 }
  0x30   : > { %309 = vst.msk [vmem:[#allocation3 + $0x149] sm:$0x1] %vm234_vm1, %v4278_v0  ;;  %310 = vst.msk [vmem:[#allocation3 + $0x161] sm:$0x1] %vm234_vm1, %v4278_v0 }
  0x31   : > { %311 = vst.msk [vmem:[#allocation3 + $0x179] sm:$0x1] %vm234_vm1, %v4278_v0  ;;  %312 = vst.msk [vmem:[#allocation3 + $0x191] sm:$0x1] %vm234_vm1, %v4278_v0 }
  0x32   : > { %235 = vst.msk [vmem:[#allocation2] sm:$0x1] %vm234_vm1, %v4278_v0  ;;  %252 = vst.msk [vmem:[#allocation2 + $0x198] sm:$0x1] %vm234_vm1, %v4278_v0 }
  0x33   : > { %229 = vst.msk [vmem:[#allocation2 + $0x10] sm:$0x3] %vm228_vm2, %v4278_v0  ;;  %233 = vst.msk [vmem:[#allocation2 + $0x1a8] sm:$0x3] %vm228_vm2, %v4278_v0 }
  0x34   : > { %273 = vst.msk [vmem:[#allocation3 + $0x10] sm:$0x3] %vm228_vm2, %v4278_v0  ;;  %277 = vst.msk [vmem:[#allocation3 + $0x1a8] sm:$0x3] %vm228_vm2, %v4278_v0 }
  0x35   : > { %278 = vst.msk [vmem:[#allocation3] sm:$0x1] %vm234_vm1, %v4278_v0  ;;  %295 = vst.msk [vmem:[#allocation3 + $0x198] sm:$0x1] %vm234_vm1, %v4278_v0 }
  0x36   : > { %253 = vst.msk [vmem:[#allocation2 + $0x11] sm:$0x1] %vm234_vm1, %v4278_v0  ;;  %270 = vst.msk [vmem:[#allocation2 + $0x1a9] sm:$0x1] %vm234_vm1, %v4278_v0 }
  0x37   : > { %296 = vst.msk [vmem:[#allocation3 + $0x11] sm:$0x1] %vm234_vm1, %v4278_v0  ;;  %313 = vst.msk [vmem:[#allocation3 + $0x1a9] sm:$0x1] %vm234_vm1, %v4278_v0 }
  0x38   : > { %347 = vst.msk [vmem:[#allocation2 + $0x19] sm:$0xff] %vm225_vm0, %v314_v1  ;;  %348 = vst.msk [vmem:[#allocation2 + $0x21] sm:$0xff] %vm225_vm0, %v315_v2  ;;  %v336_v2 = vld [vmem:[%s4507_s24 + $0xb0] sm:$0xff] }
  0x39   : > { %349 = vst.msk [vmem:[#allocation2 + $0x31] sm:$0xff] %vm225_vm0, %v316_v3  ;;  %350 = vst.msk [vmem:[#allocation2 + $0x39] sm:$0xff] %vm225_vm0, %v317_v4  ;;  %v4525_v10 = vld [vmem:[#allocation2] sm:$0xff]  ;;  %v337_v3 = vld [vmem:[%s4507_s24 + $0xb8] sm:$0xff] }
  0x3a   : > { %351 = vst.msk [vmem:[#allocation2 + $0x49] sm:$0xff] %vm225_vm0, %v318_v5  ;;  %352 = vst.msk [vmem:[#allocation2 + $0x51] sm:$0xff] %vm225_vm0, %v319_v6  ;;  %v482_v14 = vrot.slane %v4525_v10, 1  ;;  %v338_v4 = vld [vmem:[%s4507_s24 + $0xc0] sm:$0xff] }
  0x3b   : > { %353 = vst.msk [vmem:[#allocation2 + $0x61] sm:$0xff] %vm225_vm0, %v320_v8  ;;  %354 = vst.msk [vmem:[#allocation2 + $0x69] sm:$0xff] %vm225_vm0, %v321_v9  ;;  %v339_v8 = vld [vmem:[%s4507_s24 + $0xc8] sm:$0xff]  ;;  %v340_v9 = vld [vmem:[%s4507_s24 + $0xd0] sm:$0xff] }
  0x3c   : > { %355 = vst.msk [vmem:[#allocation2 + $0x79] sm:$0xff] %vm225_vm0, %v322_v12  ;;  %356 = vst.msk [vmem:[#allocation2 + $0x81] sm:$0xff] %vm225_vm0, %v323_v13  ;;  %v484_v22 = vsel %vm481_vm3, %v482_v14, %v483_v11  ;;  %v342_v13 = vld [vmem:[%s4507_s24 + $0xe0] sm:$0xff]  ;;  %v343_v14 = vld [vmem:[%s4507_s24 + $0xe8] sm:$0xff] }
  0x3d   : > { %v4533_v15 = vld [vmem:[#allocation2 + $0x10] sm:$0x3]  ;;  %357 = vst.msk [vmem:[#allocation2 + $0x91] sm:$0xff] %vm225_vm0, %v324_v16  ;;  %358 = vst.msk [vmem:[#allocation2 + $0x99] sm:$0xff] %vm225_vm0, %v325_v17  ;;  %562 = vrot.lane.b32.xlu0 %v484_v22, %s4279_s25 }
  0x3e   : > { %v485_v18 = vrot.slane %v4533_v15, 1  ;;  %359 = vst.msk [vmem:[#allocation2 + $0xa9] sm:$0xff] %vm225_vm0, %v326_v19  ;;  %360 = vst.msk [vmem:[#allocation2 + $0xb1] sm:$0xff] %vm225_vm0, %v327_v20 }
  0x3f   : > { %361 = vst.msk [vmem:[#allocation2 + $0xc1] sm:$0xff] %vm225_vm0, %v328_v21  ;;  %362 = vst.msk [vmem:[#allocation2 + $0xc9] sm:$0xff] %vm225_vm0, %v329_v23  ;;  %v4560_v30 = vld [vmem:[#allocation2 + $0x18] sm:$0xff]  ;;  %v4562_v31 = vld [vmem:[#allocation2 + $0x20] sm:$0xff] }
  0x40   : > { %363 = vst.msk [vmem:[#allocation2 + $0xd9] sm:$0xff] %vm225_vm0, %v330_v24  ;;  %364 = vst.msk [vmem:[#allocation2 + $0xe1] sm:$0xff] %vm225_vm0, %v331_v25  ;;  %v486_v29 = vsel %vm481_vm3, %v483_v11, %v485_v18  ;;  %v4564_v32 = vld [vmem:[#allocation2 + $0x30] sm:$0xff]  ;;  %v487_v33 = vrot.slane %v4560_v30, 1  ;;  %v488_v34 = vrot.slane %v4562_v31, 1  ;;  %v4571_v35 = vld [vmem:[#allocation2 + $0x38] sm:$0xff] }
  0x41   : > { %365 = vst.msk [vmem:[#allocation2 + $0xf1] sm:$0xff] %vm225_vm0, %v332_v26  ;;  %366 = vst.msk [vmem:[#allocation2 + $0xf9] sm:$0xff] %vm225_vm0, %v333_v27  ;;  %v492_v36 = vrot.slane %v4564_v32, 1  ;;  %v4574_v37 = vld [vmem:[#allocation2 + $0x28] sm:$0x3]  ;;  %v493_v38 = vrot.slane %v4571_v35, 1  ;;  %564 = vrot.lane.b32.xlu0 %v486_v29, %s4279_s25 }
  0x42   : > { %367 = vst.msk [vmem:[#allocation2 + $0x109] sm:$0xff] %vm225_vm0, %v334_v28  ;;  %v490_v39 = vrot.slane %v4574_v37, 1  ;;  %v4578_v40 = vld [vmem:[#allocation2 + $0x48] sm:$0xff]  ;;  %v4580_v41 = vld [vmem:[#allocation2 + $0x50] sm:$0xff]  ;;  %v4582_v42 = vld [vmem:[#allocation2 + $0x40] sm:$0x3]  ;;  %v4586_v43 = vsel %vm481_vm3, %v487_v33, %v488_v34 }
  0x43   : > { %566 = vrot.lane.b32.xlu1 %v4586_v43, %s4279_s25  ;;  %v4591_v44 = vsel %vm481_vm3, %v492_v36, %v493_v38  ;;  %v497_v45 = vrot.slane %v4578_v40, 1  ;;  %v498_v46 = vrot.slane %v4580_v41, 1  ;;  %v495_v48 = vrot.slane %v4582_v42, 1  ;;  %v4599_v49 = vld [vmem:[#allocation2 + $0x60] sm:$0xff]  ;;  %v4601_v50 = vld [vmem:[#allocation2 + $0x68] sm:$0xff]  ;;  %v4618_v57 = vld [vmem:[#allocation2 + $0x78] sm:$0xff] }
  0x44   : > { %v4596_v47 = vsel %vm481_vm3, %v488_v34, %v490_v39  ;;  %v4603_v51 = vld [vmem:[#allocation2 + $0x58] sm:$0x3]  ;;  %v502_v53 = vrot.slane %v4599_v49, 1  ;;  %v503_v54 = vrot.slane %v4601_v50, 1  ;;  %v4620_v58 = vld [vmem:[#allocation2 + $0x80] sm:$0xff]  ;;  %v4627_v61 = vld [vmem:[#allocation2 + $0x90] sm:$0xff] }
  0x45   : > { %570 = vrot.lane.b32.xlu0 %v4591_v44, %s4279_s25  ;;  %v4610_v52 = vsel %vm481_vm3, %v497_v45, %v498_v46  ;;  %v4615_v55 = vsel %vm481_vm3, %v493_v38, %v495_v48  ;;  %v500_v56 = vrot.slane %v4603_v51, 1  ;;  %v4622_v59 = vld [vmem:[#allocation2 + $0x70] sm:$0x3]  ;;  %v4629_v62 = vld [vmem:[#allocation2 + $0x98] sm:$0xff]  ;;  %368 = vst.msk [vmem:[#allocation2 + $0x111] sm:$0xff] %vm225_vm0, %v335_v60  ;;  %v507_v0 = vrot.slane %v4618_v57, 1 }
  0x46   : > { %8216 = vst [vmem:[#allocation4_spill] sm:$0xff] %v4615_v55  ;;  %v4635_v63 = vsel %vm481_vm3, %v502_v53, %v503_v54  ;;  %v508_v1 = vrot.slane %v4620_v58, 1  ;;  %v505_v6 = vrot.slane %v4622_v59, 1  ;;  %369 = vst.msk [vmem:[#allocation2 + $0x121] sm:$0xff] %vm225_vm0, %v336_v2  ;;  %v341_v11 = vld [vmem:[%s4507_s24 + $0xd8] sm:$0xff]  ;;  %v512_v17 = vrot.slane %v4627_v61, 1 }
  0x47   : > { %568 = vrot.lane.b32.xlu1 %v4596_v47, %s4279_s25  ;;  %8217 = vst [vmem:[#allocation5_spill] sm:$0xff] %v4635_v63  ;;  %v4643_v5 = vsel %vm481_vm3, %v498_v46, %v500_v56  ;;  %370 = vst.msk [vmem:[#allocation2 + $0x129] sm:$0xff] %vm225_vm0, %v337_v3  ;;  %v4652_v12 = vld [vmem:[#allocation2 + $0x88] sm:$0x3]  ;;  %v513_v18 = vrot.slane %v4629_v62, 1  ;;  %v4676_v22 = vld [vmem:[#allocation2 + $0xb0] sm:$0xff] }
  0x48   : > { %8218 = vst [vmem:[#allocation6_spill] sm:$0xff] %v4643_v5  ;;  %371 = vst.msk [vmem:[#allocation2 + $0x139] sm:$0xff] %vm225_vm0, %v338_v4  ;;  %v4666_v16 = vsel %vm481_vm3, %v507_v0, %v508_v1  ;;  %v4671_v19 = vsel %vm481_vm3, %v503_v54, %v505_v6  ;;  %v510_v20 = vrot.slane %v4652_v12, 1  ;;  %v4674_v21 = vld [vmem:[#allocation2 + $0xa8] sm:$0xff]  ;;  %v4678_v23 = vld [vmem:[#allocation2 + $0xa0] sm:$0x3] }
  0x49   : > { %574 = vrot.lane.b32.xlu0 %v4610_v52, %s4279_s25  ;;  %372 = vst.msk [vmem:[#allocation2 + $0x141] sm:$0xff] %vm225_vm0, %v339_v8  ;;  %373 = vst.msk [vmem:[#allocation2 + $0x151] sm:$0xff] %vm225_vm0, %v340_v9  ;;  %v4685_v24 = vsel %vm481_vm3, %v512_v17, %v513_v18  ;;  %v517_v25 = vrot.slane %v4674_v21, 1  ;;  %v518_v26 = vrot.slane %v4676_v22, 1  ;;  %v515_v28 = vrot.slane %v4678_v23, 1  ;;  %v4693_v29 = vld [vmem:[#allocation2 + $0xc0] sm:$0xff] }
  0x4a   : > { %374 = vst.msk [vmem:[#allocation2 + $0x159] sm:$0xff] %vm225_vm0, %v341_v11  ;;  %375 = vst.msk [vmem:[#allocation2 + $0x169] sm:$0xff] %vm225_vm0, %v342_v13  ;;  %v4690_v27 = vsel %vm481_vm3, %v508_v1, %v510_v20  ;;  %v4695_v33 = vld [vmem:[#allocation2 + $0xc8] sm:$0xff]  ;;  %v4697_v34 = vld [vmem:[#allocation2 + $0xb8] sm:$0x3]  ;;  %v522_v38 = vrot.slane %v4693_v29, 1 }
  0x4b   : > { %572 = vrot.lane.b32.xlu1 %v4615_v55, %s4279_s25  ;;  %376 = vst.msk [vmem:[#allocation2 + $0x171] sm:$0xff] %vm225_vm0, %v343_v14  ;;  %8219 = vst [vmem:[#allocation7_spill] sm:$0xff] %v4666_v16  ;;  %v4704_v36 = vsel %vm481_vm3, %v517_v25, %v518_v26  ;;  %v523_v39 = vrot.slane %v4695_v33, 1  ;;  %v4709_v45 = vsel %vm481_vm3, %v513_v18, %v515_v28  ;;  %v520_v46 = vrot.slane %v4697_v34, 1  ;;  %v4712_v48 = vld [vmem:[#allocation2 + $0xd8] sm:$0xff]  ;;  %v4714_v53 = vld [vmem:[#allocation2 + $0xe0] sm:$0xff] }
  0x4c   : > { %8220 = vst [vmem:[#allocation8_spill] sm:$0xff] %v4671_v19  ;;  %8221 = vst [vmem:[#allocation9_spill] sm:$0xff] %v4685_v24  ;;  %v4716_v54 = vld [vmem:[#allocation2 + $0xd0] sm:$0x3]  ;;  %v527_v60 = vrot.slane %v4712_v48, 1  ;;  %v528_v0 = vrot.slane %v4714_v53, 1 }
  0x4d   : > { %578 = vrot.lane.b32.xlu0 %v4635_v63, %s4279_s25  ;;  %8222 = vst [vmem:[#allocation10_spill] sm:$0xff] %v4690_v27  ;;  %8223 = vst [vmem:[#allocation11_spill] sm:$0xff] %v4704_v36  ;;  %v4723_v56 = vsel %vm481_vm3, %v522_v38, %v523_v39  ;;  %v4728_v1 = vsel %vm481_vm3, %v518_v26, %v520_v46  ;;  %v525_v2 = vrot.slane %v4716_v54, 1  ;;  %v4731_v3 = vld [vmem:[#allocation2 + $0xf0] sm:$0xff]  ;;  %v4733_v4 = vld [vmem:[#allocation2 + $0xf8] sm:$0xff] }
  0x4e   : > { %8224 = vst [vmem:[#allocation12_spill] sm:$0xff] %v4709_v45  ;;  %8225 = vst [vmem:[#allocation13_spill] sm:$0xff] %v4723_v56  ;;  %v4735_v6 = vld [vmem:[#allocation2 + $0xe8] sm:$0x3]  ;;  %v4742_v8 = vsel %vm481_vm3, %v527_v60, %v528_v0  ;;  %v532_v9 = vrot.slane %v4731_v3, 1  ;;  %v533_v11 = vrot.slane %v4733_v4, 1 }
  0x4f   : > { %576 = vrot.lane.b32.xlu1 %v4643_v5, %s4279_s25  ;;  %8226 = vst [vmem:[#allocation14_spill] sm:$0xff] %v4728_v1  ;;  %8227 = vst [vmem:[#allocation15_spill] sm:$0xff] %v4742_v8  ;;  %v4747_v13 = vsel %vm481_vm3, %v523_v39, %v525_v2  ;;  %v530_v14 = vrot.slane %v4735_v6, 1  ;;  %v4750_v17 = vld [vmem:[#allocation2 + $0x108] sm:$0xff]  ;;  %v4752_v18 = vld [vmem:[#allocation2 + $0x110] sm:$0xff] }
  0x50   : > { %8228 = vst [vmem:[#allocation16_spill] sm:$0xff] %v4747_v13  ;;  %v4754_v20 = vld [vmem:[#allocation2 + $0x100] sm:$0x3]  ;;  %v4761_v25 = vsel %vm481_vm3, %v532_v9, %v533_v11  ;;  %v537_v26 = vrot.slane %v4750_v17, 1  ;;  %v538_v28 = vrot.slane %v4752_v18, 1  ;;  %v4771_v60 = vld [vmem:[#allocation2 + $0x128] sm:$0xff] }
  0x51   : > { %582 = vrot.lane.b32.xlu0 %v4666_v16, %s4279_s25  ;;  %8229 = vst [vmem:[#allocation17_spill] sm:$0xff] %v4761_v25  ;;  %v4766_v38 = vsel %vm481_vm3, %v528_v0, %v530_v14  ;;  %v535_v39 = vrot.slane %v4754_v20, 1  ;;  %v4769_v46 = vld [vmem:[#allocation2 + $0x120] sm:$0xff]  ;;  %v4773_v2 = vld [vmem:[#allocation2 + $0x118] sm:$0x3]  ;;  %v543_v14 = vrot.slane %v4771_v60, 1 }
  0x52   : > { %8230 = vst [vmem:[#allocation18_spill] sm:$0xff] %v4766_v38  ;;  %v4780_v9 = vsel %vm481_vm3, %v537_v26, %v538_v28  ;;  %v542_v0 = vrot.slane %v4769_v46, 1  ;;  %v4828_v16 = vld [vmem:[#allocation2 + $0x170] sm:$0xff]  ;;  %v4847_v55 = vld [vmem:[#allocation2 + $0x178] sm:$0x3] }
  0x53   : > { %580 = vrot.lane.b32.xlu1 %v4671_v19, %s4279_s25  ;;  %8231 = vst [vmem:[#allocation19_spill] sm:$0xff] %v4780_v9  ;;  %v4826_v19 = vld [vmem:[#allocation2 + $0x168] sm:$0xff] }
  0x54   : > { %v4799_v26 = vsel %vm481_vm3, %v542_v0, %v543_v14 }
  0x55   : > { %586 = vrot.lane.b32.xlu0 %v4685_v24, %s4279_s25  ;;  %8233 = vst [vmem:[#allocation21_spill] sm:$0xff] %v4799_v26 }
  0x57   : > { %584 = vrot.lane.b32.xlu1 %v4690_v27, %s4279_s25  ;;  %v4809_v27 = vld [vmem:[#allocation2 + $0x158] sm:$0xff] }
  0x59   : > { %590 = vrot.lane.b32.xlu0 %v4704_v36, %s4279_s25  ;;  %v4807_v36 = vld [vmem:[#allocation2 + $0x150] sm:$0xff] }
  0x5b   : > { %588 = vrot.lane.b32.xlu1 %v4709_v45, %s4279_s25 }
  0x5d   : > { %594 = vrot.lane.b32.xlu0 %v4723_v56, %s4279_s25  ;;  %v4790_v56 = vld [vmem:[#allocation2 + $0x140] sm:$0xff] }
  0x5f   : > { %592 = vrot.lane.b32.xlu1 %v4728_v1, %s4279_s25  ;;  %v4788_v1 = vld [vmem:[#allocation2 + $0x138] sm:$0xff] }
  0x61   : > { %598 = vrot.lane.b32.xlu0 %v4742_v8, %s4279_s25  ;;  %v540_v8 = vrot.slane %v4773_v2, 1 }
  0x63   : > { %596 = vrot.lane.b32.xlu1 %v4747_v13, %s4279_s25  ;;  %v4785_v13 = vsel %vm481_vm3, %v533_v11, %v535_v39  ;;  %v547_v11 = vrot.slane %v4788_v1, 1  ;;  %v548_v39 = vrot.slane %v4790_v56, 1 }
  0x64   : > { %8232 = vst [vmem:[#allocation20_spill] sm:$0xff] %v4785_v13 }
  0x65   : > { %602 = vrot.lane.b32.xlu0 %v4761_v25, %s4279_s25  ;;  %v4792_v25 = vld [vmem:[#allocation2 + $0x130] sm:$0x3]  ;;  %v4818_v0 = vsel %vm481_vm3, %v547_v11, %v548_v39  ;;  %v558_v11 = vrot.slane %v4828_v16, 1 }
  0x66   : > { %v545_v45 = vrot.slane %v4792_v25, 1  ;;  %8235 = vst [vmem:[#allocation23_spill] sm:$0xff] %v4818_v0 }
  0x67   : > { %600 = vrot.lane.b32.xlu1 %v4766_v38, %s4279_s25  ;;  %v4804_v38 = vsel %vm481_vm3, %v538_v28, %v540_v8  ;;  %v552_v8 = vrot.slane %v4807_v36, 1  ;;  %v553_v28 = vrot.slane %v4809_v27, 1 }
  0x68   : > { %8234 = vst [vmem:[#allocation22_spill] sm:$0xff] %v4804_v38 }
  0x69   : > { %606 = vrot.lane.b32.xlu0 %v4780_v9, %s4279_s25  ;;  %v4811_v9 = vld [vmem:[#allocation2 + $0x148] sm:$0x3] }
  0x6a   : > { %v550_v24 = vrot.slane %v4811_v9, 1 }
  0x6b   : > { %604 = vrot.lane.b32.xlu1 %v4785_v13, %s4279_s25  ;;  %v4823_v13 = vsel %vm481_vm3, %v543_v14, %v545_v45  ;;  %v4839_v45 = vsel %vm481_vm3, %v552_v8, %v553_v28  ;;  %v557_v14 = vrot.slane %v4826_v19, 1 }
  0x6c   : > { %8236 = vst [vmem:[#allocation24_spill] sm:$0xff] %v4823_v13  ;;  %8237 = vst [vmem:[#allocation25_spill] sm:$0xff] %v4839_v45  ;;  %v4844_v5 = vsel %vm481_vm3, %v548_v39, %v550_v24  ;;  %v560_v39 = vrot.slane %v4847_v55, 1 }
  0x6d   : > { %610 = vrot.lane.b32.xlu0 %v4799_v26, %s4279_s25  ;;  %v4830_v26 = vld [vmem:[#allocation2 + $0x160] sm:$0x3]  ;;  %8238 = vst [vmem:[#allocation26_spill] sm:$0xff] %v4844_v5  ;;  %v4855_v8 = vsel %vm481_vm3, %v557_v14, %v558_v11 }
  0x6e   : > { %v555_v63 = vrot.slane %v4830_v26, 1  ;;  %8239 = vst [vmem:[#allocation27_spill] sm:$0xff] %v4855_v8 }
  0x6f   : > { %608 = vrot.lane.b32.xlu1 %v4804_v38, %s4279_s25  ;;  %v344_v38 = vld [vmem:[%s4507_s24 + $0xf0] sm:$0xff] }
  0x70   : > { %377 = vst.msk [vmem:[#allocation2 + $0x181] sm:$0xff] %vm225_vm0, %v344_v38  ;;  %v345_v38 = vld [vmem:[%s4507_s24 + $0xf8] sm:$0xff]  ;;  %v4861_v24 = vsel %vm481_vm3, %v553_v28, %v555_v63  ;;  %v662_v63 = vrot.slane %v4533_v15, 2 }
  0x71   : > { %614 = vrot.lane.b32.xlu0 %v4818_v0, %s4279_s25  ;;  %v660_v0 = vrot.slane %v4518_v7, 2  ;;  %378 = vst.msk [vmem:[#allocation2 + $0x189] sm:$0xff] %vm225_vm0, %v345_v38  ;;  %8240 = vst [vmem:[#allocation28_spill] sm:$0xff] %v4861_v24  ;;  %v665_v7 = vrot.slane %v4562_v31, 2  ;;  %v4872_v38 = vsel %vm481_vm3, %v558_v11, %v560_v39  ;;  %v667_v11 = vrot.slane %v4574_v37, 2 }
  0x72   : > { %8241 = vst [vmem:[#allocation29_spill] sm:$0xff] %v4872_v38  ;;  %v674_v39 = vrot.slane %v4578_v40, 2 }
  0x73   : > { %612 = vrot.lane.b32.xlu1 %v4823_v13, %s4279_s25  ;;  %v659_v13 = vrot.slane %v4525_v10, 2  ;;  %v664_v10 = vrot.slane %v4560_v30, 2 }
  0x75   : > { %618 = vrot.lane.b32.xlu0 %v4839_v45, %s4279_s25  ;;  %v661_v14 = vsel %vm658_vm4, %v659_v13, %v660_v0  ;;  %v4879_v28 = vsel %vm658_vm4, %v664_v10, %v665_v7  ;;  %v669_v13 = vrot.slane %v4564_v32, 2  ;;  %v4894_v10 = vsel %vm658_vm4, %v665_v7, %v667_v11 }
  0x76   : > { %v677_v7 = vrot.slane %v4603_v51, 2  ;;  %v685_v11 = vrot.slane %v4620_v58, 2 }
  0x77   : > { %616 = vrot.lane.b32.xlu1 %v4844_v5, %s4279_s25 }
  0x79   : > { %622 = vrot.lane.b32.xlu0 %v4855_v8, %s4279_s25  ;;  %v663_v8 = vsel %vm658_vm4, %v660_v0, %v662_v63  ;;  %v679_v0 = vrot.slane %v4599_v49, 2 }
  0x7b   : > { %620 = vrot.lane.b32.xlu1 %v4861_v24, %s4279_s25  ;;  %v670_v24 = vrot.slane %v4571_v35, 2 }
  0x7d   : > { %739 = vrot.lane.b32.xlu0 %v661_v14, %s4280_s26  ;;  %v4889_v15 = vsel %vm658_vm4, %v669_v13, %v670_v24  ;;  %v675_v14 = vrot.slane %v4580_v41, 2  ;;  %v684_v13 = vrot.slane %v4618_v57, 2 }
  0x7f   : > { %624 = vrot.lane.b32.xlu1 %v4872_v38, %s4279_s25  ;;  %v672_v38 = vrot.slane %v4582_v42, 2  ;;  %v4902_v37 = vsel %vm658_vm4, %v674_v39, %v675_v14  ;;  %v4920_v39 = vsel %vm658_vm4, %v675_v14, %v677_v7  ;;  %v4928_v51 = vsel %vm658_vm4, %v684_v13, %v685_v11 }
  0x80   : > { %8243 = vst [vmem:[#allocation31_spill] sm:$0xff] %v4920_v39  ;;  %v687_v14 = vrot.slane %v4652_v12, 2  ;;  %v694_v7 = vrot.slane %v4674_v21, 2  ;;  %v695_v13 = vrot.slane %v4676_v22, 2 }
  0x81   : > { %743 = vrot.lane.b32.xlu0 %v4879_v28, %s4280_s26  ;;  %v4907_v63 = vsel %vm658_vm4, %v670_v24, %v672_v38  ;;  %v682_v24 = vrot.slane %v4622_v59, 2  ;;  %v689_v38 = vrot.slane %v4627_v61, 2 }
  0x82   : > { %8242 = vst [vmem:[#allocation30_spill] sm:$0xff] %v4907_v63  ;;  %v4954_v12 = vsel %vm658_vm4, %v694_v7, %v695_v13  ;;  %v705_v7 = vrot.slane %v4714_v53, 2 }
  0x83   : > { %741 = vrot.lane.b32.xlu1 %v663_v8, %s4280_s26  ;;  %v680_v8 = vrot.slane %v4601_v50, 2 }
  0x85   : > { %747 = vrot.lane.b32.xlu0 %v4889_v15, %s4280_s26  ;;  %v4915_v42 = vsel %vm658_vm4, %v679_v0, %v680_v8  ;;  %v690_v0 = vrot.slane %v4629_v62, 2 }
  0x87   : > { %745 = vrot.lane.b32.xlu1 %v4894_v10, %s4280_s26  ;;  %v4941_v59 = vsel %vm658_vm4, %v689_v38, %v690_v0  ;;  %v700_v38 = vrot.slane %v4695_v33, 2 }
  0x89   : > { %751 = vrot.lane.b32.xlu0 %v4902_v37, %s4280_s26 }
  0x8b   : > { %749 = vrot.lane.b32.xlu1 %v4907_v63, %s4280_s26  ;;  %v4933_v63 = vsel %vm658_vm4, %v680_v8, %v682_v24  ;;  %v692_v8 = vrot.slane %v4678_v23, 2  ;;  %v699_v24 = vrot.slane %v4693_v29, 2 }
  0x8c   : > { %8244 = vst [vmem:[#allocation32_spill] sm:$0xff] %v4933_v63 }
  0x8d   : > { %755 = vrot.lane.b32.xlu0 %v4915_v42, %s4280_s26  ;;  %v4967_v23 = vsel %vm658_vm4, %v699_v24, %v700_v38  ;;  %v710_v24 = vrot.slane %v4733_v4, 2 }
  0x8e   : > { %8247 = vst [vmem:[#allocation35_spill] sm:$0xff] %v4967_v23 }
  0x8f   : > { %753 = vrot.lane.b32.xlu1 %v4920_v39, %s4280_s26  ;;  %v4946_v39 = vsel %vm658_vm4, %v685_v11, %v687_v14  ;;  %v697_v11 = vrot.slane %v4697_v34, 2  ;;  %v704_v14 = vrot.slane %v4712_v48, 2 }
  0x90   : > { %8245 = vst [vmem:[#allocation33_spill] sm:$0xff] %v4946_v39 }
  0x91   : > { %759 = vrot.lane.b32.xlu0 %v4928_v51, %s4280_s26  ;;  %v4980_v34 = vsel %vm658_vm4, %v704_v14, %v705_v7  ;;  %v715_v14 = vrot.slane %v4752_v18, 2 }
  0x92   : > { %8249 = vst [vmem:[#allocation37_spill] sm:$0xff] %v4980_v34 }
  0x93   : > { %757 = vrot.lane.b32.xlu1 %v4933_v63, %s4280_s26  ;;  %v4959_v63 = vsel %vm658_vm4, %v690_v0, %v692_v8  ;;  %v702_v0 = vrot.slane %v4716_v54, 2  ;;  %v709_v8 = vrot.slane %v4731_v3, 2 }
  0x94   : > { %8246 = vst [vmem:[#allocation34_spill] sm:$0xff] %v4959_v63 }
  0x95   : > { %763 = vrot.lane.b32.xlu0 %v4941_v59, %s4280_s26  ;;  %v4993_v54 = vsel %vm658_vm4, %v709_v8, %v710_v24  ;;  %v720_v8 = vrot.slane %v4771_v60, 2 }
  0x96   : > { %8251 = vst [vmem:[#allocation39_spill] sm:$0xff] %v4993_v54 }
  0x97   : > { %761 = vrot.lane.b32.xlu1 %v4946_v39, %s4280_s26  ;;  %v4972_v39 = vsel %vm658_vm4, %v695_v13, %v697_v11  ;;  %v707_v13 = vrot.slane %v4735_v6, 2  ;;  %v714_v11 = vrot.slane %v4750_v17, 2 }
  0x98   : > { %8248 = vst [vmem:[#allocation36_spill] sm:$0xff] %v4972_v39 }
  0x99   : > { %767 = vrot.lane.b32.xlu0 %v4954_v12, %s4280_s26  ;;  %v5006_v6 = vsel %vm658_vm4, %v714_v11, %v715_v14  ;;  %v725_v11 = vrot.slane %v4790_v56, 2 }
  0x9b   : > { %765 = vrot.lane.b32.xlu1 %v4959_v63, %s4280_s26  ;;  %v4985_v63 = vsel %vm658_vm4, %v700_v38, %v702_v0  ;;  %v712_v38 = vrot.slane %v4754_v20, 2  ;;  %v719_v0 = vrot.slane %v4769_v46, 2 }
  0x9c   : > { %8250 = vst [vmem:[#allocation38_spill] sm:$0xff] %v4985_v63 }
  0x9d   : > { %771 = vrot.lane.b32.xlu0 %v4967_v23, %s4280_s26  ;;  %v5019_v20 = vsel %vm658_vm4, %v719_v0, %v720_v8  ;;  %v730_v0 = vrot.slane %v4809_v27, 2 }
  0x9e   : > { %8254 = vst [vmem:[#allocation42_spill] sm:$0xff] %v5019_v20 }
  0x9f   : > { %769 = vrot.lane.b32.xlu1 %v4972_v39, %s4280_s26  ;;  %v4998_v39 = vsel %vm658_vm4, %v705_v7, %v707_v13  ;;  %v717_v7 = vrot.slane %v4773_v2, 2  ;;  %v724_v13 = vrot.slane %v4788_v1, 2 }
  0xa0   : > { %8252 = vst [vmem:[#allocation40_spill] sm:$0xff] %v4998_v39 }
  0xa1   : > { %775 = vrot.lane.b32.xlu0 %v4980_v34, %s4280_s26  ;;  %v5032_v2 = vsel %vm658_vm4, %v724_v13, %v725_v11  ;;  %v734_v13 = vrot.slane %v4826_v19, 2 }
  0xa2   : > { %8256 = vst [vmem:[#allocation44_spill] sm:$0xff] %v5032_v2 }
  0xa3   : > { %773 = vrot.lane.b32.xlu1 %v4985_v63, %s4280_s26  ;;  %v5011_v63 = vsel %vm658_vm4, %v710_v24, %v712_v38  ;;  %v722_v24 = vrot.slane %v4792_v25, 2  ;;  %v729_v38 = vrot.slane %v4807_v36, 2  ;;  %v727_v25 = vrot.slane %v4811_v9, 2 }
  0xa4   : > { %8253 = vst [vmem:[#allocation41_spill] sm:$0xff] %v5011_v63  ;;  %v732_v9 = vrot.slane %v4830_v26, 2 }
  0xa5   : > { %779 = vrot.lane.b32.xlu0 %v4993_v54, %s4280_s26 }
  0xa7   : > { %777 = vrot.lane.b32.xlu1 %v4998_v39, %s4280_s26  ;;  %v5024_v39 = vsel %vm658_vm4, %v715_v14, %v717_v7  ;;  %v5039_v14 = vsel %vm658_vm4, %v720_v8, %v722_v24  ;;  %v5047_v7 = vsel %vm658_vm4, %v729_v38, %v730_v0  ;;  %v5054_v8 = vsel %vm658_vm4, %v725_v11, %v727_v25 }
  0xa8   : > { %8255 = vst [vmem:[#allocation43_spill] sm:$0xff] %v5024_v39  ;;  %8258 = vst [vmem:[#allocation46_spill] sm:$0xff] %v5047_v7  ;;  %v737_v11 = vrot.slane %v4847_v55, 2 }
  0xa9   : > { %783 = vrot.lane.b32.xlu0 %v5006_v6, %s4280_s26 }
  0xab   : > { %781 = vrot.lane.b32.xlu1 %v5011_v63, %s4280_s26 }
  0xad   : > { %787 = vrot.lane.b32.xlu0 %v5019_v20, %s4280_s26 }
  0xaf   : > { %785 = vrot.lane.b32.xlu1 %v5024_v39, %s4280_s26  ;;  %v5036_v63 = vpop.permute.xlu0 %562  ;;  %v735_v39 = vrot.slane %v4828_v16, 2 }
  0xb0   : > { %8257 = vst [vmem:[#allocation45_spill] sm:$0xff] %v5036_v63 }
  0xb1   : > { %791 = vrot.lane.b32.xlu0 %v5032_v2, %s4280_s26  ;;  %v5064_v38 = vsel %vm658_vm4, %v734_v13, %v735_v39  ;;  %v5081_v13 = vsel %vm658_vm4, %v735_v39, %v737_v11 }
  0xb2   : > { %8261 = vst [vmem:[#allocation49_spill] sm:$0xff] %v5064_v38 }
  0xb3   : > { %789 = vrot.lane.b32.xlu1 %v5039_v14, %s4280_s26  ;;  %v5051_v20 = vpop.permute.xlu0 %564 }
  0xb4   : > { %8259 = vst [vmem:[#allocation47_spill] sm:$0xff] %v5051_v20  ;;  %v5069_v20 = vsel %vm658_vm4, %v730_v0, %v732_v9 }
  0xb5   : > { %v5057_v24 = vpop.permute.xlu1 %566  ;;  %795 = vrot.lane.b32.xlu0 %v5047_v7, %s4280_s26 }
  0xb6   : > { %8260 = vst [vmem:[#allocation48_spill] sm:$0xff] %v5057_v24 }
  0xb7   : > { %793 = vrot.lane.b32.xlu1 %v5054_v8, %s4280_s26  ;;  %v5066_v63 = vpop.permute.xlu0 %570 }
  0xb8   : > { %8262 = vst [vmem:[#allocation50_spill] sm:$0xff] %v5066_v63  ;;  %v8314_v63 = vld [vmem:[#allocation10_spill] sm:$0xff] }
  0xb9   : > { %v5072_v25 = vpop.permute.xlu1 %568  ;;  %799 = vrot.lane.b32.xlu0 %v5064_v38, %s4280_s26 }
  0xba   : > { %8263 = vst [vmem:[#allocation51_spill] sm:$0xff] %v5072_v25  ;;  %v8310_v25 = vld [vmem:[#allocation8_spill] sm:$0xff] }
  0xbb   : > { %797 = vrot.lane.b32.xlu1 %v5069_v20, %s4280_s26  ;;  %v5078_v26 = vpop.permute.xlu0 %574 }
  0xbc   : > { %8264 = vst [vmem:[#allocation52_spill] sm:$0xff] %v5078_v26  ;;  %v5213_v26 = vld [vmem:[#allocation2 + $0x188] sm:$0xff] }
  0xbd   : > { %v5083_v24 = vpop.permute.xlu1 %572  ;;  %837 = vrot.lane.b32.xlu0 %v4560_v30, %s4281_s27 }
  0xbe   : > { %8265 = vst [vmem:[#allocation53_spill] sm:$0xff] %v5083_v24 }
  0xbf   : > { %801 = vrot.lane.b32.xlu1 %v5081_v13, %s4280_s26  ;;  %v5089_v55 = vpop.permute.xlu0 %578 }
  0xc0   : > { %8266 = vst [vmem:[#allocation54_spill] sm:$0xff] %v5089_v55 }
  0xc1   : > { %v5091_v0 = vpop.permute.xlu1 %576  ;;  %841 = vrot.lane.b32.xlu0 %v4564_v32, %s4281_s27 }
  0xc2   : > { %8267 = vst [vmem:[#allocation55_spill] sm:$0xff] %v5091_v0 }
  0xc3   : > { %839 = vrot.lane.b32.xlu1 %v4562_v31, %s4281_s27  ;;  %v5097_v39 = vpop.permute.xlu0 %582 }
  0xc4   : > { %8268 = vst [vmem:[#allocation56_spill] sm:$0xff] %v5097_v39 }
  0xc5   : > { %v5099_v9 = vpop.permute.xlu1 %580  ;;  %845 = vrot.lane.b32.xlu0 %v4578_v40, %s4281_s27 }
  0xc6   : > { %8269 = vst [vmem:[#allocation57_spill] sm:$0xff] %v5099_v9 }
  0xc7   : > { %843 = vrot.lane.b32.xlu1 %v4571_v35, %s4281_s27  ;;  %v5105_v30 = vpop.permute.xlu0 %586 }
  0xc8   : > { %8270 = vst [vmem:[#allocation58_spill] sm:$0xff] %v5105_v30 }
  0xc9   : > { %v5107_v11 = vpop.permute.xlu1 %584  ;;  %849 = vrot.lane.b32.xlu0 %v4599_v49, %s4281_s27 }
  0xca   : > { %8271 = vst [vmem:[#allocation59_spill] sm:$0xff] %v5107_v11 }
  0xcb   : > { %847 = vrot.lane.b32.xlu1 %v4580_v41, %s4281_s27  ;;  %v5113_v31 = vpop.permute.xlu0 %590 }
  0xcc   : > { %8272 = vst [vmem:[#allocation60_spill] sm:$0xff] %v5113_v31 }
  0xcd   : > { %v5115_v39 = vpop.permute.xlu1 %588  ;;  %853 = vrot.lane.b32.xlu0 %v4618_v57, %s4281_s27 }
  0xce   : > { %8273 = vst [vmem:[#allocation61_spill] sm:$0xff] %v5115_v39 }
  0xcf   : > { %851 = vrot.lane.b32.xlu1 %v4601_v50, %s4281_s27  ;;  %v5121_v9 = vpop.permute.xlu0 %594 }
  0xd0   : > { %8274 = vst [vmem:[#allocation62_spill] sm:$0xff] %v5121_v9 }
  0xd1   : > { %v5123_v30 = vpop.permute.xlu1 %592  ;;  %857 = vrot.lane.b32.xlu0 %v4627_v61, %s4281_s27 }
  0xd2   : > { %8275 = vst [vmem:[#allocation63_spill] sm:$0xff] %v5123_v30 }
  0xd3   : > { %855 = vrot.lane.b32.xlu1 %v4620_v58, %s4281_s27  ;;  %v5129_v11 = vpop.permute.xlu0 %598 }
  0xd4   : > { %8276 = vst [vmem:[#allocation64_spill] sm:$0xff] %v5129_v11 }
  0xd5   : > { %v5131_v31 = vpop.permute.xlu1 %596  ;;  %861 = vrot.lane.b32.xlu0 %v4674_v21, %s4281_s27 }
  0xd6   : > { %8277 = vst [vmem:[#allocation65_spill] sm:$0xff] %v5131_v31 }
  0xd7   : > { %859 = vrot.lane.b32.xlu1 %v4629_v62, %s4281_s27  ;;  %v5137_v39 = vpop.permute.xlu0 %602 }
  0xd8   : > { %8278 = vst [vmem:[#allocation66_spill] sm:$0xff] %v5137_v39 }
  0xd9   : > { %v5139_v9 = vpop.permute.xlu1 %600  ;;  %865 = vrot.lane.b32.xlu0 %v4693_v29, %s4281_s27 }
  0xda   : > { %8279 = vst [vmem:[#allocation67_spill] sm:$0xff] %v5139_v9 }
  0xdb   : > { %863 = vrot.lane.b32.xlu1 %v4676_v22, %s4281_s27  ;;  %v5145_v30 = vpop.permute.xlu0 %606 }
  0xdc   : > { %8280 = vst [vmem:[#allocation68_spill] sm:$0xff] %v5145_v30 }
  0xdd   : > { %v5147_v11 = vpop.permute.xlu1 %604  ;;  %869 = vrot.lane.b32.xlu0 %v4712_v48, %s4281_s27 }
  0xde   : > { %8281 = vst [vmem:[#allocation69_spill] sm:$0xff] %v5147_v11 }
  0xdf   : > { %867 = vrot.lane.b32.xlu1 %v4695_v33, %s4281_s27  ;;  %v5153_v31 = vpop.permute.xlu0 %610 }
  0xe0   : > { %8282 = vst [vmem:[#allocation70_spill] sm:$0xff] %v5153_v31 }
  0xe1   : > { %v5155_v39 = vpop.permute.xlu1 %608  ;;  %873 = vrot.lane.b32.xlu0 %v4731_v3, %s4281_s27 }
  0xe2   : > { %8283 = vst [vmem:[#allocation71_spill] sm:$0xff] %v5155_v39 }
  0xe3   : > { %871 = vrot.lane.b32.xlu1 %v4714_v53, %s4281_s27  ;;  %v5161_v9 = vpop.permute.xlu0 %614 }
  0xe4   : > { %8284 = vst [vmem:[#allocation72_spill] sm:$0xff] %v5161_v9 }
  0xe5   : > { %v5163_v30 = vpop.permute.xlu1 %612  ;;  %877 = vrot.lane.b32.xlu0 %v4750_v17, %s4281_s27 }
  0xe6   : > { %8285 = vst [vmem:[#allocation73_spill] sm:$0xff] %v5163_v30 }
  0xe7   : > { %875 = vrot.lane.b32.xlu1 %v4733_v4, %s4281_s27  ;;  %v5169_v11 = vpop.permute.xlu0 %618 }
  0xe8   : > { %8286 = vst [vmem:[#allocation74_spill] sm:$0xff] %v5169_v11 }
  0xe9   : > { %v5171_v31 = vpop.permute.xlu1 %616  ;;  %881 = vrot.lane.b32.xlu0 %v4769_v46, %s4281_s27 }
  0xea   : > { %8287 = vst [vmem:[#allocation75_spill] sm:$0xff] %v5171_v31 }
  0xeb   : > { %879 = vrot.lane.b32.xlu1 %v4752_v18, %s4281_s27  ;;  %v5177_v39 = vpop.permute.xlu0 %622 }
  0xec   : > { %8288 = vst [vmem:[#allocation76_spill] sm:$0xff] %v5177_v39 }
  0xed   : > { %v5179_v9 = vpop.permute.xlu1 %620  ;;  %885 = vrot.lane.b32.xlu0 %v4788_v1, %s4281_s27 }
  0xee   : > { %8289 = vst [vmem:[#allocation77_spill] sm:$0xff] %v5179_v9  ;;  %v5201_v9 = vld [vmem:[#allocation2 + $0x180] sm:$0xff] }
  0xef   : > { %883 = vrot.lane.b32.xlu1 %v4771_v60, %s4281_s27  ;;  %v5185_v30 = vpop.permute.xlu0 %739 }
  0xf0   : > { %8290 = vst [vmem:[#allocation78_spill] sm:$0xff] %v5185_v30 }
  0xf1   : > { %v5187_v11 = vpop.permute.xlu1 %624  ;;  %889 = vrot.lane.b32.xlu0 %v4807_v36, %s4281_s27 }
  0xf2   : > { %8291 = vst [vmem:[#allocation79_spill] sm:$0xff] %v5187_v11 }
  0xf3   : > { %887 = vrot.lane.b32.xlu1 %v4790_v56, %s4281_s27  ;;  %v5193_v31 = vpop.permute.xlu0 %743 }
  0xf4   : > { %8292 = vst [vmem:[#allocation80_spill] sm:$0xff] %v5193_v31 }
  0xf5   : > { %v5195_v39 = vpop.permute.xlu1 %741  ;;  %893 = vrot.lane.b32.xlu0 %v4826_v19, %s4281_s27 }
  0xf6   : > { %8293 = vst [vmem:[#allocation81_spill] sm:$0xff] %v5195_v39  ;;  %v8306_v39 = vld [vmem:[#allocation6_spill] sm:$0xff] }
  0xf7   : > { %891 = vrot.lane.b32.xlu1 %v4809_v27, %s4281_s27  ;;  %v5203_v55 = vpop.permute.xlu0 %747 }
  0xf8   : > { %8294 = vst [vmem:[#allocation82_spill] sm:$0xff] %v5203_v55 }
  0xf9   : > { %v5205_v11 = vpop.permute.xlu1 %745  ;;  %897 = vrot.lane.b32.xlu0 %v5201_v9, %s4281_s27 }
  0xfa   : > { %8295 = vst [vmem:[#allocation83_spill] sm:$0xff] %v5205_v11 }
  0xfb   : > { %895 = vrot.lane.b32.xlu1 %v4828_v16, %s4281_s27  ;;  %v5211_v0 = vpop.permute.xlu0 %751 }
  0xfc   : > { %8296 = vst [vmem:[#allocation84_spill] sm:$0xff] %v5211_v0 }
  0xfd   : > { %v5215_v24 = vpop.permute.xlu1 %749  ;;  %939 = vrot.lane.b32.xlu0 %v4586_v43, %s4282_s28  ;;  %v8302_v43 = vld [vmem:[#allocation4_spill] sm:$0xff] }
  0xfe   : > { %8297 = vst [vmem:[#allocation85_spill] sm:$0xff] %v5215_v24 }
  0xff   : > { %899 = vrot.lane.b32.xlu1 %v5213_v26, %s4281_s27  ;;  %v5221_v11 = vpop.permute.xlu0 %755 }
 0x100   : > { %8298 = vst [vmem:[#allocation86_spill] sm:$0xff] %v5221_v11 }
 0x101   : > { %v5223_v55 = vpop.permute.xlu1 %753  ;;  %943 = vrot.lane.b32.xlu0 %v4591_v44, %s4282_s28 }
 0x102   : > { %8299 = vst [vmem:[#allocation87_spill] sm:$0xff] %v5223_v55  ;;  %v8305_v55 = vld [vmem:[#allocation5_spill] sm:$0xff] }
 0x103   : > { %941 = vrot.lane.b32.xlu1 %v4596_v47, %s4282_s28  ;;  %v5229_v0 = vpop.permute.xlu0 %759 }
 0x104   : > { %8300 = vst [vmem:[#allocation88_spill] sm:$0xff] %v5229_v0 }
 0x105   : > { %v5231_v24 = vpop.permute.xlu1 %757  ;;  %947 = vrot.lane.b32.xlu0 %v4610_v52, %s4282_s28 }
 0x106   : > { %8301 = vst [vmem:[#allocation89_spill] sm:$0xff] %v5231_v24  ;;  %v8309_v24 = vld [vmem:[#allocation7_spill] sm:$0xff] }
 0x107   : > { %945 = vrot.lane.b32.xlu1 %v8302_v43, %s4282_s28  ;;  %v5237_v31 = vpop.permute.xlu0 %763 }
 0x108   : > { %8303 = vst [vmem:[#allocation4_spill] sm:$0xff] %v5237_v31 }
 0x109   : > { %v5239_v11 = vpop.permute.xlu1 %761  ;;  %951 = vrot.lane.b32.xlu0 %v8305_v55, %s4282_s28 }
 0x10a   : > { %8304 = vst [vmem:[#allocation90_spill] sm:$0xff] %v5239_v11  ;;  %v8313_v11 = vld [vmem:[#allocation9_spill] sm:$0xff] }
 0x10b   : > { %949 = vrot.lane.b32.xlu1 %v8306_v39, %s4282_s28  ;;  %v5245_v47 = vpop.permute.xlu0 %767 }
 0x10c   : > { %8307 = vst [vmem:[#allocation5_spill] sm:$0xff] %v5245_v47 }
 0x10d   : > { %v5247_v0 = vpop.permute.xlu1 %765  ;;  %955 = vrot.lane.b32.xlu0 %v8309_v24, %s4282_s28  ;;  %v8318_v24 = vld [vmem:[#allocation12_spill] sm:$0xff] }
 0x10e   : > { %8308 = vst [vmem:[#allocation91_spill] sm:$0xff] %v5247_v0  ;;  %v8317_v0 = vld [vmem:[#allocation11_spill] sm:$0xff] }
 0x10f   : > { %953 = vrot.lane.b32.xlu1 %v8310_v25, %s4282_s28  ;;  %v5253_v30 = vpop.permute.xlu0 %771 }
 0x110   : > { %8311 = vst [vmem:[#allocation92_spill] sm:$0xff] %v5253_v30 }
 0x111   : > { %v5255_v31 = vpop.permute.xlu1 %769  ;;  %959 = vrot.lane.b32.xlu0 %v8313_v11, %s4282_s28  ;;  %v8322_v11 = vld [vmem:[#allocation14_spill] sm:$0xff] }
 0x112   : > { %8312 = vst [vmem:[#allocation93_spill] sm:$0xff] %v5255_v31  ;;  %v8321_v31 = vld [vmem:[#allocation13_spill] sm:$0xff] }
 0x113   : > { %957 = vrot.lane.b32.xlu1 %v8314_v63, %s4282_s28  ;;  %v5261_v39 = vpop.permute.xlu0 %775 }
 0x114   : > { %8315 = vst [vmem:[#allocation94_spill] sm:$0xff] %v5261_v39 }
 0x115   : > { %v5263_v47 = vpop.permute.xlu1 %773  ;;  %963 = vrot.lane.b32.xlu0 %v8317_v0, %s4282_s28  ;;  %v8326_v0 = vld [vmem:[#allocation16_spill] sm:$0xff] }
 0x116   : > { %8316 = vst [vmem:[#allocation95_spill] sm:$0xff] %v5263_v47  ;;  %v8325_v47 = vld [vmem:[#allocation15_spill] sm:$0xff] }
 0x117   : > { %961 = vrot.lane.b32.xlu1 %v8318_v24, %s4282_s28  ;;  %v5269_v25 = vpop.permute.xlu0 %779 }
 0x118   : > { %8319 = vst [vmem:[#allocation96_spill] sm:$0xff] %v5269_v25 }
 0x119   : > { %v5271_v30 = vpop.permute.xlu1 %777  ;;  %967 = vrot.lane.b32.xlu0 %v8321_v31, %s4282_s28  ;;  %v8330_v31 = vld [vmem:[#allocation18_spill] sm:$0xff] }
 0x11a   : > { %8320 = vst [vmem:[#allocation97_spill] sm:$0xff] %v5271_v30  ;;  %v8329_v30 = vld [vmem:[#allocation17_spill] sm:$0xff] }
 0x11b   : > { %965 = vrot.lane.b32.xlu1 %v8322_v11, %s4282_s28  ;;  %v5277_v63 = vpop.permute.xlu0 %783 }
 0x11c   : > { %8323 = vst [vmem:[#allocation98_spill] sm:$0xff] %v5277_v63 }
 0x11d   : > { %v5279_v39 = vpop.permute.xlu1 %781  ;;  %971 = vrot.lane.b32.xlu0 %v8325_v47, %s4282_s28  ;;  %v8334_v47 = vld [vmem:[#allocation20_spill] sm:$0xff] }
 0x11e   : > { %8324 = vst [vmem:[#allocation99_spill] sm:$0xff] %v5279_v39  ;;  %v8333_v39 = vld [vmem:[#allocation19_spill] sm:$0xff] }
 0x11f   : > { %969 = vrot.lane.b32.xlu1 %v8326_v0, %s4282_s28  ;;  %v5285_v24 = vpop.permute.xlu0 %787 }
 0x120   : > { %8327 = vst [vmem:[#allocation100_spill] sm:$0xff] %v5285_v24 }
 0x121   : > { %v5287_v25 = vpop.permute.xlu1 %785  ;;  %975 = vrot.lane.b32.xlu0 %v8329_v30, %s4282_s28  ;;  %v8338_v30 = vld [vmem:[#allocation22_spill] sm:$0xff] }
 0x122   : > { %8328 = vst [vmem:[#allocation101_spill] sm:$0xff] %v5287_v25  ;;  %v8337_v25 = vld [vmem:[#allocation21_spill] sm:$0xff] }
 0x123   : > { %973 = vrot.lane.b32.xlu1 %v8330_v31, %s4282_s28  ;;  %v5293_v11 = vpop.permute.xlu0 %791 }
 0x124   : > { %8331 = vst [vmem:[#allocation102_spill] sm:$0xff] %v5293_v11 }
 0x125   : > { %v5295_v63 = vpop.permute.xlu1 %789  ;;  %979 = vrot.lane.b32.xlu0 %v8333_v39, %s4282_s28  ;;  %v8342_v39 = vld [vmem:[#allocation24_spill] sm:$0xff] }
 0x126   : > { %8332 = vst [vmem:[#allocation103_spill] sm:$0xff] %v5295_v63  ;;  %v8341_v63 = vld [vmem:[#allocation23_spill] sm:$0xff] }
 0x127   : > { %977 = vrot.lane.b32.xlu1 %v8334_v47, %s4282_s28  ;;  %v5301_v0 = vpop.permute.xlu0 %795 }
 0x128   : > { %8335 = vst [vmem:[#allocation104_spill] sm:$0xff] %v5301_v0 }
 0x129   : > { %v5303_v24 = vpop.permute.xlu1 %793  ;;  %983 = vrot.lane.b32.xlu0 %v8337_v25, %s4282_s28  ;;  %v935_v25 = vrot.slane %v5213_v26, 1 }
 0x12a   : > { %8336 = vst [vmem:[#allocation105_spill] sm:$0xff] %v5303_v24  ;;  %v934_v24 = vrot.slane %v5201_v9, 1 }
 0x12b   : > { %981 = vrot.lane.b32.xlu1 %v8338_v30, %s4282_s28  ;;  %v5309_v31 = vpop.permute.xlu0 %799 }
 0x12c   : > { %8339 = vst [vmem:[#allocation106_spill] sm:$0xff] %v5309_v31 }
 0x12d   : > { %v5311_v11 = vpop.permute.xlu1 %797  ;;  %987 = vrot.lane.b32.xlu0 %v8341_v63, %s4282_s28  ;;  %v5331_v63 = vld [vmem:[#allocation2 + $0x190] sm:$0x3] }
 0x12e   : > { %8340 = vst [vmem:[#allocation107_spill] sm:$0xff] %v5311_v11  ;;  %v937_v30 = vrot.slane %v5331_v63, 1 }
 0x12f   : > { %985 = vrot.lane.b32.xlu1 %v8342_v39, %s4282_s28  ;;  %v5317_v47 = vpop.permute.xlu0 %837 }
 0x130   : > { %8343 = vst [vmem:[#allocation108_spill] sm:$0xff] %v5317_v47  ;;  %v8347_v47 = vld [vmem:[#allocation27_spill] sm:$0xff] }
 0x131   : > { %v5319_v0 = vpop.permute.xlu1 %801  ;;  %991 = vrot.lane.b32.xlu0 %v4839_v45, %s4282_s28  ;;  %v5338_v45 = vsel %vm481_vm3, %v934_v24, %v935_v25 }
 0x132   : > { %8344 = vst [vmem:[#allocation109_spill] sm:$0xff] %v5319_v0  ;;  %v8348_v0 = vld [vmem:[#allocation28_spill] sm:$0xff]  ;;  %8349 = vst [vmem:[#allocation112_spill] sm:$0xff] %v5338_v45 }
 0x133   : > { %989 = vrot.lane.b32.xlu1 %v4844_v5, %s4282_s28  ;;  %v5327_v31 = vpop.permute.xlu0 %841 }
 0x134   : > { %8345 = vst [vmem:[#allocation110_spill] sm:$0xff] %v5327_v31  ;;  %v8352_v31 = vld [vmem:[#allocation29_spill] sm:$0xff] }
 0x135   : > { %v5329_v11 = vpop.permute.xlu1 %839  ;;  %995 = vrot.lane.b32.xlu0 %v8347_v47, %s4282_s28  ;;  %v5352_v47 = vsel %vm481_vm3, %v935_v25, %v937_v30 }
 0x136   : > { %8346 = vst [vmem:[#allocation111_spill] sm:$0xff] %v5329_v11  ;;  %8354 = vst [vmem:[#allocation116_spill] sm:$0xff] %v5352_v47 }
 0x137   : > { %993 = vrot.lane.b32.xlu1 %v8348_v0, %s4282_s28  ;;  %v5340_v39 = vpop.permute.xlu0 %845 }
 0x138   : > { %8350 = vst [vmem:[#allocation113_spill] sm:$0xff] %v5340_v39 }
 0x139   : > { %v5343_v5 = vpop.permute.xlu1 %843  ;;  %999 = vrot.lane.b32.xlu0 %v5338_v45, %s4282_s28 }
 0x13a   : > { %8351 = vst [vmem:[#allocation114_spill] sm:$0xff] %v5343_v5 }
 0x13b   : > { %997 = vrot.lane.b32.xlu1 %v8352_v31, %s4282_s28  ;;  %v5349_v11 = vpop.permute.xlu0 %849 }
 0x13c   : > { %8353 = vst [vmem:[#allocation115_spill] sm:$0xff] %v5349_v11 }
 0x13d   : > { %v5354_v0 = vpop.permute.xlu1 %847  ;;  %1040 = vrot.lane.b32.xlu0 %v4879_v28, %s4283_s29  ;;  %v8360_v28 = vld [vmem:[#allocation30_spill] sm:$0xff] }
 0x13e   : > { %8355 = vst [vmem:[#allocation117_spill] sm:$0xff] %v5354_v0 }
 0x13f   : > { %1001 = vrot.lane.b32.xlu1 %v5352_v47, %s4282_s28  ;;  %v5360_v24 = vpop.permute.xlu0 %853 }
 0x140   : > { %8356 = vst [vmem:[#allocation118_spill] sm:$0xff] %v5360_v24 }
 0x141   : > { %v5362_v39 = vpop.permute.xlu1 %851  ;;  %1044 = vrot.lane.b32.xlu0 %v4889_v15, %s4283_s29 }
 0x142   : > { %8357 = vst [vmem:[#allocation119_spill] sm:$0xff] %v5362_v39  ;;  %v8363_v39 = vld [vmem:[#allocation31_spill] sm:$0xff] }
 0x143   : > { %1042 = vrot.lane.b32.xlu1 %v4894_v10, %s4283_s29  ;;  %v5368_v25 = vpop.permute.xlu0 %857 }
 0x144   : > { %8358 = vst [vmem:[#allocation120_spill] sm:$0xff] %v5368_v25 }
 0x145   : > { %v5370_v30 = vpop.permute.xlu1 %855  ;;  %1048 = vrot.lane.b32.xlu0 %v4902_v37, %s4283_s29 }
 0x146   : > { %8359 = vst [vmem:[#allocation121_spill] sm:$0xff] %v5370_v30  ;;  %v8366_v30 = vld [vmem:[#allocation32_spill] sm:$0xff] }
 0x147   : > { %1046 = vrot.lane.b32.xlu1 %v8360_v28, %s4283_s29  ;;  %v5376_v11 = vpop.permute.xlu0 %861 }
 0x148   : > { %8361 = vst [vmem:[#allocation30_spill] sm:$0xff] %v5376_v11 }
 0x149   : > { %v5378_v24 = vpop.permute.xlu1 %859  ;;  %1052 = vrot.lane.b32.xlu0 %v4915_v42, %s4283_s29 }
 0x14a   : > { %8362 = vst [vmem:[#allocation122_spill] sm:$0xff] %v5378_v24  ;;  %v8369_v24 = vld [vmem:[#allocation33_spill] sm:$0xff] }
 0x14b   : > { %1050 = vrot.lane.b32.xlu1 %v8363_v39, %s4283_s29  ;;  %v5384_v10 = vpop.permute.xlu0 %865 }
 0x14c   : > { %8364 = vst [vmem:[#allocation31_spill] sm:$0xff] %v5384_v10 }
 0x14d   : > { %v5386_v25 = vpop.permute.xlu1 %863  ;;  %1056 = vrot.lane.b32.xlu0 %v4928_v51, %s4283_s29 }
 0x14e   : > { %8365 = vst [vmem:[#allocation123_spill] sm:$0xff] %v5386_v25  ;;  %v8372_v25 = vld [vmem:[#allocation34_spill] sm:$0xff] }
 0x14f   : > { %1054 = vrot.lane.b32.xlu1 %v8366_v30, %s4283_s29  ;;  %v5392_v0 = vpop.permute.xlu0 %869 }
 0x150   : > { %8367 = vst [vmem:[#allocation32_spill] sm:$0xff] %v5392_v0 }
 0x151   : > { %v5394_v11 = vpop.permute.xlu1 %867  ;;  %1060 = vrot.lane.b32.xlu0 %v4941_v59, %s4283_s29 }
 0x152   : > { %8368 = vst [vmem:[#allocation124_spill] sm:$0xff] %v5394_v11  ;;  %v8375_v11 = vld [vmem:[#allocation36_spill] sm:$0xff] }
 0x153   : > { %1058 = vrot.lane.b32.xlu1 %v8369_v24, %s4283_s29  ;;  %v5400_v5 = vpop.permute.xlu0 %873 }
 0x154   : > { %8370 = vst [vmem:[#allocation33_spill] sm:$0xff] %v5400_v5 }
 0x155   : > { %v5402_v10 = vpop.permute.xlu1 %871  ;;  %1064 = vrot.lane.b32.xlu0 %v4954_v12, %s4283_s29 }
 0x156   : > { %8371 = vst [vmem:[#allocation125_spill] sm:$0xff] %v5402_v10  ;;  %v8378_v10 = vld [vmem:[#allocation38_spill] sm:$0xff] }
 0x157   : > { %1062 = vrot.lane.b32.xlu1 %v8372_v25, %s4283_s29  ;;  %v5408_v47 = vpop.permute.xlu0 %877 }
 0x158   : > { %8373 = vst [vmem:[#allocation34_spill] sm:$0xff] %v5408_v47 }
 0x159   : > { %v5410_v0 = vpop.permute.xlu1 %875  ;;  %1068 = vrot.lane.b32.xlu0 %v4967_v23, %s4283_s29 }
 0x15a   : > { %8374 = vst [vmem:[#allocation126_spill] sm:$0xff] %v5410_v0  ;;  %v8381_v0 = vld [vmem:[#allocation40_spill] sm:$0xff] }
 0x15b   : > { %1066 = vrot.lane.b32.xlu1 %v8375_v11, %s4283_s29  ;;  %v5416_v45 = vpop.permute.xlu0 %881 }
 0x15c   : > { %8376 = vst [vmem:[#allocation36_spill] sm:$0xff] %v5416_v45 }
 0x15d   : > { %v5418_v5 = vpop.permute.xlu1 %879  ;;  %1072 = vrot.lane.b32.xlu0 %v4980_v34, %s4283_s29 }
 0x15e   : > { %8377 = vst [vmem:[#allocation127_spill] sm:$0xff] %v5418_v5  ;;  %v8384_v5 = vld [vmem:[#allocation41_spill] sm:$0xff] }
 0x15f   : > { %1070 = vrot.lane.b32.xlu1 %v8378_v10, %s4283_s29  ;;  %v5424_v31 = vpop.permute.xlu0 %885 }
 0x160   : > { %8379 = vst [vmem:[#allocation38_spill] sm:$0xff] %v5424_v31 }
 0x161   : > { %v5426_v47 = vpop.permute.xlu1 %883  ;;  %1076 = vrot.lane.b32.xlu0 %v4993_v54, %s4283_s29  ;;  %v8388_v54 = vld [vmem:[#allocation43_spill] sm:$0xff] }
 0x162   : > { %8380 = vst [vmem:[#allocation128_spill] sm:$0xff] %v5426_v47  ;;  %v8387_v47 = vld [vmem:[#allocation42_spill] sm:$0xff] }
 0x163   : > { %1074 = vrot.lane.b32.xlu1 %v8381_v0, %s4283_s29  ;;  %v5432_v23 = vpop.permute.xlu0 %889 }
 0x164   : > { %8382 = vst [vmem:[#allocation129_spill] sm:$0xff] %v5432_v23 }
 0x165   : > { %v5434_v45 = vpop.permute.xlu1 %887  ;;  %1080 = vrot.lane.b32.xlu0 %v5006_v6, %s4283_s29 }
 0x166   : > { %8383 = vst [vmem:[#allocation130_spill] sm:$0xff] %v5434_v45 }
 0x167   : > { %1078 = vrot.lane.b32.xlu1 %v8384_v5, %s4283_s29  ;;  %v5440_v34 = vpop.permute.xlu0 %893 }
 0x168   : > { %8385 = vst [vmem:[#allocation41_spill] sm:$0xff] %v5440_v34 }
 0x169   : > { %v5442_v31 = vpop.permute.xlu1 %891  ;;  %1084 = vrot.lane.b32.xlu0 %v8387_v47, %s4283_s29  ;;  %v1036_v47 = vrot.slane %v5213_v26, 2 }
 0x16a   : > { %8386 = vst [vmem:[#allocation131_spill] sm:$0xff] %v5442_v31  ;;  %v1035_v31 = vrot.slane %v5201_v9, 2 }
 0x16b   : > { %1082 = vrot.lane.b32.xlu1 %v8388_v54, %s4283_s29  ;;  %v5448_v0 = vpop.permute.xlu0 %897 }
 0x16c   : > { %8389 = vst [vmem:[#allocation43_spill] sm:$0xff] %v5448_v0 }
 0x16d   : > { %v5450_v23 = vpop.permute.xlu1 %895  ;;  %1088 = vrot.lane.b32.xlu0 %v5032_v2, %s4283_s29 }
 0x16e   : > { %8390 = vst [vmem:[#allocation132_spill] sm:$0xff] %v5450_v23 }
 0x16f   : > { %1086 = vrot.lane.b32.xlu1 %v5039_v14, %s4283_s29  ;;  %v5456_v45 = vpop.permute.xlu0 %939 }
 0x170   : > { %8391 = vst [vmem:[#allocation133_spill] sm:$0xff] %v5456_v45 }
 0x171   : > { %v5458_v34 = vpop.permute.xlu1 %899  ;;  %1092 = vrot.lane.b32.xlu0 %v5047_v7, %s4283_s29  ;;  %v1038_v7 = vrot.slane %v5331_v63, 2 }
 0x172   : > { %8392 = vst [vmem:[#allocation134_spill] sm:$0xff] %v5458_v34  ;;  %v5475_v34 = vsel %vm658_vm4, %v1035_v31, %v1036_v47 }
 0x173   : > { %1090 = vrot.lane.b32.xlu1 %v5054_v8, %s4283_s29  ;;  %v5466_v0 = vpop.permute.xlu0 %943 }
 0x174   : > { %8393 = vst [vmem:[#allocation135_spill] sm:$0xff] %v5466_v0 }
 0x175   : > { %v5468_v23 = vpop.permute.xlu1 %941  ;;  %1096 = vrot.lane.b32.xlu0 %v5064_v38, %s4283_s29 }
 0x176   : > { %8394 = vst [vmem:[#allocation136_spill] sm:$0xff] %v5468_v23  ;;  %v5489_v23 = vsel %vm658_vm4, %v1036_v47, %v1038_v7 }
 0x177   : > { %1094 = vrot.lane.b32.xlu1 %v5069_v20, %s4283_s29  ;;  %v5477_v45 = vpop.permute.xlu0 %947 }
 0x179   : > { %v5480_v2 = vpop.permute.xlu1 %945  ;;  %1100 = vrot.lane.b32.xlu0 %v5475_v34, %s4283_s29 }
 0x17b   : > { %1098 = vrot.lane.b32.xlu1 %v5081_v13, %s4283_s29  ;;  %v5486_v0 = vpop.permute.xlu0 %951 }
 0x17d   : > { %v5491_v38 = vpop.permute.xlu1 %949  ;;  %1138 = vrot.lane.b32.xlu0 %v4564_v32, %s4284_s30 }
 0x17f   : > { %1102 = vrot.lane.b32.xlu1 %v5489_v23, %s4283_s29  ;;  %v5497_v63 = vpop.permute.xlu0 %955 }
 0x180   : > { %8395 = vst [vmem:[#allocation137_spill] sm:$0xff] %v5497_v63 }
 0x181   : > { %v5499_v31 = vpop.permute.xlu1 %953  ;;  %1142 = vrot.lane.b32.xlu0 %v4578_v40, %s4284_s30 }
 0x183   : > { %1140 = vrot.lane.b32.xlu1 %v4571_v35, %s4284_s30  ;;  %v5505_v7 = vpop.permute.xlu0 %959 }
 0x185   : > { %v5507_v47 = vpop.permute.xlu1 %957  ;;  %1146 = vrot.lane.b32.xlu0 %v4599_v49, %s4284_s30 }
 0x187   : > { %1144 = vrot.lane.b32.xlu1 %v4580_v41, %s4284_s30  ;;  %v5513_v32 = vpop.permute.xlu0 %963 }
 0x189   : > { %v5515_v63 = vpop.permute.xlu1 %961  ;;  %1150 = vrot.lane.b32.xlu0 %v4618_v57, %s4284_s30 }
 0x18b   : > { %1148 = vrot.lane.b32.xlu1 %v4601_v50, %s4284_s30  ;;  %v5521_v35 = vpop.permute.xlu0 %967 }
 0x18c   : > { %8396 = vst [vmem:[#allocation138_spill] sm:$0xff] %v5521_v35  ;;  %v8493_v35 = vld [vmem:[#allocation80_spill] sm:$0xff] }
 0x18d   : > { %v5523_v40 = vpop.permute.xlu1 %965  ;;  %1154 = vrot.lane.b32.xlu0 %v4627_v61, %s4284_s30 }
 0x18f   : > { %1152 = vrot.lane.b32.xlu1 %v4620_v58, %s4284_s30  ;;  %v5529_v41 = vpop.permute.xlu0 %971 }
 0x190   : > { %8397 = vst [vmem:[#allocation139_spill] sm:$0xff] %v5529_v41  ;;  %v4209_v41 = vld [vmem:[#allocation2 + $0x30] sm:$0xff] }
 0x191   : > { %v5531_v49 = vpop.permute.xlu1 %969  ;;  %1158 = vrot.lane.b32.xlu0 %v4674_v21, %s4284_s30 }
 0x192   : > { %8398 = vst [vmem:[#allocation140_spill] sm:$0xff] %v5531_v49 }
 0x193   : > { %1156 = vrot.lane.b32.xlu1 %v4629_v62, %s4284_s30  ;;  %v5537_v50 = vpop.permute.xlu0 %975 }
 0x194   : > { %8399 = vst [vmem:[#allocation141_spill] sm:$0xff] %v5537_v50  ;;  %v8461_v50 = vld [vmem:[#allocation23_spill] sm:$0xff] }
 0x195   : > { %v5539_v57 = vpop.permute.xlu1 %973  ;;  %1162 = vrot.lane.b32.xlu0 %v4693_v29, %s4284_s30 }
 0x196   : > { %8400 = vst [vmem:[#allocation142_spill] sm:$0xff] %v5539_v57  ;;  %v4206_v57 = vld [vmem:[#allocation2] sm:$0xff] }
 0x197   : > { %1160 = vrot.lane.b32.xlu1 %v4676_v22, %s4284_s30  ;;  %v5545_v58 = vpop.permute.xlu0 %979 }
 0x198   : > { %8401 = vst [vmem:[#allocation143_spill] sm:$0xff] %v5545_v58 }
 0x199   : > { %v5547_v61 = vpop.permute.xlu1 %977  ;;  %1166 = vrot.lane.b32.xlu0 %v4712_v48, %s4284_s30 }
 0x19a   : > { %8402 = vst [vmem:[#allocation144_spill] sm:$0xff] %v5547_v61  ;;  %v8457_v61 = vld [vmem:[#allocation42_spill] sm:$0xff] }
 0x19b   : > { %1164 = vrot.lane.b32.xlu1 %v4695_v33, %s4284_s30  ;;  %v5553_v62 = vpop.permute.xlu0 %983 }
 0x19c   : > { %8403 = vst [vmem:[#allocation145_spill] sm:$0xff] %v5553_v62  ;;  %v8433_v62 = vld [vmem:[#allocation11_spill] sm:$0xff] }
 0x19d   : > { %v5555_v21 = vpop.permute.xlu1 %981  ;;  %1170 = vrot.lane.b32.xlu0 %v4731_v3, %s4284_s30 }
 0x19e   : > { %8404 = vst [vmem:[#allocation146_spill] sm:$0xff] %v5555_v21 }
 0x19f   : > { %1168 = vrot.lane.b32.xlu1 %v4714_v53, %s4284_s30  ;;  %v5561_v22 = vpop.permute.xlu0 %987 }
 0x1a0   : > { %8405 = vst [vmem:[#allocation147_spill] sm:$0xff] %v5561_v22 }
 0x1a1   : > { %v5563_v29 = vpop.permute.xlu1 %985  ;;  %1174 = vrot.lane.b32.xlu0 %v4750_v17, %s4284_s30 }
 0x1a2   : > { %8406 = vst [vmem:[#allocation148_spill] sm:$0xff] %v5563_v29  ;;  %v8427_v29 = vld [vmem:[#allocation9_spill] sm:$0xff] }
 0x1a3   : > { %1172 = vrot.lane.b32.xlu1 %v4733_v4, %s4284_s30  ;;  %v5569_v33 = vpop.permute.xlu0 %991 }
 0x1a4   : > { %8407 = vst [vmem:[#allocation149_spill] sm:$0xff] %v5569_v33 }
 0x1a5   : > { %v5571_v48 = vpop.permute.xlu1 %989  ;;  %1178 = vrot.lane.b32.xlu0 %v4769_v46, %s4284_s30 }
 0x1a6   : > { %8408 = vst [vmem:[#allocation150_spill] sm:$0xff] %v5571_v48  ;;  %v8421_v48 = vld [vmem:[#allocation7_spill] sm:$0xff] }
 0x1a7   : > { %1176 = vrot.lane.b32.xlu1 %v4752_v18, %s4284_s30  ;;  %v5577_v53 = vpop.permute.xlu0 %995 }
 0x1a8   : > { %8409 = vst [vmem:[#allocation151_spill] sm:$0xff] %v5577_v53  ;;  %v8414_v53 = vld [vmem:[#allocation6_spill] sm:$0xff] }
 0x1a9   : > { %v5579_v3 = vpop.permute.xlu1 %993  ;;  %1182 = vrot.lane.b32.xlu0 %v4788_v1, %s4284_s30  ;;  %v1700_v1 = vld [vmem:[%s8056_s1] sm:$0xff] }
 0x1aa   : > { %8410 = vst [vmem:[#allocation152_spill] sm:$0xff] %v5579_v3 }
 0x1ab   : > { %1180 = vrot.lane.b32.xlu1 %v4771_v60, %s4284_s30  ;;  %v5585_v4 = vpop.permute.xlu0 %999 }
 0x1ac   : > { %8411 = vst [vmem:[#allocation153_spill] sm:$0xff] %v5585_v4 }
 0x1ad   : > { %v5587_v17 = vpop.permute.xlu1 %997  ;;  %1186 = vrot.lane.b32.xlu0 %v4807_v36, %s4284_s30  ;;  %v1701_v36 = vld [vmem:[%s8056_s1 + $0x8] sm:$0xff] }
 0x1ae   : > { %8412 = vst [vmem:[#allocation154_spill] sm:$0xff] %v5587_v17 }
 0x1af   : > { %1184 = vrot.lane.b32.xlu1 %v4790_v56, %s4284_s30  ;;  %v5593_v18 = vpop.permute.xlu0 %1040  ;;  %v4173_v56 = vpack.c.bf16 %v1701_v36, %v1700_v1  ;;  %v1703_v1 = vld [vmem:[%s8056_s1 + $0x18] sm:$0xff] }
 0x1b1   : > { %v5595_v46 = vpop.permute.xlu1 %1001  ;;  %1190 = vrot.lane.b32.xlu0 %v4826_v19, %s4284_s30  ;;  %4174 = vmatprep.subr.bf16.mxu0 %v4173_v56  ;;  %v5615_v19 = vld [vmem:[#allocation2 + $0x198] sm:$0xff] }
 0x1b2   : > { %8413 = vst [vmem:[#allocation155_spill] sm:$0xff] %v5595_v46  ;;  %4176 = vmatpush3.bf16.msra.mxu0 %v4173_v56 }
 0x1b3   : > { %1188 = vrot.lane.b32.xlu1 %v4809_v27, %s4284_s30  ;;  %v5607_v60 = vpop.permute.xlu0 %1044  ;;  %v1702_v27 = vld [vmem:[%s8056_s1 + $0x10] sm:$0xff] }
 0x1b4   : > { %v4177_v46 = vpack.c.bf16 %v1703_v1, %v1702_v27  ;;  %v1704_v27 = vld [vmem:[%s8056_s1 + $0x20] sm:$0xf] }
 0x1b5   : > { %v5609_v4 = vpop.permute.xlu1 %1042  ;;  %1194 = vrot.lane.b32.xlu0 %v5201_v9, %s4284_s30  ;;  %v5633_v9 = vld [vmem:[#allocation2 + $0x1a0] sm:$0xff] }
 0x1b6   : > { %4178 = vmatprep.subr.bf16.mxu0 %v4177_v46 }
 0x1b7   : > { %1192 = vrot.lane.b32.xlu1 %v4828_v16, %s4284_s30  ;;  %v5623_v36 = vpop.permute.xlu0 %1048  ;;  %4180 = vmatpush3.bf16.msra.mxu0 %v4177_v46 }
 0x1b8   : > { %4065 = vmatprep.subr.msk.mxu0 %vm1809_vm5, %v1704_v27 }
 0x1b9   : > { %v5625_v17 = vpop.permute.xlu1 %1046  ;;  %1198 = vrot.lane.b32.xlu0 %v5615_v19, %s4284_s30 }
 0x1bb   : > { %1196 = vrot.lane.b32.xlu1 %v5213_v26, %s4284_s30  ;;  %v5631_v16 = vpop.permute.xlu0 %1052  ;;  %4066 = vmatpush3.msk.msra.mxu0 %vm1809_vm5, %v1704_v27 }
 0x1bd   : > { %v5635_v56 = vpop.permute.xlu1 %1050  ;;  %1240 = vrot.lane.b32.xlu0 %v4591_v44, %s4285_s16 }
 0x1bf   : > { %1200 = vrot.lane.b32.xlu1 %v5633_v9, %s4284_s30  ;;  %v5646_v26 = vpop.permute.xlu0 %1056 }
 0x1c1   : > { %v5648_v46 = vpop.permute.xlu1 %1054  ;;  %1244 = vrot.lane.b32.xlu0 %v4610_v52, %s4285_s16 }
 0x1c3   : > { %1242 = vrot.lane.b32.xlu1 %v8302_v43, %s4285_s16  ;;  %v5654_v1 = vpop.permute.xlu0 %1060 }
 0x1c5   : > { %v5656_v44 = vpop.permute.xlu1 %1058  ;;  %1248 = vrot.lane.b32.xlu0 %v8305_v55, %s4285_s16 }
 0x1c7   : > { %1246 = vrot.lane.b32.xlu1 %v8414_v53, %s4285_s16  ;;  %v5662_v27 = vpop.permute.xlu0 %1064 }
 0x1c9   : > { %v5664_v3 = vpop.permute.xlu1 %1062  ;;  %1343 = vrot.lane.b32.xlu0 %v8360_v28, %s4286_s17  ;;  %v8418_v28 = vld [vmem:[#allocation8_spill] sm:$0xff] }
 0x1cb   : > { %1341 = vrot.lane.b32.xlu1 %v4889_v15, %s4286_s17  ;;  %v5670_v52 = vpop.permute.xlu0 %1068 }
 0x1cc   : > { %8415 = vst [vmem:[#allocation6_spill] sm:$0xff] %v5670_v52  ;;  %v8491_v52 = vld [vmem:[#allocation81_spill] sm:$0xff] }
 0x1cd   : > { %v5672_v43 = vpop.permute.xlu1 %1066  ;;  %1347 = vrot.lane.b32.xlu0 %v8363_v39, %s4286_s17 }
 0x1cf   : > { %1345 = vrot.lane.b32.xlu1 %v4902_v37, %s4286_s17  ;;  %v5678_v55 = vpop.permute.xlu0 %1072 }
 0x1d0   : > { %8416 = vst [vmem:[#allocation156_spill] sm:$0xff] %v5678_v55  ;;  %v4207_v55 = vld [vmem:[#allocation2 + $0x8] sm:$0xff] }
 0x1d1   : > { %v5680_v53 = vpop.permute.xlu1 %1070  ;;  %1349 = vrot.lane.b32.xlu0 %v4915_v42, %s4286_s17  ;;  %v8424_v42 = vld [vmem:[#allocation10_spill] sm:$0xff] }
 0x1d2   : > { %8417 = vst [vmem:[#allocation157_spill] sm:$0xff] %v5680_v53 }
 0x1d3   : > { %1250 = vrot.lane.b32.xlu1 %v8418_v28, %s4285_s16  ;;  %v5686_v15 = vpop.permute.xlu0 %1076 }
 0x1d4   : > { %8419 = vst [vmem:[#allocation8_spill] sm:$0xff] %v5686_v15 }
 0x1d5   : > { %v5688_v33 = vpop.permute.xlu1 %1074  ;;  %1252 = vrot.lane.b32.xlu0 %v8421_v48, %s4285_s16 }
 0x1d6   : > { %8420 = vst [vmem:[#allocation158_spill] sm:$0xff] %v5688_v33  ;;  %v8464_v33 = vld [vmem:[#allocation44_spill] sm:$0xff] }
 0x1d7   : > { %1351 = vrot.lane.b32.xlu1 %v8366_v30, %s4286_s17  ;;  %v5694_v37 = vpop.permute.xlu0 %1080 }
 0x1d8   : > { %8422 = vst [vmem:[#allocation7_spill] sm:$0xff] %v5694_v37  ;;  %v8450_v37 = vld [vmem:[#allocation19_spill] sm:$0xff] }
 0x1d9   : > { %v5696_v39 = vpop.permute.xlu1 %1078  ;;  %1353 = vrot.lane.b32.xlu0 %v4928_v51, %s4286_s17  ;;  %v8430_v51 = vld [vmem:[#allocation12_spill] sm:$0xff] }
 0x1da   : > { %8423 = vst [vmem:[#allocation159_spill] sm:$0xff] %v5696_v39  ;;  %v8454_v39 = vld [vmem:[#allocation21_spill] sm:$0xff] }
 0x1db   : > { %1254 = vrot.lane.b32.xlu1 %v8424_v42, %s4285_s16  ;;  %v5702_v28 = vpop.permute.xlu0 %1084 }
 0x1dc   : > { %8425 = vst [vmem:[#allocation10_spill] sm:$0xff] %v5702_v28 }
 0x1dd   : > { %v5704_v22 = vpop.permute.xlu1 %1082  ;;  %1256 = vrot.lane.b32.xlu0 %v8427_v29, %s4285_s16 }
 0x1de   : > { %8426 = vst [vmem:[#allocation160_spill] sm:$0xff] %v5704_v22  ;;  %v8448_v22 = vld [vmem:[#allocation39_spill] sm:$0xff] }
 0x1df   : > { %1355 = vrot.lane.b32.xlu1 %v8369_v24, %s4286_s17  ;;  %v5710_v30 = vpop.permute.xlu0 %1088 }
 0x1e0   : > { %8428 = vst [vmem:[#allocation9_spill] sm:$0xff] %v5710_v30  ;;  %v8446_v30 = vld [vmem:[#allocation17_spill] sm:$0xff] }
 0x1e1   : > { %v5712_v48 = vpop.permute.xlu1 %1086  ;;  %1357 = vrot.lane.b32.xlu0 %v4941_v59, %s4286_s17  ;;  %v8436_v59 = vld [vmem:[#allocation14_spill] sm:$0xff] }
 0x1e2   : > { %8429 = vst [vmem:[#allocation161_spill] sm:$0xff] %v5712_v48 }
 0x1e3   : > { %1258 = vrot.lane.b32.xlu1 %v8430_v51, %s4285_s16  ;;  %v5718_v42 = vpop.permute.xlu0 %1092 }
 0x1e4   : > { %8431 = vst [vmem:[#allocation12_spill] sm:$0xff] %v5718_v42 }
 0x1e5   : > { %v5720_v28 = vpop.permute.xlu1 %1090  ;;  %1260 = vrot.lane.b32.xlu0 %v8433_v62, %s4285_s16 }
 0x1e6   : > { %8432 = vst [vmem:[#allocation162_spill] sm:$0xff] %v5720_v28  ;;  %v8439_v28 = vld [vmem:[#allocation13_spill] sm:$0xff] }
 0x1e7   : > { %1359 = vrot.lane.b32.xlu1 %v8372_v25, %s4286_s17  ;;  %v5726_v24 = vpop.permute.xlu0 %1096 }
 0x1e8   : > { %8434 = vst [vmem:[#allocation11_spill] sm:$0xff] %v5726_v24  ;;  %v8441_v24 = vld [vmem:[#allocation35_spill] sm:$0xff] }
 0x1e9   : > { %v5728_v29 = vpop.permute.xlu1 %1094  ;;  %1361 = vrot.lane.b32.xlu0 %v4954_v12, %s4286_s17  ;;  %v8442_v12 = vld [vmem:[#allocation16_spill] sm:$0xff] }
 0x1ea   : > { %8435 = vst [vmem:[#allocation163_spill] sm:$0xff] %v5728_v29 }
 0x1eb   : > { %1262 = vrot.lane.b32.xlu1 %v8436_v59, %s4285_s16  ;;  %v5734_v51 = vpop.permute.xlu0 %1100 }
 0x1ec   : > { %8437 = vst [vmem:[#allocation14_spill] sm:$0xff] %v5734_v51 }
 0x1ed   : > { %v5736_v42 = vpop.permute.xlu1 %1098  ;;  %1264 = vrot.lane.b32.xlu0 %v8439_v28, %s4285_s16 }
 0x1ee   : > { %8438 = vst [vmem:[#allocation164_spill] sm:$0xff] %v5736_v42  ;;  %v8443_v42 = vld [vmem:[#allocation15_spill] sm:$0xff] }
 0x1ef   : > { %1363 = vrot.lane.b32.xlu1 %v8375_v11, %s4286_s17  ;;  %v5742_v25 = vpop.permute.xlu0 %1138 }
 0x1f1   : > { %v5744_v62 = vpop.permute.xlu1 %1102  ;;  %1365 = vrot.lane.b32.xlu0 %v8441_v24, %s4286_s17  ;;  %v8445_v24 = vld [vmem:[#allocation18_spill] sm:$0xff] }
 0x1f2   : > { %8440 = vst [vmem:[#allocation13_spill] sm:$0xff] %v5744_v62  ;;  %v8444_v62 = vld [vmem:[#allocation37_spill] sm:$0xff] }
 0x1f3   : > { %1266 = vrot.lane.b32.xlu1 %v8442_v12, %s4285_s16  ;;  %v5750_v59 = vpop.permute.xlu0 %1142 }
 0x1f5   : > { %v5752_v51 = vpop.permute.xlu1 %1140  ;;  %1268 = vrot.lane.b32.xlu0 %v8443_v42, %s4285_s16  ;;  %v8447_v42 = vld [vmem:[#allocation40_spill] sm:$0xff] }
 0x1f7   : > { %1367 = vrot.lane.b32.xlu1 %v8378_v10, %s4286_s17  ;;  %v5758_v11 = vpop.permute.xlu0 %1146 }
 0x1f9   : > { %v5760_v28 = vpop.permute.xlu1 %1144  ;;  %1369 = vrot.lane.b32.xlu0 %v8444_v62, %s4286_s17  ;;  %v8449_v62 = vld [vmem:[#allocation20_spill] sm:$0xff] }
 0x1fb   : > { %1270 = vrot.lane.b32.xlu1 %v8445_v24, %s4285_s16  ;;  %v5766_v12 = vpop.permute.xlu0 %1150 }
 0x1fd   : > { %v5768_v29 = vpop.permute.xlu1 %1148  ;;  %1272 = vrot.lane.b32.xlu0 %v8446_v30, %s4285_s16 }
 0x1ff   : > { %1371 = vrot.lane.b32.xlu1 %v8447_v42, %s4286_s17  ;;  %v5774_v10 = vpop.permute.xlu0 %1154 }
 0x201   : > { %v5776_v48 = vpop.permute.xlu1 %1152  ;;  %1373 = vrot.lane.b32.xlu0 %v8448_v22, %s4286_s17  ;;  %v8451_v22 = vld [vmem:[#allocation22_spill] sm:$0xff] }
 0x203   : > { %1274 = vrot.lane.b32.xlu1 %v8449_v62, %s4285_s16  ;;  %v5782_v24 = vpop.permute.xlu0 %1158 }
 0x205   : > { %v5784_v21 = vpop.permute.xlu1 %1156  ;;  %1276 = vrot.lane.b32.xlu0 %v8450_v37, %s4285_s16 }
 0x207   : > { %1375 = vrot.lane.b32.xlu1 %v8384_v5, %s4286_s17  ;;  %v5790_v30 = vpop.permute.xlu0 %1162 }
 0x209   : > { %v5792_v42 = vpop.permute.xlu1 %1160  ;;  %1377 = vrot.lane.b32.xlu0 %v5006_v6, %s4286_s17  ;;  %v8458_v6 = vld [vmem:[#allocation24_spill] sm:$0xff] }
 0x20b   : > { %1278 = vrot.lane.b32.xlu1 %v8451_v22, %s4285_s16  ;;  %v5798_v62 = vpop.permute.xlu0 %1166 }
 0x20c   : > { %8452 = vst [vmem:[#allocation35_spill] sm:$0xff] %v5798_v62  ;;  %v4210_v62 = vld [vmem:[#allocation2 + $0x20] sm:$0xff] }
 0x20d   : > { %v5800_v58 = vpop.permute.xlu1 %1164  ;;  %1280 = vrot.lane.b32.xlu0 %v8454_v39, %s4285_s16 }
 0x20e   : > { %8453 = vst [vmem:[#allocation16_spill] sm:$0xff] %v5800_v58 }
 0x20f   : > { %1379 = vrot.lane.b32.xlu1 %v8388_v54, %s4286_s17  ;;  %v5806_v5 = vpop.permute.xlu0 %1170 }
 0x210   : > { %8455 = vst [vmem:[#allocation15_spill] sm:$0xff] %v5806_v5 }
 0x211   : > { %v5808_v37 = vpop.permute.xlu1 %1168  ;;  %1381 = vrot.lane.b32.xlu0 %v8457_v61, %s4286_s17  ;;  %v8465_v61 = vld [vmem:[#allocation26_spill] sm:$0xff] }
 0x212   : > { %8456 = vst [vmem:[#allocation37_spill] sm:$0xff] %v5808_v37  ;;  %v8488_v37 = vld [vmem:[#allocation50_spill] sm:$0xff] }
 0x213   : > { %1282 = vrot.lane.b32.xlu1 %v8458_v6, %s4285_s16  ;;  %v5814_v22 = vpop.permute.xlu0 %1174  ;;  %v1441_v53 = vsel %vm225_vm0, %v4209_v41, %v8488_v37  ;;  %v8492_v37 = vld [vmem:[#allocation108_spill] sm:$0xff] }
 0x214   : > { %8459 = vst [vmem:[#allocation18_spill] sm:$0xff] %v5814_v22 }
 0x215   : > { %v5816_v15 = vpop.permute.xlu1 %1172  ;;  %1284 = vrot.lane.b32.xlu0 %v8461_v50, %s4285_s16 }
 0x216   : > { %8460 = vst [vmem:[#allocation17_spill] sm:$0xff] %v5816_v15  ;;  %v8468_v15 = vld [vmem:[#allocation25_spill] sm:$0xff] }
 0x217   : > { %1383 = vrot.lane.b32.xlu1 %v5039_v14, %s4286_s17  ;;  %v5822_v54 = vpop.permute.xlu0 %1178 }
 0x218   : > { %8462 = vst [vmem:[#allocation40_spill] sm:$0xff] %v5822_v54  ;;  %v8471_v54 = vld [vmem:[#allocation46_spill] sm:$0xff] }
 0x219   : > { %v5824_v39 = vpop.permute.xlu1 %1176  ;;  %1385 = vrot.lane.b32.xlu0 %v8464_v33, %s4286_s17  ;;  %v8472_v33 = vld [vmem:[#allocation28_spill] sm:$0xff] }
 0x21a   : > { %8463 = vst [vmem:[#allocation39_spill] sm:$0xff] %v5824_v39 }
 0x21b   : > { %1286 = vrot.lane.b32.xlu1 %v8465_v61, %s4285_s16  ;;  %v5830_v6 = vpop.permute.xlu0 %1182 }
 0x21c   : > { %8466 = vst [vmem:[#allocation20_spill] sm:$0xff] %v5830_v6 }
 0x21d   : > { %v5832_v22 = vpop.permute.xlu1 %1180  ;;  %1288 = vrot.lane.b32.xlu0 %v8468_v15, %s4285_s16 }
 0x21e   : > { %8467 = vst [vmem:[#allocation19_spill] sm:$0xff] %v5832_v22  ;;  %v8475_v22 = vld [vmem:[#allocation27_spill] sm:$0xff] }
 0x21f   : > { %1387 = vrot.lane.b32.xlu1 %v5054_v8, %s4286_s17  ;;  %v5838_v14 = vpop.permute.xlu0 %1186 }
 0x220   : > { %8469 = vst [vmem:[#allocation22_spill] sm:$0xff] %v5838_v14  ;;  %v8478_v14 = vld [vmem:[#allocation49_spill] sm:$0xff] }
 0x221   : > { %v5840_v50 = vpop.permute.xlu1 %1184  ;;  %1389 = vrot.lane.b32.xlu0 %v8471_v54, %s4286_s17  ;;  %v8479_v54 = vld [vmem:[#allocation29_spill] sm:$0xff] }
 0x222   : > { %8470 = vst [vmem:[#allocation21_spill] sm:$0xff] %v5840_v50 }
 0x223   : > { %1290 = vrot.lane.b32.xlu1 %v8472_v33, %s4285_s16  ;;  %v5846_v61 = vpop.permute.xlu0 %1190 }
 0x224   : > { %8473 = vst [vmem:[#allocation42_spill] sm:$0xff] %v5846_v61 }
 0x225   : > { %v5848_v6 = vpop.permute.xlu1 %1188  ;;  %1292 = vrot.lane.b32.xlu0 %v8475_v22, %s4285_s16  ;;  %v1235_v22 = vrot.slane %v5615_v19, 1 }
 0x226   : > { %8474 = vst [vmem:[#allocation24_spill] sm:$0xff] %v5848_v6  ;;  %v8482_v6 = vld [vmem:[#allocation112_spill] sm:$0xff] }
 0x227   : > { %1391 = vrot.lane.b32.xlu1 %v5069_v20, %s4286_s17  ;;  %v5854_v8 = vpop.permute.xlu0 %1194  ;;  %v1236_v20 = vrot.slane %v5633_v9, 1 }
 0x228   : > { %8476 = vst [vmem:[#allocation23_spill] sm:$0xff] %v5854_v8 }
 0x229   : > { %v5856_v15 = vpop.permute.xlu1 %1192  ;;  %1393 = vrot.lane.b32.xlu0 %v8478_v14, %s4286_s17  ;;  %v432_v14 = vld [vmem:[#allocation2 + $0x1a8] sm:$0x3] }
 0x22a   : > { %8477 = vst [vmem:[#allocation44_spill] sm:$0xff] %v5856_v15  ;;  %v1238_v39 = vrot.slane %v432_v14, 1  ;;  %v1339_v49 = vrot.slane %v432_v14, 2  ;;  %v8497_v14 = vld [vmem:[#allocation136_spill] sm:$0xff] }
 0x22b   : > { %1294 = vrot.lane.b32.xlu1 %v8479_v54, %s4285_s16  ;;  %v5862_v33 = vpop.permute.xlu0 %1198  ;;  %v1336_v54 = vrot.slane %v5615_v19, 2 }
 0x22c   : > { %8480 = vst [vmem:[#allocation26_spill] sm:$0xff] %v5862_v33  ;;  %v1337_v33 = vrot.slane %v5633_v9, 2  ;;  %v4208_v9 = vld [vmem:[#allocation2 + $0x18] sm:$0xff] }
 0x22d   : > { %v5864_v61 = vpop.permute.xlu1 %1196  ;;  %1296 = vrot.lane.b32.xlu0 %v8482_v6, %s4285_s16  ;;  %v8484_v6 = vld [vmem:[#allocation116_spill] sm:$0xff] }
 0x22e   : > { %8481 = vst [vmem:[#allocation25_spill] sm:$0xff] %v5864_v61  ;;  %v1237_v61 = vsel %vm481_vm3, %v1235_v22, %v1236_v20 }
 0x22f   : > { %1395 = vrot.lane.b32.xlu1 %v5081_v13, %s4286_s17  ;;  %v1241_v8 = vpop.permute.xlu0 %1240 }
 0x231   : > { %v5872_v15 = vpop.permute.xlu1 %1200  ;;  %1397 = vrot.lane.b32.xlu0 %v5475_v34, %s4286_s17  ;;  %v8486_v34 = vld [vmem:[#allocation47_spill] sm:$0xff] }
 0x232   : > { %8483 = vst [vmem:[#allocation46_spill] sm:$0xff] %v5872_v15  ;;  %v8485_v15 = vld [vmem:[#allocation45_spill] sm:$0xff]  ;;  %v1438_v19 = vsel %vm225_vm0, %v4207_v55, %v8486_v34 }
 0x233   : > { %1298 = vrot.lane.b32.xlu1 %v8484_v6, %s4285_s16  ;;  %v5881_v50 = vpop.permute.xlu0 %1244  ;;  %v1437_v5 = vsel %vm225_vm0, %v4206_v57, %v8485_v15  ;;  %v8487_v6 = vld [vmem:[#allocation48_spill] sm:$0xff]  ;;  %v1338_v57 = vsel %vm658_vm4, %v1336_v54, %v1337_v33  ;;  %v8489_v15 = vld [vmem:[#allocation78_spill] sm:$0xff]  ;;  %v1471_v41 = vsel %vm1469_vm6, %v1438_v19, %v8491_v52 }
 0x234   : > { %v1439_v22 = vsel %vm225_vm0, %v4208_v9, %v8487_v6  ;;  %v1470_v55 = vsel %vm1469_vm6, %v1437_v5, %v8489_v15  ;;  %v8490_v9 = vld [vmem:[#allocation51_spill] sm:$0xff] }
 0x235   : > { %v1243_v13 = vpop.permute.xlu1 %1242  ;;  %1300 = vrot.lane.b32.xlu0 %v1237_v61, %s4285_s16  ;;  %v1239_v61 = vsel %vm481_vm3, %v1236_v20, %v1238_v39  ;;  %v1440_v6 = vsel %vm225_vm0, %v4210_v62, %v8490_v9  ;;  %v1472_v5 = vsel %vm1469_vm6, %v1439_v22, %v8493_v35  ;;  %v8494_v15 = vld [vmem:[#allocation111_spill] sm:$0xff]  ;;  %v8495_v39 = vld [vmem:[#allocation133_spill] sm:$0xff]  ;;  %v8496_v62 = vld [vmem:[#allocation82_spill] sm:$0xff] }
 0x236   : > { %v1504_v58 = vsel %vm1502_vm7, %v1471_v41, %v8494_v15  ;;  %v1474_v52 = vsel %vm1469_vm6, %v1441_v53, %v8496_v62  ;;  %v8498_v53 = vld [vmem:[#allocation83_spill] sm:$0xff] }
 0x237   : > { %1399 = vrot.lane.b32.xlu1 %v5489_v23, %s4286_s17  ;;  %v1249_v34 = vpop.permute.xlu0 %1248  ;;  %v1503_v23 = vsel %vm1502_vm7, %v1470_v55, %v8492_v37  ;;  %v1537_v19 = vsel %vm1535_vm8, %v1504_v58, %v8497_v14  ;;  %v1473_v41 = vsel %vm1469_vm6, %v1440_v6, %v8498_v53  ;;  %v8499_v58 = vld [vmem:[#allocation110_spill] sm:$0xff] }
 0x238   : > { %v1536_v20 = vsel %vm1535_vm8, %v1503_v23, %v8495_v39  ;;  %v1570_v35 = vsel %vm1568_vm9, %v1537_v19, %v5609_v4  ;;  %v1505_v37 = vsel %vm1502_vm7, %v1472_v5, %v8499_v58  ;;  %v8500_v4 = vld [vmem:[#allocation114_spill] sm:$0xff] }
 0x239   : > { %v1247_v54 = vpop.permute.xlu1 %1246  ;;  %1401 = vrot.lane.b32.xlu0 %v1338_v57, %s4286_s17  ;;  %v1569_v55 = vsel %vm1568_vm9, %v1536_v20, %v5593_v18  ;;  %v1340_v57 = vsel %vm658_vm4, %v1337_v33, %v1339_v49  ;;  %v1603_v18 = vsel %vm1601_vm10, %v1570_v35, %v5752_v51  ;;  %v1506_v15 = vsel %vm1502_vm7, %v1473_v41, %v8500_v4  ;;  %v4211_v35 = vld [vmem:[#allocation2 + $0x38] sm:$0xff]  ;;  %v8507_v4 = vld [vmem:[#allocation84_spill] sm:$0xff] }
 0x23a   : > { %v1602_v22 = vsel %vm1601_vm10, %v1569_v55, %v5742_v25  ;;  %v8501_v25 = vld [vmem:[#allocation135_spill] sm:$0xff]  ;;  %v1636_v49 = vsel %vm1634_vm11, %v1603_v18, %v1243_v13  ;;  %v1539_v6 = vsel %vm1535_vm8, %v1506_v15, %v5480_v2  ;;  %v4212_v18 = vld [vmem:[#allocation2 + $0x48] sm:$0xff] }
 0x23b   : > { %1302 = vrot.lane.b32.xlu1 %v1239_v61, %s4285_s16  ;;  %v1344_v9 = vpop.permute.xlu0 %1343  ;;  %v1635_v61 = vsel %vm1634_vm11, %v1602_v22, %v1241_v8  ;;  %v1538_v39 = vsel %vm1535_vm8, %v1505_v37, %v8501_v25  ;;  %v8502_v8 = vld [vmem:[#allocation113_spill] sm:$0xff]  ;;  %v1572_v13 = vsel %vm1568_vm9, %v1539_v6, %v5625_v17  ;;  %v8508_v25 = vld [vmem:[#allocation115_spill] sm:$0xff] }
 0x23c   : > { %v1571_v5 = vsel %vm1568_vm9, %v1538_v39, %v5607_v60  ;;  %v1669_v51 = vsel %vm1667_vm12, %v1636_v49, %v1344_v9  ;;  %v1507_v20 = vsel %vm1502_vm7, %v1474_v52, %v8502_v8  ;;  %v1605_v60 = vsel %vm1601_vm10, %v1572_v13, %v5760_v28  ;;  %v8503_v22 = vld [vmem:[#allocation53_spill] sm:$0xff] }
 0x23d   : > { %v1342_v23 = vpop.permute.xlu1 %1341  ;;  %v1604_v62 = vsel %vm1601_vm10, %v1571_v5, %v5750_v59  ;;  %v1540_v2 = vsel %vm1535_vm8, %v1507_v20, %v5477_v45  ;;  %v1638_v17 = vsel %vm1634_vm11, %v1605_v60, %v1247_v54  ;;  %v1442_v9 = vsel %vm225_vm0, %v4211_v35, %v8503_v22  ;;  %v8505_v54 = vld [vmem:[#allocation117_spill] sm:$0xff]  ;;  %v4213_v20 = vld [vmem:[#allocation2 + $0x50] sm:$0xff]  ;;  %v8511_v60 = vld [vmem:[#allocation119_spill] sm:$0xff] }
 0x23e   : > { %v1668_v33 = vsel %vm1667_vm12, %v1635_v61, %v1342_v23  ;;  %v1637_v19 = vsel %vm1634_vm11, %v1604_v62, %v5881_v50  ;;  %v1573_v52 = vsel %vm1568_vm9, %v1540_v2, %v5623_v36  ;;  %v8504_v50 = vld [vmem:[#allocation85_spill] sm:$0xff]  ;;  %v8513_v35 = vld [vmem:[#allocation86_spill] sm:$0xff] }
 0x23f   : > { %1403 = vrot.lane.b32.xlu1 %v1340_v57, %s4286_s17  ;;  %4067 = vmatprep.mubr.msk.f32.mxu0 %vm1712_vm13, %v1668_v33  ;;  %v1348_v14 = vpop.permute.xlu0 %1347  ;;  %v1606_v45 = vsel %vm1601_vm10, %v1573_v52, %v5758_v11  ;;  %v1475_v57 = vsel %vm1469_vm6, %v1442_v9, %v8504_v50  ;;  %v8506_v11 = vld [vmem:[#allocation52_spill] sm:$0xff] }
 0x240   : > { %4068 = vmatmul.mubr.msk.f32.vlgmr.msra.gmra.mrb[0].mxu0 %vm1712_vm13, %v1669_v51  ;;  %v1671_v28 = vsel %vm1667_vm12, %v1638_v17, %v1348_v14  ;;  %v1639_v36 = vsel %vm1634_vm11, %v1606_v45, %v1249_v34  ;;  %v1508_v41 = vsel %vm1502_vm7, %v1475_v57, %v8505_v54  ;;  %v1443_v61 = vsel %vm225_vm0, %v4212_v18, %v8506_v11  ;;  %v4214_v52 = vld [vmem:[#allocation2 + $0x60] sm:$0xff]  ;;  %v8512_v17 = vld [vmem:[#allocation54_spill] sm:$0xff] }
 0x241   : > { %v1346_v55 = vpop.permute.xlu1 %1345  ;;  %v1541_v23 = vsel %vm1535_vm8, %v1508_v41, %v5491_v38  ;;  %v1476_v34 = vsel %vm1469_vm6, %v1443_v61, %v8507_v4  ;;  %v8514_v45 = vld [vmem:[#allocation118_spill] sm:$0xff] }
 0x242   : > { %v1670_v59 = vsel %vm1667_vm12, %v1637_v19, %v1346_v55  ;;  %v1574_v15 = vsel %vm1568_vm9, %v1541_v23, %v5635_v56  ;;  %v1509_v39 = vsel %vm1502_vm7, %v1476_v34, %v8508_v25  ;;  %v8509_v56 = vld [vmem:[#allocation55_spill] sm:$0xff]  ;;  %v8518_v34 = vld [vmem:[#allocation121_spill] sm:$0xff] }
 0x243   : > { %4070 = vmatprep.mubr.msk.f32.mxu0 %vm1712_vm13, %v1670_v59  ;;  %v1350_v53 = vpop.permute.xlu0 %1349  ;;  %v1607_v49 = vsel %vm1601_vm10, %v1574_v15, %v5768_v29  ;;  %v1542_v6 = vsel %vm1535_vm8, %v1509_v39, %v5486_v0  ;;  %v1444_v13 = vsel %vm225_vm0, %v4213_v20, %v8509_v56  ;;  %v8510_v29 = vld [vmem:[#allocation87_spill] sm:$0xff]  ;;  %v1445_v59 = vsel %vm225_vm0, %v4214_v52, %v8512_v17 }
 0x244   : > { %4071 = vmatmul.mubr.msk.f32.gmra.mrb[2].mxu0 %vm1712_vm13, %v1671_v28  ;;  %v1672_v58 = vsel %vm1667_vm12, %v1639_v36, %v1350_v53  ;;  %v1575_v51 = vsel %vm1568_vm9, %v1542_v6, %v5631_v16  ;;  %v1477_v0 = vsel %vm1469_vm6, %v1444_v13, %v8510_v29  ;;  %v1478_v22 = vsel %vm1469_vm6, %v1445_v59, %v8513_v35  ;;  %v8515_v36 = vld [vmem:[#allocation137_spill] sm:$0xff]  ;;  %v4216_v39 = vld [vmem:[#allocation2 + $0x78] sm:$0xff]  ;;  %v8520_v6 = vld [vmem:[#allocation88_spill] sm:$0xff] }
 0x245   : > { %v1251_v37 = vpop.permute.xlu1 %1250  ;;  %4073 = vmatprep.mubr.msk.f32.mxu0 %vm1712_vm13, %v1672_v58  ;;  %v1608_v62 = vsel %vm1601_vm10, %v1575_v51, %v5766_v12  ;;  %v1510_v16 = vsel %vm1502_vm7, %v1477_v0, %v8511_v60  ;;  %v1511_v28 = vsel %vm1502_vm7, %v1478_v22, %v8514_v45  ;;  %v8521_v51 = vld [vmem:[#allocation120_spill] sm:$0xff]  ;;  %v4218_v59 = vld [vmem:[#allocation2 + $0x90] sm:$0xff] }
 0x246   : > { %v1640_v38 = vsel %vm1634_vm11, %v1607_v49, %v1251_v37  ;;  %v1543_v12 = vsel %vm1535_vm8, %v1510_v16, %v5499_v31  ;;  %v1544_v53 = vsel %vm1535_vm8, %v1511_v28, %v8515_v36  ;;  %v4215_v37 = vld [vmem:[#allocation2 + $0x68] sm:$0xff]  ;;  %v8519_v49 = vld [vmem:[#allocation56_spill] sm:$0xff]  ;;  %v8527_v28 = vld [vmem:[#allocation30_spill] sm:$0xff] }
 0x247   : > { %v1253_v33 = vpop.permute.xlu0 %1252  ;;  %v1576_v9 = vsel %vm1568_vm9, %v1543_v12, %v5648_v46  ;;  %v1577_v41 = vsel %vm1568_vm9, %v1544_v53, %v5646_v26  ;;  %v8516_v46 = vld [vmem:[#allocation57_spill] sm:$0xff]  ;;  %v8525_v12 = vld [vmem:[#allocation58_spill] sm:$0xff]  ;;  %v8526_v22 = vld [vmem:[#allocation4_spill] sm:$0xff] }
 0x248   : > { %v1641_v14 = vsel %vm1634_vm11, %v1608_v62, %v1253_v33  ;;  %v1609_v50 = vsel %vm1601_vm10, %v1576_v9, %v5776_v48  ;;  %v1446_v18 = vsel %vm225_vm0, %v4215_v37, %v8516_v46  ;;  %v1610_v11 = vsel %vm1601_vm10, %v1577_v41, %v5774_v10  ;;  %v8517_v48 = vld [vmem:[#allocation89_spill] sm:$0xff] }
 0x249   : > { %v1352_v5 = vpop.permute.xlu1 %1351  ;;  %v1479_v61 = vsel %vm1469_vm6, %v1446_v18, %v8517_v48  ;;  %v1447_v33 = vsel %vm225_vm0, %v4216_v39, %v8519_v49  ;;  %v1449_v35 = vsel %vm225_vm0, %v4218_v59, %v8525_v12  ;;  %v8530_v48 = vld [vmem:[#allocation123_spill] sm:$0xff]  ;;  %v8543_v12 = vld [vmem:[#allocation92_spill] sm:$0xff] }
 0x24a   : > { %v1673_v8 = vsel %vm1667_vm12, %v1640_v38, %v1352_v5  ;;  %v1512_v26 = vsel %vm1502_vm7, %v1479_v61, %v8518_v34  ;;  %v1480_v38 = vsel %vm1469_vm6, %v1447_v33, %v8520_v6  ;;  %v1482_v9 = vsel %vm1469_vm6, %v1449_v35, %v8526_v22  ;;  %v8531_v34 = vld [vmem:[#allocation60_spill] sm:$0xff]  ;;  %v8533_v49 = vld [vmem:[#allocation31_spill] sm:$0xff] }
 0x24b   : > { %4074 = vmatmul.mubr.msk.f32.gmra.mrb[4].mxu0 %vm1712_vm13, %v1673_v8  ;;  %v1354_v2 = vpop.permute.xlu0 %1353  ;;  %v1545_v10 = vsel %vm1535_vm8, %v1512_v26, %v5507_v47  ;;  %v1513_v8 = vsel %vm1502_vm7, %v1480_v38, %v8521_v51 }
 0x24c   : > { %v1674_v19 = vsel %vm1667_vm12, %v1641_v14, %v1354_v2  ;;  %v1578_v5 = vsel %vm1568_vm9, %v1545_v10, %v5656_v44  ;;  %v1546_v13 = vsel %vm1535_vm8, %v1513_v8, %v5505_v7  ;;  %v4217_v14 = vld [vmem:[#allocation2 + $0x80] sm:$0xff]  ;;  %v8522_v44 = vld [vmem:[#allocation59_spill] sm:$0xff] }
 0x24d   : > { %v1255_v55 = vpop.permute.xlu1 %1254  ;;  %4076 = vmatprep.mubr.msk.f32.mxu0 %vm1712_vm13, %v1674_v19  ;;  %v1611_v20 = vsel %vm1601_vm10, %v1578_v5, %v5784_v21  ;;  %v1579_v29 = vsel %vm1568_vm9, %v1546_v13, %v5654_v1  ;;  %v1448_v2 = vsel %vm225_vm0, %v4217_v14, %v8522_v44  ;;  %v8523_v21 = vld [vmem:[#allocation90_spill] sm:$0xff]  ;;  %v8534_v10 = vld [vmem:[#allocation16_spill] sm:$0xff]  ;;  %v8539_v14 = vld [vmem:[#allocation93_spill] sm:$0xff] }
 0x24e   : > { %v1642_v31 = vsel %vm1634_vm11, %v1609_v50, %v1255_v55  ;;  %v1612_v60 = vsel %vm1601_vm10, %v1579_v29, %v5782_v24  ;;  %v1481_v7 = vsel %vm1469_vm6, %v1448_v2, %v8523_v21  ;;  %v8524_v55 = vld [vmem:[#allocation122_spill] sm:$0xff]  ;;  %v1515_v50 = vsel %vm1502_vm7, %v1482_v9, %v8527_v28  ;;  %v8538_v29 = vld [vmem:[#allocation35_spill] sm:$0xff]  ;;  %v8540_v21 = vld [vmem:[#allocation124_spill] sm:$0xff] }
 0x24f   : > { %v1257_v57 = vpop.permute.xlu0 %1256  ;;  %v1514_v1 = vsel %vm1502_vm7, %v1481_v7, %v8524_v55  ;;  %v1548_v53 = vsel %vm1535_vm8, %v1515_v50, %v5513_v32  ;;  %v8535_v5 = vld [vmem:[#allocation138_spill] sm:$0xff]  ;;  %v4222_v55 = vld [vmem:[#allocation2 + $0xc0] sm:$0xff]  ;;  %v8546_v28 = vld [vmem:[#allocation37_spill] sm:$0xff] }
 0x250   : > { %v1643_v23 = vsel %vm1634_vm11, %v1610_v11, %v1257_v57  ;;  %v1547_v24 = vsel %vm1535_vm8, %v1514_v1, %v5515_v63  ;;  %v8541_v1 = vld [vmem:[#allocation62_spill] sm:$0xff]  ;;  %v8545_v9 = vld [vmem:[#allocation32_spill] sm:$0xff] }
 0x251   : > { %v1356_v54 = vpop.permute.xlu1 %1355  ;;  %v1580_v45 = vsel %vm1568_vm9, %v1547_v24, %v5664_v3  ;;  %v8528_v3 = vld [vmem:[#allocation61_spill] sm:$0xff] }
 0x252   : > { %v1675_v58 = vsel %vm1667_vm12, %v1642_v31, %v1356_v54  ;;  %v1613_v57 = vsel %vm1601_vm10, %v1580_v45, %v5792_v42  ;;  %v1581_v54 = vsel %vm1568_vm9, %v1548_v53, %v5662_v27  ;;  %v8529_v42 = vld [vmem:[#allocation91_spill] sm:$0xff]  ;;  %v8544_v24 = vld [vmem:[#allocation157_spill] sm:$0xff] }
 0x253   : > { %4077 = vmatmul.mubr.msk.f32.gmra.mrb[6].mxu0 %vm1712_vm13, %v1675_v58  ;;  %v1358_v4 = vpop.permute.xlu0 %1357  ;;  %v4219_v58 = vld [vmem:[#allocation2 + $0x98] sm:$0xff]  ;;  %v1614_v46 = vsel %vm1601_vm10, %v1581_v54, %v5790_v30  ;;  %v8548_v54 = vld [vmem:[#allocation156_spill] sm:$0xff] }
 0x254   : > { %v1676_v15 = vsel %vm1667_vm12, %v1643_v23, %v1358_v4  ;;  %v1450_v37 = vsel %vm225_vm0, %v4219_v58, %v8528_v3  ;;  %v4220_v4 = vld [vmem:[#allocation2 + $0xa8] sm:$0xff] }
 0x255   : > { %v1259_v25 = vpop.permute.xlu1 %1258  ;;  %4079 = vmatprep.mubr.msk.f32.mxu0 %vm1712_vm13, %v1676_v15  ;;  %v1483_v32 = vsel %vm1469_vm6, %v1450_v37, %v8529_v42  ;;  %v1451_v26 = vsel %vm225_vm0, %v4220_v4, %v8531_v34  ;;  %v8532_v15 = vld [vmem:[#allocation5_spill] sm:$0xff]  ;;  %v8550_v42 = vld [vmem:[#allocation15_spill] sm:$0xff] }
 0x256   : > { %v1644_v47 = vsel %vm1634_vm11, %v1611_v20, %v1259_v25  ;;  %v1516_v27 = vsel %vm1502_vm7, %v1483_v32, %v8530_v48  ;;  %v1484_v25 = vsel %vm1469_vm6, %v1451_v26, %v8532_v15  ;;  %v8536_v20 = vld [vmem:[#allocation6_spill] sm:$0xff]  ;;  %v4223_v3 = vld [vmem:[#allocation2 + $0xc8] sm:$0xff]  ;;  %v4224_v26 = vld [vmem:[#allocation2 + $0xd8] sm:$0xff] }
 0x257   : > { %v1261_v56 = vpop.permute.xlu0 %1260  ;;  %v1549_v30 = vsel %vm1535_vm8, %v1516_v27, %v5523_v40  ;;  %v1517_v33 = vsel %vm1502_vm7, %v1484_v25, %v8533_v49  ;;  %v8549_v37 = vld [vmem:[#allocation65_spill] sm:$0xff]  ;;  %v8554_v25 = vld [vmem:[#allocation142_spill] sm:$0xff] }
 0x258   : > { %v1645_v16 = vsel %vm1634_vm11, %v1612_v60, %v1261_v56  ;;  %v1582_v39 = vsel %vm1568_vm9, %v1549_v30, %v5672_v43  ;;  %v1550_v51 = vsel %vm1535_vm8, %v1517_v33, %v8535_v5  ;;  %v8537_v43 = vld [vmem:[#allocation63_spill] sm:$0xff]  ;;  %v8553_v30 = vld [vmem:[#allocation64_spill] sm:$0xff]  ;;  %v8555_v49 = vld [vmem:[#allocation94_spill] sm:$0xff] }
 0x259   : > { %v1360_v62 = vpop.permute.xlu1 %1359  ;;  %v1615_v6 = vsel %vm1601_vm10, %v1582_v39, %v8534_v10  ;;  %v1583_v56 = vsel %vm1568_vm9, %v1550_v51, %v8536_v20  ;;  %v1455_v15 = vsel %vm225_vm0, %v4224_v26, %v8553_v30  ;;  %v8556_v10 = vld [vmem:[#allocation158_spill] sm:$0xff]  ;;  %v8558_v51 = vld [vmem:[#allocation17_spill] sm:$0xff]  ;;  %v8576_v26 = vld [vmem:[#allocation127_spill] sm:$0xff] }
 0x25a   : > { %v1677_v0 = vsel %vm1667_vm12, %v1644_v47, %v1360_v62  ;;  %v4221_v47 = vld [vmem:[#allocation2 + $0xb0] sm:$0xff]  ;;  %v1488_v33 = vsel %vm1469_vm6, %v1455_v15, %v8555_v49  ;;  %v8559_v20 = vld [vmem:[#allocation141_spill] sm:$0xff]  ;;  %v8577_v49 = vld [vmem:[#allocation68_spill] sm:$0xff] }
 0x25b   : > { %4080 = vmatmul.mubr.msk.f32.gmra.mrb[8].mxu0 %vm1712_vm13, %v1677_v0  ;;  %v1362_v19 = vpop.permute.xlu0 %1361  ;;  %v1452_v62 = vsel %vm225_vm0, %v4221_v47, %v8537_v43  ;;  %v1616_v0 = vsel %vm1601_vm10, %v1583_v56, %v8538_v29  ;;  %v8560_v43 = vld [vmem:[#allocation8_spill] sm:$0xff] }
 0x25c   : > { %v1678_v52 = vsel %vm1667_vm12, %v1645_v16, %v1362_v19  ;;  %v1485_v44 = vsel %vm1469_vm6, %v1452_v62, %v8539_v14  ;;  %v8561_v14 = vld [vmem:[#allocation67_spill] sm:$0xff] }
 0x25d   : > { %v1263_v17 = vpop.permute.xlu1 %1262  ;;  %4082 = vmatprep.mubr.msk.f32.mxu0 %vm1712_vm13, %v1678_v52  ;;  %v1518_v7 = vsel %vm1502_vm7, %v1485_v44, %v8540_v21  ;;  %v1453_v52 = vsel %vm225_vm0, %v4222_v55, %v8541_v1  ;;  %v8563_v21 = vld [vmem:[#allocation97_spill] sm:$0xff]  ;;  %v8564_v55 = vld [vmem:[#allocation126_spill] sm:$0xff] }
 0x25e   : > { %v1646_v63 = vsel %vm1634_vm11, %v1613_v57, %v1263_v17  ;;  %v8542_v17 = vld [vmem:[#allocation140_spill] sm:$0xff]  ;;  %v1486_v35 = vsel %vm1469_vm6, %v1453_v52, %v8543_v12  ;;  %v8565_v12 = vld [vmem:[#allocation66_spill] sm:$0xff] }
 0x25f   : > { %v1265_v36 = vpop.permute.xlu0 %1264  ;;  %v1551_v59 = vsel %vm1535_vm8, %v1518_v7, %v8542_v17  ;;  %v1519_v45 = vsel %vm1502_vm7, %v1486_v35, %v8545_v9  ;;  %v8567_v9 = vld [vmem:[#allocation96_spill] sm:$0xff] }
 0x260   : > { %v1647_v18 = vsel %vm1634_vm11, %v1614_v46, %v1265_v36  ;;  %v1584_v22 = vsel %vm1568_vm9, %v1551_v59, %v8544_v24  ;;  %v8547_v36 = vld [vmem:[#allocation139_spill] sm:$0xff]  ;;  %v1454_v46 = vsel %vm225_vm0, %v4223_v3, %v8549_v37  ;;  %v4226_v59 = vld [vmem:[#allocation2 + $0xf0] sm:$0xff]  ;;  %v8566_v24 = vld [vmem:[#allocation144_spill] sm:$0xff] }
 0x261   : > { %v1364_v31 = vpop.permute.xlu1 %1363  ;;  %v1617_v50 = vsel %vm1601_vm10, %v1584_v22, %v8546_v28  ;;  %v1552_v53 = vsel %vm1535_vm8, %v1519_v45, %v8547_v36  ;;  %v1457_v35 = vsel %vm225_vm0, %v4226_v59, %v8565_v12  ;;  %v8568_v28 = vld [vmem:[#allocation159_spill] sm:$0xff]  ;;  %v8588_v59 = vld [vmem:[#allocation128_spill] sm:$0xff] }
 0x262   : > { %v1679_v41 = vsel %vm1667_vm12, %v1646_v63, %v1364_v31  ;;  %v1490_v45 = vsel %vm1469_vm6, %v1457_v35, %v8567_v9  ;;  %v8572_v37 = vld [vmem:[#allocation7_spill] sm:$0xff]  ;;  %v8589_v9 = vld [vmem:[#allocation70_spill] sm:$0xff] }
 0x263   : > { %4083 = vmatmul.mubr.msk.f32.gmra.mrb[10].mxu0 %vm1712_vm13, %v1679_v41  ;;  %v1366_v11 = vpop.permute.xlu0 %1365  ;;  %v1585_v41 = vsel %vm1568_vm9, %v1552_v53, %v8548_v54  ;;  %v8570_v53 = vld [vmem:[#allocation39_spill] sm:$0xff] }
 0x264   : > { %v1680_v61 = vsel %vm1667_vm12, %v1647_v18, %v1366_v11  ;;  %v1618_v32 = vsel %vm1601_vm10, %v1585_v41, %v8550_v42  ;;  %v8551_v18 = vld [vmem:[#allocation95_spill] sm:$0xff] }
 0x265   : > { %v1267_v23 = vpop.permute.xlu1 %1266  ;;  %4085 = vmatprep.mubr.msk.f32.mxu0 %vm1712_vm13, %v1680_v61  ;;  %v1487_v11 = vsel %vm1469_vm6, %v1454_v46, %v8551_v18  ;;  %v8552_v61 = vld [vmem:[#allocation125_spill] sm:$0xff]  ;;  %v8571_v54 = vld [vmem:[#allocation143_spill] sm:$0xff] }
 0x266   : > { %v1648_v40 = vsel %vm1634_vm11, %v1615_v6, %v1267_v23  ;;  %v1520_v23 = vsel %vm1502_vm7, %v1487_v11, %v8552_v61  ;;  %v8573_v18 = vld [vmem:[#allocation69_spill] sm:$0xff]  ;;  %v8575_v61 = vld [vmem:[#allocation99_spill] sm:$0xff] }
 0x267   : > { %v1269_v38 = vpop.permute.xlu0 %1268  ;;  %v1553_v39 = vsel %vm1535_vm8, %v1520_v23, %v8554_v25 }
 0x268   : > { %v1649_v2 = vsel %vm1634_vm11, %v1616_v0, %v1269_v38  ;;  %v1586_v6 = vsel %vm1568_vm9, %v1553_v39, %v8556_v10  ;;  %v8557_v38 = vld [vmem:[#allocation33_spill] sm:$0xff]  ;;  %v4225_v0 = vld [vmem:[#allocation2 + $0xe0] sm:$0xff]  ;;  %v8578_v10 = vld [vmem:[#allocation146_spill] sm:$0xff] }
 0x269   : > { %v1368_v8 = vpop.permute.xlu1 %1367  ;;  %v1521_v5 = vsel %vm1502_vm7, %v1488_v33, %v8557_v38  ;;  %v1456_v44 = vsel %vm225_vm0, %v4225_v0, %v8561_v14  ;;  %v4228_v39 = vld [vmem:[#allocation2 + $0x108] sm:$0xff]  ;;  %v8579_v38 = vld [vmem:[#allocation98_spill] sm:$0xff] }
 0x26a   : > { %v1681_v13 = vsel %vm1667_vm12, %v1648_v40, %v1368_v8  ;;  %v1619_v40 = vsel %vm1601_vm10, %v1586_v6, %v8558_v51  ;;  %v1554_v56 = vsel %vm1535_vm8, %v1521_v5, %v8559_v20  ;;  %v1489_v7 = vsel %vm1469_vm6, %v1456_v44, %v8563_v21  ;;  %v8580_v51 = vld [vmem:[#allocation160_spill] sm:$0xff]  ;;  %v8584_v14 = vld [vmem:[#allocation10_spill] sm:$0xff]  ;;  %v8585_v21 = vld [vmem:[#allocation71_spill] sm:$0xff] }
 0x26b   : > { %4086 = vmatmul.mubr.msk.f32.gmra.mrb[12].mxu0 %vm1712_vm13, %v1681_v13  ;;  %v1370_v60 = vpop.permute.xlu0 %1369  ;;  %v1587_v62 = vsel %vm1568_vm9, %v1554_v56, %v8560_v43  ;;  %v1522_v1 = vsel %vm1502_vm7, %v1489_v7, %v8564_v55  ;;  %v1459_v33 = vsel %vm225_vm0, %v4228_v39, %v8577_v49  ;;  %v8582_v56 = vld [vmem:[#allocation19_spill] sm:$0xff]  ;;  %v8583_v43 = vld [vmem:[#allocation145_spill] sm:$0xff]  ;;  %v8600_v39 = vld [vmem:[#allocation130_spill] sm:$0xff] }
 0x26c   : > { %v1682_v16 = vsel %vm1667_vm12, %v1649_v2, %v1370_v60  ;;  %v8562_v2 = vld [vmem:[#allocation18_spill] sm:$0xff]  ;;  %v1555_v22 = vsel %vm1535_vm8, %v1522_v1, %v8566_v24  ;;  %v1492_v5 = vsel %vm1469_vm6, %v1459_v33, %v8579_v38  ;;  %v8587_v55 = vld [vmem:[#allocation101_spill] sm:$0xff]  ;;  %v8601_v38 = vld [vmem:[#allocation72_spill] sm:$0xff] }
 0x26d   : > { %v1271_v19 = vpop.permute.xlu1 %1270  ;;  %4088 = vmatprep.mubr.msk.f32.mxu0 %vm1712_vm13, %v1682_v16  ;;  %v1620_v60 = vsel %vm1601_vm10, %v1587_v62, %v8562_v2 }
 0x26e   : > { %v1650_v63 = vsel %vm1634_vm11, %v1617_v50, %v1271_v19  ;;  %v1588_v50 = vsel %vm1568_vm9, %v1555_v22, %v8568_v28  ;;  %v4230_v22 = vld [vmem:[#allocation2 + $0x120] sm:$0xff] }
 0x26f   : > { %v1273_v57 = vpop.permute.xlu0 %1272  ;;  %v8590_v28 = vld [vmem:[#allocation148_spill] sm:$0xff] }
 0x270   : > { %v1651_v48 = vsel %vm1634_vm11, %v1618_v32, %v1273_v57  ;;  %v8569_v57 = vld [vmem:[#allocation34_spill] sm:$0xff]  ;;  %v4227_v32 = vld [vmem:[#allocation2 + $0xf8] sm:$0xff] }
 0x271   : > { %v1372_v31 = vpop.permute.xlu1 %1371  ;;  %v1523_v36 = vsel %vm1502_vm7, %v1490_v45, %v8569_v57  ;;  %v1458_v11 = vsel %vm225_vm0, %v4227_v32, %v8573_v18  ;;  %v1461_v45 = vsel %vm225_vm0, %v4230_v22, %v8589_v9  ;;  %v8591_v57 = vld [vmem:[#allocation100_spill] sm:$0xff]  ;;  %v8596_v18 = vld [vmem:[#allocation9_spill] sm:$0xff] }
 0x272   : > { %v1683_v58 = vsel %vm1667_vm12, %v1650_v63, %v1372_v31  ;;  %v1621_v63 = vsel %vm1601_vm10, %v1588_v50, %v8570_v53  ;;  %v1556_v41 = vsel %vm1535_vm8, %v1523_v36, %v8571_v54  ;;  %v1491_v23 = vsel %vm1469_vm6, %v1458_v11, %v8575_v61  ;;  %v8592_v53 = vld [vmem:[#allocation161_spill] sm:$0xff] }
 0x273   : > { %4089 = vmatmul.mubr.msk.f32.gmra.mrb[14].mxu0 %vm1712_vm13, %v1683_v58  ;;  %v1374_v27 = vpop.permute.xlu0 %1373  ;;  %v1589_v46 = vsel %vm1568_vm9, %v1556_v41, %v8572_v37  ;;  %v1524_v30 = vsel %vm1502_vm7, %v1491_v23, %v8576_v26  ;;  %v1494_v36 = vsel %vm1469_vm6, %v1461_v45, %v8591_v57  ;;  %v8594_v41 = vld [vmem:[#allocation21_spill] sm:$0xff]  ;;  %v8595_v37 = vld [vmem:[#allocation147_spill] sm:$0xff]  ;;  %v6302_v45 = vld [vmem:[#allocation3] sm:$0xff] }
 0x274   : > { %v1684_v4 = vsel %vm1667_vm12, %v1651_v48, %v1374_v27  ;;  %v8574_v48 = vld [vmem:[#allocation40_spill] sm:$0xff]  ;;  %v1557_v6 = vsel %vm1535_vm8, %v1524_v30, %v8578_v10  ;;  %v8597_v61 = vld [vmem:[#allocation73_spill] sm:$0xff]  ;;  %v8599_v26 = vld [vmem:[#allocation103_spill] sm:$0xff] }
 0x275   : > { %v1275_v34 = vpop.permute.xlu1 %1274  ;;  %4091 = vmatprep.mubr.msk.f32.mxu0 %vm1712_vm13, %v1684_v4  ;;  %v1622_v27 = vsel %vm1601_vm10, %v1589_v46, %v8574_v48 }
 0x276   : > { %v1652_v13 = vsel %vm1634_vm11, %v1619_v40, %v1275_v34  ;;  %v1590_v40 = vsel %vm1568_vm9, %v1557_v6, %v8580_v51  ;;  %v4232_v6 = vld [vmem:[#allocation2 + $0x138] sm:$0xff]  ;;  %v8602_v51 = vld [vmem:[#allocation150_spill] sm:$0xff] }
 0x277   : > { %v1277_v8 = vpop.permute.xlu0 %1276 }
 0x278   : > { %v1653_v16 = vsel %vm1634_vm11, %v1620_v60, %v1277_v8  ;;  %v8581_v8 = vld [vmem:[#allocation36_spill] sm:$0xff]  ;;  %v4229_v60 = vld [vmem:[#allocation2 + $0x110] sm:$0xff] }
 0x279   : > { %v1376_v47 = vpop.permute.xlu1 %1375  ;;  %v1525_v20 = vsel %vm1502_vm7, %v1492_v5, %v8581_v8  ;;  %v1460_v7 = vsel %vm225_vm0, %v4229_v60, %v8585_v21  ;;  %v1463_v5 = vsel %vm225_vm0, %v4232_v6, %v8601_v38  ;;  %v8603_v8 = vld [vmem:[#allocation102_spill] sm:$0xff]  ;;  %v4233_v21 = vld [vmem:[#allocation2 + $0x140] sm:$0xff]  ;;  %v8621_v6 = vld [vmem:[#allocation77_spill] sm:$0xff] }
 0x27a   : > { %v1685_v29 = vsel %vm1667_vm12, %v1652_v13, %v1376_v47  ;;  %v1623_v13 = vsel %vm1601_vm10, %v1590_v40, %v8582_v56  ;;  %v1558_v62 = vsel %vm1535_vm8, %v1525_v20, %v8583_v43  ;;  %v1493_v1 = vsel %vm1469_vm6, %v1460_v7, %v8587_v55  ;;  %v8604_v56 = vld [vmem:[#allocation162_spill] sm:$0xff]  ;;  %v8608_v7 = vld [vmem:[#allocation75_spill] sm:$0xff] }
 0x27b   : > { %4092 = vmatmul.mubr.msk.f32.gmra.mrb[16].mxu0 %vm1712_vm13, %v1685_v29  ;;  %v1378_v19 = vpop.permute.xlu0 %1377  ;;  %v1591_v44 = vsel %vm1568_vm9, %v1558_v62, %v8584_v14  ;;  %v1526_v12 = vsel %vm1502_vm7, %v1493_v1, %v8588_v59  ;;  %v1496_v20 = vsel %vm1469_vm6, %v1463_v5, %v8603_v8  ;;  %v8606_v62 = vld [vmem:[#allocation24_spill] sm:$0xff]  ;;  %v8607_v14 = vld [vmem:[#allocation149_spill] sm:$0xff]  ;;  %v8611_v59 = vld [vmem:[#allocation42_spill] sm:$0xff] }
 0x27c   : > { %v1686_v52 = vsel %vm1667_vm12, %v1653_v16, %v1378_v19  ;;  %v8586_v16 = vld [vmem:[#allocation20_spill] sm:$0xff]  ;;  %v1559_v50 = vsel %vm1535_vm8, %v1526_v12, %v8590_v28  ;;  %v6304_v28 = vld [vmem:[#allocation3 + $0x8] sm:$0xff] }
 0x27d   : > { %v1279_v17 = vpop.permute.xlu1 %1278  ;;  %4094 = vmatprep.mubr.msk.f32.mxu0 %vm1712_vm13, %v1686_v52  ;;  %v1624_v19 = vsel %vm1601_vm10, %v1591_v44, %v8586_v16  ;;  %v1464_v16 = vsel %vm225_vm0, %v4233_v21, %v8608_v7  ;;  %v8622_v5 = vld [vmem:[#allocation23_spill] sm:$0xff]  ;;  %v8628_v7 = vld [vmem:[#allocation164_spill] sm:$0xff] }
 0x27e   : > { %v1654_v58 = vsel %vm1634_vm11, %v1621_v63, %v1279_v17  ;;  %v1592_v63 = vsel %vm1568_vm9, %v1559_v50, %v8592_v53  ;;  %v6306_v50 = vld [vmem:[#allocation3 + $0x10] sm:$0x3]  ;;  %v2205_v53 = vrot.slane %v6302_v45, 1 }
 0x27f   : > { %v1281_v31 = vpop.permute.xlu0 %1280 }
 0x280   : > { %v1655_v4 = vsel %vm1634_vm11, %v1622_v27, %v1281_v31  ;;  %v8593_v31 = vld [vmem:[#allocation38_spill] sm:$0xff]  ;;  %v4231_v27 = vld [vmem:[#allocation2 + $0x128] sm:$0xff] }
 0x281   : > { %v1380_v3 = vpop.permute.xlu1 %1379  ;;  %v1527_v54 = vsel %vm1502_vm7, %v1494_v36, %v8593_v31  ;;  %v1462_v23 = vsel %vm225_vm0, %v4231_v27, %v8597_v61  ;;  %v2208_v31 = vrot.slane %v6306_v50, 1  ;;  %v8617_v27 = vld [vmem:[#allocation41_spill] sm:$0xff] }
 0x282   : > { %v1687_v42 = vsel %vm1667_vm12, %v1654_v58, %v1380_v3  ;;  %v1625_v58 = vsel %vm1601_vm10, %v1592_v63, %v8594_v41  ;;  %v1560_v46 = vsel %vm1535_vm8, %v1527_v54, %v8595_v37  ;;  %v1495_v30 = vsel %vm1469_vm6, %v1462_v23, %v8599_v26  ;;  %v4234_v54 = vld [vmem:[#allocation2 + $0x150] sm:$0xff]  ;;  %v8618_v23 = vld [vmem:[#allocation44_spill] sm:$0xff]  ;;  %v8619_v26 = vld [vmem:[#allocation151_spill] sm:$0xff] }
 0x283   : > { %4095 = vmatmul.mubr.msk.f32.gmra.mrb[18].mxu0 %vm1712_vm13, %v1687_v42  ;;  %v1382_v34 = vpop.permute.xlu0 %1381  ;;  %v1593_v11 = vsel %vm1568_vm9, %v1560_v46, %v8596_v18  ;;  %v1528_v49 = vsel %vm1502_vm7, %v1495_v30, %v8600_v39  ;;  %v2206_v63 = vrot.slane %v6304_v28, 1  ;;  %v8613_v41 = vld [vmem:[#allocation74_spill] sm:$0xff]  ;;  %v8615_v46 = vld [vmem:[#allocation104_spill] sm:$0xff]  ;;  %v8620_v39 = vld [vmem:[#allocation11_spill] sm:$0xff] }
 0x284   : > { %v1688_v15 = vsel %vm1667_vm12, %v1655_v4, %v1382_v34  ;;  %v8598_v4 = vld [vmem:[#allocation22_spill] sm:$0xff]  ;;  %v1561_v40 = vsel %vm1535_vm8, %v1528_v49, %v8602_v51 }
 0x285   : > { %v1283_v25 = vpop.permute.xlu1 %1282  ;;  %4097 = vmatprep.mubr.msk.f32.mxu0 %vm1712_vm13, %v1688_v15  ;;  %v1626_v34 = vsel %vm1601_vm10, %v1593_v11, %v8598_v4  ;;  %v2207_v11 = vsel %vm481_vm3, %v2205_v53, %v2206_v63  ;;  %v8633_v53 = vld [vmem:[#allocation79_spill] sm:$0xff] }
 0x286   : > { %v1656_v29 = vsel %vm1634_vm11, %v1623_v13, %v1283_v25  ;;  %v1594_v13 = vsel %vm1568_vm9, %v1561_v40, %v8604_v56  ;;  %2285 = vrot.lane.b32.xlu0 %v2207_v11, %s4279_s25  ;;  %v8623_v40 = vld [vmem:[#allocation107_spill] sm:$0xff] }
 0x287   : > { %v1285_v47 = vpop.permute.xlu0 %1284  ;;  %v8637_v11 = vld [vmem:[#allocation155_spill] sm:$0xff] }
 0x288   : > { %v1657_v52 = vsel %vm1634_vm11, %v1624_v19, %v1285_v47  ;;  %v8605_v47 = vld [vmem:[#allocation129_spill] sm:$0xff]  ;;  %v8609_v19 = vld [vmem:[#allocation12_spill] sm:$0xff] }
 0x289   : > { %v1384_v0 = vpop.permute.xlu1 %1383  ;;  %v1529_v43 = vsel %vm1502_vm7, %v1496_v20, %v8605_v47 }
 0x28a   : > { %v1689_v2 = vsel %vm1667_vm12, %v1656_v29, %v1384_v0  ;;  %v1627_v29 = vsel %vm1601_vm10, %v1594_v13, %v8606_v62  ;;  %v1562_v44 = vsel %vm1535_vm8, %v1529_v43, %v8607_v14  ;;  %v8624_v13 = vld [vmem:[#allocation132_spill] sm:$0xff] }
 0x28b   : > { %4098 = vmatmul.mubr.msk.f32.gmra.mrb[20].mxu0 %vm1712_vm13, %v1689_v2  ;;  %v1386_v17 = vpop.permute.xlu0 %1385  ;;  %v1595_v55 = vsel %vm1568_vm9, %v1562_v44, %v8609_v19  ;;  %v8626_v44 = vld [vmem:[#allocation154_spill] sm:$0xff]  ;;  %v8629_v19 = vld [vmem:[#allocation43_spill] sm:$0xff] }
 0x28c   : > { %v1690_v35 = vsel %vm1667_vm12, %v1657_v52, %v1386_v17  ;;  %v8610_v52 = vld [vmem:[#allocation105_spill] sm:$0xff]  ;;  %v1628_v12 = vsel %vm1601_vm10, %v1595_v55, %v8611_v59 }
 0x28d   : > { %v1287_v24 = vpop.permute.xlu1 %1286  ;;  %4100 = vmatprep.mubr.msk.f32.mxu0 %vm1712_vm13, %v1690_v35  ;;  %v1497_v17 = vsel %vm1469_vm6, %v1464_v16, %v8610_v52  ;;  %v8612_v35 = vld [vmem:[#allocation131_spill] sm:$0xff]  ;;  %v8631_v59 = vld [vmem:[#allocation153_spill] sm:$0xff] }
 0x28e   : > { %v1658_v42 = vsel %vm1634_vm11, %v1625_v58, %v1287_v24  ;;  %v1530_v24 = vsel %vm1502_vm7, %v1497_v17, %v8612_v35  ;;  %v1465_v58 = vsel %vm225_vm0, %v4234_v54, %v8613_v41  ;;  %v8635_v41 = vld [vmem:[#allocation109_spill] sm:$0xff] }
 0x28f   : > { %v1289_v3 = vpop.permute.xlu0 %1288 }
 0x290   : > { %v1659_v15 = vsel %vm1634_vm11, %v1626_v34, %v1289_v3  ;;  %v8614_v3 = vld [vmem:[#allocation152_spill] sm:$0xff] }
 0x291   : > { %v1388_v32 = vpop.permute.xlu1 %1387  ;;  %v1563_v37 = vsel %vm1535_vm8, %v1530_v24, %v8614_v3 }
 0x292   : > { %v1691_v48 = vsel %vm1667_vm12, %v1658_v42, %v1388_v32  ;;  %v1498_v42 = vsel %vm1469_vm6, %v1465_v58, %v8615_v46  ;;  %v8616_v32 = vld [vmem:[#allocation163_spill] sm:$0xff]  ;;  %v8636_v46 = vld [vmem:[#allocation134_spill] sm:$0xff] }
 0x293   : > { %4101 = vmatmul.mubr.msk.f32.gmra.mrb[22].mxu0 %vm1712_vm13, %v1691_v48  ;;  %v1390_v25 = vpop.permute.xlu0 %1389  ;;  %v1596_v18 = vsel %vm1568_vm9, %v1563_v37, %v8616_v32  ;;  %v2209_v48 = vsel %vm481_vm3, %v2206_v63, %v2208_v31  ;;  %v1531_v61 = vsel %vm1502_vm7, %v1498_v42, %v8617_v27  ;;  %v8634_v31 = vld [vmem:[#allocation26_spill] sm:$0xff]  ;;  %v8638_v27 = vld [vmem:[#allocation13_spill] sm:$0xff] }
 0x294   : > { %v1692_v33 = vsel %vm1667_vm12, %v1659_v15, %v1390_v25  ;;  %v1629_v4 = vsel %vm1601_vm10, %v1596_v18, %v8618_v23  ;;  %2287 = vrot.lane.b32.xlu1 %v2209_v48, %s4279_s25  ;;  %v1564_v30 = vsel %vm1535_vm8, %v1531_v61, %v8619_v26  ;;  %v8639_v23 = vld [vmem:[#allocation46_spill] sm:$0xff] }
 0x295   : > { %v1291_v10 = vpop.permute.xlu1 %1290  ;;  %4103 = vmatprep.mubr.msk.f32.mxu0 %vm1712_vm13, %v1692_v33  ;;  %v1597_v49 = vsel %vm1568_vm9, %v1564_v30, %v8620_v39 }
 0x296   : > { %v1660_v2 = vsel %vm1634_vm11, %v1627_v29, %v1291_v10  ;;  %v4235_v10 = vld [vmem:[#allocation2 + $0x158] sm:$0xff]  ;;  %v1630_v51 = vsel %vm1601_vm10, %v1597_v49, %v8622_v5  ;;  %v4236_v29 = vld [vmem:[#allocation2 + $0x168] sm:$0xff] }
 0x297   : > { %v1293_v0 = vpop.permute.xlu0 %1292  ;;  %v1466_v38 = vsel %vm225_vm0, %v4235_v10, %v8621_v6 }
 0x298   : > { %v1661_v22 = vsel %vm1634_vm11, %v1628_v12, %v1293_v0  ;;  %v1499_v8 = vsel %vm1469_vm6, %v1466_v38, %v8623_v40  ;;  %v8625_v0 = vld [vmem:[#allocation76_spill] sm:$0xff] }
 0x299   : > { %v1392_v60 = vpop.permute.xlu1 %1391  ;;  %v1532_v47 = vsel %vm1502_vm7, %v1499_v8, %v8624_v13  ;;  %v1467_v14 = vsel %vm225_vm0, %v4236_v29, %v8625_v0 }
 0x29a   : > { %v1693_v1 = vsel %vm1667_vm12, %v1660_v2, %v1392_v60  ;;  %v1565_v2 = vsel %vm1535_vm8, %v1532_v47, %v8626_v44  ;;  %v8627_v60 = vld [vmem:[#allocation106_spill] sm:$0xff] }
 0x29b   : > { %4104 = vmatmul.mubr.msk.f32.gmra.mrb[24].mxu0 %vm1712_vm13, %v1693_v1  ;;  %v1394_v9 = vpop.permute.xlu0 %1393  ;;  %v1500_v21 = vsel %vm1469_vm6, %v1467_v14, %v8627_v60  ;;  %v1598_v16 = vsel %vm1568_vm9, %v1565_v2, %v8628_v7  ;;  %v8630_v1 = vld [vmem:[#allocation25_spill] sm:$0xff] }
 0x29c   : > { %v1694_v57 = vsel %vm1667_vm12, %v1661_v22, %v1394_v9  ;;  %v1533_v55 = vsel %vm1502_vm7, %v1500_v21, %v8629_v19  ;;  %v1631_v52 = vsel %vm1601_vm10, %v1598_v16, %v8630_v1  ;;  %v8632_v22 = vld [vmem:[#allocation14_spill] sm:$0xff] }
 0x29d   : > { %v1295_v36 = vpop.permute.xlu1 %1294  ;;  %4106 = vmatprep.mubr.msk.f32.mxu0 %vm1712_vm13, %v1694_v57  ;;  %v1566_v12 = vsel %vm1535_vm8, %v1533_v55, %v8631_v59 }
 0x29e   : > { %v1662_v15 = vsel %vm1634_vm11, %v1629_v4, %v1295_v36  ;;  %v1599_v9 = vsel %vm1568_vm9, %v1566_v12, %v8632_v22  ;;  %v4237_v36 = vld [vmem:[#allocation2 + $0x170] sm:$0xff] }
 0x29f   : > { %v1297_v34 = vpop.permute.xlu0 %1296  ;;  %v1468_v63 = vsel %vm225_vm0, %v4237_v36, %v8633_v53  ;;  %v1632_v54 = vsel %vm1601_vm10, %v1599_v9, %v8634_v31 }
 0x2a0   : > { %v1663_v20 = vsel %vm1634_vm11, %v1630_v51, %v1297_v34  ;;  %v1501_v58 = vsel %vm1469_vm6, %v1468_v63, %v8635_v41 }
 0x2a1   : > { %v1396_v25 = vpop.permute.xlu1 %1395  ;;  %v1534_v42 = vsel %vm1502_vm7, %v1501_v58, %v8636_v46 }
 0x2a2   : > { %v1695_v33 = vsel %vm1667_vm12, %v1662_v15, %v1396_v25  ;;  %v1567_v48 = vsel %vm1535_vm8, %v1534_v42, %v8637_v11  ;;  %v6389_v15 = vld [vmem:[%s8057_s2] ss:$0 sm:$0xff] }
 0x2a3   : > { %4107 = vmatmul.mubr.msk.f32.gmra.mrb[26].mxu0 %vm1712_vm13, %v1695_v33  ;;  %v1398_v56 = vpop.permute.xlu0 %1397  ;;  %v1600_v61 = vsel %vm1568_vm9, %v1567_v48, %v8638_v27 }
 0x2a4   : > { %v1696_v43 = vsel %vm1667_vm12, %v1663_v20, %v1398_v56  ;;  %v1633_v4 = vsel %vm1601_vm10, %v1600_v61, %v8639_v23 }
 0x2a5   : > { %v1299_v62 = vpop.permute.xlu1 %1298  ;;  %4109 = vmatprep.mubr.msk.f32.mxu0 %vm1712_vm13, %v1696_v43 }
 0x2a6   : > { %v1664_v35 = vsel %vm1634_vm11, %v1631_v52, %v1299_v62 }
 0x2a7   : > { %v1301_v17 = vpop.permute.xlu0 %1300 }
 0x2a8   : > { %v1665_v3 = vsel %vm1634_vm11, %v1632_v54, %v1301_v17 }
 0x2a9   : > { %v1400_v24 = vpop.permute.xlu1 %1399 }
 0x2aa   : > { %v1697_v57 = vsel %vm1667_vm12, %v1664_v35, %v1400_v24 }
 0x2ab   : > { %4110 = vmatmul.mubr.msk.f32.gmra.mrb[28].mxu0 %vm1712_vm13, %v1697_v57  ;;  %v1402_v37 = vpop.permute.xlu0 %1401 }
 0x2ac   : > { %v1698_v32 = vsel %vm1667_vm12, %v1665_v3, %v1402_v37 }
 0x2ad   : > { %v1303_v18 = vpop.permute.xlu1 %1302  ;;  %4112 = vmatprep.mubr.msk.f32.mxu0 %vm1712_vm13, %v1698_v32 }
 0x2ae   : > { %v1666_v34 = vsel %vm1634_vm11, %v1633_v4, %v1303_v18 }
 0x2b1   : > { %v1404_v26 = vpop.permute.xlu1 %1403 }
 0x2b2   : > { %v1699_v30 = vsel %vm1667_vm12, %v1666_v34, %v1404_v26 }
 0x2b3   : > { %4113 = vmatmul.mubr.msk.f32.gmra.mrb[30].mxu0 %vm1712_vm13, %v1699_v30 }
 0x313   : > { %v4069_v25 = vpop.f32.mrb[0].mxu0 }
 0x314   : > { %v1885_v39 = vadd.f32 %v4069_v25, %v6389_v15  ;;  %v1879_v49 = vpop.f32.mrb[1].mxu0 }
 0x315   : > { %v1880_v33 = vadd.f32 %v6389_v15, %v1879_v49 }
 0x316   : > { %v2039_v10 = vmax.f32 %v1885_v39, 0.0 }
 0x317   : > { %v2038_v6 = vmax.f32 %v1880_v33, 0.0  ;;  %v4072_v38 = vpop.f32.mrb[2].mxu0 }
 0x318   : > { %2072 = vst.msk [vmem:[#allocation3 + $0x21] sm:$0xff] %vm225_vm0, %v2039_v10  ;;  %v1895_v5 = vadd.f32 %v4072_v38, %v6389_v15  ;;  %v1889_v51 = vpop.f32.mrb[3].mxu0 }
 0x319   : > { %2071 = vst.msk [vmem:[#allocation3 + $0x19] sm:$0xff] %vm225_vm0, %v2038_v6  ;;  %v1890_v40 = vadd.f32 %v6389_v15, %v1889_v51 }
 0x31a   : > { %v2041_v8 = vmax.f32 %v1895_v5, 0.0 }
 0x31b   : > { %v2040_v20 = vmax.f32 %v1890_v40, 0.0 }
 0x31c   : > { %2074 = vst.msk [vmem:[#allocation3 + $0x39] sm:$0xff] %vm225_vm0, %v2041_v8 }
 0x31d   : > { %2073 = vst.msk [vmem:[#allocation3 + $0x31] sm:$0xff] %vm225_vm0, %v2040_v20 }
 0x31e   : > { %v4075_v56 = vpop.f32.mrb[4].mxu0 }
 0x31f   : > { %v1905_v13 = vadd.f32 %v4075_v56, %v6389_v15  ;;  %v1899_v47 = vpop.f32.mrb[5].mxu0  ;;  %v6400_v43 = vld [vmem:[#allocation3 + $0x28] sm:$0x3] }
 0x320   : > { %v1900_v62 = vadd.f32 %v6389_v15, %v1899_v47  ;;  %v6403_v29 = vld [vmem:[#allocation3 + $0x20] sm:$0xff]  ;;  %v2213_v0 = vrot.slane %v6400_v43, 1  ;;  %v6406_v14 = vld [vmem:[#allocation3 + $0x18] sm:$0xff] }
 0x321   : > { %v2043_v44 = vmax.f32 %v1905_v13, 0.0  ;;  %v2211_v2 = vrot.slane %v6403_v29, 1  ;;  %v2210_v60 = vrot.slane %v6406_v14, 1 }
 0x322   : > { %v2042_v21 = vmax.f32 %v1900_v62, 0.0 }
 0x323   : > { %2076 = vst.msk [vmem:[#allocation3 + $0x51] sm:$0xff] %vm225_vm0, %v2043_v44  ;;  %v6412_v7 = vsel %vm481_vm3, %v2211_v2, %v2213_v0  ;;  %v6415_v16 = vsel %vm481_vm3, %v2210_v60, %v2211_v2  ;;  %v6417_v19 = vld [vmem:[#allocation3 + $0x40] sm:$0x3] }
 0x324   : > { %2075 = vst.msk [vmem:[#allocation3 + $0x49] sm:$0xff] %vm225_vm0, %v2042_v21  ;;  %2291 = vrot.lane.b32.xlu1 %v6412_v7, %s4279_s25  ;;  %2289 = vrot.lane.b32.xlu0 %v6415_v16, %s4279_s25  ;;  %v6424_v55 = vld [vmem:[#allocation3 + $0x38] sm:$0xff]  ;;  %v2218_v1 = vrot.slane %v6417_v19, 1  ;;  %v6427_v52 = vld [vmem:[#allocation3 + $0x30] sm:$0xff] }
 0x325   : > { %v2216_v17 = vrot.slane %v6424_v55, 1  ;;  %v2215_v59 = vrot.slane %v6427_v52, 1 }
 0x326   : > { %v4078_v12 = vpop.f32.mrb[6].mxu0 }
 0x327   : > { %v1915_v35 = vadd.f32 %v4078_v12, %v6389_v15  ;;  %v1909_v24 = vpop.f32.mrb[7].mxu0  ;;  %v6433_v22 = vsel %vm481_vm3, %v2216_v17, %v2218_v1  ;;  %v6436_v9 = vsel %vm481_vm3, %v2215_v59, %v2216_v17 }
 0x328   : > { %v1910_v57 = vadd.f32 %v6389_v15, %v1909_v24  ;;  %2295 = vrot.lane.b32.xlu1 %v6433_v22, %s4279_s25  ;;  %2293 = vrot.lane.b32.xlu0 %v6436_v9, %s4279_s25 }
 0x329   : > { %v2045_v36 = vmax.f32 %v1915_v35, 0.0 }
 0x32a   : > { %v2044_v53 = vmax.f32 %v1910_v57, 0.0  ;;  %v6443_v63 = vld [vmem:[#allocation3 + $0x58] sm:$0x3] }
 0x32b   : > { %2078 = vst.msk [vmem:[#allocation3 + $0x69] sm:$0xff] %vm225_vm0, %v2045_v36  ;;  %v6446_v31 = vld [vmem:[#allocation3 + $0x50] sm:$0xff]  ;;  %v2223_v54 = vrot.slane %v6443_v63, 1  ;;  %v6449_v41 = vld [vmem:[#allocation3 + $0x48] sm:$0xff] }
 0x32c   : > { %2077 = vst.msk [vmem:[#allocation3 + $0x61] sm:$0xff] %vm225_vm0, %v2044_v53  ;;  %v2221_v58 = vrot.slane %v6446_v31, 1  ;;  %v2220_v3 = vrot.slane %v6449_v41, 1 }
 0x32e   : > { %v4081_v37 = vpop.f32.mrb[8].mxu0  ;;  %v6455_v46 = vsel %vm481_vm3, %v2221_v58, %v2223_v54  ;;  %v6458_v42 = vsel %vm481_vm3, %v2220_v3, %v2221_v58 }
 0x32f   : > { %v1925_v32 = vadd.f32 %v4081_v37, %v6389_v15  ;;  %2299 = vrot.lane.b32.xlu1 %v6455_v46, %s4279_s25  ;;  %2297 = vrot.lane.b32.xlu0 %v6458_v42, %s4279_s25  ;;  %v1919_v18 = vpop.f32.mrb[9].mxu0 }
 0x330   : > { %v1920_v11 = vadd.f32 %v6389_v15, %v1919_v18 }
 0x331   : > { %v2047_v48 = vmax.f32 %v1925_v32, 0.0 }
 0x332   : > { %v2046_v27 = vmax.f32 %v1920_v11, 0.0  ;;  %v6466_v61 = vld [vmem:[#allocation3 + $0x70] sm:$0x3] }
 0x333   : > { %2080 = vst.msk [vmem:[#allocation3 + $0x81] sm:$0xff] %vm225_vm0, %v2047_v48  ;;  %v6469_v23 = vld [vmem:[#allocation3 + $0x68] sm:$0xff]  ;;  %v2228_v4 = vrot.slane %v6466_v61, 1  ;;  %v6472_v34 = vld [vmem:[#allocation3 + $0x60] sm:$0xff] }
 0x334   : > { %2079 = vst.msk [vmem:[#allocation3 + $0x79] sm:$0xff] %vm225_vm0, %v2046_v27  ;;  %v2226_v26 = vrot.slane %v6469_v23, 1  ;;  %v2225_v30 = vrot.slane %v6472_v34, 1 }
 0x336   : > { %v4084_v25 = vpop.f32.mrb[10].mxu0  ;;  %v6478_v39 = vsel %vm481_vm3, %v2226_v26, %v2228_v4  ;;  %v6481_v49 = vsel %vm481_vm3, %v2225_v30, %v2226_v26 }
 0x337   : > { %8640 = vst [vmem:[#allocation28_spill] sm:$0xff] %v6478_v39  ;;  %8641 = vst [vmem:[#allocation27_spill] sm:$0xff] %v6481_v49  ;;  %v1935_v33 = vadd.f32 %v4084_v25, %v6389_v15  ;;  %2303 = vrot.lane.b32.xlu1 %v6478_v39, %s4279_s25  ;;  %2301 = vrot.lane.b32.xlu0 %v6481_v49, %s4279_s25  ;;  %v1929_v10 = vpop.f32.mrb[11].mxu0 }
 0x338   : > { %v1930_v6 = vadd.f32 %v6389_v15, %v1929_v10 }
 0x339   : > { %v2049_v38 = vmax.f32 %v1935_v33, 0.0 }
 0x33a   : > { %v2048_v5 = vmax.f32 %v1930_v6, 0.0  ;;  %v6489_v51 = vld [vmem:[#allocation3 + $0x88] sm:$0x3] }
 0x33b   : > { %2082 = vst.msk [vmem:[#allocation3 + $0x99] sm:$0xff] %vm225_vm0, %v2049_v38  ;;  %v6492_v40 = vld [vmem:[#allocation3 + $0x80] sm:$0xff]  ;;  %v2233_v8 = vrot.slane %v6489_v51, 1  ;;  %v6495_v20 = vld [vmem:[#allocation3 + $0x78] sm:$0xff] }
 0x33c   : > { %2081 = vst.msk [vmem:[#allocation3 + $0x91] sm:$0xff] %vm225_vm0, %v2048_v5  ;;  %v2231_v56 = vrot.slane %v6492_v40, 1  ;;  %v2230_v13 = vrot.slane %v6495_v20, 1 }
 0x33e   : > { %v4087_v47 = vpop.f32.mrb[12].mxu0  ;;  %v6501_v62 = vsel %vm481_vm3, %v2231_v56, %v2233_v8  ;;  %v6504_v0 = vsel %vm481_vm3, %v2230_v13, %v2231_v56 }
 0x33f   : > { %8642 = vst [vmem:[#allocation49_spill] sm:$0xff] %v6501_v62  ;;  %8643 = vst [vmem:[#allocation29_spill] sm:$0xff] %v6504_v0  ;;  %v1945_v44 = vadd.f32 %v4087_v47, %v6389_v15  ;;  %2307 = vrot.lane.b32.xlu1 %v6501_v62, %s4279_s25  ;;  %2305 = vrot.lane.b32.xlu0 %v6504_v0, %s4279_s25  ;;  %v1939_v2 = vpop.f32.mrb[13].mxu0 }
 0x340   : > { %v1940_v60 = vadd.f32 %v6389_v15, %v1939_v2 }
 0x341   : > { %v2051_v21 = vmax.f32 %v1945_v44, 0.0 }
 0x342   : > { %v2050_v1 = vmax.f32 %v1940_v60, 0.0  ;;  %v6512_v17 = vld [vmem:[#allocation3 + $0xa0] sm:$0x3] }
 0x343   : > { %2084 = vst.msk [vmem:[#allocation3 + $0xb1] sm:$0xff] %vm225_vm0, %v2051_v21  ;;  %v6515_v59 = vld [vmem:[#allocation3 + $0x98] sm:$0xff]  ;;  %v2238_v12 = vrot.slane %v6512_v17, 1  ;;  %v6518_v35 = vld [vmem:[#allocation3 + $0x90] sm:$0xff] }
 0x344   : > { %2083 = vst.msk [vmem:[#allocation3 + $0xa9] sm:$0xff] %vm225_vm0, %v2050_v1  ;;  %v2236_v24 = vrot.slane %v6515_v59, 1  ;;  %v2235_v57 = vrot.slane %v6518_v35, 1 }
 0x346   : > { %v4090_v36 = vpop.f32.mrb[14].mxu0  ;;  %v6524_v53 = vsel %vm481_vm3, %v2236_v24, %v2238_v12  ;;  %v6527_v54 = vsel %vm481_vm3, %v2235_v57, %v2236_v24 }
 0x347   : > { %8644 = vst [vmem:[#allocation112_spill] sm:$0xff] %v6524_v53  ;;  %8645 = vst [vmem:[#allocation116_spill] sm:$0xff] %v6527_v54  ;;  %v1955_v58 = vadd.f32 %v4090_v36, %v6389_v15  ;;  %2311 = vrot.lane.b32.xlu1 %v6524_v53, %s4279_s25  ;;  %2309 = vrot.lane.b32.xlu0 %v6527_v54, %s4279_s25  ;;  %v1949_v3 = vpop.f32.mrb[15].mxu0 }
 0x348   : > { %v1950_v37 = vadd.f32 %v6389_v15, %v1949_v3 }
 0x349   : > { %v2053_v32 = vmax.f32 %v1955_v58, 0.0 }
 0x34a   : > { %v2052_v18 = vmax.f32 %v1950_v37, 0.0  ;;  %v6535_v11 = vld [vmem:[#allocation3 + $0xb8] sm:$0x3] }
 0x34b   : > { %2086 = vst.msk [vmem:[#allocation3 + $0xc9] sm:$0xff] %vm225_vm0, %v2053_v32  ;;  %v6538_v48 = vld [vmem:[#allocation3 + $0xb0] sm:$0xff]  ;;  %v2243_v27 = vrot.slane %v6535_v11, 1  ;;  %v6541_v4 = vld [vmem:[#allocation3 + $0xa8] sm:$0xff] }
 0x34c   : > { %2085 = vst.msk [vmem:[#allocation3 + $0xc1] sm:$0xff] %vm225_vm0, %v2052_v18  ;;  %v2241_v26 = vrot.slane %v6538_v48, 1  ;;  %v2240_v30 = vrot.slane %v6541_v4, 1 }
 0x34e   : > { %v4093_v25 = vpop.f32.mrb[16].mxu0  ;;  %v6547_v33 = vsel %vm481_vm3, %v2241_v26, %v2243_v27  ;;  %v6550_v10 = vsel %vm481_vm3, %v2240_v30, %v2241_v26 }
 0x34f   : > { %8646 = vst [vmem:[#allocation45_spill] sm:$0xff] %v6547_v33  ;;  %8647 = vst [vmem:[#allocation47_spill] sm:$0xff] %v6550_v10  ;;  %v1965_v6 = vadd.f32 %v4093_v25, %v6389_v15  ;;  %2315 = vrot.lane.b32.xlu1 %v6547_v33, %s4279_s25  ;;  %2313 = vrot.lane.b32.xlu0 %v6550_v10, %s4279_s25  ;;  %v1959_v38 = vpop.f32.mrb[17].mxu0 }
 0x350   : > { %v1960_v5 = vadd.f32 %v6389_v15, %v1959_v38 }
 0x351   : > { %v2055_v8 = vmax.f32 %v1965_v6, 0.0 }
 0x352   : > { %v2054_v56 = vmax.f32 %v1960_v5, 0.0  ;;  %v6558_v13 = vld [vmem:[#allocation3 + $0xd0] sm:$0x3] }
 0x353   : > { %2088 = vst.msk [vmem:[#allocation3 + $0xe1] sm:$0xff] %vm225_vm0, %v2055_v8  ;;  %v6561_v47 = vld [vmem:[#allocation3 + $0xc8] sm:$0xff]  ;;  %v2248_v44 = vrot.slane %v6558_v13, 1  ;;  %v6564_v2 = vld [vmem:[#allocation3 + $0xc0] sm:$0xff] }
 0x354   : > { %2087 = vst.msk [vmem:[#allocation3 + $0xd9] sm:$0xff] %vm225_vm0, %v2054_v56  ;;  %v2246_v60 = vrot.slane %v6561_v47, 1  ;;  %v2245_v21 = vrot.slane %v6564_v2, 1 }
 0x356   : > { %v4096_v1 = vpop.f32.mrb[18].mxu0  ;;  %v6570_v12 = vsel %vm481_vm3, %v2246_v60, %v2248_v44  ;;  %v6573_v24 = vsel %vm481_vm3, %v2245_v21, %v2246_v60 }
 0x357   : > { %8648 = vst [vmem:[#allocation48_spill] sm:$0xff] %v6570_v12  ;;  %8649 = vst [vmem:[#allocation50_spill] sm:$0xff] %v6573_v24  ;;  %v1975_v57 = vadd.f32 %v4096_v1, %v6389_v15  ;;  %2319 = vrot.lane.b32.xlu1 %v6570_v12, %s4279_s25  ;;  %2317 = vrot.lane.b32.xlu0 %v6573_v24, %s4279_s25  ;;  %v1969_v36 = vpop.f32.mrb[19].mxu0 }
 0x358   : > { %v1970_v58 = vadd.f32 %v6389_v15, %v1969_v36 }
 0x359   : > { %v2057_v3 = vmax.f32 %v1975_v57, 0.0 }
 0x35a   : > { %v2056_v37 = vmax.f32 %v1970_v58, 0.0  ;;  %v6581_v32 = vld [vmem:[#allocation3 + $0xe8] sm:$0x3] }
 0x35b   : > { %2090 = vst.msk [vmem:[#allocation3 + $0xf9] sm:$0xff] %vm225_vm0, %v2057_v3  ;;  %v6584_v18 = vld [vmem:[#allocation3 + $0xe0] sm:$0xff]  ;;  %v2253_v27 = vrot.slane %v6581_v32, 1  ;;  %v6587_v26 = vld [vmem:[#allocation3 + $0xd8] sm:$0xff] }
 0x35c   : > { %2089 = vst.msk [vmem:[#allocation3 + $0xf1] sm:$0xff] %vm225_vm0, %v2056_v37  ;;  %v2251_v30 = vrot.slane %v6584_v18, 1  ;;  %v2250_v25 = vrot.slane %v6587_v26, 1 }
 0x35e   : > { %v4099_v6 = vpop.f32.mrb[20].mxu0  ;;  %v6593_v38 = vsel %vm481_vm3, %v2251_v30, %v2253_v27  ;;  %v6596_v5 = vsel %vm481_vm3, %v2250_v25, %v2251_v30 }
 0x35f   : > { %8650 = vst [vmem:[#allocation78_spill] sm:$0xff] %v6593_v38  ;;  %8651 = vst [vmem:[#allocation51_spill] sm:$0xff] %v6596_v5  ;;  %v1985_v8 = vadd.f32 %v4099_v6, %v6389_v15  ;;  %2323 = vrot.lane.b32.xlu1 %v6593_v38, %s4279_s25  ;;  %2321 = vrot.lane.b32.xlu0 %v6596_v5, %s4279_s25  ;;  %v1979_v56 = vpop.f32.mrb[21].mxu0 }
 0x360   : > { %v1980_v44 = vadd.f32 %v6389_v15, %v1979_v56 }
 0x361   : > { %v2059_v60 = vmax.f32 %v1985_v8, 0.0 }
 0x362   : > { %v2058_v21 = vmax.f32 %v1980_v44, 0.0  ;;  %v6604_v1 = vld [vmem:[#allocation3 + $0x100] sm:$0x3] }
 0x363   : > { %2092 = vst.msk [vmem:[#allocation3 + $0x111] sm:$0xff] %vm225_vm0, %v2059_v60  ;;  %v6607_v57 = vld [vmem:[#allocation3 + $0xf8] sm:$0xff]  ;;  %v2258_v36 = vrot.slane %v6604_v1, 1  ;;  %v6610_v58 = vld [vmem:[#allocation3 + $0xf0] sm:$0xff] }
 0x364   : > { %2091 = vst.msk [vmem:[#allocation3 + $0x109] sm:$0xff] %vm225_vm0, %v2058_v21  ;;  %v2256_v3 = vrot.slane %v6607_v57, 1  ;;  %v2255_v37 = vrot.slane %v6610_v58, 1 }
 0x366   : > { %v4102_v27 = vpop.f32.mrb[22].mxu0  ;;  %v6616_v30 = vsel %vm481_vm3, %v2256_v3, %v2258_v36  ;;  %v6619_v25 = vsel %vm481_vm3, %v2255_v37, %v2256_v3 }
 0x367   : > { %8652 = vst [vmem:[#allocation81_spill] sm:$0xff] %v6616_v30  ;;  %8653 = vst [vmem:[#allocation108_spill] sm:$0xff] %v6619_v25  ;;  %v1995_v6 = vadd.f32 %v4102_v27, %v6389_v15  ;;  %2327 = vrot.lane.b32.xlu1 %v6616_v30, %s4279_s25  ;;  %2325 = vrot.lane.b32.xlu0 %v6619_v25, %s4279_s25  ;;  %v1989_v8 = vpop.f32.mrb[23].mxu0 }
 0x368   : > { %v1990_v56 = vadd.f32 %v6389_v15, %v1989_v8 }
 0x369   : > { %v2061_v44 = vmax.f32 %v1995_v6, 0.0 }
 0x36a   : > { %v2060_v60 = vmax.f32 %v1990_v56, 0.0  ;;  %v6627_v21 = vld [vmem:[#allocation3 + $0x118] sm:$0x3] }
 0x36b   : > { %2094 = vst.msk [vmem:[#allocation3 + $0x129] sm:$0xff] %vm225_vm0, %v2061_v44  ;;  %v6630_v36 = vld [vmem:[#allocation3 + $0x110] sm:$0xff]  ;;  %v2263_v3 = vrot.slane %v6627_v21, 1  ;;  %v6633_v37 = vld [vmem:[#allocation3 + $0x108] sm:$0xff] }
 0x36c   : > { %2093 = vst.msk [vmem:[#allocation3 + $0x121] sm:$0xff] %vm225_vm0, %v2060_v60  ;;  %v2261_v27 = vrot.slane %v6630_v36, 1  ;;  %v2260_v30 = vrot.slane %v6633_v37, 1 }
 0x36e   : > { %v4105_v25 = vpop.f32.mrb[24].mxu0  ;;  %v6639_v6 = vsel %vm481_vm3, %v2261_v27, %v2263_v3  ;;  %v6642_v8 = vsel %vm481_vm3, %v2260_v30, %v2261_v27 }
 0x36f   : > { %8654 = vst [vmem:[#allocation80_spill] sm:$0xff] %v6639_v6  ;;  %8655 = vst [vmem:[#allocation111_spill] sm:$0xff] %v6642_v8  ;;  %v2005_v56 = vadd.f32 %v4105_v25, %v6389_v15  ;;  %2331 = vrot.lane.b32.xlu1 %v6639_v6, %s4279_s25  ;;  %2329 = vrot.lane.b32.xlu0 %v6642_v8, %s4279_s25  ;;  %v1999_v44 = vpop.f32.mrb[25].mxu0 }
 0x370   : > { %v2000_v60 = vadd.f32 %v6389_v15, %v1999_v44 }
 0x371   : > { %v2063_v38 = vmax.f32 %v2005_v56, 0.0 }
 0x372   : > { %v2062_v5 = vmax.f32 %v2000_v60, 0.0  ;;  %v6650_v12 = vld [vmem:[#allocation3 + $0x130] sm:$0x3] }
 0x373   : > { %2096 = vst.msk [vmem:[#allocation3 + $0x141] sm:$0xff] %vm225_vm0, %v2063_v38  ;;  %v6653_v3 = vld [vmem:[#allocation3 + $0x128] sm:$0xff]  ;;  %v2268_v30 = vrot.slane %v6650_v12, 1  ;;  %v6656_v25 = vld [vmem:[#allocation3 + $0x120] sm:$0xff] }
 0x374   : > { %2095 = vst.msk [vmem:[#allocation3 + $0x139] sm:$0xff] %vm225_vm0, %v2062_v5  ;;  %v2266_v27 = vrot.slane %v6653_v3, 1  ;;  %v2265_v6 = vrot.slane %v6656_v25, 1 }
 0x376   : > { %v4108_v8 = vpop.f32.mrb[26].mxu0  ;;  %v6662_v56 = vsel %vm481_vm3, %v2266_v27, %v2268_v30  ;;  %v6665_v44 = vsel %vm481_vm3, %v2265_v6, %v2266_v27 }
 0x377   : > { %8656 = vst [vmem:[#allocation133_spill] sm:$0xff] %v6662_v56  ;;  %8657 = vst [vmem:[#allocation82_spill] sm:$0xff] %v6665_v44  ;;  %v2015_v38 = vadd.f32 %v4108_v8, %v6389_v15  ;;  %2335 = vrot.lane.b32.xlu1 %v6662_v56, %s4279_s25  ;;  %2333 = vrot.lane.b32.xlu0 %v6665_v44, %s4279_s25  ;;  %v2009_v5 = vpop.f32.mrb[27].mxu0 }
 0x378   : > { %v2010_v60 = vadd.f32 %v6389_v15, %v2009_v5 }
 0x379   : > { %v2065_v24 = vmax.f32 %v2015_v38, 0.0 }
 0x37a   : > { %v2064_v33 = vmax.f32 %v2010_v60, 0.0  ;;  %v6673_v10 = vld [vmem:[#allocation3 + $0x148] sm:$0x3] }
 0x37b   : > { %2098 = vst.msk [vmem:[#allocation3 + $0x159] sm:$0xff] %vm225_vm0, %v2065_v24  ;;  %v6676_v30 = vld [vmem:[#allocation3 + $0x140] sm:$0xff]  ;;  %v2273_v6 = vrot.slane %v6673_v10, 1  ;;  %v6679_v8 = vld [vmem:[#allocation3 + $0x138] sm:$0xff] }
 0x37c   : > { %2097 = vst.msk [vmem:[#allocation3 + $0x151] sm:$0xff] %vm225_vm0, %v2064_v33  ;;  %v2271_v27 = vrot.slane %v6676_v30, 1  ;;  %v2270_v56 = vrot.slane %v6679_v8, 1 }
 0x37e   : > { %v4111_v44 = vpop.f32.mrb[28].mxu0  ;;  %v6685_v38 = vsel %vm481_vm3, %v2271_v27, %v2273_v6  ;;  %v6688_v5 = vsel %vm481_vm3, %v2270_v56, %v2271_v27 }
 0x37f   : > { %8658 = vst [vmem:[#allocation136_spill] sm:$0xff] %v6685_v38  ;;  %8659 = vst [vmem:[#allocation83_spill] sm:$0xff] %v6688_v5  ;;  %v2025_v24 = vadd.f32 %v4111_v44, %v6389_v15  ;;  %2339 = vrot.lane.b32.xlu1 %v6685_v38, %s4279_s25  ;;  %2337 = vrot.lane.b32.xlu0 %v6688_v5, %s4279_s25  ;;  %v2019_v33 = vpop.f32.mrb[29].mxu0 }
 0x380   : > { %v2020_v60 = vadd.f32 %v6389_v15, %v2019_v33 }
 0x381   : > { %v2067_v53 = vmax.f32 %v2025_v24, 0.0 }
 0x382   : > { %v2066_v54 = vmax.f32 %v2020_v60, 0.0  ;;  %v6696_v62 = vld [vmem:[#allocation3 + $0x160] sm:$0x3] }
 0x383   : > { %2100 = vst.msk [vmem:[#allocation3 + $0x171] sm:$0xff] %vm225_vm0, %v2067_v53  ;;  %v6699_v6 = vld [vmem:[#allocation3 + $0x158] sm:$0xff]  ;;  %v2278_v56 = vrot.slane %v6696_v62, 1  ;;  %v6702_v44 = vld [vmem:[#allocation3 + $0x150] sm:$0xff] }
 0x384   : > { %2099 = vst.msk [vmem:[#allocation3 + $0x169] sm:$0xff] %vm225_vm0, %v2066_v54  ;;  %v2276_v27 = vrot.slane %v6699_v6, 1  ;;  %v2275_v38 = vrot.slane %v6702_v44, 1 }
 0x386   : > { %v4114_v5 = vpop.f32.mrb[30].mxu0  ;;  %v6708_v24 = vsel %vm481_vm3, %v2276_v27, %v2278_v56  ;;  %v6711_v33 = vsel %vm481_vm3, %v2275_v38, %v2276_v27  ;;  %v2382_v27 = vrot.slane %v6304_v28, 2 }
 0x387   : > { %8660 = vst [vmem:[#allocation110_spill] sm:$0xff] %v6708_v24  ;;  %8661 = vst [vmem:[#allocation114_spill] sm:$0xff] %v6711_v33  ;;  %v2035_v53 = vadd.f32 %v4114_v5, %v6389_v15  ;;  %2343 = vrot.lane.b32.xlu1 %v6708_v24, %s4279_s25  ;;  %2341 = vrot.lane.b32.xlu0 %v6711_v33, %s4279_s25  ;;  %v2029_v54 = vpop.f32.mrb[31].mxu0 }
 0x388   : > { %v2030_v60 = vadd.f32 %v6389_v15, %v2029_v54  ;;  %v2381_v54 = vrot.slane %v6302_v45, 2  ;;  %v2389_v45 = vrot.slane %v6400_v43, 2 }
 0x389   : > { %v2069_v0 = vmax.f32 %v2035_v53, 0.0  ;;  %v2384_v53 = vrot.slane %v6306_v50, 2  ;;  %v2387_v50 = vrot.slane %v6403_v29, 2 }
 0x38a   : > { %v2068_v39 = vmax.f32 %v2030_v60, 0.0  ;;  %v6719_v49 = vld [vmem:[#allocation3 + $0x178] sm:$0x3] }
 0x38b   : > { %2102 = vst.msk [vmem:[#allocation3 + $0x189] sm:$0xff] %vm225_vm0, %v2069_v0  ;;  %v6722_v56 = vld [vmem:[#allocation3 + $0x170] sm:$0xff]  ;;  %v2283_v38 = vrot.slane %v6719_v49, 1  ;;  %v6725_v5 = vld [vmem:[#allocation3 + $0x168] sm:$0xff]  ;;  %v2385_v28 = vsel %vm658_vm4, %v2382_v27, %v2384_v53 }
 0x38c   : > { %2101 = vst.msk [vmem:[#allocation3 + $0x181] sm:$0xff] %vm225_vm0, %v2068_v39  ;;  %v2281_v24 = vrot.slane %v6722_v56, 1  ;;  %v2280_v15 = vrot.slane %v6725_v5, 1  ;;  %v2383_v39 = vsel %vm658_vm4, %v2381_v54, %v2382_v27  ;;  %v2391_v27 = vrot.slane %v6427_v52, 2 }
 0x38e   : > { %v6734_v0 = vsel %vm481_vm3, %v2281_v24, %v2283_v38  ;;  %v6737_v60 = vsel %vm481_vm3, %v2280_v15, %v2281_v24  ;;  %v2386_v38 = vrot.slane %v6406_v14, 2  ;;  %v2392_v24 = vrot.slane %v6424_v55, 2 }
 0x38f   : > { %8662 = vst [vmem:[#allocation135_spill] sm:$0xff] %v6734_v0  ;;  %8663 = vst [vmem:[#allocation113_spill] sm:$0xff] %v6737_v60  ;;  %2347 = vrot.lane.b32.xlu1 %v6734_v0, %s4279_s25  ;;  %2345 = vrot.lane.b32.xlu0 %v6737_v60, %s4279_s25  ;;  %v2394_v15 = vrot.slane %v6417_v19, 2  ;;  %v6753_v0 = vsel %vm658_vm4, %v2387_v50, %v2389_v45  ;;  %v2397_v19 = vrot.slane %v6446_v31, 2  ;;  %v2404_v45 = vrot.slane %v6466_v61, 2 }
 0x390   : > { %v6756_v53 = vsel %vm658_vm4, %v2386_v38, %v2387_v50  ;;  %v6767_v54 = vsel %vm658_vm4, %v2391_v27, %v2392_v24  ;;  %v2402_v50 = vrot.slane %v6469_v23, 2  ;;  %v2407_v61 = vrot.slane %v6492_v40, 2 }
 0x391   : > { %v6764_v43 = vsel %vm658_vm4, %v2392_v24, %v2394_v15 }
 0x392   : > { %v6790_v15 = vsel %vm658_vm4, %v2402_v50, %v2404_v45  ;;  %v2414_v45 = vrot.slane %v6512_v17, 2  ;;  %v2417_v17 = vrot.slane %v6538_v48, 2 }
 0x393   : > { %2463 = vrot.lane.b32.xlu1 %v2385_v28, %s4280_s26  ;;  %2461 = vrot.lane.b32.xlu0 %v2383_v39, %s4280_s26  ;;  %v2399_v28 = vrot.slane %v6443_v63, 2  ;;  %v2396_v39 = vrot.slane %v6449_v41, 2  ;;  %v2401_v63 = vrot.slane %v6472_v34, 2 }
 0x395   : > { %v6779_v38 = vsel %vm658_vm4, %v2397_v19, %v2399_v28  ;;  %v6782_v24 = vsel %vm658_vm4, %v2396_v39, %v2397_v19  ;;  %v6793_v27 = vsel %vm658_vm4, %v2401_v63, %v2402_v50  ;;  %v2409_v28 = vrot.slane %v6489_v51, 2 }
 0x396   : > { %v2406_v19 = vrot.slane %v6495_v20, 2  ;;  %v2412_v39 = vrot.slane %v6515_v59, 2  ;;  %v2411_v51 = vrot.slane %v6518_v35, 2 }
 0x397   : > { %2467 = vrot.lane.b32.xlu1 %v6753_v0, %s4280_s26  ;;  %2465 = vrot.lane.b32.xlu0 %v6756_v53, %s4280_s26  ;;  %v6805_v60 = vsel %vm658_vm4, %v2407_v61, %v2409_v28  ;;  %v2419_v28 = vrot.slane %v6535_v11, 2  ;;  %v2421_v11 = vrot.slane %v6564_v2, 2 }
 0x398   : > { %8664 = vst [vmem:[#allocation53_spill] sm:$0xff] %v6805_v60  ;;  %v6808_v50 = vsel %vm658_vm4, %v2406_v19, %v2407_v61  ;;  %v6816_v63 = vsel %vm658_vm4, %v2412_v39, %v2414_v45  ;;  %v6819_v33 = vsel %vm658_vm4, %v2411_v51, %v2412_v39  ;;  %v2416_v61 = vrot.slane %v6541_v4, 2 }
 0x399   : > { %8665 = vst [vmem:[#allocation85_spill] sm:$0xff] %v6816_v63  ;;  %v2422_v19 = vrot.slane %v6561_v47, 2  ;;  %v2424_v45 = vrot.slane %v6558_v13, 2  ;;  %v2427_v13 = vrot.slane %v6584_v18, 2 }
 0x39a   : > { %v6834_v39 = vsel %vm658_vm4, %v2416_v61, %v2417_v17  ;;  %v2432_v61 = vrot.slane %v6607_v57, 2 }
 0x39b   : > { %2471 = vrot.lane.b32.xlu1 %v6764_v43, %s4280_s26  ;;  %2469 = vrot.lane.b32.xlu0 %v6767_v54, %s4280_s26  ;;  %v6842_v51 = vsel %vm658_vm4, %v2422_v19, %v2424_v45  ;;  %v2434_v45 = vrot.slane %v6604_v1, 2  ;;  %v2437_v1 = vrot.slane %v6630_v36, 2 }
 0x39c   : > { %8667 = vst [vmem:[#allocation52_spill] sm:$0xff] %v6842_v51 }
 0x39f   : > { %2475 = vrot.lane.b32.xlu1 %v6779_v38, %s4280_s26  ;;  %2473 = vrot.lane.b32.xlu0 %v6782_v24, %s4280_s26 }
 0x3a3   : > { %2479 = vrot.lane.b32.xlu1 %v6790_v15, %s4280_s26  ;;  %2477 = vrot.lane.b32.xlu0 %v6793_v27, %s4280_s26 }
 0x3a7   : > { %2483 = vrot.lane.b32.xlu1 %v6805_v60, %s4280_s26  ;;  %2481 = vrot.lane.b32.xlu0 %v6808_v50, %s4280_s26  ;;  %v6831_v60 = vsel %vm658_vm4, %v2417_v17, %v2419_v28  ;;  %v2429_v28 = vrot.slane %v6581_v32, 2  ;;  %v2426_v17 = vrot.slane %v6587_v26, 2  ;;  %v2431_v32 = vrot.slane %v6610_v58, 2 }
 0x3a8   : > { %8666 = vst [vmem:[#allocation117_spill] sm:$0xff] %v6831_v60 }
 0x3ab   : > { %2487 = vrot.lane.b32.xlu1 %v6816_v63, %s4280_s26  ;;  %2485 = vrot.lane.b32.xlu0 %v6819_v33, %s4280_s26  ;;  %v6845_v63 = vsel %vm658_vm4, %v2421_v11, %v2422_v19  ;;  %v6860_v19 = vsel %vm658_vm4, %v2426_v17, %v2427_v13  ;;  %v6868_v11 = vsel %vm658_vm4, %v2432_v61, %v2434_v45  ;;  %v2442_v17 = vrot.slane %v6653_v3, 2 }
 0x3ac   : > { %8669 = vst [vmem:[#allocation115_spill] sm:$0xff] %v6868_v11  ;;  %v2444_v45 = vrot.slane %v6650_v12, 2 }
 0x3ae   : > { %v6898_v12 = vsel %vm658_vm4, %v2442_v17, %v2444_v45  ;;  %v2454_v45 = vrot.slane %v6696_v62, 2 }
 0x3af   : > { %2491 = vrot.lane.b32.xlu1 %v6831_v60, %s4280_s26  ;;  %2489 = vrot.lane.b32.xlu0 %v6834_v39, %s4280_s26  ;;  %v6857_v60 = vsel %vm658_vm4, %v2427_v13, %v2429_v28  ;;  %v2439_v28 = vrot.slane %v6627_v21, 2  ;;  %v2436_v13 = vrot.slane %v6633_v37, 2  ;;  %v2441_v21 = vrot.slane %v6656_v25, 2 }
 0x3b0   : > { %8668 = vst [vmem:[#allocation84_spill] sm:$0xff] %v6857_v60  ;;  %v2449_v25 = vrot.slane %v6673_v10, 2  ;;  %v2451_v10 = vrot.slane %v6702_v44, 2  ;;  %v2459_v44 = vrot.slane %v6719_v49, 2 }
 0x3b1   : > { %v6901_v3 = vsel %vm658_vm4, %v2441_v21, %v2442_v17  ;;  %v2457_v21 = vrot.slane %v6722_v56, 2 }
 0x3b3   : > { %2495 = vrot.lane.b32.xlu1 %v6842_v51, %s4280_s26  ;;  %2493 = vrot.lane.b32.xlu0 %v6845_v63, %s4280_s26  ;;  %v6871_v51 = vsel %vm658_vm4, %v2431_v32, %v2432_v61  ;;  %v6886_v61 = vsel %vm658_vm4, %v2436_v13, %v2437_v1  ;;  %v6893_v32 = vpop.permute.xlu0 %2285  ;;  %v2452_v13 = vrot.slane %v6699_v6, 2 }
 0x3b5   : > { %v6928_v62 = vsel %vm658_vm4, %v2452_v13, %v2454_v45  ;;  %v6931_v6 = vsel %vm658_vm4, %v2451_v10, %v2452_v13  ;;  %v6945_v45 = vsel %vm658_vm4, %v2457_v21, %v2459_v44 }
 0x3b6   : > { %8673 = vst [vmem:[#allocation54_spill] sm:$0xff] %v6928_v62  ;;  %8674 = vst [vmem:[#allocation86_spill] sm:$0xff] %v6931_v6 }
 0x3b7   : > { %2499 = vrot.lane.b32.xlu1 %v6857_v60, %s4280_s26  ;;  %2497 = vrot.lane.b32.xlu0 %v6860_v19, %s4280_s26  ;;  %v6883_v60 = vsel %vm658_vm4, %v2437_v1, %v2439_v28  ;;  %v2447_v1 = vrot.slane %v6676_v30, 2  ;;  %v2446_v28 = vrot.slane %v6679_v8, 2  ;;  %v6919_v30 = vpop.permute.xlu0 %2289  ;;  %8675 = vst [vmem:[#allocation118_spill] sm:$0xff] %v6945_v45 }
 0x3b8   : > { %8670 = vst [vmem:[#allocation55_spill] sm:$0xff] %v6883_v60 }
 0x3b9   : > { %v6916_v17 = vsel %vm658_vm4, %v2446_v28, %v2447_v1 }
 0x3ba   : > { %8672 = vst [vmem:[#allocation119_spill] sm:$0xff] %v6916_v17 }
 0x3bb   : > { %2503 = vrot.lane.b32.xlu1 %v6868_v11, %s4280_s26  ;;  %2501 = vrot.lane.b32.xlu0 %v6871_v51, %s4280_s26  ;;  %v6895_v11 = vpop.permute.xlu1 %2287 }
 0x3bf   : > { %2507 = vrot.lane.b32.xlu1 %v6883_v60, %s4280_s26  ;;  %2505 = vrot.lane.b32.xlu0 %v6886_v61, %s4280_s26  ;;  %v6913_v60 = vsel %vm658_vm4, %v2447_v1, %v2449_v25  ;;  %v6921_v8 = vpop.permute.xlu1 %2291  ;;  %v2456_v1 = vrot.slane %v6725_v5, 2  ;;  %v6940_v25 = vpop.permute.xlu0 %2293 }
 0x3c0   : > { %8671 = vst [vmem:[#allocation87_spill] sm:$0xff] %v6913_v60 }
 0x3c1   : > { %v6948_v13 = vsel %vm658_vm4, %v2456_v1, %v2457_v21 }
 0x3c2   : > { %8676 = vst [vmem:[#allocation137_spill] sm:$0xff] %v6948_v13 }
 0x3c3   : > { %2511 = vrot.lane.b32.xlu1 %v6898_v12, %s4280_s26  ;;  %2509 = vrot.lane.b32.xlu0 %v6901_v3, %s4280_s26  ;;  %v6942_v28 = vpop.permute.xlu1 %2295  ;;  %v6954_v49 = vpop.permute.xlu0 %2297 }
 0x3c7   : > { %2515 = vrot.lane.b32.xlu1 %v6913_v60, %s4280_s26  ;;  %2513 = vrot.lane.b32.xlu0 %v6916_v17, %s4280_s26  ;;  %v6956_v56 = vpop.permute.xlu1 %2299  ;;  %v6962_v5 = vpop.permute.xlu0 %2301 }
 0x3cb   : > { %2519 = vrot.lane.b32.xlu1 %v6928_v62, %s4280_s26  ;;  %2517 = vrot.lane.b32.xlu0 %v6931_v6, %s4280_s26  ;;  %v6964_v10 = vpop.permute.xlu1 %2303  ;;  %v6970_v21 = vpop.permute.xlu0 %2305 }
 0x3cf   : > { %2523 = vrot.lane.b32.xlu1 %v6945_v45, %s4280_s26  ;;  %2521 = vrot.lane.b32.xlu0 %v6948_v13, %s4280_s26  ;;  %v6972_v44 = vpop.permute.xlu1 %2307 }
 0x3d3   : > { %2561 = vrot.lane.b32.xlu1 %v6403_v29, %s4281_s27  ;;  %2559 = vrot.lane.b32.xlu0 %v6406_v14, %s4281_s27  ;;  %v6978_v29 = vpop.permute.xlu0 %2309  ;;  %v6980_v14 = vpop.permute.xlu1 %2311 }
 0x3d4   : > { %8677 = vst [vmem:[#allocation57_spill] sm:$0xff] %v6978_v29  ;;  %8678 = vst [vmem:[#allocation89_spill] sm:$0xff] %v6980_v14 }
 0x3d7   : > { %2565 = vrot.lane.b32.xlu1 %v6424_v55, %s4281_s27  ;;  %2563 = vrot.lane.b32.xlu0 %v6427_v52, %s4281_s27  ;;  %v6986_v1 = vpop.permute.xlu0 %2313  ;;  %v6988_v45 = vpop.permute.xlu1 %2315 }
 0x3d8   : > { %8679 = vst [vmem:[#allocation121_spill] sm:$0xff] %v6986_v1  ;;  %8680 = vst [vmem:[#allocation56_spill] sm:$0xff] %v6988_v45 }
 0x3db   : > { %2569 = vrot.lane.b32.xlu1 %v6446_v31, %s4281_s27  ;;  %2567 = vrot.lane.b32.xlu0 %v6449_v41, %s4281_s27  ;;  %v6994_v13 = vpop.permute.xlu0 %2317  ;;  %v6996_v62 = vpop.permute.xlu1 %2319 }
 0x3dc   : > { %8681 = vst [vmem:[#allocation88_spill] sm:$0xff] %v6994_v13  ;;  %8682 = vst [vmem:[#allocation120_spill] sm:$0xff] %v6996_v62 }
 0x3df   : > { %2573 = vrot.lane.b32.xlu1 %v6469_v23, %s4281_s27  ;;  %2571 = vrot.lane.b32.xlu0 %v6472_v34, %s4281_s27  ;;  %v7002_v6 = vpop.permute.xlu0 %2321  ;;  %v7004_v1 = vpop.permute.xlu1 %2323 }
 0x3e0   : > { %8683 = vst [vmem:[#allocation59_spill] sm:$0xff] %v7002_v6  ;;  %8684 = vst [vmem:[#allocation90_spill] sm:$0xff] %v7004_v1 }
 0x3e3   : > { %2577 = vrot.lane.b32.xlu1 %v6492_v40, %s4281_s27  ;;  %2575 = vrot.lane.b32.xlu0 %v6495_v20, %s4281_s27  ;;  %v7010_v45 = vpop.permute.xlu0 %2325  ;;  %v7012_v13 = vpop.permute.xlu1 %2327 }
 0x3e4   : > { %8685 = vst [vmem:[#allocation122_spill] sm:$0xff] %v7010_v45  ;;  %8686 = vst [vmem:[#allocation58_spill] sm:$0xff] %v7012_v13 }
 0x3e7   : > { %2581 = vrot.lane.b32.xlu1 %v6515_v59, %s4281_s27  ;;  %2579 = vrot.lane.b32.xlu0 %v6518_v35, %s4281_s27  ;;  %v7018_v62 = vpop.permute.xlu0 %2329  ;;  %v7020_v6 = vpop.permute.xlu1 %2331 }
 0x3e8   : > { %8687 = vst [vmem:[#allocation4_spill] sm:$0xff] %v7018_v62  ;;  %8688 = vst [vmem:[#allocation30_spill] sm:$0xff] %v7020_v6 }
 0x3eb   : > { %2585 = vrot.lane.b32.xlu1 %v6538_v48, %s4281_s27  ;;  %2583 = vrot.lane.b32.xlu0 %v6541_v4, %s4281_s27  ;;  %v7026_v1 = vpop.permute.xlu0 %2333  ;;  %v7028_v45 = vpop.permute.xlu1 %2335 }
 0x3ec   : > { %8689 = vst [vmem:[#allocation61_spill] sm:$0xff] %v7026_v1  ;;  %8690 = vst [vmem:[#allocation91_spill] sm:$0xff] %v7028_v45 }
 0x3ef   : > { %2589 = vrot.lane.b32.xlu1 %v6561_v47, %s4281_s27  ;;  %2587 = vrot.lane.b32.xlu0 %v6564_v2, %s4281_s27 }
 0x3f1   : > { %v7034_v13 = vpop.permute.xlu0 %2337  ;;  %v7036_v62 = vpop.permute.xlu1 %2339 }
 0x3f2   : > { %8691 = vst [vmem:[#allocation123_spill] sm:$0xff] %v7034_v13  ;;  %8692 = vst [vmem:[#allocation60_spill] sm:$0xff] %v7036_v62  ;;  %v3415_v62 = vld [vmem:[%s8058_s3] sm:$0xff]  ;;  %v3416_v13 = vld [vmem:[%s8058_s3 + $0x8] sm:$0xff] }
 0x3f3   : > { %2593 = vrot.lane.b32.xlu1 %v6584_v18, %s4281_s27  ;;  %2591 = vrot.lane.b32.xlu0 %v6587_v26, %s4281_s27  ;;  %v4181_v45 = vpack.c.bf16 %v3416_v13, %v3415_v62 }
 0x3f5   : > { %4182 = vmatprep.subr.bf16.mxu1 %v4181_v45 }
 0x3f6   : > { %4184 = vmatpush3.bf16.msra.mxu1 %v4181_v45 }
 0x3f7   : > { %2597 = vrot.lane.b32.xlu1 %v6607_v57, %s4281_s27  ;;  %2595 = vrot.lane.b32.xlu0 %v6610_v58, %s4281_s27 }
 0x3f9   : > { %v7042_v6 = vpop.permute.xlu0 %2341  ;;  %v7044_v1 = vpop.permute.xlu1 %2343 }
 0x3fa   : > { %8693 = vst [vmem:[#allocation5_spill] sm:$0xff] %v7042_v6  ;;  %8694 = vst [vmem:[#allocation31_spill] sm:$0xff] %v7044_v1 }
 0x3fb   : > { %2601 = vrot.lane.b32.xlu1 %v6630_v36, %s4281_s27  ;;  %2599 = vrot.lane.b32.xlu0 %v6633_v37, %s4281_s27 }
 0x3ff   : > { %2663 = vrot.lane.b32.xlu1 %v6412_v7, %s4282_s28  ;;  %2661 = vrot.lane.b32.xlu0 %v6415_v16, %s4282_s28  ;;  %v3417_v7 = vld [vmem:[%s8058_s3 + $0x10] sm:$0xff]  ;;  %v3418_v16 = vld [vmem:[%s8058_s3 + $0x18] sm:$0xff] }
 0x400   : > { %v4185_v62 = vpack.c.bf16 %v3418_v16, %v3417_v7 }
 0x401   : > { %v7056_v60 = vpop.permute.xlu0 %2345  ;;  %v7058_v6 = vpop.permute.xlu1 %2347 }
 0x402   : > { %8695 = vst [vmem:[#allocation16_spill] sm:$0xff] %v7056_v60  ;;  %8696 = vst [vmem:[#allocation138_spill] sm:$0xff] %v7058_v6  ;;  %4186 = vmatprep.subr.bf16.mxu1 %v4185_v62 }
 0x403   : > { %2764 = vrot.lane.b32.xlu1 %v6753_v0, %s4283_s29  ;;  %2762 = vrot.lane.b32.xlu0 %v6756_v53, %s4283_s29  ;;  %v3419_v0 = vld [vmem:[%s8058_s3 + $0x20] sm:$0xf] }
 0x404   : > { %4188 = vmatpush3.bf16.msra.mxu1 %v4185_v62 }
 0x405   : > { %v7070_v13 = vpop.permute.xlu0 %2461  ;;  %v7072_v6 = vpop.permute.xlu1 %2463  ;;  %4123 = vmatprep.subr.msk.mxu1 %vm1809_vm5, %v3419_v0 }
 0x407   : > { %2862 = vrot.lane.b32.xlu1 %v6424_v55, %s4284_s30  ;;  %2860 = vrot.lane.b32.xlu0 %v6427_v52, %s4284_s30 }
 0x408   : > { %4124 = vmatpush3.msk.msra.mxu1 %vm1809_vm5, %v3419_v0 }
 0x409   : > { %v7081_v53 = vpop.permute.xlu0 %2465  ;;  %v7083_v45 = vpop.permute.xlu1 %2467 }
 0x40b   : > { %2665 = vrot.lane.b32.xlu1 %v6436_v9, %s4282_s28  ;;  %2962 = vrot.lane.b32.xlu0 %v6436_v9, %s4285_s16 }
 0x40d   : > { %v7091_v55 = vpop.permute.xlu0 %2469  ;;  %v7093_v52 = vpop.permute.xlu1 %2471 }
 0x40f   : > { %2964 = vrot.lane.b32.xlu0 %v6433_v22, %s4285_s16  ;;  %3063 = vrot.lane.b32.xlu1 %v6767_v54, %s4286_s17 }
 0x411   : > { %v7099_v7 = vpop.permute.xlu0 %2473  ;;  %v7101_v16 = vpop.permute.xlu1 %2475 }
 0x413   : > { %2667 = vrot.lane.b32.xlu0 %v6433_v22, %s4282_s28  ;;  %2766 = vrot.lane.b32.xlu1 %v6767_v54, %s4283_s29 }
 0x415   : > { %v7107_v9 = vpop.permute.xlu0 %2477  ;;  %v7109_v62 = vpop.permute.xlu1 %2479 }
 0x417   : > { %3065 = vrot.lane.b32.xlu0 %v6764_v43, %s4286_s17  ;;  %2768 = vrot.lane.b32.xlu1 %v6764_v43, %s4283_s29 }
 0x419   : > { %v7115_v0 = vpop.permute.xlu0 %2481  ;;  %v7117_v60 = vpop.permute.xlu1 %2483 }
 0x41b   : > { %2864 = vrot.lane.b32.xlu0 %v6449_v41, %s4284_s30  ;;  %2866 = vrot.lane.b32.xlu1 %v6446_v31, %s4284_s30 }
 0x41d   : > { %v7123_v22 = vpop.permute.xlu0 %2485  ;;  %v7125_v54 = vpop.permute.xlu1 %2487 }
 0x41e   : > { %8697 = vst [vmem:[#allocation6_spill] sm:$0xff] %v7123_v22  ;;  %8698 = vst [vmem:[#allocation63_spill] sm:$0xff] %v7125_v54  ;;  %v8726_v54 = vld [vmem:[#allocation112_spill] sm:$0xff] }
 0x41f   : > { %2966 = vrot.lane.b32.xlu0 %v6458_v42, %s4285_s16  ;;  %2669 = vrot.lane.b32.xlu1 %v6458_v42, %s4282_s28 }
 0x421   : > { %v7131_v43 = vpop.permute.xlu0 %2489  ;;  %v7133_v1 = vpop.permute.xlu1 %2491 }
 0x422   : > { %8699 = vst [vmem:[#allocation35_spill] sm:$0xff] %v7131_v43  ;;  %8700 = vst [vmem:[#allocation93_spill] sm:$0xff] %v7133_v1 }
 0x423   : > { %2968 = vrot.lane.b32.xlu0 %v6455_v46, %s4285_s16  ;;  %3067 = vrot.lane.b32.xlu1 %v6782_v24, %s4286_s17 }
 0x425   : > { %v7139_v31 = vpop.permute.xlu0 %2493  ;;  %v7141_v41 = vpop.permute.xlu1 %2495 }
 0x426   : > { %8701 = vst [vmem:[#allocation124_spill] sm:$0xff] %v7139_v31  ;;  %8702 = vst [vmem:[#allocation62_spill] sm:$0xff] %v7141_v41 }
 0x427   : > { %2671 = vrot.lane.b32.xlu0 %v6455_v46, %s4282_s28  ;;  %2770 = vrot.lane.b32.xlu1 %v6782_v24, %s4283_s29 }
 0x429   : > { %v7147_v42 = vpop.permute.xlu0 %2497  ;;  %v7149_v43 = vpop.permute.xlu1 %2499 }
 0x42a   : > { %8703 = vst [vmem:[#allocation140_spill] sm:$0xff] %v7147_v42  ;;  %8704 = vst [vmem:[#allocation92_spill] sm:$0xff] %v7149_v43  ;;  %v8709_v43 = vld [vmem:[#allocation27_spill] sm:$0xff]  ;;  %v8723_v42 = vld [vmem:[#allocation116_spill] sm:$0xff] }
 0x42b   : > { %3069 = vrot.lane.b32.xlu0 %v6779_v38, %s4286_s17  ;;  %2772 = vrot.lane.b32.xlu1 %v6779_v38, %s4283_s29 }
 0x42d   : > { %v7155_v1 = vpop.permute.xlu0 %2501  ;;  %v7157_v31 = vpop.permute.xlu1 %2503 }
 0x42e   : > { %8705 = vst [vmem:[#allocation157_spill] sm:$0xff] %v7155_v1  ;;  %8706 = vst [vmem:[#allocation32_spill] sm:$0xff] %v7157_v31  ;;  %v8712_v31 = vld [vmem:[#allocation28_spill] sm:$0xff] }
 0x42f   : > { %2868 = vrot.lane.b32.xlu0 %v6472_v34, %s4284_s30  ;;  %2870 = vrot.lane.b32.xlu1 %v6469_v23, %s4284_s30 }
 0x431   : > { %v7163_v46 = vpop.permute.xlu0 %2505  ;;  %v7165_v24 = vpop.permute.xlu1 %2507 }
 0x432   : > { %8707 = vst [vmem:[#allocation37_spill] sm:$0xff] %v7163_v46  ;;  %8708 = vst [vmem:[#allocation139_spill] sm:$0xff] %v7165_v24 }
 0x433   : > { %2970 = vrot.lane.b32.xlu0 %v8709_v43, %s4285_s16  ;;  %2673 = vrot.lane.b32.xlu1 %v8709_v43, %s4282_s28 }
 0x435   : > { %v7171_v38 = vpop.permute.xlu0 %2509  ;;  %v7173_v1 = vpop.permute.xlu1 %2511 }
 0x436   : > { %8710 = vst [vmem:[#allocation156_spill] sm:$0xff] %v7171_v38  ;;  %8711 = vst [vmem:[#allocation65_spill] sm:$0xff] %v7173_v1 }
 0x437   : > { %2972 = vrot.lane.b32.xlu0 %v8712_v31, %s4285_s16  ;;  %3071 = vrot.lane.b32.xlu1 %v6793_v27, %s4286_s17 }
 0x439   : > { %v7179_v23 = vpop.permute.xlu0 %2513  ;;  %v7181_v34 = vpop.permute.xlu1 %2515 }
 0x43a   : > { %8713 = vst [vmem:[#allocation15_spill] sm:$0xff] %v7179_v23  ;;  %8714 = vst [vmem:[#allocation95_spill] sm:$0xff] %v7181_v34  ;;  %v8721_v34 = vld [vmem:[#allocation53_spill] sm:$0xff] }
 0x43b   : > { %2675 = vrot.lane.b32.xlu0 %v8712_v31, %s4282_s28  ;;  %2774 = vrot.lane.b32.xlu1 %v6793_v27, %s4283_s29 }
 0x43d   : > { %v7187_v43 = vpop.permute.xlu0 %2517  ;;  %v7189_v38 = vpop.permute.xlu1 %2519 }
 0x43e   : > { %8715 = vst [vmem:[#allocation125_spill] sm:$0xff] %v7187_v43  ;;  %8716 = vst [vmem:[#allocation64_spill] sm:$0xff] %v7189_v38  ;;  %v8719_v38 = vld [vmem:[#allocation29_spill] sm:$0xff] }
 0x43f   : > { %3073 = vrot.lane.b32.xlu0 %v6790_v15, %s4286_s17  ;;  %2776 = vrot.lane.b32.xlu1 %v6790_v15, %s4283_s29 }
 0x441   : > { %v7195_v1 = vpop.permute.xlu0 %2521  ;;  %v7197_v23 = vpop.permute.xlu1 %2523 }
 0x442   : > { %8717 = vst [vmem:[#allocation142_spill] sm:$0xff] %v7195_v1  ;;  %8718 = vst [vmem:[#allocation94_spill] sm:$0xff] %v7197_v23  ;;  %v8720_v23 = vld [vmem:[#allocation49_spill] sm:$0xff] }
 0x443   : > { %2872 = vrot.lane.b32.xlu0 %v6495_v20, %s4284_s30  ;;  %2874 = vrot.lane.b32.xlu1 %v6492_v40, %s4284_s30 }
 0x445   : > { %v2560_v27 = vpop.permute.xlu0 %2559  ;;  %v7203_v31 = vpop.permute.xlu1 %2561 }
 0x447   : > { %2974 = vrot.lane.b32.xlu0 %v8719_v38, %s4285_s16  ;;  %2677 = vrot.lane.b32.xlu1 %v8719_v38, %s4282_s28 }
 0x449   : > { %v7209_v15 = vpop.permute.xlu0 %2563  ;;  %v7211_v1 = vpop.permute.xlu1 %2565 }
 0x44b   : > { %2976 = vrot.lane.b32.xlu0 %v8720_v23, %s4285_s16  ;;  %3075 = vrot.lane.b32.xlu1 %v6808_v50, %s4286_s17 }
 0x44d   : > { %v7217_v40 = vpop.permute.xlu0 %2567  ;;  %v7219_v20 = vpop.permute.xlu1 %2569 }
 0x44f   : > { %2679 = vrot.lane.b32.xlu0 %v8720_v23, %s4282_s28  ;;  %2778 = vrot.lane.b32.xlu1 %v6808_v50, %s4283_s29 }
 0x451   : > { %v7225_v38 = vpop.permute.xlu0 %2571  ;;  %v7227_v43 = vpop.permute.xlu1 %2573 }
 0x453   : > { %3077 = vrot.lane.b32.xlu0 %v8721_v34, %s4286_s17  ;;  %2780 = vrot.lane.b32.xlu1 %v8721_v34, %s4283_s29 }
 0x455   : > { %v7233_v24 = vpop.permute.xlu0 %2575  ;;  %v7235_v46 = vpop.permute.xlu1 %2577 }
 0x457   : > { %2876 = vrot.lane.b32.xlu0 %v6518_v35, %s4284_s30  ;;  %2878 = vrot.lane.b32.xlu1 %v6515_v59, %s4284_s30 }
 0x459   : > { %v7241_v50 = vpop.permute.xlu0 %2579  ;;  %v7243_v23 = vpop.permute.xlu1 %2581 }
 0x45a   : > { %8722 = vst [vmem:[#allocation158_spill] sm:$0xff] %v7243_v23 }
 0x45b   : > { %2978 = vrot.lane.b32.xlu0 %v8723_v42, %s4285_s16  ;;  %2681 = vrot.lane.b32.xlu1 %v8723_v42, %s4282_s28 }
 0x45d   : > { %v7249_v34 = vpop.permute.xlu0 %2583  ;;  %v7251_v41 = vpop.permute.xlu1 %2585 }
 0x45e   : > { %8724 = vst [vmem:[#allocation33_spill] sm:$0xff] %v7249_v34  ;;  %8725 = vst [vmem:[#allocation17_spill] sm:$0xff] %v7251_v41  ;;  %v8731_v41 = vld [vmem:[#allocation85_spill] sm:$0xff] }
 0x45f   : > { %2980 = vrot.lane.b32.xlu0 %v8726_v54, %s4285_s16  ;;  %3079 = vrot.lane.b32.xlu1 %v6819_v33, %s4286_s17 }
 0x461   : > { %v7257_v59 = vpop.permute.xlu0 %2587  ;;  %v7259_v35 = vpop.permute.xlu1 %2589 }
 0x462   : > { %8727 = vst [vmem:[#allocation141_spill] sm:$0xff] %v7257_v59  ;;  %8728 = vst [vmem:[#allocation8_spill] sm:$0xff] %v7259_v35  ;;  %v8738_v35 = vld [vmem:[#allocation117_spill] sm:$0xff] }
 0x463   : > { %2683 = vrot.lane.b32.xlu0 %v8726_v54, %s4282_s28  ;;  %2782 = vrot.lane.b32.xlu1 %v6819_v33, %s4283_s29 }
 0x465   : > { %v7265_v42 = vpop.permute.xlu0 %2591  ;;  %v7267_v14 = vpop.permute.xlu1 %2593 }
 0x466   : > { %8729 = vst [vmem:[#allocation67_spill] sm:$0xff] %v7265_v42  ;;  %8730 = vst [vmem:[#allocation18_spill] sm:$0xff] %v7267_v14  ;;  %v8736_v14 = vld [vmem:[#allocation47_spill] sm:$0xff]  ;;  %v4238_v42 = vld [vmem:[#allocation3] sm:$0xff] }
 0x467   : > { %3081 = vrot.lane.b32.xlu0 %v8731_v41, %s4286_s17  ;;  %2784 = vrot.lane.b32.xlu1 %v8731_v41, %s4283_s29 }
 0x469   : > { %v7273_v34 = vpop.permute.xlu0 %2595  ;;  %v7275_v59 = vpop.permute.xlu1 %2597 }
 0x46a   : > { %8732 = vst [vmem:[#allocation97_spill] sm:$0xff] %v7273_v34  ;;  %8733 = vst [vmem:[#allocation126_spill] sm:$0xff] %v7275_v59  ;;  %v8737_v59 = vld [vmem:[#allocation45_spill] sm:$0xff] }
 0x46b   : > { %2880 = vrot.lane.b32.xlu0 %v6541_v4, %s4284_s30  ;;  %2882 = vrot.lane.b32.xlu1 %v6538_v48, %s4284_s30 }
 0x46d   : > { %v7281_v33 = vpop.permute.xlu0 %2599  ;;  %v7283_v54 = vpop.permute.xlu1 %2601 }
 0x46e   : > { %8734 = vst [vmem:[#allocation66_spill] sm:$0xff] %v7281_v33  ;;  %8735 = vst [vmem:[#allocation144_spill] sm:$0xff] %v7283_v54 }
 0x46f   : > { %2982 = vrot.lane.b32.xlu0 %v8736_v14, %s4285_s16  ;;  %2685 = vrot.lane.b32.xlu1 %v8736_v14, %s4282_s28  ;;  %v3159_v14 = vsel %vm225_vm0, %v4238_v42, %v6893_v32 }
 0x470   : > { %v3191_v22 = vsel %vm1469_vm6, %v3159_v14, %v7070_v13  ;;  %v8740_v14 = vld [vmem:[#allocation48_spill] sm:$0xff] }
 0x471   : > { %v2662_v41 = vpop.permute.xlu0 %2661  ;;  %v2664_v34 = vpop.permute.xlu1 %2663 }
 0x473   : > { %2984 = vrot.lane.b32.xlu0 %v8737_v59, %s4285_s16  ;;  %3083 = vrot.lane.b32.xlu1 %v6834_v39, %s4286_s17 }
 0x475   : > { %v2763_v4 = vpop.permute.xlu0 %2762  ;;  %v2765_v48 = vpop.permute.xlu1 %2764 }
 0x477   : > { %2687 = vrot.lane.b32.xlu0 %v8737_v59, %s4282_s28  ;;  %2786 = vrot.lane.b32.xlu1 %v6834_v39, %s4283_s29  ;;  %v3223_v59 = vsel %vm1502_vm7, %v3191_v22, %v2560_v27  ;;  %v4239_v27 = vld [vmem:[#allocation3 + $0x8] sm:$0xff] }
 0x478   : > { %v3255_v39 = vsel %vm1535_vm8, %v3223_v59, %v2662_v41  ;;  %v3160_v41 = vsel %vm225_vm0, %v4239_v27, %v6895_v11 }
 0x479   : > { %v2861_v54 = vpop.permute.xlu0 %2860  ;;  %v2863_v33 = vpop.permute.xlu1 %2862  ;;  %v3287_v23 = vsel %vm1568_vm9, %v3255_v39, %v2763_v4  ;;  %v8739_v4 = vld [vmem:[#allocation50_spill] sm:$0xff] }
 0x47a   : > { %v3319_v32 = vsel %vm1601_vm10, %v3287_v23, %v2861_v54 }
 0x47b   : > { %3085 = vrot.lane.b32.xlu0 %v8738_v35, %s4286_s17  ;;  %2788 = vrot.lane.b32.xlu1 %v8738_v35, %s4283_s29 }
 0x47d   : > { %v2963_v17 = vpop.permute.xlu0 %2962  ;;  %v2666_v29 = vpop.permute.xlu1 %2665 }
 0x47e   : > { %v3351_v35 = vsel %vm1634_vm11, %v3319_v32, %v2963_v17 }
 0x47f   : > { %2884 = vrot.lane.b32.xlu0 %v6564_v2, %s4284_s30  ;;  %2886 = vrot.lane.b32.xlu1 %v6561_v47, %s4284_s30  ;;  %v3192_v47 = vsel %vm1469_vm6, %v3160_v41, %v7072_v6 }
 0x480   : > { %v3224_v2 = vsel %vm1502_vm7, %v3192_v47, %v7203_v31 }
 0x481   : > { %v2965_v42 = vpop.permute.xlu0 %2964  ;;  %v3064_v13 = vpop.permute.xlu1 %3063  ;;  %v3256_v54 = vsel %vm1535_vm8, %v3224_v2, %v2664_v34 }
 0x482   : > { %v3383_v22 = vsel %vm1667_vm12, %v3351_v35, %v3064_v13  ;;  %v3288_v11 = vsel %vm1568_vm9, %v3256_v54, %v2765_v48  ;;  %v4240_v35 = vld [vmem:[#allocation3 + $0x18] sm:$0xff]  ;;  %v4241_v54 = vld [vmem:[#allocation3 + $0x20] sm:$0xff] }
 0x483   : > { %2986 = vrot.lane.b32.xlu0 %v8739_v4, %s4285_s16  ;;  %2689 = vrot.lane.b32.xlu1 %v8739_v4, %s4282_s28  ;;  %v3320_v59 = vsel %vm1601_vm10, %v3288_v11, %v2863_v33  ;;  %v3161_v33 = vsel %vm225_vm0, %v4240_v35, %v6919_v30  ;;  %v4242_v35 = vld [vmem:[#allocation3 + $0x30] sm:$0xff] }
 0x484   : > { %4125 = vmatprep.mubr.msk.f32.mxu1 %vm1712_vm13, %v3383_v22  ;;  %v3352_v6 = vsel %vm1634_vm11, %v3320_v59, %v2965_v42  ;;  %v8741_v42 = vld [vmem:[#allocation52_spill] sm:$0xff]  ;;  %v3193_v13 = vsel %vm1469_vm6, %v3161_v33, %v7081_v53 }
 0x485   : > { %v2668_v17 = vpop.permute.xlu0 %2667  ;;  %v2767_v23 = vpop.permute.xlu1 %2766  ;;  %v8744_v33 = vld [vmem:[#allocation84_spill] sm:$0xff] }
 0x487   : > { %2988 = vrot.lane.b32.xlu0 %v8740_v14, %s4285_s16  ;;  %3087 = vrot.lane.b32.xlu1 %v6845_v63, %s4286_s17 }
 0x489   : > { %v3066_v39 = vpop.permute.xlu0 %3065  ;;  %v2769_v32 = vpop.permute.xlu1 %2768 }
 0x48a   : > { %v3384_v31 = vsel %vm1667_vm12, %v3352_v6, %v3066_v39  ;;  %v8743_v6 = vld [vmem:[#allocation78_spill] sm:$0xff] }
 0x48b   : > { %2691 = vrot.lane.b32.xlu0 %v8740_v14, %s4282_s28  ;;  %2790 = vrot.lane.b32.xlu1 %v6845_v63, %s4283_s29  ;;  %v3225_v63 = vsel %vm1502_vm7, %v3193_v13, %v7209_v15 }
 0x48c   : > { %4126 = vmatmul.mubr.msk.f32.vlgmr.msra.gmra.mrb[0].mxu1 %vm1712_vm13, %v3384_v31  ;;  %v3257_v41 = vsel %vm1535_vm8, %v3225_v63, %v2666_v29  ;;  %v3162_v29 = vsel %vm225_vm0, %v4241_v54, %v6921_v8 }
 0x48d   : > { %v2865_v34 = vpop.permute.xlu0 %2864  ;;  %v2867_v48 = vpop.permute.xlu1 %2866  ;;  %v3289_v4 = vsel %vm1568_vm9, %v3257_v41, %v2767_v23  ;;  %v8742_v23 = vld [vmem:[#allocation51_spill] sm:$0xff] }
 0x48e   : > { %v3321_v30 = vsel %vm1601_vm10, %v3289_v4, %v2865_v34 }
 0x48f   : > { %3089 = vrot.lane.b32.xlu0 %v8741_v42, %s4286_s17  ;;  %2792 = vrot.lane.b32.xlu1 %v8741_v42, %s4283_s29 }
 0x491   : > { %v2967_v22 = vpop.permute.xlu0 %2966  ;;  %v2670_v27 = vpop.permute.xlu1 %2669 }
 0x492   : > { %v3353_v47 = vsel %vm1634_vm11, %v3321_v30, %v2967_v22 }
 0x493   : > { %2888 = vrot.lane.b32.xlu0 %v6587_v26, %s4284_s30  ;;  %2890 = vrot.lane.b32.xlu1 %v6584_v18, %s4284_s30  ;;  %v3194_v18 = vsel %vm1469_vm6, %v3162_v29, %v7083_v45  ;;  %v8746_v29 = vld [vmem:[#allocation81_spill] sm:$0xff] }
 0x494   : > { %v3226_v26 = vsel %vm1502_vm7, %v3194_v18, %v7211_v1 }
 0x495   : > { %v2969_v53 = vpop.permute.xlu0 %2968  ;;  %v3068_v2 = vpop.permute.xlu1 %3067  ;;  %v3258_v59 = vsel %vm1535_vm8, %v3226_v26, %v2668_v17 }
 0x496   : > { %v3385_v15 = vsel %vm1667_vm12, %v3353_v47, %v3068_v2  ;;  %v3290_v8 = vsel %vm1568_vm9, %v3258_v59, %v2769_v32  ;;  %v4243_v47 = vld [vmem:[#allocation3 + $0x38] sm:$0xff]  ;;  %v4244_v59 = vld [vmem:[#allocation3 + $0x48] sm:$0xff] }
 0x497   : > { %2990 = vrot.lane.b32.xlu0 %v8742_v23, %s4285_s16  ;;  %2693 = vrot.lane.b32.xlu1 %v8742_v23, %s4282_s28  ;;  %v3322_v39 = vsel %vm1601_vm10, %v3290_v8, %v2867_v48  ;;  %v3163_v48 = vsel %vm225_vm0, %v4242_v35, %v6940_v25  ;;  %v3165_v8 = vsel %vm225_vm0, %v4244_v59, %v6954_v49  ;;  %v4245_v35 = vld [vmem:[#allocation3 + $0x50] sm:$0xff] }
 0x498   : > { %4128 = vmatprep.mubr.msk.f32.mxu1 %vm1712_vm13, %v3385_v15  ;;  %v3354_v45 = vsel %vm1634_vm11, %v3322_v39, %v2969_v53  ;;  %v3195_v42 = vsel %vm1469_vm6, %v3163_v48, %v7091_v55  ;;  %v8745_v53 = vld [vmem:[#allocation108_spill] sm:$0xff]  ;;  %v3197_v39 = vsel %vm1469_vm6, %v3165_v8, %v7099_v7  ;;  %v3166_v48 = vsel %vm225_vm0, %v4245_v35, %v6956_v56 }
 0x499   : > { %v2672_v11 = vpop.permute.xlu0 %2671  ;;  %v2771_v14 = vpop.permute.xlu1 %2770 }
 0x49b   : > { %2992 = vrot.lane.b32.xlu0 %v8743_v6, %s4285_s16  ;;  %3091 = vrot.lane.b32.xlu1 %v6860_v19, %s4286_s17 }
 0x49d   : > { %v3070_v31 = vpop.permute.xlu0 %3069  ;;  %v2773_v34 = vpop.permute.xlu1 %2772 }
 0x49e   : > { %v3386_v1 = vsel %vm1667_vm12, %v3354_v45, %v3070_v31 }
 0x49f   : > { %2695 = vrot.lane.b32.xlu0 %v8743_v6, %s4282_s28  ;;  %2794 = vrot.lane.b32.xlu1 %v6860_v19, %s4283_s29  ;;  %v3227_v19 = vsel %vm1502_vm7, %v3195_v42, %v7217_v40  ;;  %v8747_v6 = vld [vmem:[#allocation115_spill] sm:$0xff] }
 0x4a0   : > { %4129 = vmatmul.mubr.msk.f32.gmra.mrb[2].mxu1 %vm1712_vm13, %v3386_v1  ;;  %v3259_v22 = vsel %vm1535_vm8, %v3227_v19, %v2670_v27  ;;  %v3164_v27 = vsel %vm225_vm0, %v4243_v47, %v6942_v28  ;;  %v8750_v47 = vld [vmem:[#allocation55_spill] sm:$0xff] }
 0x4a1   : > { %v2869_v17 = vpop.permute.xlu0 %2868  ;;  %v2871_v32 = vpop.permute.xlu1 %2870  ;;  %v3291_v41 = vsel %vm1568_vm9, %v3259_v22, %v2771_v14 }
 0x4a2   : > { %v3323_v25 = vsel %vm1601_vm10, %v3291_v41, %v2869_v17 }
 0x4a3   : > { %3093 = vrot.lane.b32.xlu0 %v8744_v33, %s4286_s17  ;;  %2796 = vrot.lane.b32.xlu1 %v8744_v33, %s4283_s29  ;;  %v8748_v33 = vld [vmem:[#allocation111_spill] sm:$0xff] }
 0x4a5   : > { %v2971_v13 = vpop.permute.xlu0 %2970  ;;  %v2674_v63 = vpop.permute.xlu1 %2673 }
 0x4a6   : > { %v3355_v4 = vsel %vm1634_vm11, %v3323_v25, %v2971_v13 }
 0x4a7   : > { %2892 = vrot.lane.b32.xlu0 %v6610_v58, %s4284_s30  ;;  %2894 = vrot.lane.b32.xlu1 %v6607_v57, %s4284_s30  ;;  %v3196_v57 = vsel %vm1469_vm6, %v3164_v27, %v7093_v52 }
 0x4a8   : > { %v3228_v58 = vsel %vm1502_vm7, %v3196_v57, %v7219_v20 }
 0x4a9   : > { %v2973_v55 = vpop.permute.xlu0 %2972  ;;  %v3072_v30 = vpop.permute.xlu1 %3071  ;;  %v3260_v54 = vsel %vm1535_vm8, %v3228_v58, %v2672_v11 }
 0x4aa   : > { %v3387_v40 = vsel %vm1667_vm12, %v3355_v4, %v3072_v30  ;;  %v3292_v28 = vsel %vm1568_vm9, %v3260_v54, %v2773_v34  ;;  %v4246_v30 = vld [vmem:[#allocation3 + $0x60] sm:$0xff] }
 0x4ab   : > { %2994 = vrot.lane.b32.xlu0 %v8745_v53, %s4285_s16  ;;  %2697 = vrot.lane.b32.xlu1 %v8745_v53, %s4282_s28  ;;  %v3324_v23 = vsel %vm1601_vm10, %v3292_v28, %v2871_v32 }
 0x4ac   : > { %4131 = vmatprep.mubr.msk.f32.mxu1 %vm1712_vm13, %v3387_v40  ;;  %v3356_v52 = vsel %vm1634_vm11, %v3324_v23, %v2973_v55  ;;  %v3167_v40 = vsel %vm225_vm0, %v4246_v30, %v6962_v5 }
 0x4ad   : > { %v2676_v2 = vpop.permute.xlu0 %2675  ;;  %v2775_v15 = vpop.permute.xlu1 %2774  ;;  %v3199_v27 = vsel %vm1469_vm6, %v3167_v40, %v7107_v9  ;;  %v4254_v40 = vld [vmem:[#allocation3 + $0x90] sm:$0xff] }
 0x4af   : > { %2996 = vrot.lane.b32.xlu0 %v8746_v29, %s4285_s16  ;;  %3095 = vrot.lane.b32.xlu1 %v6871_v51, %s4286_s17 }
 0x4b1   : > { %v3074_v18 = vpop.permute.xlu0 %3073  ;;  %v2777_v26 = vpop.permute.xlu1 %2776 }
 0x4b2   : > { %v3388_v20 = vsel %vm1667_vm12, %v3356_v52, %v3074_v18  ;;  %v7495_v52 = vld [vmem:[#allocation3 + $0x128] sm:$0xff]  ;;  %v8751_v18 = vld [vmem:[#allocation82_spill] sm:$0xff] }
 0x4b3   : > { %2699 = vrot.lane.b32.xlu0 %v8746_v29, %s4282_s28  ;;  %2798 = vrot.lane.b32.xlu1 %v6871_v51, %s4283_s29  ;;  %v3229_v51 = vsel %vm1502_vm7, %v3197_v39, %v7225_v38  ;;  %v4248_v29 = vld [vmem:[#allocation3 + $0x68] sm:$0xff] }
 0x4b4   : > { %4132 = vmatmul.mubr.msk.f32.gmra.mrb[4].mxu1 %vm1712_vm13, %v3388_v20  ;;  %v3261_v34 = vsel %vm1535_vm8, %v3229_v51, %v2674_v63  ;;  %v8749_v63 = vld [vmem:[#allocation80_spill] sm:$0xff]  ;;  %v3168_v23 = vsel %vm225_vm0, %v4248_v29, %v6964_v10  ;;  %v8752_v51 = vld [vmem:[#allocation133_spill] sm:$0xff] }
 0x4b5   : > { %v2873_v11 = vpop.permute.xlu0 %2872  ;;  %v2875_v14 = vpop.permute.xlu1 %2874  ;;  %v3293_v1 = vsel %vm1568_vm9, %v3261_v34, %v2775_v15  ;;  %v7484_v15 = vld [vmem:[#allocation3 + $0x120] sm:$0xff]  ;;  %v4250_v34 = vld [vmem:[#allocation3 + $0x78] sm:$0xff] }
 0x4b6   : > { %v3325_v49 = vsel %vm1601_vm10, %v3293_v1, %v2873_v11  ;;  %v3169_v1 = vsel %vm225_vm0, %v4250_v34, %v6970_v21  ;;  %v7600_v34 = vld [vmem:[#allocation3 + $0x150] sm:$0xff] }
 0x4b7   : > { %3097 = vrot.lane.b32.xlu0 %v8747_v6, %s4286_s17  ;;  %2800 = vrot.lane.b32.xlu1 %v8747_v6, %s4283_s29 }
 0x4b9   : > { %v2975_v45 = vpop.permute.xlu0 %2974  ;;  %v2678_v31 = vpop.permute.xlu1 %2677 }
 0x4ba   : > { %v3357_v17 = vsel %vm1634_vm11, %v3325_v49, %v2975_v45  ;;  %v3201_v49 = vsel %vm1469_vm6, %v3169_v1, %v7115_v0 }
 0x4bb   : > { %2896 = vrot.lane.b32.xlu0 %v6633_v37, %s4284_s30  ;;  %2898 = vrot.lane.b32.xlu1 %v6630_v36, %s4284_s30  ;;  %v3198_v36 = vsel %vm1469_vm6, %v3166_v48, %v7101_v16 }
 0x4bc   : > { %v3230_v37 = vsel %vm1502_vm7, %v3198_v36, %v7227_v43 }
 0x4bd   : > { %v2977_v7 = vpop.permute.xlu0 %2976  ;;  %v3076_v32 = vpop.permute.xlu1 %3075  ;;  %v3262_v13 = vsel %vm1535_vm8, %v3230_v37, %v2676_v2  ;;  %v7541_v37 = vld [vmem:[#allocation3 + $0x138] sm:$0xff] }
 0x4be   : > { %v3389_v38 = vsel %vm1667_vm12, %v3357_v17, %v3076_v32  ;;  %v3294_v56 = vsel %vm1568_vm9, %v3262_v13, %v2777_v26  ;;  %v3200_v26 = vsel %vm1469_vm6, %v3168_v23, %v7109_v62  ;;  %v3233_v17 = vsel %vm1502_vm7, %v3201_v49, %v7241_v50 }
 0x4bf   : > { %2998 = vrot.lane.b32.xlu0 %v8748_v33, %s4285_s16  ;;  %2701 = vrot.lane.b32.xlu1 %v8748_v33, %s4282_s28  ;;  %v3326_v22 = vsel %vm1601_vm10, %v3294_v56, %v2875_v14  ;;  %v3232_v20 = vsel %vm1502_vm7, %v3200_v26, %v7235_v46  ;;  %v4251_v33 = vld [vmem:[#allocation3 + $0x80] sm:$0xff] }
 0x4c0   : > { %4134 = vmatprep.mubr.msk.f32.mxu1 %vm1712_vm13, %v3389_v38  ;;  %v3358_v16 = vsel %vm1634_vm11, %v3326_v22, %v2977_v7  ;;  %v3170_v36 = vsel %vm225_vm0, %v4251_v33, %v6972_v44  ;;  %v7554_v22 = vld [vmem:[#allocation3 + $0x140] sm:$0xff]  ;;  %v8766_v33 = vld [vmem:[#allocation35_spill] sm:$0xff] }
 0x4c1   : > { %v2680_v42 = vpop.permute.xlu0 %2679  ;;  %v2779_v19 = vpop.permute.xlu1 %2778 }
 0x4c2   : > { %v3264_v10 = vsel %vm1535_vm8, %v3232_v20, %v2680_v42  ;;  %v8753_v42 = vld [vmem:[#allocation158_spill] sm:$0xff] }
 0x4c3   : > { %3000 = vrot.lane.b32.xlu0 %v8749_v63, %s4285_s16  ;;  %3099 = vrot.lane.b32.xlu1 %v6886_v61, %s4286_s17 }
 0x4c5   : > { %v3078_v41 = vpop.permute.xlu0 %3077  ;;  %v2781_v25 = vpop.permute.xlu1 %2780 }
 0x4c6   : > { %v3390_v43 = vsel %vm1667_vm12, %v3358_v16, %v3078_v41  ;;  %v3296_v59 = vsel %vm1568_vm9, %v3264_v10, %v2781_v25  ;;  %v8754_v16 = vld [vmem:[#allocation83_spill] sm:$0xff] }
 0x4c7   : > { %2703 = vrot.lane.b32.xlu0 %v8749_v63, %s4282_s28  ;;  %2802 = vrot.lane.b32.xlu1 %v6886_v61, %s4283_s29  ;;  %v3231_v61 = vsel %vm1502_vm7, %v3199_v27, %v7233_v24 }
 0x4c8   : > { %4135 = vmatmul.mubr.msk.f32.gmra.mrb[6].mxu1 %vm1712_vm13, %v3390_v43  ;;  %v3263_v58 = vsel %vm1535_vm8, %v3231_v61, %v2678_v31  ;;  %v8756_v61 = vld [vmem:[#allocation136_spill] sm:$0xff] }
 0x4c9   : > { %v2877_v4 = vpop.permute.xlu0 %2876  ;;  %v2879_v55 = vpop.permute.xlu1 %2878  ;;  %v3295_v2 = vsel %vm1568_vm9, %v3263_v58, %v2779_v19 }
 0x4ca   : > { %v3327_v5 = vsel %vm1601_vm10, %v3295_v2, %v2877_v4  ;;  %v3328_v8 = vsel %vm1601_vm10, %v3296_v59, %v2879_v55  ;;  %v8759_v2 = vld [vmem:[#allocation33_spill] sm:$0xff]  ;;  %v8761_v59 = vld [vmem:[#allocation87_spill] sm:$0xff] }
 0x4cb   : > { %3101 = vrot.lane.b32.xlu0 %v8750_v47, %s4286_s17  ;;  %2804 = vrot.lane.b32.xlu1 %v8750_v47, %s4283_s29  ;;  %v8755_v47 = vld [vmem:[#allocation57_spill] sm:$0xff] }
 0x4cc   : > { %v3171_v27 = vsel %vm225_vm0, %v4254_v40, %v8755_v47  ;;  %v8771_v47 = vld [vmem:[#allocation93_spill] sm:$0xff] }
 0x4cd   : > { %v2979_v53 = vpop.permute.xlu0 %2978  ;;  %v2682_v57 = vpop.permute.xlu1 %2681 }
 0x4ce   : > { %v3359_v9 = vsel %vm1634_vm11, %v3327_v5, %v2979_v53  ;;  %v3265_v38 = vsel %vm1535_vm8, %v3233_v17, %v2682_v57  ;;  %v8757_v53 = vld [vmem:[#allocation119_spill] sm:$0xff]  ;;  %v8758_v57 = vld [vmem:[#allocation6_spill] sm:$0xff] }
 0x4cf   : > { %2900 = vrot.lane.b32.xlu0 %v7484_v15, %s4284_s30  ;;  %2603 = vrot.lane.b32.xlu1 %v7484_v15, %s4281_s27  ;;  %v3203_v58 = vsel %vm1469_vm6, %v3171_v27, %v8758_v57 }
 0x4d0   : > { %v3235_v5 = vsel %vm1502_vm7, %v3203_v58, %v8759_v2 }
 0x4d1   : > { %v2981_v54 = vpop.permute.xlu0 %2980  ;;  %v3080_v24 = vpop.permute.xlu1 %3079 }
 0x4d2   : > { %v3391_v28 = vsel %vm1667_vm12, %v3359_v9, %v3080_v24  ;;  %v3360_v62 = vsel %vm1634_vm11, %v3328_v8, %v2981_v54  ;;  %v8762_v8 = vld [vmem:[#allocation63_spill] sm:$0xff] }
 0x4d3   : > { %2902 = vrot.lane.b32.xlu0 %v7495_v52, %s4284_s30  ;;  %3002 = vrot.lane.b32.xlu1 %v8751_v18, %s4285_s16 }
 0x4d4   : > { %4137 = vmatprep.mubr.msk.f32.mxu1 %vm1712_vm13, %v3391_v28 }
 0x4d5   : > { %v2684_v11 = vpop.permute.xlu0 %2683  ;;  %v2783_v14 = vpop.permute.xlu1 %2782 }
 0x4d6   : > { %v3297_v35 = vsel %vm1568_vm9, %v3265_v38, %v2783_v14  ;;  %v8760_v14 = vld [vmem:[#allocation89_spill] sm:$0xff] }
 0x4d7   : > { %2605 = vrot.lane.b32.xlu0 %v7495_v52, %s4281_s27  ;;  %2705 = vrot.lane.b32.xlu1 %v8751_v18, %s4282_s28  ;;  %v7609_v38 = vld [vmem:[#allocation3 + $0x158] sm:$0xff] }
 0x4d9   : > { %v3082_v6 = vpop.permute.xlu0 %3081  ;;  %v2785_v39 = vpop.permute.xlu1 %2784 }
 0x4da   : > { %v3392_v46 = vsel %vm1667_vm12, %v3360_v62, %v3082_v6  ;;  %v8763_v6 = vld [vmem:[#allocation17_spill] sm:$0xff] }
 0x4db   : > { %3004 = vrot.lane.b32.xlu0 %v8752_v51, %s4285_s16  ;;  %3103 = vrot.lane.b32.xlu1 %v6901_v3, %s4286_s17 }
 0x4dc   : > { %4138 = vmatmul.mubr.msk.f32.gmra.mrb[8].mxu1 %vm1712_vm13, %v3392_v46 }
 0x4dd   : > { %v2881_v45 = vpop.permute.xlu0 %2880  ;;  %v2883_v31 = vpop.permute.xlu1 %2882 }
 0x4df   : > { %2707 = vrot.lane.b32.xlu0 %v8752_v51, %s4282_s28  ;;  %2806 = vrot.lane.b32.xlu1 %v6901_v3, %s4283_s29  ;;  %v3329_v3 = vsel %vm1601_vm10, %v3297_v35, %v2881_v45  ;;  %v8764_v35 = vld [vmem:[#allocation114_spill] sm:$0xff] }
 0x4e1   : > { %v2983_v7 = vpop.permute.xlu0 %2982  ;;  %v2686_v32 = vpop.permute.xlu1 %2685 }
 0x4e2   : > { %v3361_v21 = vsel %vm1634_vm11, %v3329_v3, %v2983_v7  ;;  %v3267_v24 = vsel %vm1535_vm8, %v3235_v5, %v2686_v32 }
 0x4e3   : > { %3105 = vrot.lane.b32.xlu0 %v6898_v12, %s4286_s17  ;;  %2808 = vrot.lane.b32.xlu1 %v6898_v12, %s4283_s29  ;;  %v3202_v12 = vsel %vm1469_vm6, %v3170_v36, %v7117_v60 }
 0x4e4   : > { %v3234_v19 = vsel %vm1502_vm7, %v3202_v12, %v8753_v42  ;;  %v8767_v12 = vld [vmem:[#allocation141_spill] sm:$0xff] }
 0x4e5   : > { %v2985_v0 = vpop.permute.xlu0 %2984  ;;  %v3084_v48 = vpop.permute.xlu1 %3083  ;;  %v3266_v44 = vsel %vm1535_vm8, %v3234_v19, %v2684_v11  ;;  %v4255_v11 = vld [vmem:[#allocation3 + $0x98] sm:$0xff] }
 0x4e6   : > { %v3393_v50 = vsel %vm1667_vm12, %v3361_v21, %v3084_v48  ;;  %v3298_v63 = vsel %vm1568_vm9, %v3266_v44, %v2785_v39  ;;  %v3172_v10 = vsel %vm225_vm0, %v4255_v11, %v8760_v14  ;;  %v8765_v48 = vld [vmem:[#allocation121_spill] sm:$0xff]  ;;  %v4261_v11 = vld [vmem:[#allocation3 + $0xc0] sm:$0xff]  ;;  %v8774_v14 = vld [vmem:[#allocation88_spill] sm:$0xff] }
 0x4e7   : > { %2904 = vrot.lane.b32.xlu0 %v7541_v37, %s4284_s30  ;;  %2607 = vrot.lane.b32.xlu1 %v7541_v37, %s4281_s27  ;;  %v3330_v60 = vsel %vm1601_vm10, %v3298_v63, %v2883_v31  ;;  %v3204_v62 = vsel %vm1469_vm6, %v3172_v10, %v8762_v8  ;;  %v8768_v63 = vld [vmem:[#allocation110_spill] sm:$0xff]  ;;  %v3175_v10 = vsel %vm225_vm0, %v4261_v11, %v8774_v14  ;;  %v8775_v8 = vld [vmem:[#allocation113_spill] sm:$0xff] }
 0x4e8   : > { %4140 = vmatprep.mubr.msk.f32.mxu1 %vm1712_vm13, %v3393_v50  ;;  %v3362_v41 = vsel %vm1634_vm11, %v3330_v60, %v2985_v0  ;;  %v3236_v39 = vsel %vm1502_vm7, %v3204_v62, %v8763_v6  ;;  %v4258_v0 = vld [vmem:[#allocation3 + $0xa8] sm:$0xff]  ;;  %v8776_v62 = vld [vmem:[#allocation124_spill] sm:$0xff] }
 0x4e9   : > { %v2688_v13 = vpop.permute.xlu0 %2687  ;;  %v2787_v56 = vpop.permute.xlu1 %2786  ;;  %v3173_v50 = vsel %vm225_vm0, %v4258_v0, %v8765_v48  ;;  %v3207_v6 = vsel %vm1469_vm6, %v3175_v10, %v8776_v62  ;;  %v8779_v48 = vld [vmem:[#allocation135_spill] sm:$0xff] }
 0x4ea   : > { %v3299_v28 = vsel %vm1568_vm9, %v3267_v24, %v2787_v56  ;;  %v3268_v45 = vsel %vm1535_vm8, %v3236_v39, %v2688_v13  ;;  %v3205_v36 = vsel %vm1469_vm6, %v3173_v50, %v8766_v33  ;;  %v8777_v39 = vld [vmem:[#allocation67_spill] sm:$0xff]  ;;  %v8780_v50 = vld [vmem:[#allocation137_spill] sm:$0xff]  ;;  %v8781_v33 = vld [vmem:[#allocation62_spill] sm:$0xff] }
 0x4eb   : > { %2906 = vrot.lane.b32.xlu0 %v7554_v22, %s4284_s30  ;;  %3006 = vrot.lane.b32.xlu1 %v8754_v16, %s4285_s16  ;;  %v3237_v42 = vsel %vm1502_vm7, %v3205_v36, %v8767_v12  ;;  %v8782_v12 = vld [vmem:[#allocation18_spill] sm:$0xff] }
 0x4ed   : > { %v3086_v25 = vpop.permute.xlu0 %3085  ;;  %v2789_v43 = vpop.permute.xlu1 %2788 }
 0x4ee   : > { %v3394_v4 = vsel %vm1667_vm12, %v3362_v41, %v3086_v25  ;;  %v3300_v31 = vsel %vm1568_vm9, %v3268_v45, %v2789_v43 }
 0x4ef   : > { %2609 = vrot.lane.b32.xlu0 %v7554_v22, %s4281_s27  ;;  %2709 = vrot.lane.b32.xlu1 %v8754_v16, %s4282_s28  ;;  %v8769_v16 = vld [vmem:[#allocation86_spill] sm:$0xff] }
 0x4f0   : > { %4141 = vmatmul.mubr.msk.f32.gmra.mrb[10].mxu1 %vm1712_vm13, %v3394_v4 }
 0x4f1   : > { %v2885_v55 = vpop.permute.xlu0 %2884  ;;  %v2887_v30 = vpop.permute.xlu1 %2886 }
 0x4f2   : > { %v3331_v29 = vsel %vm1601_vm10, %v3299_v28, %v2885_v55  ;;  %v3332_v1 = vsel %vm1601_vm10, %v3300_v31, %v2887_v30  ;;  %v4259_v55 = vld [vmem:[#allocation3 + $0xb0] sm:$0xff] }
 0x4f3   : > { %3008 = vrot.lane.b32.xlu0 %v8756_v61, %s4285_s16  ;;  %3107 = vrot.lane.b32.xlu1 %v8757_v53, %s4286_s17  ;;  %v8770_v30 = vld [vmem:[#allocation56_spill] sm:$0xff] }
 0x4f4   : > { %v3174_v40 = vsel %vm225_vm0, %v4259_v55, %v8770_v30  ;;  %v2152_v55 = vld [vmem:[#allocation3 + $0x188] sm:$0xff] }
 0x4f5   : > { %v2987_v9 = vpop.permute.xlu0 %2986  ;;  %v2690_v54 = vpop.permute.xlu1 %2689  ;;  %v3206_v27 = vsel %vm1469_vm6, %v3174_v40, %v8771_v47  ;;  %v2758_v62 = vrot.slane %v2152_v55, 2 }
 0x4f6   : > { %v3363_v23 = vsel %vm1634_vm11, %v3331_v29, %v2987_v9  ;;  %v3269_v56 = vsel %vm1535_vm8, %v3237_v42, %v2690_v54  ;;  %v8773_v9 = vld [vmem:[#allocation54_spill] sm:$0xff] }
 0x4f7   : > { %2711 = vrot.lane.b32.xlu0 %v8756_v61, %s4282_s28  ;;  %2810 = vrot.lane.b32.xlu1 %v8757_v53, %s4283_s29  ;;  %v8772_v61 = vld [vmem:[#allocation8_spill] sm:$0xff] }
 0x4f8   : > { %v3238_v53 = vsel %vm1502_vm7, %v3206_v27, %v8772_v61  ;;  %v2657_v27 = vrot.slane %v2152_v55, 1  ;;  %v4264_v61 = vld [vmem:[#allocation3 + $0xd8] sm:$0xff] }
 0x4f9   : > { %v2989_v18 = vpop.permute.xlu0 %2988  ;;  %v3088_v26 = vpop.permute.xlu1 %3087 }
 0x4fa   : > { %v3395_v20 = vsel %vm1667_vm12, %v3363_v23, %v3088_v26  ;;  %v3364_v49 = vsel %vm1634_vm11, %v3332_v1, %v2989_v18  ;;  %v7655_v18 = vld [vmem:[#allocation3 + $0x168] sm:$0xff] }
 0x4fb   : > { %3109 = vrot.lane.b32.xlu0 %v8761_v59, %s4286_s17  ;;  %2812 = vrot.lane.b32.xlu1 %v8761_v59, %s4283_s29  ;;  %v7664_v59 = vld [vmem:[#allocation3 + $0x170] sm:$0xff] }
 0x4fc   : > { %4143 = vmatprep.mubr.msk.f32.mxu1 %vm1712_vm13, %v3395_v20 }
 0x4fd   : > { %v2692_v46 = vpop.permute.xlu0 %2691  ;;  %v2791_v51 = vpop.permute.xlu1 %2790 }
 0x4fe   : > { %v3301_v44 = vsel %vm1568_vm9, %v3269_v56, %v2791_v51  ;;  %v3270_v2 = vsel %vm1535_vm8, %v3238_v53, %v2692_v46  ;;  %v3239_v46 = vsel %vm1502_vm7, %v3207_v6, %v8777_v39  ;;  %v8784_v53 = vld [vmem:[#allocation59_spill] sm:$0xff] }
 0x4ff   : > { %2908 = vrot.lane.b32.xlu0 %v7600_v34, %s4284_s30  ;;  %2611 = vrot.lane.b32.xlu1 %v7600_v34, %s4281_s27 }
 0x501   : > { %v3090_v17 = vpop.permute.xlu0 %3089  ;;  %v2793_v7 = vpop.permute.xlu1 %2792 }
 0x502   : > { %v3396_v32 = vsel %vm1667_vm12, %v3364_v49, %v3090_v17  ;;  %v3302_v5 = vsel %vm1568_vm9, %v3270_v2, %v2793_v7 }
 0x503   : > { %2910 = vrot.lane.b32.xlu0 %v7609_v38, %s4284_s30  ;;  %3010 = vrot.lane.b32.xlu1 %v8764_v35, %s4285_s16 }
 0x504   : > { %4144 = vmatmul.mubr.msk.f32.gmra.mrb[12].mxu1 %vm1712_vm13, %v3396_v32 }
 0x505   : > { %v2889_v3 = vpop.permute.xlu0 %2888  ;;  %v2891_v21 = vpop.permute.xlu1 %2890 }
 0x506   : > { %v3333_v60 = vsel %vm1601_vm10, %v3301_v44, %v2889_v3  ;;  %v3334_v54 = vsel %vm1601_vm10, %v3302_v5, %v2891_v21  ;;  %v4263_v3 = vld [vmem:[#allocation3 + $0xc8] sm:$0xff]  ;;  %v8778_v21 = vld [vmem:[#allocation120_spill] sm:$0xff]  ;;  %v8786_v5 = vld [vmem:[#allocation97_spill] sm:$0xff] }
 0x507   : > { %2613 = vrot.lane.b32.xlu0 %v7609_v38, %s4281_s27  ;;  %2713 = vrot.lane.b32.xlu1 %v8764_v35, %s4282_s28  ;;  %v3176_v0 = vsel %vm225_vm0, %v4263_v3, %v8778_v21 }
 0x508   : > { %v3208_v36 = vsel %vm1469_vm6, %v3176_v0, %v8781_v33 }
 0x509   : > { %v2991_v19 = vpop.permute.xlu0 %2990  ;;  %v2694_v13 = vpop.permute.xlu1 %2693  ;;  %v3240_v42 = vsel %vm1502_vm7, %v3208_v36, %v8782_v12 }
 0x50a   : > { %v3365_v41 = vsel %vm1634_vm11, %v3333_v60, %v2991_v19  ;;  %v3271_v31 = vsel %vm1535_vm8, %v3239_v46, %v2694_v13  ;;  %v4265_v46 = vld [vmem:[#allocation3 + $0xe0] sm:$0xff] }
 0x50b   : > { %3012 = vrot.lane.b32.xlu0 %v8768_v63, %s4285_s16  ;;  %3111 = vrot.lane.b32.xlu1 %v8769_v16, %s4286_s17 }
 0x50d   : > { %v2993_v25 = vpop.permute.xlu0 %2992  ;;  %v3092_v43 = vpop.permute.xlu1 %3091 }
 0x50e   : > { %v3397_v4 = vsel %vm1667_vm12, %v3365_v41, %v3092_v43  ;;  %v3366_v24 = vsel %vm1634_vm11, %v3334_v54, %v2993_v25  ;;  %v8783_v43 = vld [vmem:[#allocation118_spill] sm:$0xff] }
 0x50f   : > { %2715 = vrot.lane.b32.xlu0 %v8768_v63, %s4282_s28  ;;  %2814 = vrot.lane.b32.xlu1 %v8769_v16, %s4283_s29 }
 0x510   : > { %4146 = vmatprep.mubr.msk.f32.mxu1 %vm1712_vm13, %v3397_v4  ;;  %v2151_v4 = vld [vmem:[#allocation3 + $0x180] sm:$0xff] }
 0x511   : > { %v2696_v57 = vpop.permute.xlu0 %2695  ;;  %v2795_v58 = vpop.permute.xlu1 %2794  ;;  %v2656_v47 = vrot.slane %v2151_v4, 1 }
 0x512   : > { %v3303_v1 = vsel %vm1568_vm9, %v3271_v31, %v2795_v58  ;;  %v3272_v56 = vsel %vm1535_vm8, %v3240_v42, %v2696_v57  ;;  %v3177_v57 = vsel %vm225_vm0, %v4264_v61, %v8784_v53  ;;  %v8785_v58 = vld [vmem:[#allocation140_spill] sm:$0xff] }
 0x513   : > { %3113 = vrot.lane.b32.xlu0 %v8773_v9, %s4286_s17  ;;  %2816 = vrot.lane.b32.xlu1 %v8773_v9, %s4283_s29  ;;  %v3209_v2 = vsel %vm1469_vm6, %v3177_v57, %v8785_v58  ;;  %v8788_v31 = vld [vmem:[#allocation92_spill] sm:$0xff] }
 0x514   : > { %v3241_v9 = vsel %vm1502_vm7, %v3209_v2, %v8786_v5  ;;  %v8792_v5 = vld [vmem:[#allocation66_spill] sm:$0xff] }
 0x515   : > { %v3094_v28 = vpop.permute.xlu0 %3093  ;;  %v2797_v29 = vpop.permute.xlu1 %2796 }
 0x516   : > { %v3398_v23 = vsel %vm1667_vm12, %v3366_v24, %v3094_v28  ;;  %v3304_v44 = vsel %vm1568_vm9, %v3272_v56, %v2797_v29  ;;  %v2658_v29 = vsel %vm481_vm3, %v2656_v47, %v2657_v27  ;;  %v2154_v56 = vld [vmem:[#allocation3 + $0x198] sm:$0xff] }
 0x517   : > { %2912 = vrot.lane.b32.xlu0 %v7655_v18, %s4284_s30  ;;  %2615 = vrot.lane.b32.xlu1 %v7655_v18, %s4281_s27  ;;  %v8791_v47 = vld [vmem:[#allocation157_spill] sm:$0xff]  ;;  %v3058_v61 = vrot.slane %v2154_v56, 2 }
 0x518   : > { %4147 = vmatmul.mubr.msk.f32.gmra.mrb[14].mxu1 %vm1712_vm13, %v3398_v23 }
 0x519   : > { %v2893_v26 = vpop.permute.xlu0 %2892  ;;  %v2895_v20 = vpop.permute.xlu1 %2894 }
 0x51a   : > { %v3335_v49 = vsel %vm1601_vm10, %v3303_v1, %v2893_v26  ;;  %v3336_v63 = vsel %vm1601_vm10, %v3304_v44, %v2895_v20  ;;  %v2153_v26 = vld [vmem:[#allocation3 + $0x190] sm:$0x3]  ;;  %v2155_v44 = vld [vmem:[#allocation3 + $0x1a0] sm:$0xff] }
 0x51b   : > { %2914 = vrot.lane.b32.xlu0 %v7664_v59, %s4284_s30  ;;  %3014 = vrot.lane.b32.xlu1 %v8775_v8, %s4285_s16  ;;  %v2659_v39 = vrot.slane %v2153_v26, 1  ;;  %v2760_v42 = vrot.slane %v2153_v26, 2  ;;  %v3059_v53 = vrot.slane %v2155_v44, 2 }
 0x51d   : > { %v2995_v51 = vpop.permute.xlu0 %2994  ;;  %v2698_v45 = vpop.permute.xlu1 %2697  ;;  %v2660_v3 = vsel %vm481_vm3, %v2657_v27, %v2659_v39 }
 0x51e   : > { %v3367_v17 = vsel %vm1634_vm11, %v3335_v49, %v2995_v51  ;;  %v3273_v28 = vsel %vm1535_vm8, %v3241_v9, %v2698_v45  ;;  %v8787_v51 = vld [vmem:[#allocation90_spill] sm:$0xff] }
 0x51f   : > { %2617 = vrot.lane.b32.xlu0 %v7664_v59, %s4281_s27  ;;  %2717 = vrot.lane.b32.xlu1 %v8775_v8, %s4282_s28  ;;  %v2757_v8 = vrot.slane %v2151_v4, 2  ;;  %v3178_v45 = vsel %vm225_vm0, %v4265_v46, %v8787_v51  ;;  %v8789_v49 = vld [vmem:[#allocation126_spill] sm:$0xff]  ;;  %v8794_v46 = vld [vmem:[#allocation32_spill] sm:$0xff] }
 0x520   : > { %v3210_v1 = vsel %vm1469_vm6, %v3178_v45, %v8788_v31  ;;  %v8795_v45 = vld [vmem:[#allocation144_spill] sm:$0xff] }
 0x521   : > { %v2997_v7 = vpop.permute.xlu0 %2996  ;;  %v3096_v32 = vpop.permute.xlu1 %3095  ;;  %v2759_v21 = vsel %vm658_vm4, %v2757_v8, %v2758_v62 }
 0x522   : > { %v3399_v35 = vsel %vm1667_vm12, %v3367_v17, %v3096_v32  ;;  %v3368_v16 = vsel %vm1634_vm11, %v3336_v63, %v2997_v7  ;;  %v3242_v17 = vsel %vm1502_vm7, %v3210_v1, %v8789_v49  ;;  %v2156_v63 = vld [vmem:[#allocation3 + $0x1a8] sm:$0x3] }
 0x523   : > { %3016 = vrot.lane.b32.xlu0 %v8779_v48, %s4285_s16  ;;  %3115 = vrot.lane.b32.xlu1 %v8780_v50, %s4286_s17  ;;  %v3061_v2 = vrot.slane %v2156_v63, 2 }
 0x524   : > { %4149 = vmatprep.mubr.msk.f32.mxu1 %vm1712_vm13, %v3399_v35 }
 0x525   : > { %v2700_v19 = vpop.permute.xlu0 %2699  ;;  %v2799_v13 = vpop.permute.xlu1 %2798 }
 0x526   : > { %v3305_v23 = vsel %vm1568_vm9, %v3273_v28, %v2799_v13  ;;  %v3274_v35 = vsel %vm1535_vm8, %v3242_v17, %v2700_v19 }
 0x527   : > { %2719 = vrot.lane.b32.xlu0 %v8779_v48, %s4282_s28  ;;  %2818 = vrot.lane.b32.xlu1 %v8780_v50, %s4283_s29 }
 0x529   : > { %v3098_v60 = vpop.permute.xlu0 %3097  ;;  %v2801_v41 = vpop.permute.xlu1 %2800 }
 0x52a   : > { %v3400_v25 = vsel %vm1667_vm12, %v3368_v16, %v3098_v60  ;;  %v3306_v0 = vsel %vm1568_vm9, %v3274_v35, %v2801_v41  ;;  %v2761_v16 = vsel %vm658_vm4, %v2758_v62, %v2760_v42  ;;  %v2957_v60 = vrot.slane %v2154_v56, 1 }
 0x52b   : > { %3117 = vrot.lane.b32.xlu0 %v8783_v43, %s4286_s17  ;;  %2820 = vrot.lane.b32.xlu1 %v8783_v43, %s4283_s29  ;;  %v2958_v41 = vrot.slane %v2155_v44, 1 }
 0x52c   : > { %4150 = vmatmul.mubr.msk.f32.gmra.mrb[16].mxu1 %vm1712_vm13, %v3400_v25  ;;  %v2960_v25 = vrot.slane %v2156_v63, 1  ;;  %v3752_v63 = vld [vmem:[%s4507_s24 + $0x8] sm:$0xff] }
 0x52d   : > { %v2897_v30 = vpop.permute.xlu0 %2896  ;;  %v2899_v40 = vpop.permute.xlu1 %2898  ;;  %v2959_v57 = vsel %vm481_vm3, %v2957_v60, %v2958_v41 }
 0x52e   : > { %v3337_v20 = vsel %vm1601_vm10, %v3305_v23, %v2897_v30  ;;  %v3338_v48 = vsel %vm1601_vm10, %v3306_v0, %v2899_v40  ;;  %v8790_v30 = vld [vmem:[#allocation122_spill] sm:$0xff]  ;;  %v2961_v58 = vsel %vm481_vm3, %v2958_v41, %v2960_v25 }
 0x52f   : > { %2916 = vrot.lane.b32.xlu0 %v2151_v4, %s4284_s30  ;;  %2619 = vrot.lane.b32.xlu1 %v2151_v4, %s4281_s27 }
 0x531   : > { %v2999_v54 = vpop.permute.xlu0 %2998  ;;  %v7716_v24 = vpop.permute.xlu1 %2701 }
 0x532   : > { %v3369_v11 = vsel %vm1634_vm11, %v3337_v20, %v2999_v54  ;;  %v3060_v20 = vsel %vm658_vm4, %v3058_v61, %v3059_v53 }
 0x533   : > { %2918 = vrot.lane.b32.xlu0 %v2152_v55, %s4284_s30  ;;  %3018 = vrot.lane.b32.xlu1 %v2658_v29, %s4285_s16 }
 0x535   : > { %v3001_v14 = vpop.permute.xlu0 %3000  ;;  %v3100_v10 = vpop.permute.xlu1 %3099 }
 0x536   : > { %v3401_v6 = vsel %vm1667_vm12, %v3369_v11, %v3100_v10  ;;  %v3370_v50 = vsel %vm1634_vm11, %v3338_v48, %v3001_v14  ;;  %v3062_v11 = vsel %vm658_vm4, %v3059_v53, %v3061_v2 }
 0x537   : > { %2621 = vrot.lane.b32.xlu0 %v2152_v55, %s4281_s27  ;;  %2721 = vrot.lane.b32.xlu1 %v2658_v29, %s4282_s28  ;;  %v4266_v55 = vld [vmem:[#allocation3 + $0xf0] sm:$0xff] }
 0x538   : > { %4152 = vmatprep.mubr.msk.f32.mxu1 %vm1712_vm13, %v3401_v6  ;;  %v3179_v40 = vsel %vm225_vm0, %v4266_v55, %v8790_v30  ;;  %v4267_v6 = vld [vmem:[#allocation3 + $0xf8] sm:$0xff] }
 0x539   : > { %v7735_v7 = vpop.permute.xlu0 %2703  ;;  %v2803_v32 = vpop.permute.xlu1 %2802  ;;  %v3211_v27 = vsel %vm1469_vm6, %v3179_v40, %v8791_v47 }
 0x53a   : > { %v3243_v9 = vsel %vm1502_vm7, %v3211_v27, %v8792_v5 }
 0x53b   : > { %3020 = vrot.lane.b32.xlu0 %v2660_v3, %s4285_s16  ;;  %3119 = vrot.lane.b32.xlu1 %v2759_v21, %s4286_s17  ;;  %v3275_v29 = vsel %vm1535_vm8, %v3243_v9, %v7716_v24  ;;  %v8793_v24 = vld [vmem:[#allocation58_spill] sm:$0xff]  ;;  %v4269_v9 = vld [vmem:[#allocation3 + $0x110] sm:$0xff] }
 0x53c   : > { %v3307_v23 = vsel %vm1568_vm9, %v3275_v29, %v2803_v32  ;;  %v3180_v39 = vsel %vm225_vm0, %v4267_v6, %v8793_v24  ;;  %v8798_v29 = vld [vmem:[#allocation30_spill] sm:$0xff] }
 0x53d   : > { %v3102_v33 = vpop.permute.xlu0 %3101  ;;  %v2805_v36 = vpop.permute.xlu1 %2804  ;;  %v3212_v51 = vsel %vm1469_vm6, %v3180_v39, %v8794_v46 }
 0x53e   : > { %v3402_v12 = vsel %vm1667_vm12, %v3370_v50, %v3102_v33  ;;  %v3244_v31 = vsel %vm1502_vm7, %v3212_v51, %v8795_v45 }
 0x53f   : > { %2723 = vrot.lane.b32.xlu0 %v2660_v3, %s4282_s28  ;;  %2822 = vrot.lane.b32.xlu1 %v2759_v21, %s4283_s29  ;;  %v3276_v17 = vsel %vm1535_vm8, %v3244_v31, %v7735_v7  ;;  %v7795_v7 = vld [vmem:[%s8059_s4] ss:$0 sm:$0xff]  ;;  %v3754_v31 = vld [vmem:[%s4507_s24 + $0x18] sm:$0xff] }
 0x540   : > { %4153 = vmatmul.mubr.msk.f32.gmra.mrb[18].mxu1 %vm1712_vm13, %v3402_v12  ;;  %v3308_v32 = vsel %vm1568_vm9, %v3276_v17, %v2805_v36  ;;  %v4268_v36 = vld [vmem:[#allocation3 + $0x108] sm:$0xff]  ;;  %v3753_v17 = vld [vmem:[%s4507_s24 + $0x10] sm:$0xff] }
 0x541   : > { %v2901_v19 = vpop.permute.xlu0 %2900  ;;  %v7749_v13 = vpop.permute.xlu1 %2603 }
 0x542   : > { %v3339_v26 = vsel %vm1601_vm10, %v3307_v23, %v2901_v19  ;;  %v8796_v19 = vld [vmem:[#allocation4_spill] sm:$0xff]  ;;  %v8799_v23 = vld [vmem:[#allocation139_spill] sm:$0xff] }
 0x543   : > { %3121 = vrot.lane.b32.xlu0 %v2761_v16, %s4286_s17  ;;  %2824 = vrot.lane.b32.xlu1 %v2761_v16, %s4283_s29  ;;  %v8797_v16 = vld [vmem:[#allocation37_spill] sm:$0xff] }
 0x545   : > { %v2903_v43 = vpop.permute.xlu0 %2902  ;;  %v3003_v4 = vpop.permute.xlu1 %3002 }
 0x546   : > { %v3371_v14 = vsel %vm1634_vm11, %v3339_v26, %v3003_v4  ;;  %v3340_v35 = vsel %vm1601_vm10, %v3308_v32, %v2903_v43  ;;  %v3751_v43 = vld [vmem:[%s4507_s24] sm:$0xff] }
 0x547   : > { %2920 = vrot.lane.b32.xlu0 %v2154_v56, %s4284_s30  ;;  %2922 = vrot.lane.b32.xlu1 %v2155_v44, %s4284_s30  ;;  %v3181_v56 = vsel %vm225_vm0, %v4268_v36, %v8796_v19 }
 0x548   : > { %v3213_v60 = vsel %vm1469_vm6, %v3181_v56, %v8797_v16 }
 0x549   : > { %v7764_v54 = vpop.permute.xlu0 %2605  ;;  %v2706_v28 = vpop.permute.xlu1 %2705  ;;  %v3245_v4 = vsel %vm1502_vm7, %v3213_v60, %v7749_v13 }
 0x54a   : > { %v3277_v47 = vsel %vm1535_vm8, %v3245_v4, %v2706_v28  ;;  %v3182_v28 = vsel %vm225_vm0, %v4269_v9, %v8798_v29  ;;  %v8803_v4 = vld [vmem:[#allocation65_spill] sm:$0xff] }
 0x54b   : > { %3022 = vrot.lane.b32.xlu0 %v2959_v57, %s4285_s16  ;;  %3024 = vrot.lane.b32.xlu1 %v2961_v58, %s4285_s16  ;;  %v3214_v26 = vsel %vm1469_vm6, %v3182_v28, %v8799_v23  ;;  %v3756_v9 = vld [vmem:[%s4507_s24 + $0x28] sm:$0xff]  ;;  %v3755_v28 = vld [vmem:[%s4507_s24 + $0x20] sm:$0xff] }
 0x54d   : > { %v3005_v10 = vpop.permute.xlu0 %3004  ;;  %v3104_v8 = vpop.permute.xlu1 %3103 }
 0x54e   : > { %v3403_v62 = vsel %vm1667_vm12, %v3371_v14, %v3104_v8  ;;  %v3372_v3 = vsel %vm1634_vm11, %v3340_v35, %v3005_v10 }
 0x54f   : > { %3123 = vrot.lane.b32.xlu0 %v3060_v20, %s4286_s17  ;;  %3125 = vrot.lane.b32.xlu1 %v3062_v11, %s4286_s17  ;;  %v3246_v20 = vsel %vm1502_vm7, %v3214_v26, %v7764_v54 }
 0x550   : > { %4155 = vmatprep.mubr.msk.f32.mxu1 %vm1712_vm13, %v3403_v62 }
 0x551   : > { %v2708_v1 = vpop.permute.xlu0 %2707  ;;  %v2807_v49 = vpop.permute.xlu1 %2806 }
 0x552   : > { %v3309_v61 = vsel %vm1568_vm9, %v3277_v47, %v2807_v49  ;;  %v3278_v10 = vsel %vm1535_vm8, %v3246_v20, %v2708_v1 }
 0x555   : > { %v3106_v21 = vpop.permute.xlu0 %3105  ;;  %v2809_v0 = vpop.permute.xlu1 %2808 }
 0x556   : > { %v3404_v48 = vsel %vm1667_vm12, %v3372_v3, %v3106_v21  ;;  %v3310_v8 = vsel %vm1568_vm9, %v3278_v10, %v2809_v0  ;;  %v8800_v0 = vld [vmem:[#allocation61_spill] sm:$0xff] }
 0x557   : > { %4156 = vmatmul.mubr.msk.f32.gmra.mrb[20].mxu1 %vm1712_vm13, %v3404_v48  ;;  %v3183_v48 = vsel %vm225_vm0, %v7484_v15, %v8800_v0 }
 0x559   : > { %v2905_v50 = vpop.permute.xlu0 %2904  ;;  %v2608_v33 = vpop.permute.xlu1 %2607 }
 0x55a   : > { %v3341_v13 = vsel %vm1601_vm10, %v3309_v61, %v2905_v50 }
 0x55d   : > { %v2907_v12 = vpop.permute.xlu0 %2906  ;;  %v3007_v42 = vpop.permute.xlu1 %3006 }
 0x55e   : > { %v3373_v57 = vsel %vm1634_vm11, %v3341_v13, %v3007_v42  ;;  %v3342_v62 = vsel %vm1601_vm10, %v3310_v8, %v2907_v12  ;;  %v8801_v12 = vld [vmem:[#allocation156_spill] sm:$0xff] }
 0x55f   : > { %v4127_v44 = vpop.f32.mrb[0].mxu1  ;;  %v3215_v42 = vsel %vm1469_vm6, %v3183_v48, %v8801_v12 }
 0x560   : > { %v3598_v41 = vadd.f32 %v4127_v44, %v7795_v7  ;;  %v3592_v25 = vpop.f32.mrb[1].mxu1  ;;  %v3247_v36 = vsel %vm1502_vm7, %v3215_v42, %v2608_v33 }
 0x561   : > { %v3593_v55 = vadd.f32 %v7795_v7, %v3592_v25  ;;  %v2610_v30 = vpop.permute.xlu0 %2609  ;;  %v2710_v40 = vpop.permute.xlu1 %2709 }
 0x562   : > { %v3784_v27 = vadd.f32 %v3752_v63, %v3598_v41  ;;  %v3279_v44 = vsel %vm1535_vm8, %v3247_v36, %v2710_v40 }
 0x563   : > { %v3783_v53 = vadd.f32 %v3751_v43, %v3593_v55  ;;  %v8802_v43 = vld [vmem:[#allocation91_spill] sm:$0xff] }
 0x564   : > { %3816 = vst.msk [vmem:[%s7811_s13 + $0x8] sm:$0xff] %vm225_vm0, %v3784_v27  ;;  %v3184_v33 = vsel %vm225_vm0, %v7495_v52, %v8802_v43 }
 0x565   : > { %3815 = vst.msk [vmem:[%s7811_s13] sm:$0xff] %vm225_vm0, %v3783_v53  ;;  %v3009_v58 = vpop.permute.xlu0 %3008  ;;  %v3108_v2 = vpop.permute.xlu1 %3107  ;;  %v3216_v55 = vsel %vm1469_vm6, %v3184_v33, %v8803_v4 }
 0x566   : > { %v3405_v5 = vsel %vm1667_vm12, %v3373_v57, %v3108_v2  ;;  %v3374_v6 = vsel %vm1634_vm11, %v3342_v62, %v3009_v58  ;;  %v3248_v40 = vsel %vm1502_vm7, %v3216_v55, %v2610_v30  ;;  %v8804_v62 = vld [vmem:[#allocation123_spill] sm:$0xff] }
 0x567   : > { %4158 = vmatprep.mubr.msk.f32.mxu1 %vm1712_vm13, %v3405_v5 }
 0x569   : > { %v2712_v11 = vpop.permute.xlu0 %2711  ;;  %v2811_v14 = vpop.permute.xlu1 %2810 }
 0x56a   : > { %v3311_v63 = vsel %vm1568_vm9, %v3279_v44, %v2811_v14  ;;  %v3280_v61 = vsel %vm1535_vm8, %v3248_v40, %v2712_v11  ;;  %v3758_v44 = vld [vmem:[%s4507_s24 + $0x38] sm:$0xff] }
 0x56d   : > { %v3110_v24 = vpop.permute.xlu0 %3109  ;;  %v2813_v39 = vpop.permute.xlu1 %2812 }
 0x56e   : > { %v3406_v46 = vsel %vm1667_vm12, %v3374_v6, %v3110_v24  ;;  %v3312_v53 = vsel %vm1568_vm9, %v3280_v61, %v2813_v39  ;;  %v3185_v6 = vsel %vm225_vm0, %v7541_v37, %v8804_v62  ;;  %v8805_v24 = vld [vmem:[#allocation15_spill] sm:$0xff]  ;;  %v8808_v61 = vld [vmem:[#allocation5_spill] sm:$0xff] }
 0x56f   : > { %4159 = vmatmul.mubr.msk.f32.gmra.mrb[22].mxu1 %vm1712_vm13, %v3406_v46  ;;  %v3217_v39 = vsel %vm1469_vm6, %v3185_v6, %v8805_v24  ;;  %v3759_v24 = vld [vmem:[%s4507_s24 + $0x40] sm:$0xff] }
 0x571   : > { %v2909_v51 = vpop.permute.xlu0 %2908  ;;  %v2612_v54 = vpop.permute.xlu1 %2611 }
 0x572   : > { %v3343_v16 = vsel %vm1601_vm10, %v3311_v63, %v2909_v51  ;;  %v3249_v46 = vsel %vm1502_vm7, %v3217_v39, %v2612_v54 }
 0x573   : > { %v4130_v45 = vpop.f32.mrb[2].mxu1 }
 0x574   : > { %v3608_v1 = vadd.f32 %v4130_v45, %v7795_v7  ;;  %v3602_v49 = vpop.f32.mrb[3].mxu1 }
 0x575   : > { %v3603_v32 = vadd.f32 %v7795_v7, %v3602_v49  ;;  %v2911_v35 = vpop.permute.xlu0 %2910  ;;  %v3011_v3 = vpop.permute.xlu1 %3010 }
 0x576   : > { %v3786_v21 = vadd.f32 %v3754_v31, %v3608_v1  ;;  %v3375_v15 = vsel %vm1634_vm11, %v3343_v16, %v3011_v3  ;;  %v3344_v13 = vsel %vm1601_vm10, %v3312_v53, %v2911_v35  ;;  %v8806_v3 = vld [vmem:[#allocation60_spill] sm:$0xff]  ;;  %v3187_v53 = vsel %vm225_vm0, %v7600_v34, %v8808_v61  ;;  %v3762_v61 = vld [vmem:[%s4507_s24 + $0x58] sm:$0xff] }
 0x577   : > { %v3785_v50 = vadd.f32 %v3753_v17, %v3603_v32  ;;  %v3186_v54 = vsel %vm225_vm0, %v7554_v22, %v8806_v3 }
 0x578   : > { %3818 = vst.msk [vmem:[%s7811_s13 + $0x18] sm:$0xff] %vm225_vm0, %v3786_v21  ;;  %v8807_v21 = vld [vmem:[#allocation95_spill] sm:$0xff] }
 0x579   : > { %3817 = vst.msk [vmem:[%s7811_s13 + $0x10] sm:$0xff] %vm225_vm0, %v3785_v50  ;;  %v2614_v19 = vpop.permute.xlu0 %2613  ;;  %v2714_v56 = vpop.permute.xlu1 %2713  ;;  %v3218_v0 = vsel %vm1469_vm6, %v3186_v54, %v8807_v21 }
 0x57a   : > { %v3281_v31 = vsel %vm1535_vm8, %v3249_v46, %v2714_v56  ;;  %v3250_v48 = vsel %vm1502_vm7, %v3218_v0, %v2614_v19  ;;  %v8812_v0 = vld [vmem:[#allocation16_spill] sm:$0xff] }
 0x57d   : > { %v3013_v60 = vpop.permute.xlu0 %3012  ;;  %v3112_v41 = vpop.permute.xlu1 %3111 }
 0x57e   : > { %v3407_v25 = vsel %vm1667_vm12, %v3375_v15, %v3112_v41  ;;  %v3376_v57 = vsel %vm1634_vm11, %v3344_v13, %v3013_v60  ;;  %v3757_v15 = vld [vmem:[%s4507_s24 + $0x30] sm:$0xff]  ;;  %v8809_v13 = vld [vmem:[#allocation125_spill] sm:$0xff] }
 0x57f   : > { %4161 = vmatprep.mubr.msk.f32.mxu1 %vm1712_vm13, %v3407_v25 }
 0x581   : > { %v2716_v47 = vpop.permute.xlu0 %2715  ;;  %v2815_v27 = vpop.permute.xlu1 %2814 }
 0x582   : > { %v3313_v1 = vsel %vm1568_vm9, %v3281_v31, %v2815_v27  ;;  %v3282_v42 = vsel %vm1535_vm8, %v3250_v48, %v2716_v47  ;;  %v3189_v48 = vsel %vm225_vm0, %v7655_v18, %v8812_v0 }
 0x585   : > { %v3114_v52 = vpop.permute.xlu0 %3113  ;;  %v2817_v58 = vpop.permute.xlu1 %2816 }
 0x586   : > { %v3408_v2 = vsel %vm1667_vm12, %v3376_v57, %v3114_v52  ;;  %v3314_v36 = vsel %vm1568_vm9, %v3282_v42, %v2817_v58  ;;  %v3219_v57 = vsel %vm1469_vm6, %v3187_v53, %v8809_v13  ;;  %v8814_v42 = vld [vmem:[#allocation142_spill] sm:$0xff] }
 0x587   : > { %v4133_v5 = vpop.f32.mrb[4].mxu1  ;;  %4162 = vmatmul.mubr.msk.f32.gmra.mrb[24].mxu1 %vm1712_vm13, %v3408_v2 }
 0x588   : > { %v3618_v30 = vadd.f32 %v4133_v5, %v7795_v7  ;;  %v3612_v29 = vpop.f32.mrb[5].mxu1 }
 0x589   : > { %v3613_v23 = vadd.f32 %v7795_v7, %v3612_v29  ;;  %v2913_v26 = vpop.permute.xlu0 %2912  ;;  %v2616_v20 = vpop.permute.xlu1 %2615 }
 0x58a   : > { %v3788_v11 = vadd.f32 %v3756_v9, %v3618_v30  ;;  %v3345_v49 = vsel %vm1601_vm10, %v3313_v1, %v2913_v26  ;;  %v3251_v52 = vsel %vm1502_vm7, %v3219_v57, %v2616_v20  ;;  %v8810_v26 = vld [vmem:[#allocation31_spill] sm:$0xff]  ;;  %v3761_v57 = vld [vmem:[%s4507_s24 + $0x50] sm:$0xff] }
 0x58b   : > { %v3787_v14 = vadd.f32 %v3755_v28, %v3613_v23 }
 0x58c   : > { %3820 = vst.msk [vmem:[%s7811_s13 + $0x28] sm:$0xff] %vm225_vm0, %v3788_v11  ;;  %v3188_v11 = vsel %vm225_vm0, %v7609_v38, %v8810_v26 }
 0x58d   : > { %3819 = vst.msk [vmem:[%s7811_s13 + $0x20] sm:$0xff] %vm225_vm0, %v3787_v14  ;;  %v2915_v10 = vpop.permute.xlu0 %2914  ;;  %v3015_v8 = vpop.permute.xlu1 %3014  ;;  %v3760_v14 = vld [vmem:[%s4507_s24 + $0x48] sm:$0xff] }
 0x58e   : > { %v3377_v17 = vsel %vm1634_vm11, %v3345_v49, %v3015_v8  ;;  %v3346_v63 = vsel %vm1601_vm10, %v3314_v36, %v2915_v10  ;;  %v8811_v10 = vld [vmem:[#allocation64_spill] sm:$0xff]  ;;  %v3221_v36 = vsel %vm1469_vm6, %v3189_v48, %v8814_v42 }
 0x58f   : > { %v3220_v8 = vsel %vm1469_vm6, %v3188_v11, %v8811_v10 }
 0x591   : > { %v2618_v51 = vpop.permute.xlu0 %2617  ;;  %v2718_v45 = vpop.permute.xlu1 %2717 }
 0x592   : > { %v3283_v5 = vsel %vm1535_vm8, %v3251_v52, %v2718_v45  ;;  %v3252_v39 = vsel %vm1502_vm7, %v3220_v8, %v2618_v51  ;;  %v3765_v8 = vld [vmem:[%s4507_s24 + $0x70] sm:$0xff] }
 0x595   : > { %v3017_v32 = vpop.permute.xlu0 %3016  ;;  %v3116_v35 = vpop.permute.xlu1 %3115 }
 0x596   : > { %v3409_v37 = vsel %vm1667_vm12, %v3377_v17, %v3116_v35  ;;  %v3378_v60 = vsel %vm1634_vm11, %v3346_v63, %v3017_v32 }
 0x597   : > { %4164 = vmatprep.mubr.msk.f32.mxu1 %vm1712_vm13, %v3409_v37 }
 0x599   : > { %v2720_v50 = vpop.permute.xlu0 %2719  ;;  %v2819_v12 = vpop.permute.xlu1 %2818 }
 0x59a   : > { %v3315_v9 = vsel %vm1568_vm9, %v3283_v5, %v2819_v12  ;;  %v3284_v38 = vsel %vm1535_vm8, %v3252_v39, %v2720_v50  ;;  %v8813_v50 = vld [vmem:[#allocation138_spill] sm:$0xff] }
 0x59b   : > { %v4136_v56 = vpop.f32.mrb[6].mxu1  ;;  %v3190_v12 = vsel %vm225_vm0, %v7664_v59, %v8813_v50  ;;  %v3772_v50 = vld [vmem:[%s4507_s24 + $0xa8] sm:$0xff] }
 0x59c   : > { %v3628_v22 = vadd.f32 %v4136_v56, %v7795_v7  ;;  %v3622_v16 = vpop.f32.mrb[7].mxu1  ;;  %v8815_v56 = vld [vmem:[#allocation94_spill] sm:$0xff] }
 0x59d   : > { %v3623_v19 = vadd.f32 %v7795_v7, %v3622_v16  ;;  %v3118_v41 = vpop.permute.xlu0 %3117  ;;  %v2821_v25 = vpop.permute.xlu1 %2820 }
 0x59e   : > { %v3790_v43 = vadd.f32 %v3758_v44, %v3628_v22  ;;  %v3410_v33 = vsel %vm1667_vm12, %v3378_v60, %v3118_v41  ;;  %v3316_v49 = vsel %vm1568_vm9, %v3284_v38, %v2821_v25  ;;  %v3222_v44 = vsel %vm1469_vm6, %v3190_v12, %v8815_v56  ;;  %v3767_v38 = vld [vmem:[%s4507_s24 + $0x80] sm:$0xff] }
 0x59f   : > { %v3789_v4 = vadd.f32 %v3757_v15, %v3623_v19  ;;  %4165 = vmatmul.mubr.msk.f32.gmra.mrb[26].mxu1 %vm1712_vm13, %v3410_v33 }
 0x5a0   : > { %3822 = vst.msk [vmem:[%s7811_s13 + $0x38] sm:$0xff] %vm225_vm0, %v3790_v43 }
 0x5a1   : > { %3821 = vst.msk [vmem:[%s7811_s13 + $0x30] sm:$0xff] %vm225_vm0, %v3789_v4  ;;  %v2917_v55 = vpop.permute.xlu0 %2916  ;;  %v2620_v40 = vpop.permute.xlu1 %2619 }
 0x5a2   : > { %v3347_v30 = vsel %vm1601_vm10, %v3315_v9, %v2917_v55  ;;  %v3253_v63 = vsel %vm1502_vm7, %v3221_v36, %v2620_v40  ;;  %v3764_v9 = vld [vmem:[%s4507_s24 + $0x68] sm:$0xff]  ;;  %v3771_v36 = vld [vmem:[%s4507_s24 + $0xa0] sm:$0xff] }
 0x5a5   : > { %v2919_v47 = vpop.permute.xlu0 %2918  ;;  %v3019_v27 = vpop.permute.xlu1 %3018 }
 0x5a6   : > { %v3379_v29 = vsel %vm1634_vm11, %v3347_v30, %v3019_v27  ;;  %v3348_v32 = vsel %vm1601_vm10, %v3316_v49, %v2919_v47 }
 0x5a9   : > { %v2622_v58 = vpop.permute.xlu0 %2621  ;;  %v2722_v2 = vpop.permute.xlu1 %2721 }
 0x5aa   : > { %v3254_v22 = vsel %vm1502_vm7, %v3222_v44, %v2622_v58  ;;  %v3285_v60 = vsel %vm1535_vm8, %v3253_v63, %v2722_v2 }
 0x5ad   : > { %v3021_v28 = vpop.permute.xlu0 %3020  ;;  %v3120_v23 = vpop.permute.xlu1 %3119 }
 0x5ae   : > { %v3411_v34 = vsel %vm1667_vm12, %v3379_v29, %v3120_v23  ;;  %v3380_v35 = vsel %vm1634_vm11, %v3348_v32, %v3021_v28  ;;  %v3763_v28 = vld [vmem:[%s4507_s24 + $0x60] sm:$0xff] }
 0x5af   : > { %v4139_v20 = vpop.f32.mrb[8].mxu1  ;;  %4167 = vmatprep.mubr.msk.f32.mxu1 %vm1712_vm13, %v3411_v34 }
 0x5b0   : > { %v3638_v62 = vadd.f32 %v4139_v20, %v7795_v7  ;;  %v3632_v6 = vpop.f32.mrb[9].mxu1  ;;  %v3766_v20 = vld [vmem:[%s4507_s24 + $0x78] sm:$0xff] }
 0x5b1   : > { %v3633_v46 = vadd.f32 %v7795_v7, %v3632_v6  ;;  %v2724_v45 = vpop.permute.xlu0 %2723  ;;  %v2823_v31 = vpop.permute.xlu1 %2822 }
 0x5b2   : > { %v3792_v1 = vadd.f32 %v3760_v14, %v3638_v62  ;;  %v3286_v18 = vsel %vm1535_vm8, %v3254_v22, %v2724_v45  ;;  %v3317_v59 = vsel %vm1568_vm9, %v3285_v60, %v2823_v31 }
 0x5b3   : > { %v3791_v17 = vadd.f32 %v3759_v24, %v3633_v46  ;;  %v3768_v46 = vld [vmem:[%s4507_s24 + $0x88] sm:$0xff] }
 0x5b4   : > { %3824 = vst.msk [vmem:[%s7811_s13 + $0x48] sm:$0xff] %vm225_vm0, %v3792_v1 }
 0x5b5   : > { %3823 = vst.msk [vmem:[%s7811_s13 + $0x40] sm:$0xff] %vm225_vm0, %v3791_v17  ;;  %v3122_v37 = vpop.permute.xlu0 %3121  ;;  %v2825_v51 = vpop.permute.xlu1 %2824 }
 0x5b6   : > { %v3412_v3 = vsel %vm1667_vm12, %v3380_v35, %v3122_v37  ;;  %v3318_v19 = vsel %vm1568_vm9, %v3286_v18, %v2825_v51  ;;  %v3770_v35 = vld [vmem:[%s4507_s24 + $0x98] sm:$0xff]  ;;  %v3773_v18 = vld [vmem:[%s4507_s24 + $0xb0] sm:$0xff] }
 0x5b7   : > { %4168 = vmatmul.mubr.msk.f32.gmra.mrb[28].mxu1 %vm1712_vm13, %v3412_v3  ;;  %v3769_v3 = vld [vmem:[%s4507_s24 + $0x90] sm:$0xff] }
 0x5b9   : > { %v2921_v54 = vpop.permute.xlu0 %2920  ;;  %v2923_v21 = vpop.permute.xlu1 %2922 }
 0x5ba   : > { %v3349_v41 = vsel %vm1601_vm10, %v3317_v59, %v2921_v54  ;;  %v3350_v25 = vsel %vm1601_vm10, %v3318_v19, %v2923_v21 }
 0x5bd   : > { %v3023_v16 = vpop.permute.xlu0 %3022  ;;  %v3025_v15 = vpop.permute.xlu1 %3024 }
 0x5be   : > { %v3381_v43 = vsel %vm1634_vm11, %v3349_v41, %v3023_v16  ;;  %v3382_v33 = vsel %vm1634_vm11, %v3350_v25, %v3025_v15  ;;  %v3774_v16 = vld [vmem:[%s4507_s24 + $0xb8] sm:$0xff] }
 0x5c1   : > { %v3124_v4 = vpop.permute.xlu0 %3123  ;;  %v3126_v55 = vpop.permute.xlu1 %3125 }
 0x5c2   : > { %v3413_v40 = vsel %vm1667_vm12, %v3381_v43, %v3124_v4  ;;  %v3414_v47 = vsel %vm1667_vm12, %v3382_v33, %v3126_v55  ;;  %v3776_v43 = vld [vmem:[%s4507_s24 + $0xc8] sm:$0xff]  ;;  %v3775_v55 = vld [vmem:[%s4507_s24 + $0xc0] sm:$0xff] }
 0x5c3   : > { %v4142_v27 = vpop.f32.mrb[10].mxu1  ;;  %4170 = vmatprep.mubr.msk.f32.mxu1 %vm1712_vm13, %v3413_v40 }
 0x5c4   : > { %v3648_v53 = vadd.f32 %v4142_v27, %v7795_v7  ;;  %v3642_v13 = vpop.f32.mrb[11].mxu1  ;;  %4171 = vmatmul.mubr.msk.f32.gmra.mrb[30].mxu1 %vm1712_vm13, %v3414_v47 }
 0x5c5   : > { %v3643_v52 = vadd.f32 %v7795_v7, %v3642_v13 }
 0x5c6   : > { %v3794_v58 = vadd.f32 %v3762_v61, %v3648_v53  ;;  %v3778_v53 = vld [vmem:[%s4507_s24 + $0xd8] sm:$0xff] }
 0x5c7   : > { %v3793_v2 = vadd.f32 %v3761_v57, %v3643_v52  ;;  %v3777_v52 = vld [vmem:[%s4507_s24 + $0xd0] sm:$0xff] }
 0x5c8   : > { %3826 = vst.msk [vmem:[%s7811_s13 + $0x58] sm:$0xff] %vm225_vm0, %v3794_v58 }
 0x5c9   : > { %3825 = vst.msk [vmem:[%s7811_s13 + $0x50] sm:$0xff] %vm225_vm0, %v3793_v2 }
 0x5d7   : > { %v4145_v5 = vpop.f32.mrb[12].mxu1 }
 0x5d8   : > { %v3658_v30 = vadd.f32 %v4145_v5, %v7795_v7  ;;  %v3652_v29 = vpop.f32.mrb[13].mxu1 }
 0x5d9   : > { %v3653_v23 = vadd.f32 %v7795_v7, %v3652_v29 }
 0x5da   : > { %v3796_v34 = vadd.f32 %v3764_v9, %v3658_v30  ;;  %v3780_v30 = vld [vmem:[%s4507_s24 + $0xe8] sm:$0xff] }
 0x5db   : > { %v3795_v26 = vadd.f32 %v3763_v28, %v3653_v23  ;;  %v3779_v23 = vld [vmem:[%s4507_s24 + $0xe0] sm:$0xff] }
 0x5dc   : > { %3828 = vst.msk [vmem:[%s7811_s13 + $0x68] sm:$0xff] %vm225_vm0, %v3796_v34 }
 0x5dd   : > { %3827 = vst.msk [vmem:[%s7811_s13 + $0x60] sm:$0xff] %vm225_vm0, %v3795_v26 }
 0x5eb   : > { %v4148_v11 = vpop.f32.mrb[14].mxu1 }
 0x5ec   : > { %v3668_v14 = vadd.f32 %v4148_v11, %v7795_v7  ;;  %v3662_v10 = vpop.f32.mrb[15].mxu1 }
 0x5ed   : > { %v3663_v62 = vadd.f32 %v7795_v7, %v3662_v10 }
 0x5ee   : > { %v3798_v6 = vadd.f32 %v3766_v20, %v3668_v14  ;;  %v3782_v14 = vld [vmem:[%s4507_s24 + $0xf8] sm:$0xff] }
 0x5ef   : > { %v3797_v24 = vadd.f32 %v3765_v8, %v3663_v62  ;;  %v3781_v62 = vld [vmem:[%s4507_s24 + $0xf0] sm:$0xff] }
 0x5f0   : > { %3830 = vst.msk [vmem:[%s7811_s13 + $0x78] sm:$0xff] %vm225_vm0, %v3798_v6 }
 0x5f1   : > { %3829 = vst.msk [vmem:[%s7811_s13 + $0x70] sm:$0xff] %vm225_vm0, %v3797_v24 }
 0x5ff   : > { %v4151_v39 = vpop.f32.mrb[16].mxu1 }
 0x600   : > { %v3678_v45 = vadd.f32 %v4151_v39, %v7795_v7  ;;  %v3672_v31 = vpop.f32.mrb[17].mxu1 }
 0x601   : > { %v3673_v1 = vadd.f32 %v7795_v7, %v3672_v31 }
 0x602   : > { %v3800_v49 = vadd.f32 %v3768_v46, %v3678_v45 }
 0x603   : > { %v3799_v17 = vadd.f32 %v3767_v38, %v3673_v1 }
 0x604   : > { %3832 = vst.msk [vmem:[%s7811_s13 + $0x88] sm:$0xff] %vm225_vm0, %v3800_v49 }
 0x605   : > { %3831 = vst.msk [vmem:[%s7811_s13 + $0x80] sm:$0xff] %vm225_vm0, %v3799_v17 }
 0x613   : > { %v4154_v32 = vpop.f32.mrb[18].mxu1 }
 0x614   : > { %v3688_v37 = vadd.f32 %v4154_v32, %v7795_v7  ;;  %v3682_v51 = vpop.f32.mrb[19].mxu1 }
 0x615   : > { %v3683_v54 = vadd.f32 %v7795_v7, %v3682_v51 }
 0x616   : > { %v3802_v21 = vadd.f32 %v3770_v35, %v3688_v37 }
 0x617   : > { %v3801_v0 = vadd.f32 %v3769_v3, %v3683_v54 }
 0x618   : > { %3834 = vst.msk [vmem:[%s7811_s13 + $0x98] sm:$0xff] %vm225_vm0, %v3802_v21 }
 0x619   : > { %3833 = vst.msk [vmem:[%s7811_s13 + $0x90] sm:$0xff] %vm225_vm0, %v3801_v0 }
 0x62a   : > { %v4157_v48 = vpop.f32.mrb[20].mxu1 }
 0x62b   : > { %v3698_v12 = vadd.f32 %v4157_v48, %v7795_v7  ;;  %v3692_v42 = vpop.f32.mrb[21].mxu1 }
 0x62c   : > { %v3693_v56 = vadd.f32 %v7795_v7, %v3692_v42 }
 0x62d   : > { %v3804_v44 = vadd.f32 %v3772_v50, %v3698_v12 }
 0x62e   : > { %v3803_v63 = vadd.f32 %v3771_v36, %v3693_v56 }
 0x62f   : > { %3836 = vst.msk [vmem:[%s7811_s13 + $0xa8] sm:$0xff] %vm225_vm0, %v3804_v44 }
 0x630   : > { %3835 = vst.msk [vmem:[%s7811_s13 + $0xa0] sm:$0xff] %vm225_vm0, %v3803_v63 }
 0x642   : > { %v4160_v22 = vpop.f32.mrb[22].mxu1 }
 0x643   : > { %v3708_v15 = vadd.f32 %v4160_v22, %v7795_v7  ;;  %v3702_v60 = vpop.f32.mrb[23].mxu1 }
 0x644   : > { %v3703_v59 = vadd.f32 %v7795_v7, %v3702_v60 }
 0x645   : > { %v3806_v19 = vadd.f32 %v3774_v16, %v3708_v15 }
 0x646   : > { %v3805_v41 = vadd.f32 %v3773_v18, %v3703_v59 }
 0x647   : > { %3838 = vst.msk [vmem:[%s7811_s13 + $0xb8] sm:$0xff] %vm225_vm0, %v3806_v19 }
 0x648   : > { %3837 = vst.msk [vmem:[%s7811_s13 + $0xb0] sm:$0xff] %vm225_vm0, %v3805_v41 }
 0x65a   : > { %v4163_v25 = vpop.f32.mrb[24].mxu1 }
 0x65b   : > { %v3718_v33 = vadd.f32 %v4163_v25, %v7795_v7  ;;  %v3712_v4 = vpop.f32.mrb[25].mxu1 }
 0x65c   : > { %v3713_v40 = vadd.f32 %v7795_v7, %v3712_v4 }
 0x65d   : > { %v3808_v47 = vadd.f32 %v3776_v43, %v3718_v33 }
 0x65e   : > { %v3807_v27 = vadd.f32 %v3775_v55, %v3713_v40 }
 0x65f   : > { %3840 = vst.msk [vmem:[%s7811_s13 + $0xc8] sm:$0xff] %vm225_vm0, %v3808_v47 }
 0x660   : > { %3839 = vst.msk [vmem:[%s7811_s13 + $0xc0] sm:$0xff] %vm225_vm0, %v3807_v27 }
 0x672   : > { %v4166_v61 = vpop.f32.mrb[26].mxu1 }
 0x673   : > { %v3728_v13 = vadd.f32 %v4166_v61, %v7795_v7  ;;  %v3722_v57 = vpop.f32.mrb[27].mxu1 }
 0x674   : > { %v3723_v58 = vadd.f32 %v7795_v7, %v3722_v57 }
 0x675   : > { %v3810_v2 = vadd.f32 %v3778_v53, %v3728_v13 }
 0x676   : > { %v3809_v5 = vadd.f32 %v3777_v52, %v3723_v58 }
 0x677   : > { %3842 = vst.msk [vmem:[%s7811_s13 + $0xd8] sm:$0xff] %vm225_vm0, %v3810_v2 }
 0x678   : > { %3841 = vst.msk [vmem:[%s7811_s13 + $0xd0] sm:$0xff] %vm225_vm0, %v3809_v5 }
 0x68a   : > { %v4169_v9 = vpop.f32.mrb[28].mxu1 }
 0x68b   : > { %v3738_v29 = vadd.f32 %v4169_v9, %v7795_v7  ;;  %v3732_v28 = vpop.f32.mrb[29].mxu1 }
 0x68c   : > { %v3733_v34 = vadd.f32 %v7795_v7, %v3732_v28 }
 0x68d   : > { %v3812_v26 = vadd.f32 %v3780_v30, %v3738_v29 }
 0x68e   : > { %v3811_v11 = vadd.f32 %v3779_v23, %v3733_v34 }
 0x68f   : > { %3844 = vst.msk [vmem:[%s7811_s13 + $0xe8] sm:$0xff] %vm225_vm0, %v3812_v26 }
 0x690   : > { %3843 = vst.msk [vmem:[%s7811_s13 + $0xe0] sm:$0xff] %vm225_vm0, %v3811_v11 }
 0x697   : > { %v4172_v20 = vpop.f32.mrb[30].mxu1 }
 0x698   : > { %v3748_v10 = vadd.f32 %v4172_v20, %v7795_v7  ;;  %v3742_v8 = vpop.f32.mrb[31].mxu1 }
 0x699   : > { %v3743_v6 = vadd.f32 %v7795_v7, %v3742_v8 }
 0x69a   : > { %v3814_v24 = vadd.f32 %v3782_v14, %v3748_v10 }
 0x69b   : > { %v3813_v39 = vadd.f32 %v3781_v62, %v3743_v6 }
 0x69c   : > { %3846 = vst.msk [vmem:[%s7811_s13 + $0xf8] sm:$0xff] %vm225_vm0, %v3814_v24 }
 0x69d   : > { %3845 = vst.msk [vmem:[%s7811_s13 + $0xf0] sm:$0xff] %vm225_vm0, %v3813_v39 }
 0x69e PF: > { %s15_s18 = sadd.s32 1, %s4276_s18  }
 0x69f   : > { %p12_p4 = scmp.ge.s32.totalorder %s15_s18, 4  }
 0x6a1   :  { %14 = sbr.rel (!%p12_p4) target bundleno = 1 (0x1), region = 74 }

// kernel: tpu_custom_call.1
= control target key start
LH: loop header
LB: loop body
LE: loop exit
PB: predicated region body
PF: predicated region fallthrough
CT: control target
= control target key end

     0   :  { %s8917_s18 = smov 0   ;;  %s11451_s0 = inlined_call_operand.vmem [shape: f32[2,16,16,4], index: 0, kind: input, shape index: {}]   ;;  %s11452_s1 = inlined_call_operand.vmem [shape: f32[36,4], index: 1, kind: input, shape index: {}]   ;;  %s11453_s2 = inlined_call_operand.vmem [shape: f32[1,4], index: 2, kind: input, shape index: {}]   ;;  %s11454_s3 = inlined_call_operand.vmem [shape: f32[36,4], index: 3, kind: input, shape index: {}]   ;;  %s11455_s4 = inlined_call_operand.vmem [shape: f32[1,4], index: 4, kind: input, shape index: {}]   ;;  %s11456_s5 = inlined_call_operand.vmem [shape: f32[2,16,16,4], index: 5, kind: output, shape index: {}]  }
   0x1 LB: > { %s6254_s19 = sadd.s32 4294967295, %s8884_s18   ;;  %p6258_p0 = scmp.ge.s32.totalorder %s8884_s18, 1  ;;  %s8884_s18 = sphi %s8917_s18, %s15_s18  }
   0x2   : > { %p187_p1 = scmp.lt.s32.totalorder %s8884_s18, 3 }
   0x4   : > { %p188_p2 = pnand %p6258_p0, %p187_p1 }
   0x6   : > { %191 = sbr.rel (%p188_p2) target bundleno = 1593 (0x639), region = 40 }
   0xd   : > { %v8928_v0 = vld [vmem:[%s11452_s1 + $0x4] sm:$0xf]  ;;  %vm628_vm0 = vcmask 1043456   ;;  %vm225_vm1 = vcmask 31744   ;;  %vm234_vm2 = vcmask 24576   ;;  %v8886_v1 = vmov 0.0  }
   0xe   : > { %7457 = vmatprep.subr.msk.mxu0 %vm628_vm0, %v8928_v0  ;;  %226 = vst.msk [vmem:[#allocation2] sm:$0xff] %vm225_vm1, %v8886_v1  ;;  %227 = vst.msk [vmem:[#allocation2 + $0x8] sm:$0xff] %vm225_vm1, %v8886_v1  ;;  %v9079_v2 = vld [vmem:[%s11452_s1] sm:$0xf]  ;;  %vm228_vm3 = vcmask 25600   ;;  %p9083_p3 = scmp.lt.s32.totalorder %s6254_s19, 1 }
   0xf   : > { %231 = vst.msk [vmem:[#allocation2 + $0x198] sm:$0xff] %vm225_vm1, %v8886_v1  ;;  %232 = vst.msk [vmem:[#allocation2 + $0x1a0] sm:$0xff] %vm225_vm1, %v8886_v1  ;;  %7458 = vmatpush3.msk.msra.mxu0 %vm628_vm0, %v8928_v0  ;;  %vm482_vm4 = vcmask 1046528   ;;  %v9158_v21 = vld [vmem:[%s11452_s1 + $0x8] sm:$0xf]  ;;  %vm1149_vm5 = vcmask 1045504  }
  0x10   : > { %236 = vst.msk [vmem:[#allocation2 + $0x18] sm:$0x1] %vm234_vm2, %v8886_v1  ;;  %237 = vst.msk [vmem:[#allocation2 + $0x30] sm:$0x1] %vm234_vm2, %v8886_v1  ;;  %7507 = vmatprep.subr.msk.mxu0 %vm628_vm0, %v9079_v2  ;;  %s11811_s19 = smov (!%p9083_p3, %s6254_s19), 1 }
  0x11   : > { %238 = vst.msk [vmem:[#allocation2 + $0x48] sm:$0x1] %vm234_vm2, %v8886_v1  ;;  %239 = vst.msk [vmem:[#allocation2 + $0x60] sm:$0x1] %vm234_vm2, %v8886_v1  ;;  %s6861_s25 = sshll.u32 %s11811_s19, 8 }
  0x12   : > { %240 = vst.msk [vmem:[#allocation2 + $0x78] sm:$0x1] %vm234_vm2, %v8886_v1  ;;  %241 = vst.msk [vmem:[#allocation2 + $0x90] sm:$0x1] %vm234_vm2, %v8886_v1  ;;  %s9123_s28 = scalar_lea.vmem %s11451_s0, %s6861_s25  ;;  %s11321_s23 = scalar_lea.vmem %s11456_s5, %s6861_s25 }
  0x13   : > { %242 = vst.msk [vmem:[#allocation2 + $0xa8] sm:$0x1] %vm234_vm2, %v8886_v1  ;;  %243 = vst.msk [vmem:[#allocation2 + $0xc0] sm:$0x1] %vm234_vm2, %v8886_v1  ;;  %v314_v3 = vld [vmem:[%s9123_s28] sm:$0xff]  ;;  %v315_v4 = vld [vmem:[%s9123_s28 + $0x8] sm:$0xff] }
  0x14   : > { %244 = vst.msk [vmem:[#allocation2 + $0xd8] sm:$0x1] %vm234_vm2, %v8886_v1  ;;  %245 = vst.msk [vmem:[#allocation2 + $0xf0] sm:$0x1] %vm234_vm2, %v8886_v1  ;;  %v316_v5 = vld [vmem:[%s9123_s28 + $0x10] sm:$0xff]  ;;  %v317_v7 = vld [vmem:[%s9123_s28 + $0x18] sm:$0xff] }
  0x15   : > { %246 = vst.msk [vmem:[#allocation2 + $0x108] sm:$0x1] %vm234_vm2, %v8886_v1  ;;  %247 = vst.msk [vmem:[#allocation2 + $0x120] sm:$0x1] %vm234_vm2, %v8886_v1  ;;  %v9128_v6 = vld [vmem:[#allocation2 + $0x8] sm:$0xff]  ;;  %v318_v8 = vld [vmem:[%s9123_s28 + $0x20] sm:$0xff] }
  0x16   : > { %248 = vst.msk [vmem:[#allocation2 + $0x138] sm:$0x1] %vm234_vm2, %v8886_v1  ;;  %249 = vst.msk [vmem:[#allocation2 + $0x150] sm:$0x1] %vm234_vm2, %v8886_v1  ;;  %v484_v10 = vrot.slane %v9128_v6, 1  ;;  %v319_v11 = vld [vmem:[%s9123_s28 + $0x28] sm:$0xff] }
  0x17   : > { %250 = vst.msk [vmem:[#allocation2 + $0x168] sm:$0x1] %vm234_vm2, %v8886_v1  ;;  %251 = vst.msk [vmem:[#allocation2 + $0x180] sm:$0x1] %vm234_vm2, %v8886_v1  ;;  %v320_v12 = vld [vmem:[%s9123_s28 + $0x30] sm:$0xff]  ;;  %v321_v15 = vld [vmem:[%s9123_s28 + $0x38] sm:$0xff] }
  0x18   : > { %254 = vst.msk [vmem:[#allocation2 + $0x29] sm:$0x1] %vm234_vm2, %v8886_v1  ;;  %255 = vst.msk [vmem:[#allocation2 + $0x41] sm:$0x1] %vm234_vm2, %v8886_v1  ;;  %v322_v16 = vld [vmem:[%s9123_s28 + $0x40] sm:$0xff]  ;;  %v323_v18 = vld [vmem:[%s9123_s28 + $0x48] sm:$0xff] }
  0x19   : > { %256 = vst.msk [vmem:[#allocation2 + $0x59] sm:$0x1] %vm234_vm2, %v8886_v1  ;;  %257 = vst.msk [vmem:[#allocation2 + $0x71] sm:$0x1] %vm234_vm2, %v8886_v1  ;;  %v324_v19 = vld [vmem:[%s9123_s28 + $0x50] sm:$0xff]  ;;  %v325_v20 = vld [vmem:[%s9123_s28 + $0x58] sm:$0xff] }
  0x1a   : > { %258 = vst.msk [vmem:[#allocation2 + $0x89] sm:$0x1] %vm234_vm2, %v8886_v1  ;;  %259 = vst.msk [vmem:[#allocation2 + $0xa1] sm:$0x1] %vm234_vm2, %v8886_v1  ;;  %v326_v23 = vld [vmem:[%s9123_s28 + $0x60] sm:$0xff]  ;;  %v327_v24 = vld [vmem:[%s9123_s28 + $0x68] sm:$0xff] }
  0x1b   : > { %260 = vst.msk [vmem:[#allocation2 + $0xb9] sm:$0x1] %vm234_vm2, %v8886_v1  ;;  %261 = vst.msk [vmem:[#allocation2 + $0xd1] sm:$0x1] %vm234_vm2, %v8886_v1  ;;  %v328_v25 = vld [vmem:[%s9123_s28 + $0x70] sm:$0xff]  ;;  %v329_v27 = vld [vmem:[%s9123_s28 + $0x78] sm:$0xff] }
  0x1c   : > { %262 = vst.msk [vmem:[#allocation2 + $0xe9] sm:$0x1] %vm234_vm2, %v8886_v1  ;;  %263 = vst.msk [vmem:[#allocation2 + $0x101] sm:$0x1] %vm234_vm2, %v8886_v1  ;;  %v330_v28 = vld [vmem:[%s9123_s28 + $0x80] sm:$0xff]  ;;  %v331_v29 = vld [vmem:[%s9123_s28 + $0x88] sm:$0xff] }
  0x1d   : > { %264 = vst.msk [vmem:[#allocation2 + $0x119] sm:$0x1] %vm234_vm2, %v8886_v1  ;;  %265 = vst.msk [vmem:[#allocation2 + $0x131] sm:$0x1] %vm234_vm2, %v8886_v1  ;;  %v332_v30 = vld [vmem:[%s9123_s28 + $0x90] sm:$0xff]  ;;  %v333_v31 = vld [vmem:[%s9123_s28 + $0x98] sm:$0xff] }
  0x1e   : > { %266 = vst.msk [vmem:[#allocation2 + $0x149] sm:$0x1] %vm234_vm2, %v8886_v1  ;;  %267 = vst.msk [vmem:[#allocation2 + $0x161] sm:$0x1] %vm234_vm2, %v8886_v1  ;;  %v334_v32 = vld [vmem:[%s9123_s28 + $0xa0] sm:$0xff] }
  0x1f   : > { %268 = vst.msk [vmem:[#allocation2 + $0x179] sm:$0x1] %vm234_vm2, %v8886_v1  ;;  %269 = vst.msk [vmem:[#allocation2 + $0x191] sm:$0x1] %vm234_vm2, %v8886_v1 }
  0x20   : > { %271 = vst.msk [vmem:[#allocation3] sm:$0xff] %vm225_vm1, %v8886_v1  ;;  %272 = vst.msk [vmem:[#allocation3 + $0x8] sm:$0xff] %vm225_vm1, %v8886_v1 }
  0x21   : > { %275 = vst.msk [vmem:[#allocation3 + $0x198] sm:$0xff] %vm225_vm1, %v8886_v1  ;;  %276 = vst.msk [vmem:[#allocation3 + $0x1a0] sm:$0xff] %vm225_vm1, %v8886_v1 }
  0x22   : > { %279 = vst.msk [vmem:[#allocation3 + $0x18] sm:$0x1] %vm234_vm2, %v8886_v1  ;;  %280 = vst.msk [vmem:[#allocation3 + $0x30] sm:$0x1] %vm234_vm2, %v8886_v1 }
  0x23   : > { %281 = vst.msk [vmem:[#allocation3 + $0x48] sm:$0x1] %vm234_vm2, %v8886_v1  ;;  %282 = vst.msk [vmem:[#allocation3 + $0x60] sm:$0x1] %vm234_vm2, %v8886_v1 }
  0x24   : > { %283 = vst.msk [vmem:[#allocation3 + $0x78] sm:$0x1] %vm234_vm2, %v8886_v1  ;;  %284 = vst.msk [vmem:[#allocation3 + $0x90] sm:$0x1] %vm234_vm2, %v8886_v1 }
  0x25   : > { %285 = vst.msk [vmem:[#allocation3 + $0xa8] sm:$0x1] %vm234_vm2, %v8886_v1  ;;  %286 = vst.msk [vmem:[#allocation3 + $0xc0] sm:$0x1] %vm234_vm2, %v8886_v1 }
  0x26   : > { %287 = vst.msk [vmem:[#allocation3 + $0xd8] sm:$0x1] %vm234_vm2, %v8886_v1  ;;  %288 = vst.msk [vmem:[#allocation3 + $0xf0] sm:$0x1] %vm234_vm2, %v8886_v1 }
  0x27   : > { %289 = vst.msk [vmem:[#allocation3 + $0x108] sm:$0x1] %vm234_vm2, %v8886_v1  ;;  %290 = vst.msk [vmem:[#allocation3 + $0x120] sm:$0x1] %vm234_vm2, %v8886_v1 }
  0x28   : > { %291 = vst.msk [vmem:[#allocation3 + $0x138] sm:$0x1] %vm234_vm2, %v8886_v1  ;;  %292 = vst.msk [vmem:[#allocation3 + $0x150] sm:$0x1] %vm234_vm2, %v8886_v1 }
  0x29   : > { %293 = vst.msk [vmem:[#allocation3 + $0x168] sm:$0x1] %vm234_vm2, %v8886_v1  ;;  %294 = vst.msk [vmem:[#allocation3 + $0x180] sm:$0x1] %vm234_vm2, %v8886_v1 }
  0x2a   : > { %297 = vst.msk [vmem:[#allocation3 + $0x29] sm:$0x1] %vm234_vm2, %v8886_v1  ;;  %298 = vst.msk [vmem:[#allocation3 + $0x41] sm:$0x1] %vm234_vm2, %v8886_v1 }
  0x2b   : > { %299 = vst.msk [vmem:[#allocation3 + $0x59] sm:$0x1] %vm234_vm2, %v8886_v1  ;;  %300 = vst.msk [vmem:[#allocation3 + $0x71] sm:$0x1] %vm234_vm2, %v8886_v1 }
  0x2c   : > { %301 = vst.msk [vmem:[#allocation3 + $0x89] sm:$0x1] %vm234_vm2, %v8886_v1  ;;  %302 = vst.msk [vmem:[#allocation3 + $0xa1] sm:$0x1] %vm234_vm2, %v8886_v1 }
  0x2d   : > { %303 = vst.msk [vmem:[#allocation3 + $0xb9] sm:$0x1] %vm234_vm2, %v8886_v1  ;;  %304 = vst.msk [vmem:[#allocation3 + $0xd1] sm:$0x1] %vm234_vm2, %v8886_v1 }
  0x2e   : > { %305 = vst.msk [vmem:[#allocation3 + $0xe9] sm:$0x1] %vm234_vm2, %v8886_v1  ;;  %306 = vst.msk [vmem:[#allocation3 + $0x101] sm:$0x1] %vm234_vm2, %v8886_v1 }
  0x2f   : > { %307 = vst.msk [vmem:[#allocation3 + $0x119] sm:$0x1] %vm234_vm2, %v8886_v1  ;;  %308 = vst.msk [vmem:[#allocation3 + $0x131] sm:$0x1] %vm234_vm2, %v8886_v1 }
  0x30   : > { %309 = vst.msk [vmem:[#allocation3 + $0x149] sm:$0x1] %vm234_vm2, %v8886_v1  ;;  %310 = vst.msk [vmem:[#allocation3 + $0x161] sm:$0x1] %vm234_vm2, %v8886_v1 }
  0x31   : > { %311 = vst.msk [vmem:[#allocation3 + $0x179] sm:$0x1] %vm234_vm2, %v8886_v1  ;;  %312 = vst.msk [vmem:[#allocation3 + $0x191] sm:$0x1] %vm234_vm2, %v8886_v1 }
  0x32   : > { %235 = vst.msk [vmem:[#allocation2] sm:$0x1] %vm234_vm2, %v8886_v1  ;;  %252 = vst.msk [vmem:[#allocation2 + $0x198] sm:$0x1] %vm234_vm2, %v8886_v1 }
  0x33   : > { %278 = vst.msk [vmem:[#allocation3] sm:$0x1] %vm234_vm2, %v8886_v1  ;;  %295 = vst.msk [vmem:[#allocation3 + $0x198] sm:$0x1] %vm234_vm2, %v8886_v1 }
  0x34   : > { %229 = vst.msk [vmem:[#allocation2 + $0x10] sm:$0x3] %vm228_vm3, %v8886_v1  ;;  %233 = vst.msk [vmem:[#allocation2 + $0x1a8] sm:$0x3] %vm228_vm3, %v8886_v1 }
  0x35   : > { %273 = vst.msk [vmem:[#allocation3 + $0x10] sm:$0x3] %vm228_vm3, %v8886_v1  ;;  %277 = vst.msk [vmem:[#allocation3 + $0x1a8] sm:$0x3] %vm228_vm3, %v8886_v1 }
  0x36   : > { %253 = vst.msk [vmem:[#allocation2 + $0x11] sm:$0x1] %vm234_vm2, %v8886_v1  ;;  %270 = vst.msk [vmem:[#allocation2 + $0x1a9] sm:$0x1] %vm234_vm2, %v8886_v1 }
  0x37   : > { %296 = vst.msk [vmem:[#allocation3 + $0x11] sm:$0x1] %vm234_vm2, %v8886_v1  ;;  %313 = vst.msk [vmem:[#allocation3 + $0x1a9] sm:$0x1] %vm234_vm2, %v8886_v1  ;;  %v335_v1 = vld [vmem:[%s9123_s28 + $0xa8] sm:$0xff] }
  0x38   : > { %347 = vst.msk [vmem:[#allocation2 + $0x19] sm:$0xff] %vm225_vm1, %v314_v3  ;;  %348 = vst.msk [vmem:[#allocation2 + $0x21] sm:$0xff] %vm225_vm1, %v315_v4 }
  0x39   : > { %349 = vst.msk [vmem:[#allocation2 + $0x31] sm:$0xff] %vm225_vm1, %v316_v5  ;;  %v9135_v9 = vld [vmem:[#allocation2] sm:$0xff]  ;;  %350 = vst.msk [vmem:[#allocation2 + $0x39] sm:$0xff] %vm225_vm1, %v317_v7 }
  0x3a   : > { %351 = vst.msk [vmem:[#allocation2 + $0x49] sm:$0xff] %vm225_vm1, %v318_v8  ;;  %v483_v13 = vrot.slane %v9135_v9, 1  ;;  %352 = vst.msk [vmem:[#allocation2 + $0x51] sm:$0xff] %vm225_vm1, %v319_v11  ;;  %v337_v11 = vld [vmem:[%s9123_s28 + $0xb8] sm:$0xff] }
  0x3b   : > { %353 = vst.msk [vmem:[#allocation2 + $0x61] sm:$0xff] %vm225_vm1, %v320_v12  ;;  %354 = vst.msk [vmem:[#allocation2 + $0x69] sm:$0xff] %vm225_vm1, %v321_v15  ;;  %v338_v12 = vld [vmem:[%s9123_s28 + $0xc0] sm:$0xff]  ;;  %v340_v15 = vld [vmem:[%s9123_s28 + $0xd0] sm:$0xff] }
  0x3c   : > { %355 = vst.msk [vmem:[#allocation2 + $0x79] sm:$0xff] %vm225_vm1, %v322_v16  ;;  %v485_v22 = vsel %vm482_vm4, %v483_v13, %v484_v10  ;;  %356 = vst.msk [vmem:[#allocation2 + $0x81] sm:$0xff] %vm225_vm1, %v323_v18  ;;  %v339_v13 = vld [vmem:[%s9123_s28 + $0xc8] sm:$0xff]  ;;  %v341_v16 = vld [vmem:[%s9123_s28 + $0xd8] sm:$0xff] }
  0x3d   : > { %v9143_v14 = vld [vmem:[#allocation2 + $0x10] sm:$0x3]  ;;  %357 = vst.msk [vmem:[#allocation2 + $0x91] sm:$0xff] %vm225_vm1, %v324_v19  ;;  %358 = vst.msk [vmem:[#allocation2 + $0x99] sm:$0xff] %vm225_vm1, %v325_v20  ;;  %7459 = vmatprep.mubr.msk.f32.mxu0 %vm225_vm1, %v485_v22  ;;  %v342_v19 = vld [vmem:[%s9123_s28 + $0xe0] sm:$0xff] }
  0x3e   : > { %v486_v17 = vrot.slane %v9143_v14, 1  ;;  %359 = vst.msk [vmem:[#allocation2 + $0xa9] sm:$0xff] %vm225_vm1, %v326_v23  ;;  %360 = vst.msk [vmem:[#allocation2 + $0xb1] sm:$0xff] %vm225_vm1, %v327_v24  ;;  %v343_v20 = vld [vmem:[%s9123_s28 + $0xe8] sm:$0xff] }
  0x3f   : > { %361 = vst.msk [vmem:[#allocation2 + $0xc1] sm:$0xff] %vm225_vm1, %v328_v25  ;;  %362 = vst.msk [vmem:[#allocation2 + $0xc9] sm:$0xff] %vm225_vm1, %v329_v27  ;;  %v9184_v33 = vld [vmem:[#allocation2 + $0x18] sm:$0xff]  ;;  %v9186_v34 = vld [vmem:[#allocation2 + $0x20] sm:$0xff] }
  0x40   : > { %v487_v26 = vsel %vm482_vm4, %v484_v10, %v486_v17  ;;  %363 = vst.msk [vmem:[#allocation2 + $0xd9] sm:$0xff] %vm225_vm1, %v330_v28  ;;  %364 = vst.msk [vmem:[#allocation2 + $0xe1] sm:$0xff] %vm225_vm1, %v331_v29  ;;  %v9188_v35 = vld [vmem:[#allocation2 + $0x28] sm:$0x3]  ;;  %v488_v36 = vrot.slane %v9184_v33, 1  ;;  %v489_v37 = vrot.slane %v9186_v34, 1 }
  0x41   : > { %7460 = vmatmul.mubr.msk.f32.vlgmr.msra.gmra.mrb[0].mxu0 %vm225_vm1, %v487_v26  ;;  %365 = vst.msk [vmem:[#allocation2 + $0xf1] sm:$0xff] %vm225_vm1, %v332_v30  ;;  %366 = vst.msk [vmem:[#allocation2 + $0xf9] sm:$0xff] %vm225_vm1, %v333_v31  ;;  %v491_v38 = vrot.slane %v9188_v35, 1  ;;  %v9196_v39 = vld [vmem:[#allocation2 + $0x30] sm:$0xff]  ;;  %v9198_v40 = vld [vmem:[#allocation2 + $0x38] sm:$0xff] }
  0x42   : > { %7508 = vmatpush3.msk.msra.mxu0 %vm628_vm0, %v9079_v2  ;;  %367 = vst.msk [vmem:[#allocation2 + $0x109] sm:$0xff] %vm225_vm1, %v334_v32  ;;  %v9200_v41 = vld [vmem:[#allocation2 + $0x48] sm:$0xff]  ;;  %v493_v42 = vrot.slane %v9196_v39, 1  ;;  %v494_v43 = vrot.slane %v9198_v40, 1  ;;  %v9206_v44 = vld [vmem:[#allocation2 + $0x40] sm:$0x3]  ;;  %v9212_v47 = vsel %vm482_vm4, %v488_v36, %v489_v37 }
  0x43   : > { %7557 = vmatprep.subr.msk.mxu0 %vm628_vm0, %v9158_v21  ;;  %v9208_v45 = vld [vmem:[#allocation2 + $0x50] sm:$0xff]  ;;  %v498_v46 = vrot.slane %v9200_v41, 1  ;;  %v9215_v48 = vsel %vm482_vm4, %v489_v37, %v491_v38  ;;  %v496_v49 = vrot.slane %v9206_v44, 1  ;;  %v9219_v51 = vld [vmem:[#allocation2 + $0x58] sm:$0x3]  ;;  %7462 = vmatprep.mubr.msk.f32.mxu0 %vm225_vm1, %v9212_v47  ;;  %v9226_v53 = vld [vmem:[#allocation2 + $0x60] sm:$0xff] }
  0x44   : > { %v499_v50 = vrot.slane %v9208_v45, 1  ;;  %v9224_v52 = vsel %vm482_vm4, %v493_v42, %v494_v43  ;;  %v9228_v54 = vld [vmem:[#allocation2 + $0x68] sm:$0xff]  ;;  %v501_v56 = vrot.slane %v9219_v51, 1  ;;  %v503_v58 = vrot.slane %v9226_v53, 1  ;;  %v9243_v60 = vld [vmem:[#allocation2 + $0x70] sm:$0x3] }
  0x45   : > { %7463 = vmatmul.mubr.msk.f32.gmra.mrb[2].mxu0 %vm225_vm1, %v9215_v48  ;;  %v9235_v55 = vsel %vm482_vm4, %v494_v43, %v496_v49  ;;  %v504_v59 = vrot.slane %v9228_v54, 1  ;;  %v9245_v61 = vld [vmem:[#allocation2 + $0x78] sm:$0xff]  ;;  %v9247_v62 = vld [vmem:[#allocation2 + $0x80] sm:$0xff]  ;;  %v506_v0 = vrot.slane %v9243_v60, 1  ;;  %v9263_v5 = vld [vmem:[#allocation2 + $0x88] sm:$0x3] }
  0x46   : > { %7465 = vmatprep.mubr.msk.f32.mxu0 %vm225_vm1, %v9224_v52  ;;  %v9239_v57 = vsel %vm482_vm4, %v498_v46, %v499_v50  ;;  %v9254_v63 = vsel %vm482_vm4, %v499_v50, %v501_v56  ;;  %v508_v3 = vrot.slane %v9245_v61, 1  ;;  %v509_v4 = vrot.slane %v9247_v62, 1  ;;  %v9265_v7 = vld [vmem:[#allocation2 + $0x90] sm:$0xff]  ;;  %v9267_v8 = vld [vmem:[#allocation2 + $0x98] sm:$0xff]  ;;  %368 = vst.msk [vmem:[#allocation2 + $0x111] sm:$0xff] %vm225_vm1, %v335_v1  ;;  %370 = vst.msk [vmem:[#allocation2 + $0x129] sm:$0xff] %vm225_vm1, %v337_v11 }
  0x47   : > { %11603 = vst [vmem:[#allocation4_spill] sm:$0xff] %v9239_v57  ;;  %11604 = vst [vmem:[#allocation5_spill] sm:$0xff] %v9254_v63  ;;  %v9259_v2 = vsel %vm482_vm4, %v503_v58, %v504_v59  ;;  %v336_v10 = vld [vmem:[%s9123_s28 + $0xb0] sm:$0xff]  ;;  %v9284_v17 = vsel %vm482_vm4, %v504_v59, %v506_v0  ;;  %v511_v18 = vrot.slane %v9263_v5, 1  ;;  %v513_v23 = vrot.slane %v9265_v7, 1  ;;  %v9301_v26 = vld [vmem:[#allocation2 + $0xa8] sm:$0xff] }
  0x48   : > { %11605 = vst [vmem:[#allocation6_spill] sm:$0xff] %v9259_v2  ;;  %369 = vst.msk [vmem:[#allocation2 + $0x121] sm:$0xff] %vm225_vm1, %v336_v10  ;;  %v9293_v22 = vsel %vm482_vm4, %v508_v3, %v509_v4  ;;  %v514_v24 = vrot.slane %v9267_v8, 1  ;;  %v9297_v25 = vld [vmem:[#allocation2 + $0xa0] sm:$0x3]  ;;  %v9303_v27 = vld [vmem:[#allocation2 + $0xb0] sm:$0xff] }
  0x49   : > { %7466 = vmatmul.mubr.msk.f32.gmra.mrb[4].mxu0 %vm225_vm1, %v9235_v55  ;;  %371 = vst.msk [vmem:[#allocation2 + $0x139] sm:$0xff] %vm225_vm1, %v338_v12  ;;  %11606 = vst [vmem:[#allocation7_spill] sm:$0xff] %v9284_v17  ;;  %v9310_v28 = vsel %vm482_vm4, %v509_v4, %v511_v18  ;;  %v516_v29 = vrot.slane %v9297_v25, 1  ;;  %v518_v31 = vrot.slane %v9301_v26, 1  ;;  %v519_v32 = vrot.slane %v9303_v27, 1  ;;  %v9320_v37 = vld [vmem:[#allocation2 + $0xc0] sm:$0xff] }
  0x4a   : > { %7468 = vmatprep.mubr.msk.f32.mxu0 %vm225_vm1, %v9239_v57  ;;  %372 = vst.msk [vmem:[#allocation2 + $0x141] sm:$0xff] %vm225_vm1, %v339_v13  ;;  %373 = vst.msk [vmem:[#allocation2 + $0x151] sm:$0xff] %vm225_vm1, %v340_v15  ;;  %v9314_v30 = vsel %vm482_vm4, %v513_v23, %v514_v24  ;;  %v9318_v36 = vld [vmem:[#allocation2 + $0xb8] sm:$0x3]  ;;  %v9322_v38 = vld [vmem:[#allocation2 + $0xc8] sm:$0xff]  ;;  %v523_v49 = vrot.slane %v9320_v37, 1 }
  0x4b   : > { %374 = vst.msk [vmem:[#allocation2 + $0x159] sm:$0xff] %vm225_vm1, %v341_v16  ;;  %11607 = vst [vmem:[#allocation8_spill] sm:$0xff] %v9293_v22  ;;  %v9329_v42 = vsel %vm482_vm4, %v514_v24, %v516_v29  ;;  %v521_v43 = vrot.slane %v9318_v36, 1  ;;  %v9333_v46 = vsel %vm482_vm4, %v518_v31, %v519_v32  ;;  %v524_v50 = vrot.slane %v9322_v38, 1  ;;  %v9337_v56 = vld [vmem:[#allocation2 + $0xd0] sm:$0x3] }
  0x4c   : > { %375 = vst.msk [vmem:[#allocation2 + $0x169] sm:$0xff] %vm225_vm1, %v342_v19  ;;  %376 = vst.msk [vmem:[#allocation2 + $0x171] sm:$0xff] %vm225_vm1, %v343_v20  ;;  %v9339_v58 = vld [vmem:[#allocation2 + $0xd8] sm:$0xff]  ;;  %v9341_v59 = vld [vmem:[#allocation2 + $0xe0] sm:$0xff]  ;;  %v526_v1 = vrot.slane %v9337_v56, 1 }
  0x4d   : > { %7469 = vmatmul.mubr.msk.f32.gmra.mrb[6].mxu0 %vm225_vm1, %v9254_v63  ;;  %11608 = vst [vmem:[#allocation9_spill] sm:$0xff] %v9310_v28  ;;  %11609 = vst [vmem:[#allocation10_spill] sm:$0xff] %v9314_v30  ;;  %v9348_v0 = vsel %vm482_vm4, %v519_v32, %v521_v43  ;;  %v9352_v3 = vsel %vm482_vm4, %v523_v49, %v524_v50  ;;  %v528_v4 = vrot.slane %v9339_v58, 1  ;;  %v529_v10 = vrot.slane %v9341_v59, 1  ;;  %v9356_v11 = vld [vmem:[#allocation2 + $0xe8] sm:$0x3] }
  0x4e   : > { %7471 = vmatprep.mubr.msk.f32.mxu0 %vm225_vm1, %v9259_v2  ;;  %11610 = vst [vmem:[#allocation11_spill] sm:$0xff] %v9329_v42  ;;  %11611 = vst [vmem:[#allocation12_spill] sm:$0xff] %v9333_v46  ;;  %v9358_v12 = vld [vmem:[#allocation2 + $0xf0] sm:$0xff]  ;;  %v9360_v13 = vld [vmem:[#allocation2 + $0xf8] sm:$0xff]  ;;  %v9367_v15 = vsel %vm482_vm4, %v524_v50, %v526_v1  ;;  %v531_v16 = vrot.slane %v9356_v11, 1 }
  0x4f   : > { %11612 = vst [vmem:[#allocation13_spill] sm:$0xff] %v9348_v0  ;;  %11613 = vst [vmem:[#allocation14_spill] sm:$0xff] %v9352_v3  ;;  %v9371_v18 = vsel %vm482_vm4, %v528_v4, %v529_v10  ;;  %v533_v19 = vrot.slane %v9358_v12, 1  ;;  %v534_v20 = vrot.slane %v9360_v13, 1  ;;  %v9375_v23 = vld [vmem:[#allocation2 + $0x100] sm:$0x3] }
  0x50   : > { %11614 = vst [vmem:[#allocation15_spill] sm:$0xff] %v9367_v15  ;;  %11615 = vst [vmem:[#allocation16_spill] sm:$0xff] %v9371_v18  ;;  %v9377_v24 = vld [vmem:[#allocation2 + $0x108] sm:$0xff]  ;;  %v9379_v29 = vld [vmem:[#allocation2 + $0x110] sm:$0xff]  ;;  %v9386_v31 = vsel %vm482_vm4, %v529_v10, %v531_v16  ;;  %v536_v32 = vrot.slane %v9375_v23, 1 }
  0x51   : > { %7472 = vmatmul.mubr.msk.f32.gmra.mrb[8].mxu0 %vm225_vm1, %v9284_v17  ;;  %11616 = vst [vmem:[#allocation17_spill] sm:$0xff] %v9386_v31  ;;  %v9390_v43 = vsel %vm482_vm4, %v533_v19, %v534_v20  ;;  %v538_v49 = vrot.slane %v9377_v24, 1  ;;  %v539_v50 = vrot.slane %v9379_v29, 1  ;;  %v9394_v1 = vld [vmem:[#allocation2 + $0x118] sm:$0x3]  ;;  %v9396_v4 = vld [vmem:[#allocation2 + $0x120] sm:$0xff] }
  0x52   : > { %7474 = vmatprep.mubr.msk.f32.mxu0 %vm225_vm1, %v9293_v22  ;;  %11617 = vst [vmem:[#allocation18_spill] sm:$0xff] %v9390_v43  ;;  %v9405_v10 = vsel %vm482_vm4, %v534_v20, %v536_v32  ;;  %v541_v16 = vrot.slane %v9394_v1, 1  ;;  %v9451_v17 = vld [vmem:[#allocation2 + $0x160] sm:$0x3] }
  0x53   : > { %11618 = vst [vmem:[#allocation19_spill] sm:$0xff] %v9405_v10  ;;  %v9409_v19 = vsel %vm482_vm4, %v538_v49, %v539_v50  ;;  %v9453_v2 = vld [vmem:[#allocation2 + $0x168] sm:$0xff]  ;;  %v9470_v57 = vld [vmem:[#allocation2 + $0x178] sm:$0x3] }
  0x54   : > { %11619 = vst [vmem:[#allocation20_spill] sm:$0xff] %v9409_v19  ;;  %v9424_v20 = vsel %vm482_vm4, %v539_v50, %v541_v16 }
  0x55   : > { %7475 = vmatmul.mubr.msk.f32.gmra.mrb[10].mxu0 %vm225_vm1, %v9310_v28  ;;  %11620 = vst [vmem:[#allocation21_spill] sm:$0xff] %v9424_v20  ;;  %v9434_v28 = vld [vmem:[#allocation2 + $0x150] sm:$0xff] }
  0x56   : > { %7477 = vmatprep.mubr.msk.f32.mxu0 %vm225_vm1, %v9314_v30  ;;  %v9432_v30 = vld [vmem:[#allocation2 + $0x148] sm:$0x3] }
  0x59   : > { %7478 = vmatmul.mubr.msk.f32.gmra.mrb[12].mxu0 %vm225_vm1, %v9329_v42 }
  0x5a   : > { %7480 = vmatprep.mubr.msk.f32.mxu0 %vm225_vm1, %v9333_v46  ;;  %v9415_v46 = vld [vmem:[#allocation2 + $0x138] sm:$0xff] }
  0x5d   : > { %7481 = vmatmul.mubr.msk.f32.gmra.mrb[14].mxu0 %vm225_vm1, %v9348_v0  ;;  %v9413_v0 = vld [vmem:[#allocation2 + $0x130] sm:$0x3] }
  0x5e   : > { %7483 = vmatprep.mubr.msk.f32.mxu0 %vm225_vm1, %v9352_v3  ;;  %v546_v32 = vrot.slane %v9413_v0, 1 }
  0x61   : > { %7484 = vmatmul.mubr.msk.f32.gmra.mrb[16].mxu0 %vm225_vm1, %v9367_v15  ;;  %v9398_v15 = vld [vmem:[#allocation2 + $0x128] sm:$0xff] }
  0x62   : > { %7486 = vmatprep.mubr.msk.f32.mxu0 %vm225_vm1, %v9371_v18  ;;  %v543_v18 = vrot.slane %v9396_v4, 1  ;;  %v544_v3 = vrot.slane %v9398_v15, 1 }
  0x64   : > { %v9428_v49 = vsel %vm482_vm4, %v543_v18, %v544_v3  ;;  %v9443_v50 = vsel %vm482_vm4, %v544_v3, %v546_v32  ;;  %v551_v18 = vrot.slane %v9432_v30, 1 }
  0x65   : > { %7487 = vmatmul.mubr.msk.f32.gmra.mrb[18].mxu0 %vm225_vm1, %v9386_v31  ;;  %v9417_v31 = vld [vmem:[#allocation2 + $0x140] sm:$0xff]  ;;  %11621 = vst [vmem:[#allocation22_spill] sm:$0xff] %v9428_v49  ;;  %11622 = vst [vmem:[#allocation23_spill] sm:$0xff] %v9443_v50 }
  0x66   : > { %7489 = vmatprep.mubr.msk.f32.mxu0 %vm225_vm1, %v9390_v43  ;;  %v548_v43 = vrot.slane %v9415_v46, 1  ;;  %v549_v42 = vrot.slane %v9417_v31, 1 }
  0x68   : > { %v9447_v16 = vsel %vm482_vm4, %v548_v43, %v549_v42  ;;  %v9462_v3 = vsel %vm482_vm4, %v549_v42, %v551_v18  ;;  %v556_v43 = vrot.slane %v9451_v17, 1  ;;  %v561_v18 = vrot.slane %v9470_v57, 1 }
  0x69   : > { %7490 = vmatmul.mubr.msk.f32.gmra.mrb[20].mxu0 %vm225_vm1, %v9405_v10  ;;  %v9436_v10 = vld [vmem:[#allocation2 + $0x158] sm:$0xff]  ;;  %11623 = vst [vmem:[#allocation24_spill] sm:$0xff] %v9447_v16 }
  0x6a   : > { %7492 = vmatprep.mubr.msk.f32.mxu0 %vm225_vm1, %v9409_v19  ;;  %v553_v19 = vrot.slane %v9434_v28, 1  ;;  %v554_v22 = vrot.slane %v9436_v10, 1 }
  0x6c   : > { %v9466_v32 = vsel %vm482_vm4, %v553_v19, %v554_v22  ;;  %v9477_v42 = vsel %vm482_vm4, %v554_v22, %v556_v43  ;;  %v1555_v22 = vld [vmem:[%s11452_s1 + $0xc] sm:$0xf]  ;;  %v1151_v43 = vrot.slane %v9128_v6, 2 }
  0x6d   : > { %7493 = vmatmul.mubr.msk.f32.gmra.mrb[22].mxu0 %vm225_vm1, %v9424_v20  ;;  %v9455_v20 = vld [vmem:[#allocation2 + $0x170] sm:$0xff]  ;;  %11624 = vst [vmem:[#allocation25_spill] sm:$0xff] %v9466_v32  ;;  %11625 = vst [vmem:[#allocation26_spill] sm:$0xff] %v9477_v42 }
  0x6e   : > { %7495 = vmatprep.mubr.msk.f32.mxu0 %vm225_vm1, %v9428_v49  ;;  %v558_v49 = vrot.slane %v9453_v2, 1  ;;  %v559_v63 = vrot.slane %v9455_v20, 1 }
  0x70   : > { %v9481_v19 = vsel %vm482_vm4, %v558_v49, %v559_v63  ;;  %v1150_v49 = vrot.slane %v9135_v9, 2 }
  0x71   : > { %7496 = vmatmul.mubr.msk.f32.gmra.mrb[24].mxu0 %vm225_vm1, %v9443_v50  ;;  %11626 = vst [vmem:[#allocation27_spill] sm:$0xff] %v9481_v19 }
  0x72   : > { %7498 = vmatprep.mubr.msk.f32.mxu0 %vm225_vm1, %v9447_v16  ;;  %v9488_v16 = vsel %vm482_vm4, %v559_v63, %v561_v18  ;;  %v345_v63 = vld [vmem:[%s9123_s28 + $0xf8] sm:$0xff]  ;;  %v1153_v18 = vrot.slane %v9143_v14, 2 }
  0x73   : > { %11627 = vst [vmem:[#allocation28_spill] sm:$0xff] %v9488_v16  ;;  %378 = vst.msk [vmem:[#allocation2 + $0x189] sm:$0xff] %vm225_vm1, %v345_v63  ;;  %v1155_v63 = vrot.slane %v9184_v33, 2 }
  0x75   : > { %7499 = vmatmul.mubr.msk.f32.gmra.mrb[26].mxu0 %vm225_vm1, %v9462_v3 }
  0x76   : > { %7501 = vmatprep.mubr.msk.f32.mxu0 %vm225_vm1, %v9466_v32 }
  0x79   : > { %7502 = vmatmul.mubr.msk.f32.gmra.mrb[28].mxu0 %vm225_vm1, %v9477_v42  ;;  %v9583_v42 = vld [vmem:[%s11452_s1 + $0x10] sm:$0xf] }
  0x7a   : > { %7504 = vmatprep.mubr.msk.f32.mxu0 %vm225_vm1, %v9481_v19  ;;  %v1160_v19 = vrot.slane %v9196_v39, 2 }
  0x7d   : > { %7505 = vmatmul.mubr.msk.f32.gmra.mrb[30].mxu0 %vm225_vm1, %v9488_v16  ;;  %v1156_v16 = vrot.slane %v9186_v34, 2 }
  0x7e   : > { %7509 = vmatprep.mubr.msk.f32.mxu0 %vm225_vm1, %v9135_v9  ;;  %v1158_v9 = vrot.slane %v9188_v35, 2 }
  0x7f   : > { %v9576_v14 = vsel %vm1149_vm5, %v1155_v63, %v1156_v16  ;;  %v1166_v63 = vrot.slane %v9208_v45, 2 }
  0x80   : > { %v9590_v35 = vsel %vm1149_vm5, %v1156_v16, %v1158_v9 }
  0x81   : > { %7510 = vmatmul.mubr.msk.f32.vlgmr.msra.gmra.mrb[0].mxu0 %vm225_vm1, %v9128_v6  ;;  %v1154_v6 = vsel %vm1149_vm5, %v1151_v43, %v1153_v18 }
  0x82   : > { %7558 = vmatpush3.msk.msra.mxu0 %vm628_vm0, %v9158_v21  ;;  %7512 = vmatprep.mubr.msk.f32.mxu0 %vm225_vm1, %v9184_v33  ;;  %v344_v21 = vld [vmem:[%s9123_s28 + $0xf0] sm:$0xff] }
  0x83   : > { %7607 = vmatprep.subr.msk.mxu0 %vm628_vm0, %v1555_v22  ;;  %377 = vst.msk [vmem:[#allocation2 + $0x181] sm:$0xff] %vm225_vm1, %v344_v21  ;;  %v1152_v21 = vsel %vm1149_vm5, %v1150_v49, %v1151_v43  ;;  %v1161_v49 = vrot.slane %v9198_v40, 2  ;;  %v1163_v43 = vrot.slane %v9206_v44, 2  ;;  %v1168_v44 = vrot.slane %v9219_v51, 2 }
  0x85   : > { %7513 = vmatmul.mubr.msk.f32.gmra.mrb[2].mxu0 %vm225_vm1, %v9186_v34  ;;  %v9594_v18 = vsel %vm1149_vm5, %v1160_v19, %v1161_v49  ;;  %v9605_v16 = vsel %vm1149_vm5, %v1161_v49, %v1163_v43  ;;  %v9618_v9 = vsel %vm1149_vm5, %v1166_v63, %v1168_v44  ;;  %v1173_v49 = vrot.slane %v9243_v60, 2 }
  0x86   : > { %7515 = vmatprep.mubr.msk.f32.mxu0 %vm225_vm1, %v9196_v39  ;;  %v1175_v43 = vrot.slane %v9245_v61, 2  ;;  %v1180_v44 = vrot.slane %v9265_v7, 2 }
  0x89   : > { %7516 = vmatmul.mubr.msk.f32.gmra.mrb[4].mxu0 %vm225_vm1, %v9198_v40 }
  0x8a   : > { %7518 = vmatprep.mubr.msk.f32.mxu0 %vm225_vm1, %v9200_v41 }
  0x8d   : > { %7519 = vmatmul.mubr.msk.f32.gmra.mrb[6].mxu0 %vm225_vm1, %v9208_v45 }
  0x8e   : > { %7521 = vmatprep.mubr.msk.f32.mxu0 %vm225_vm1, %v9226_v53 }
  0x91   : > { %7522 = vmatmul.mubr.msk.f32.gmra.mrb[8].mxu0 %vm225_vm1, %v9228_v54 }
  0x92   : > { %7524 = vmatprep.mubr.msk.f32.mxu0 %vm225_vm1, %v9245_v61 }
  0x95   : > { %7525 = vmatmul.mubr.msk.f32.gmra.mrb[10].mxu0 %vm225_vm1, %v9247_v62 }
  0x96   : > { %7527 = vmatprep.mubr.msk.f32.mxu0 %vm225_vm1, %v9265_v7 }
  0x99   : > { %7528 = vmatmul.mubr.msk.f32.gmra.mrb[12].mxu0 %vm225_vm1, %v9267_v8 }
  0x9a   : > { %7530 = vmatprep.mubr.msk.f32.mxu0 %vm225_vm1, %v9301_v26 }
  0x9d   : > { %7531 = vmatmul.mubr.msk.f32.gmra.mrb[14].mxu0 %vm225_vm1, %v9303_v27 }
  0x9e   : > { %7533 = vmatprep.mubr.msk.f32.mxu0 %vm225_vm1, %v9320_v37 }
  0xa1   : > { %7534 = vmatmul.mubr.msk.f32.gmra.mrb[16].mxu0 %vm225_vm1, %v9322_v38 }
  0xa2   : > { %7536 = vmatprep.mubr.msk.f32.mxu0 %vm225_vm1, %v9339_v58 }
  0xa5   : > { %7537 = vmatmul.mubr.msk.f32.gmra.mrb[18].mxu0 %vm225_vm1, %v9341_v59 }
  0xa6   : > { %7539 = vmatprep.mubr.msk.f32.mxu0 %vm225_vm1, %v9358_v12 }
  0xa9   : > { %7540 = vmatmul.mubr.msk.f32.gmra.mrb[20].mxu0 %vm225_vm1, %v9360_v13 }
  0xaa   : > { %7542 = vmatprep.mubr.msk.f32.mxu0 %vm225_vm1, %v9377_v24 }
  0xad   : > { %7543 = vmatmul.mubr.msk.f32.gmra.mrb[22].mxu0 %vm225_vm1, %v9379_v29 }
  0xae   : > { %7545 = vmatprep.mubr.msk.f32.mxu0 %vm225_vm1, %v9396_v4 }
  0xb1   : > { %7546 = vmatmul.mubr.msk.f32.gmra.mrb[24].mxu0 %vm225_vm1, %v9398_v15 }
  0xb2   : > { %7548 = vmatprep.mubr.msk.f32.mxu0 %vm225_vm1, %v9415_v46 }
  0xb5   : > { %7549 = vmatmul.mubr.msk.f32.gmra.mrb[26].mxu0 %vm225_vm1, %v9417_v31 }
  0xb6   : > { %7551 = vmatprep.mubr.msk.f32.mxu0 %vm225_vm1, %v9434_v28 }
  0xb9   : > { %7552 = vmatmul.mubr.msk.f32.gmra.mrb[28].mxu0 %vm225_vm1, %v9436_v10 }
  0xba   : > { %7554 = vmatprep.mubr.msk.f32.mxu0 %vm225_vm1, %v9453_v2 }
  0xbd   : > { %7555 = vmatmul.mubr.msk.f32.gmra.mrb[30].mxu0 %vm225_vm1, %v9455_v20 }
  0xbe   : > { %7559 = vmatprep.mubr.msk.f32.mxu0 %vm225_vm1, %v1152_v21  ;;  %v1165_v21 = vrot.slane %v9200_v41, 2 }
  0xc0   : > { %v9609_v19 = vsel %vm1149_vm5, %v1165_v21, %v1166_v63  ;;  %v1176_v21 = vrot.slane %v9247_v62, 2  ;;  %v1178_v63 = vrot.slane %v9263_v5, 2 }
  0xc1   : > { %7560 = vmatmul.mubr.msk.f32.vlgmr.msra.gmra.mrb[0].mxu0 %vm225_vm1, %v1154_v6  ;;  %11628 = vst [vmem:[#allocation29_spill] sm:$0xff] %v9609_v19  ;;  %v1171_v6 = vrot.slane %v9228_v54, 2 }
  0xc2   : > { %7608 = vmatpush3.msk.msra.mxu0 %vm628_vm0, %v1555_v22  ;;  %7562 = vmatprep.mubr.msk.f32.mxu0 %vm225_vm1, %v9576_v14  ;;  %v1170_v22 = vrot.slane %v9226_v53, 2  ;;  %v9635_v60 = vsel %vm1149_vm5, %v1175_v43, %v1176_v21  ;;  %v1186_v43 = vrot.slane %v9303_v27, 2 }
  0xc3   : > { %7657 = vmatprep.subr.msk.mxu0 %vm628_vm0, %v9583_v42  ;;  %11630 = vst [vmem:[#allocation31_spill] sm:$0xff] %v9635_v60 }
  0xc4   : > { %v9622_v51 = vsel %vm1149_vm5, %v1170_v22, %v1171_v6  ;;  %v1181_v22 = vrot.slane %v9267_v8, 2 }
  0xc5   : > { %7563 = vmatmul.mubr.msk.f32.gmra.mrb[2].mxu0 %vm225_vm1, %v9590_v35  ;;  %11629 = vst [vmem:[#allocation30_spill] sm:$0xff] %v9622_v51 }
  0xc6   : > { %7565 = vmatprep.mubr.msk.f32.mxu0 %vm225_vm1, %v9594_v18  ;;  %v9648_v5 = vsel %vm1149_vm5, %v1180_v44, %v1181_v22  ;;  %v1191_v44 = vrot.slane %v9322_v38, 2 }
  0xc7   : > { %11631 = vst [vmem:[#allocation32_spill] sm:$0xff] %v9648_v5 }
  0xc9   : > { %7566 = vmatmul.mubr.msk.f32.gmra.mrb[4].mxu0 %vm225_vm1, %v9605_v16 }
  0xca   : > { %7568 = vmatprep.mubr.msk.f32.mxu0 %vm225_vm1, %v9609_v19  ;;  %v9631_v19 = vsel %vm1149_vm5, %v1171_v6, %v1173_v49  ;;  %v1183_v6 = vrot.slane %v9297_v25, 2  ;;  %v1185_v49 = vrot.slane %v9301_v26, 2 }
  0xcc   : > { %v9661_v25 = vsel %vm1149_vm5, %v1185_v49, %v1186_v43  ;;  %v1196_v49 = vrot.slane %v9341_v59, 2 }
  0xcd   : > { %7569 = vmatmul.mubr.msk.f32.gmra.mrb[6].mxu0 %vm225_vm1, %v9618_v9  ;;  %11632 = vst [vmem:[#allocation33_spill] sm:$0xff] %v9661_v25 }
  0xce   : > { %7571 = vmatprep.mubr.msk.f32.mxu0 %vm225_vm1, %v9622_v51  ;;  %v9644_v51 = vsel %vm1149_vm5, %v1176_v21, %v1178_v63  ;;  %v1188_v21 = vrot.slane %v9318_v36, 2  ;;  %v1190_v63 = vrot.slane %v9320_v37, 2 }
  0xd0   : > { %v9674_v36 = vsel %vm1149_vm5, %v1190_v63, %v1191_v44  ;;  %v1201_v63 = vrot.slane %v9360_v13, 2 }
  0xd1   : > { %7572 = vmatmul.mubr.msk.f32.gmra.mrb[8].mxu0 %vm225_vm1, %v9631_v19  ;;  %11633 = vst [vmem:[#allocation34_spill] sm:$0xff] %v9674_v36 }
  0xd2   : > { %7574 = vmatprep.mubr.msk.f32.mxu0 %vm225_vm1, %v9635_v60  ;;  %v9657_v60 = vsel %vm1149_vm5, %v1181_v22, %v1183_v6  ;;  %v1193_v22 = vrot.slane %v9337_v56, 2  ;;  %v1195_v6 = vrot.slane %v9339_v58, 2 }
  0xd4   : > { %v9687_v56 = vsel %vm1149_vm5, %v1195_v6, %v1196_v49  ;;  %v1206_v6 = vrot.slane %v9379_v29, 2 }
  0xd5   : > { %7575 = vmatmul.mubr.msk.f32.gmra.mrb[10].mxu0 %vm225_vm1, %v9644_v51  ;;  %11634 = vst [vmem:[#allocation35_spill] sm:$0xff] %v9687_v56 }
  0xd6   : > { %7577 = vmatprep.mubr.msk.f32.mxu0 %vm225_vm1, %v9648_v5  ;;  %v9670_v5 = vsel %vm1149_vm5, %v1186_v43, %v1188_v21  ;;  %v1198_v43 = vrot.slane %v9356_v11, 2  ;;  %v1200_v21 = vrot.slane %v9358_v12, 2 }
  0xd8   : > { %v9700_v11 = vsel %vm1149_vm5, %v1200_v21, %v1201_v63  ;;  %v1211_v21 = vrot.slane %v9398_v15, 2 }
  0xd9   : > { %7578 = vmatmul.mubr.msk.f32.gmra.mrb[12].mxu0 %vm225_vm1, %v9657_v60  ;;  %11635 = vst [vmem:[#allocation36_spill] sm:$0xff] %v9700_v11 }
  0xda   : > { %7580 = vmatprep.mubr.msk.f32.mxu0 %vm225_vm1, %v9661_v25  ;;  %v9683_v25 = vsel %vm1149_vm5, %v1191_v44, %v1193_v22  ;;  %v1203_v44 = vrot.slane %v9375_v23, 2  ;;  %v1205_v22 = vrot.slane %v9377_v24, 2 }
  0xdc   : > { %v9713_v23 = vsel %vm1149_vm5, %v1205_v22, %v1206_v6  ;;  %v1216_v22 = vrot.slane %v9417_v31, 2 }
  0xdd   : > { %7581 = vmatmul.mubr.msk.f32.gmra.mrb[14].mxu0 %vm225_vm1, %v9670_v5  ;;  %11637 = vst [vmem:[#allocation38_spill] sm:$0xff] %v9713_v23 }
  0xde   : > { %7583 = vmatprep.mubr.msk.f32.mxu0 %vm225_vm1, %v9674_v36  ;;  %v9696_v36 = vsel %vm1149_vm5, %v1196_v49, %v1198_v43  ;;  %v1208_v49 = vrot.slane %v9394_v1, 2  ;;  %v1210_v43 = vrot.slane %v9396_v4, 2 }
  0xe0   : > { %v9726_v1 = vsel %vm1149_vm5, %v1210_v43, %v1211_v21  ;;  %v1221_v43 = vrot.slane %v9436_v10, 2 }
  0xe1   : > { %7584 = vmatmul.mubr.msk.f32.gmra.mrb[16].mxu0 %vm225_vm1, %v9683_v25  ;;  %11638 = vst [vmem:[#allocation39_spill] sm:$0xff] %v9726_v1 }
  0xe2   : > { %7586 = vmatprep.mubr.msk.f32.mxu0 %vm225_vm1, %v9687_v56  ;;  %v9709_v56 = vsel %vm1149_vm5, %v1201_v63, %v1203_v44  ;;  %v1213_v63 = vrot.slane %v9413_v0, 2  ;;  %v1215_v44 = vrot.slane %v9415_v46, 2 }
  0xe3   : > { %11636 = vst [vmem:[#allocation37_spill] sm:$0xff] %v9709_v56 }
  0xe4   : > { %v9739_v0 = vsel %vm1149_vm5, %v1215_v44, %v1216_v22  ;;  %v1226_v44 = vrot.slane %v9455_v20, 2 }
  0xe5   : > { %7587 = vmatmul.mubr.msk.f32.gmra.mrb[18].mxu0 %vm225_vm1, %v9696_v36  ;;  %11640 = vst [vmem:[#allocation41_spill] sm:$0xff] %v9739_v0 }
  0xe6   : > { %7589 = vmatprep.mubr.msk.f32.mxu0 %vm225_vm1, %v9700_v11  ;;  %v9722_v11 = vsel %vm1149_vm5, %v1206_v6, %v1208_v49  ;;  %v1218_v6 = vrot.slane %v9432_v30, 2  ;;  %v1220_v49 = vrot.slane %v9434_v28, 2 }
  0xe8   : > { %v9752_v30 = vsel %vm1149_vm5, %v1220_v49, %v1221_v43  ;;  %v11642_v49 = vld [vmem:[#allocation4_spill] sm:$0xff] }
  0xe9   : > { %7590 = vmatmul.mubr.msk.f32.gmra.mrb[20].mxu0 %vm225_vm1, %v9709_v56  ;;  %11641 = vst [vmem:[#allocation42_spill] sm:$0xff] %v9752_v30 }
  0xea   : > { %7592 = vmatprep.mubr.msk.f32.mxu0 %vm225_vm1, %v9713_v23  ;;  %v9735_v23 = vsel %vm1149_vm5, %v1211_v21, %v1213_v63  ;;  %v1223_v21 = vrot.slane %v9451_v17, 2  ;;  %v1225_v63 = vrot.slane %v9453_v2, 2 }
  0xeb   : > { %11639 = vst [vmem:[#allocation40_spill] sm:$0xff] %v9735_v23 }
  0xec   : > { %v9765_v17 = vsel %vm1149_vm5, %v1225_v63, %v1226_v44  ;;  %v11647_v63 = vld [vmem:[#allocation9_spill] sm:$0xff] }
  0xed   : > { %7593 = vmatmul.mubr.msk.f32.gmra.mrb[22].mxu0 %vm225_vm1, %v9722_v11 }
  0xee   : > { %7595 = vmatprep.mubr.msk.f32.mxu0 %vm225_vm1, %v9726_v1  ;;  %v9748_v1 = vsel %vm1149_vm5, %v1216_v22, %v1218_v6  ;;  %v1228_v22 = vrot.slane %v9470_v57, 2  ;;  %v2098_v57 = vld [vmem:[%s11452_s1 + $0x14] sm:$0xf] }
  0xf0   : > { %v9772_v6 = vsel %vm1149_vm5, %v1226_v44, %v1228_v22  ;;  %v11648_v44 = vld [vmem:[#allocation10_spill] sm:$0xff]  ;;  %v11649_v22 = vld [vmem:[#allocation11_spill] sm:$0xff] }
  0xf1   : > { %7596 = vmatmul.mubr.msk.f32.gmra.mrb[24].mxu0 %vm225_vm1, %v9735_v23 }
  0xf2   : > { %7598 = vmatprep.mubr.msk.f32.mxu0 %vm225_vm1, %v9739_v0  ;;  %v9761_v0 = vsel %vm1149_vm5, %v1221_v43, %v1223_v21  ;;  %v11644_v43 = vld [vmem:[#allocation6_spill] sm:$0xff]  ;;  %v11646_v21 = vld [vmem:[#allocation8_spill] sm:$0xff] }
  0xf5   : > { %7599 = vmatmul.mubr.msk.f32.gmra.mrb[26].mxu0 %vm225_vm1, %v9748_v1 }
  0xf6   : > { %7601 = vmatprep.mubr.msk.f32.mxu0 %vm225_vm1, %v9752_v30 }
  0xf9   : > { %7602 = vmatmul.mubr.msk.f32.gmra.mrb[28].mxu0 %vm225_vm1, %v9761_v0 }
  0xfa   : > { %7604 = vmatprep.mubr.msk.f32.mxu0 %vm225_vm1, %v9765_v17 }
  0xfd   : > { %7605 = vmatmul.mubr.msk.f32.gmra.mrb[30].mxu0 %vm225_vm1, %v9772_v6 }
  0xfe   : > { %7609 = vmatprep.mubr.msk.f32.mxu0 %vm225_vm1, %v9184_v33  ;;  %v9840_v33 = vld [vmem:[#allocation2 + $0x180] sm:$0xff] }
 0x101   : > { %7610 = vmatmul.mubr.msk.f32.vlgmr.msra.gmra.mrb[0].mxu0 %vm225_vm1, %v9186_v34  ;;  %v9846_v34 = vld [vmem:[#allocation2 + $0x188] sm:$0xff] }
 0x102   : > { %7658 = vmatpush3.msk.msra.mxu0 %vm628_vm0, %v9583_v42  ;;  %7612 = vmatprep.mubr.msk.f32.mxu0 %vm225_vm1, %v9196_v39  ;;  %v2363_v42 = vld [vmem:[%s11452_s1 + $0x18] sm:$0xf] }
 0x103   : > { %7707 = vmatprep.subr.msk.mxu0 %vm628_vm0, %v2098_v57 }
 0x105   : > { %7613 = vmatmul.mubr.msk.f32.gmra.mrb[2].mxu0 %vm225_vm1, %v9198_v40 }
 0x106   : > { %7615 = vmatprep.mubr.msk.f32.mxu0 %vm225_vm1, %v9200_v41 }
 0x109   : > { %7616 = vmatmul.mubr.msk.f32.gmra.mrb[4].mxu0 %vm225_vm1, %v9208_v45 }
 0x10a   : > { %7618 = vmatprep.mubr.msk.f32.mxu0 %vm225_vm1, %v9226_v53 }
 0x10d   : > { %7619 = vmatmul.mubr.msk.f32.gmra.mrb[6].mxu0 %vm225_vm1, %v9228_v54 }
 0x10e   : > { %7621 = vmatprep.mubr.msk.f32.mxu0 %vm225_vm1, %v9245_v61 }
 0x111   : > { %7622 = vmatmul.mubr.msk.f32.gmra.mrb[8].mxu0 %vm225_vm1, %v9247_v62 }
 0x112   : > { %7624 = vmatprep.mubr.msk.f32.mxu0 %vm225_vm1, %v9265_v7 }
 0x115   : > { %7625 = vmatmul.mubr.msk.f32.gmra.mrb[10].mxu0 %vm225_vm1, %v9267_v8 }
 0x116   : > { %7627 = vmatprep.mubr.msk.f32.mxu0 %vm225_vm1, %v9301_v26 }
 0x119   : > { %7628 = vmatmul.mubr.msk.f32.gmra.mrb[12].mxu0 %vm225_vm1, %v9303_v27 }
 0x11a   : > { %7630 = vmatprep.mubr.msk.f32.mxu0 %vm225_vm1, %v9320_v37 }
 0x11d   : > { %7631 = vmatmul.mubr.msk.f32.gmra.mrb[14].mxu0 %vm225_vm1, %v9322_v38 }
 0x11e   : > { %7633 = vmatprep.mubr.msk.f32.mxu0 %vm225_vm1, %v9339_v58 }
 0x121   : > { %7634 = vmatmul.mubr.msk.f32.gmra.mrb[16].mxu0 %vm225_vm1, %v9341_v59 }
 0x122   : > { %7636 = vmatprep.mubr.msk.f32.mxu0 %vm225_vm1, %v9358_v12 }
 0x125   : > { %7637 = vmatmul.mubr.msk.f32.gmra.mrb[18].mxu0 %vm225_vm1, %v9360_v13 }
 0x126   : > { %7639 = vmatprep.mubr.msk.f32.mxu0 %vm225_vm1, %v9377_v24 }
 0x129   : > { %7640 = vmatmul.mubr.msk.f32.gmra.mrb[20].mxu0 %vm225_vm1, %v9379_v29 }
 0x12a   : > { %7642 = vmatprep.mubr.msk.f32.mxu0 %vm225_vm1, %v9396_v4 }
 0x12d   : > { %7643 = vmatmul.mubr.msk.f32.gmra.mrb[22].mxu0 %vm225_vm1, %v9398_v15 }
 0x12e   : > { %7645 = vmatprep.mubr.msk.f32.mxu0 %vm225_vm1, %v9415_v46 }
 0x131   : > { %7646 = vmatmul.mubr.msk.f32.gmra.mrb[24].mxu0 %vm225_vm1, %v9417_v31 }
 0x132   : > { %7648 = vmatprep.mubr.msk.f32.mxu0 %vm225_vm1, %v9434_v28 }
 0x135   : > { %7649 = vmatmul.mubr.msk.f32.gmra.mrb[26].mxu0 %vm225_vm1, %v9436_v10 }
 0x136   : > { %7651 = vmatprep.mubr.msk.f32.mxu0 %vm225_vm1, %v9453_v2 }
 0x139   : > { %7652 = vmatmul.mubr.msk.f32.gmra.mrb[28].mxu0 %vm225_vm1, %v9455_v20 }
 0x13a   : > { %7654 = vmatprep.mubr.msk.f32.mxu0 %vm225_vm1, %v9840_v33 }
 0x13d   : > { %7655 = vmatmul.mubr.msk.f32.gmra.mrb[30].mxu0 %vm225_vm1, %v9846_v34 }
 0x13e   : > { %7659 = vmatprep.mubr.msk.f32.mxu0 %vm225_vm1, %v9212_v47  ;;  %v11643_v47 = vld [vmem:[#allocation5_spill] sm:$0xff] }
 0x141   : > { %7660 = vmatmul.mubr.msk.f32.vlgmr.msra.gmra.mrb[0].mxu0 %vm225_vm1, %v9215_v48  ;;  %v11645_v48 = vld [vmem:[#allocation7_spill] sm:$0xff] }
 0x142   : > { %7708 = vmatpush3.msk.msra.mxu0 %vm628_vm0, %v2098_v57  ;;  %7662 = vmatprep.mubr.msk.f32.mxu0 %vm225_vm1, %v9224_v52  ;;  %v11650_v57 = vld [vmem:[#allocation12_spill] sm:$0xff] }
 0x143   : > { %7757 = vmatprep.subr.msk.mxu0 %vm628_vm0, %v2363_v42 }
 0x145   : > { %7663 = vmatmul.mubr.msk.f32.gmra.mrb[2].mxu0 %vm225_vm1, %v9235_v55 }
 0x146   : > { %7665 = vmatprep.mubr.msk.f32.mxu0 %vm225_vm1, %v11642_v49 }
 0x149   : > { %7666 = vmatmul.mubr.msk.f32.gmra.mrb[4].mxu0 %vm225_vm1, %v11643_v47  ;;  %v11651_v47 = vld [vmem:[#allocation13_spill] sm:$0xff] }
 0x14a   : > { %7668 = vmatprep.mubr.msk.f32.mxu0 %vm225_vm1, %v11644_v43  ;;  %v11652_v43 = vld [vmem:[#allocation14_spill] sm:$0xff] }
 0x14d   : > { %7669 = vmatmul.mubr.msk.f32.gmra.mrb[6].mxu0 %vm225_vm1, %v11645_v48  ;;  %v11653_v48 = vld [vmem:[#allocation15_spill] sm:$0xff] }
 0x14e   : > { %7671 = vmatprep.mubr.msk.f32.mxu0 %vm225_vm1, %v11646_v21  ;;  %v11654_v21 = vld [vmem:[#allocation16_spill] sm:$0xff] }
 0x151   : > { %7672 = vmatmul.mubr.msk.f32.gmra.mrb[8].mxu0 %vm225_vm1, %v11647_v63  ;;  %v11655_v63 = vld [vmem:[#allocation17_spill] sm:$0xff] }
 0x152   : > { %7674 = vmatprep.mubr.msk.f32.mxu0 %vm225_vm1, %v11648_v44  ;;  %v11656_v44 = vld [vmem:[#allocation18_spill] sm:$0xff] }
 0x155   : > { %7675 = vmatmul.mubr.msk.f32.gmra.mrb[10].mxu0 %vm225_vm1, %v11649_v22  ;;  %v11657_v22 = vld [vmem:[#allocation19_spill] sm:$0xff] }
 0x156   : > { %7677 = vmatprep.mubr.msk.f32.mxu0 %vm225_vm1, %v11650_v57  ;;  %v11658_v57 = vld [vmem:[#allocation20_spill] sm:$0xff] }
 0x159   : > { %7678 = vmatmul.mubr.msk.f32.gmra.mrb[12].mxu0 %vm225_vm1, %v11651_v47  ;;  %v11659_v47 = vld [vmem:[#allocation21_spill] sm:$0xff] }
 0x15a   : > { %7680 = vmatprep.mubr.msk.f32.mxu0 %vm225_vm1, %v11652_v43  ;;  %v11660_v43 = vld [vmem:[#allocation22_spill] sm:$0xff] }
 0x15d   : > { %7681 = vmatmul.mubr.msk.f32.gmra.mrb[14].mxu0 %vm225_vm1, %v11653_v48 }
 0x15e   : > { %7683 = vmatprep.mubr.msk.f32.mxu0 %vm225_vm1, %v11654_v21  ;;  %v11661_v21 = vld [vmem:[#allocation24_spill] sm:$0xff] }
 0x161   : > { %7684 = vmatmul.mubr.msk.f32.gmra.mrb[16].mxu0 %vm225_vm1, %v11655_v63  ;;  %v11664_v63 = vld [vmem:[#allocation28_spill] sm:$0xff] }
 0x162   : > { %7686 = vmatprep.mubr.msk.f32.mxu0 %vm225_vm1, %v11656_v44  ;;  %v11662_v44 = vld [vmem:[#allocation26_spill] sm:$0xff] }
 0x165   : > { %7687 = vmatmul.mubr.msk.f32.gmra.mrb[18].mxu0 %vm225_vm1, %v11657_v22  ;;  %v1824_v22 = vrot.slane %v9846_v34, 1 }
 0x166   : > { %7689 = vmatprep.mubr.msk.f32.mxu0 %vm225_vm1, %v11658_v57  ;;  %v1823_v57 = vrot.slane %v9840_v33, 1 }
 0x169   : > { %7690 = vmatmul.mubr.msk.f32.gmra.mrb[20].mxu0 %vm225_vm1, %v11659_v47  ;;  %v429_v47 = vld [vmem:[#allocation2 + $0x190] sm:$0x3] }
 0x16a   : > { %7692 = vmatprep.mubr.msk.f32.mxu0 %vm225_vm1, %v11660_v43  ;;  %v11663_v43 = vld [vmem:[#allocation27_spill] sm:$0xff] }
 0x16d   : > { %7693 = vmatmul.mubr.msk.f32.gmra.mrb[22].mxu0 %vm225_vm1, %v9443_v50  ;;  %v1826_v50 = vrot.slane %v429_v47, 1 }
 0x16e   : > { %7695 = vmatprep.mubr.msk.f32.mxu0 %vm225_vm1, %v11661_v21  ;;  %v9916_v21 = vsel %vm482_vm4, %v1823_v57, %v1824_v22  ;;  %v2636_v57 = vld [vmem:[%s11452_s1 + $0x1c] sm:$0xf] }
 0x171   : > { %7696 = vmatmul.mubr.msk.f32.gmra.mrb[24].mxu0 %vm225_vm1, %v9462_v3 }
 0x172   : > { %7698 = vmatprep.mubr.msk.f32.mxu0 %vm225_vm1, %v9466_v32  ;;  %v9923_v32 = vsel %vm482_vm4, %v1824_v22, %v1826_v50  ;;  %v11665_v50 = vld [vmem:[#allocation29_spill] sm:$0xff] }
 0x173   : > { %v11669_v22 = vld [vmem:[#allocation33_spill] sm:$0xff] }
 0x175   : > { %7699 = vmatmul.mubr.msk.f32.gmra.mrb[26].mxu0 %vm225_vm1, %v11662_v44 }
 0x176   : > { %7701 = vmatprep.mubr.msk.f32.mxu0 %vm225_vm1, %v11663_v43 }
 0x179   : > { %7702 = vmatmul.mubr.msk.f32.gmra.mrb[28].mxu0 %vm225_vm1, %v11664_v63 }
 0x17a   : > { %7704 = vmatprep.mubr.msk.f32.mxu0 %vm225_vm1, %v9916_v21 }
 0x17d   : > { %7705 = vmatmul.mubr.msk.f32.gmra.mrb[30].mxu0 %vm225_vm1, %v9923_v32 }
 0x17e   : > { %7709 = vmatprep.mubr.msk.f32.mxu0 %vm225_vm1, %v9576_v14  ;;  %v11666_v14 = vld [vmem:[#allocation30_spill] sm:$0xff] }
 0x181   : > { %7710 = vmatmul.mubr.msk.f32.vlgmr.msra.gmra.mrb[0].mxu0 %vm225_vm1, %v9590_v35  ;;  %v11667_v35 = vld [vmem:[#allocation31_spill] sm:$0xff] }
 0x182   : > { %7758 = vmatpush3.msk.msra.mxu0 %vm628_vm0, %v2363_v42  ;;  %7712 = vmatprep.mubr.msk.f32.mxu0 %vm225_vm1, %v9594_v18  ;;  %v11668_v42 = vld [vmem:[#allocation32_spill] sm:$0xff] }
 0x183   : > { %7807 = vmatprep.subr.msk.mxu0 %vm628_vm0, %v2636_v57 }
 0x185   : > { %7713 = vmatmul.mubr.msk.f32.gmra.mrb[2].mxu0 %vm225_vm1, %v9605_v16 }
 0x186   : > { %7715 = vmatprep.mubr.msk.f32.mxu0 %vm225_vm1, %v11665_v50 }
 0x189   : > { %7716 = vmatmul.mubr.msk.f32.gmra.mrb[4].mxu0 %vm225_vm1, %v9618_v9 }
 0x18a   : > { %7718 = vmatprep.mubr.msk.f32.mxu0 %vm225_vm1, %v11666_v14  ;;  %v11670_v14 = vld [vmem:[#allocation34_spill] sm:$0xff] }
 0x18d   : > { %7719 = vmatmul.mubr.msk.f32.gmra.mrb[6].mxu0 %vm225_vm1, %v9631_v19 }
 0x18e   : > { %7721 = vmatprep.mubr.msk.f32.mxu0 %vm225_vm1, %v11667_v35  ;;  %v11671_v35 = vld [vmem:[#allocation35_spill] sm:$0xff] }
 0x191   : > { %7722 = vmatmul.mubr.msk.f32.gmra.mrb[8].mxu0 %vm225_vm1, %v9644_v51 }
 0x192   : > { %7724 = vmatprep.mubr.msk.f32.mxu0 %vm225_vm1, %v11668_v42  ;;  %v11672_v42 = vld [vmem:[#allocation36_spill] sm:$0xff] }
 0x195   : > { %7725 = vmatmul.mubr.msk.f32.gmra.mrb[10].mxu0 %vm225_vm1, %v9657_v60 }
 0x196   : > { %7727 = vmatprep.mubr.msk.f32.mxu0 %vm225_vm1, %v11669_v22  ;;  %v11673_v22 = vld [vmem:[#allocation38_spill] sm:$0xff] }
 0x199   : > { %7728 = vmatmul.mubr.msk.f32.gmra.mrb[12].mxu0 %vm225_vm1, %v9670_v5 }
 0x19a   : > { %7730 = vmatprep.mubr.msk.f32.mxu0 %vm225_vm1, %v11670_v14  ;;  %v11674_v14 = vld [vmem:[#allocation39_spill] sm:$0xff] }
 0x19d   : > { %7731 = vmatmul.mubr.msk.f32.gmra.mrb[14].mxu0 %vm225_vm1, %v9683_v25 }
 0x19e   : > { %7733 = vmatprep.mubr.msk.f32.mxu0 %vm225_vm1, %v11671_v35  ;;  %v11675_v35 = vld [vmem:[#allocation41_spill] sm:$0xff] }
 0x1a1   : > { %7734 = vmatmul.mubr.msk.f32.gmra.mrb[16].mxu0 %vm225_vm1, %v9696_v36 }
 0x1a2   : > { %7736 = vmatprep.mubr.msk.f32.mxu0 %vm225_vm1, %v11672_v42 }
 0x1a5   : > { %7737 = vmatmul.mubr.msk.f32.gmra.mrb[18].mxu0 %vm225_vm1, %v9709_v56  ;;  %v2094_v56 = vrot.slane %v9846_v34, 2 }
 0x1a6   : > { %7739 = vmatprep.mubr.msk.f32.mxu0 %vm225_vm1, %v11673_v22  ;;  %v2093_v22 = vrot.slane %v9840_v33, 2 }
 0x1a9   : > { %7740 = vmatmul.mubr.msk.f32.gmra.mrb[20].mxu0 %vm225_vm1, %v9722_v11 }
 0x1aa   : > { %7742 = vmatprep.mubr.msk.f32.mxu0 %vm225_vm1, %v11674_v14  ;;  %v9993_v14 = vsel %vm1149_vm5, %v2093_v22, %v2094_v56 }
 0x1ad   : > { %7743 = vmatmul.mubr.msk.f32.gmra.mrb[22].mxu0 %vm225_vm1, %v9735_v23  ;;  %v2096_v23 = vrot.slane %v429_v47, 2  ;;  %v2906_v47 = vld [vmem:[%s11452_s1 + $0x20] sm:$0xf] }
 0x1ae   : > { %7745 = vmatprep.mubr.msk.f32.mxu0 %vm225_vm1, %v11675_v35 }
 0x1b1   : > { %7746 = vmatmul.mubr.msk.f32.gmra.mrb[24].mxu0 %vm225_vm1, %v9748_v1 }
 0x1b2   : > { %7748 = vmatprep.mubr.msk.f32.mxu0 %vm225_vm1, %v9752_v30  ;;  %v10000_v30 = vsel %vm1149_vm5, %v2094_v56, %v2096_v23 }
 0x1b5   : > { %7749 = vmatmul.mubr.msk.f32.gmra.mrb[26].mxu0 %vm225_vm1, %v9761_v0 }
 0x1b6   : > { %7751 = vmatprep.mubr.msk.f32.mxu0 %vm225_vm1, %v9765_v17 }
 0x1b9   : > { %7752 = vmatmul.mubr.msk.f32.gmra.mrb[28].mxu0 %vm225_vm1, %v9772_v6 }
 0x1ba   : > { %7754 = vmatprep.mubr.msk.f32.mxu0 %vm225_vm1, %v9993_v14 }
 0x1bd   : > { %7755 = vmatmul.mubr.msk.f32.gmra.mrb[30].mxu0 %vm225_vm1, %v10000_v30 }
 0x1be   : > { %7759 = vmatprep.mubr.msk.f32.mxu0 %vm225_vm1, %v9196_v39  ;;  %v10067_v39 = vld [vmem:[#allocation2 + $0x198] sm:$0xff] }
 0x1c1   : > { %7760 = vmatmul.mubr.msk.f32.vlgmr.msra.gmra.mrb[0].mxu0 %vm225_vm1, %v9198_v40  ;;  %v10073_v40 = vld [vmem:[#allocation2 + $0x1a0] sm:$0xff] }
 0x1c2   : > { %7808 = vmatpush3.msk.msra.mxu0 %vm628_vm0, %v2636_v57  ;;  %7762 = vmatprep.mubr.msk.f32.mxu0 %vm225_vm1, %v9200_v41  ;;  %v11676_v41 = vld [vmem:[#allocation5_spill] sm:$0xff] }
 0x1c3   : > { %7857 = vmatprep.subr.msk.mxu0 %vm628_vm0, %v2906_v47 }
 0x1c5   : > { %7763 = vmatmul.mubr.msk.f32.gmra.mrb[2].mxu0 %vm225_vm1, %v9208_v45  ;;  %v11677_v45 = vld [vmem:[#allocation6_spill] sm:$0xff] }
 0x1c6   : > { %7765 = vmatprep.mubr.msk.f32.mxu0 %vm225_vm1, %v9226_v53  ;;  %v11678_v53 = vld [vmem:[#allocation7_spill] sm:$0xff] }
 0x1c9   : > { %7766 = vmatmul.mubr.msk.f32.gmra.mrb[4].mxu0 %vm225_vm1, %v9228_v54  ;;  %v11679_v54 = vld [vmem:[#allocation8_spill] sm:$0xff] }
 0x1ca   : > { %7768 = vmatprep.mubr.msk.f32.mxu0 %vm225_vm1, %v9245_v61  ;;  %v11682_v61 = vld [vmem:[#allocation11_spill] sm:$0xff] }
 0x1cd   : > { %7769 = vmatmul.mubr.msk.f32.gmra.mrb[6].mxu0 %vm225_vm1, %v9247_v62  ;;  %v11683_v62 = vld [vmem:[#allocation12_spill] sm:$0xff] }
 0x1ce   : > { %7771 = vmatprep.mubr.msk.f32.mxu0 %vm225_vm1, %v9265_v7  ;;  %v11685_v7 = vld [vmem:[#allocation14_spill] sm:$0xff] }
 0x1d1   : > { %7772 = vmatmul.mubr.msk.f32.gmra.mrb[8].mxu0 %vm225_vm1, %v9267_v8  ;;  %v11686_v8 = vld [vmem:[#allocation16_spill] sm:$0xff] }
 0x1d2   : > { %7774 = vmatprep.mubr.msk.f32.mxu0 %vm225_vm1, %v9301_v26  ;;  %v11687_v26 = vld [vmem:[#allocation17_spill] sm:$0xff] }
 0x1d5   : > { %7775 = vmatmul.mubr.msk.f32.gmra.mrb[10].mxu0 %vm225_vm1, %v9303_v27  ;;  %v11688_v27 = vld [vmem:[#allocation18_spill] sm:$0xff] }
 0x1d6   : > { %7777 = vmatprep.mubr.msk.f32.mxu0 %vm225_vm1, %v9320_v37  ;;  %v11690_v37 = vld [vmem:[#allocation20_spill] sm:$0xff] }
 0x1d9   : > { %7778 = vmatmul.mubr.msk.f32.gmra.mrb[12].mxu0 %vm225_vm1, %v9322_v38  ;;  %v11691_v38 = vld [vmem:[#allocation21_spill] sm:$0xff] }
 0x1da   : > { %7780 = vmatprep.mubr.msk.f32.mxu0 %vm225_vm1, %v9339_v58  ;;  %v11693_v58 = vld [vmem:[#allocation23_spill] sm:$0xff] }
 0x1dd   : > { %7781 = vmatmul.mubr.msk.f32.gmra.mrb[14].mxu0 %vm225_vm1, %v9341_v59  ;;  %v11694_v59 = vld [vmem:[#allocation24_spill] sm:$0xff] }
 0x1de   : > { %7783 = vmatprep.mubr.msk.f32.mxu0 %vm225_vm1, %v9358_v12  ;;  %v11695_v12 = vld [vmem:[#allocation25_spill] sm:$0xff] }
 0x1e1   : > { %7784 = vmatmul.mubr.msk.f32.gmra.mrb[16].mxu0 %vm225_vm1, %v9360_v13  ;;  %v2631_v13 = vrot.slane %v10067_v39, 1 }
 0x1e2   : > { %7786 = vmatprep.mubr.msk.f32.mxu0 %vm225_vm1, %v9377_v24  ;;  %v432_v24 = vld [vmem:[#allocation2 + $0x1a8] sm:$0x3] }
 0x1e3   : > { %v2904_v56 = vrot.slane %v432_v24, 2 }
 0x1e5   : > { %7787 = vmatmul.mubr.msk.f32.gmra.mrb[18].mxu0 %vm225_vm1, %v9379_v29  ;;  %v2634_v29 = vrot.slane %v432_v24, 1 }
 0x1e6   : > { %7789 = vmatprep.mubr.msk.f32.mxu0 %vm225_vm1, %v9396_v4 }
 0x1e9   : > { %7790 = vmatmul.mubr.msk.f32.gmra.mrb[20].mxu0 %vm225_vm1, %v9398_v15  ;;  %v2632_v15 = vrot.slane %v10073_v40, 1 }
 0x1ea   : > { %7792 = vmatprep.mubr.msk.f32.mxu0 %vm225_vm1, %v9415_v46  ;;  %v11692_v46 = vld [vmem:[#allocation22_spill] sm:$0xff] }
 0x1eb   : > { %v2635_v4 = vsel %vm482_vm4, %v2632_v15, %v2634_v29 }
 0x1ed   : > { %7793 = vmatmul.mubr.msk.f32.gmra.mrb[22].mxu0 %vm225_vm1, %v9417_v31  ;;  %v2633_v31 = vsel %vm482_vm4, %v2631_v13, %v2632_v15 }
 0x1ee   : > { %7795 = vmatprep.mubr.msk.f32.mxu0 %vm225_vm1, %v9434_v28  ;;  %v11689_v28 = vld [vmem:[#allocation19_spill] sm:$0xff] }
 0x1f1   : > { %7796 = vmatmul.mubr.msk.f32.gmra.mrb[24].mxu0 %vm225_vm1, %v9436_v10  ;;  %v11696_v10 = vld [vmem:[#allocation30_spill] sm:$0xff] }
 0x1f2   : > { %7798 = vmatprep.mubr.msk.f32.mxu0 %vm225_vm1, %v9453_v2  ;;  %v11684_v2 = vld [vmem:[#allocation13_spill] sm:$0xff] }
 0x1f5   : > { %7799 = vmatmul.mubr.msk.f32.gmra.mrb[26].mxu0 %vm225_vm1, %v9455_v20  ;;  %v11697_v20 = vld [vmem:[#allocation31_spill] sm:$0xff] }
 0x1f6   : > { %7801 = vmatprep.mubr.msk.f32.mxu0 %vm225_vm1, %v9840_v33  ;;  %v10216_v33 = vld [vmem:[#allocation3 + $0x10] sm:$0x3] }
 0x1f9   : > { %7802 = vmatmul.mubr.msk.f32.gmra.mrb[28].mxu0 %vm225_vm1, %v9846_v34  ;;  %v3381_v34 = vrot.slane %v10216_v33, 1 }
 0x1fa   : > { %7804 = vmatprep.mubr.msk.f32.mxu0 %vm225_vm1, %v10067_v39 }
 0x1fd   : > { %7805 = vmatmul.mubr.msk.f32.gmra.mrb[30].mxu0 %vm225_vm1, %v10073_v40 }
 0x1fe   : > { %7809 = vmatprep.mubr.msk.f32.mxu0 %vm225_vm1, %v9224_v52  ;;  %v11680_v52 = vld [vmem:[#allocation9_spill] sm:$0xff] }
 0x201   : > { %7810 = vmatmul.mubr.msk.f32.vlgmr.msra.gmra.mrb[0].mxu0 %vm225_vm1, %v9235_v55  ;;  %v11681_v55 = vld [vmem:[#allocation10_spill] sm:$0xff] }
 0x202   : > { %7858 = vmatpush3.msk.msra.mxu0 %vm628_vm0, %v2906_v47  ;;  %7812 = vmatprep.mubr.msk.f32.mxu0 %vm225_vm1, %v11642_v49 }
 0x205   : > { %7813 = vmatmul.mubr.msk.f32.gmra.mrb[2].mxu0 %vm225_vm1, %v11676_v41 }
 0x206   : > { %7815 = vmatprep.mubr.msk.f32.mxu0 %vm225_vm1, %v11677_v45 }
 0x209   : > { %7816 = vmatmul.mubr.msk.f32.gmra.mrb[4].mxu0 %vm225_vm1, %v11678_v53 }
 0x20a   : > { %7818 = vmatprep.mubr.msk.f32.mxu0 %vm225_vm1, %v11679_v54 }
 0x20d   : > { %7819 = vmatmul.mubr.msk.f32.gmra.mrb[6].mxu0 %vm225_vm1, %v11680_v52 }
 0x20e   : > { %7821 = vmatprep.mubr.msk.f32.mxu0 %vm225_vm1, %v11681_v55 }
 0x211   : > { %7822 = vmatmul.mubr.msk.f32.gmra.mrb[8].mxu0 %vm225_vm1, %v11682_v61 }
 0x212   : > { %7824 = vmatprep.mubr.msk.f32.mxu0 %vm225_vm1, %v11683_v62 }
 0x215   : > { %7825 = vmatmul.mubr.msk.f32.gmra.mrb[10].mxu0 %vm225_vm1, %v11684_v2 }
 0x216   : > { %7827 = vmatprep.mubr.msk.f32.mxu0 %vm225_vm1, %v11685_v7 }
 0x219   : > { %7828 = vmatmul.mubr.msk.f32.gmra.mrb[12].mxu0 %vm225_vm1, %v11653_v48  ;;  %v3329_v48 = vld [vmem:[%s11454_s3] sm:$0xf] }
 0x21a   : > { %7830 = vmatprep.mubr.msk.f32.mxu0 %vm225_vm1, %v11686_v8 }
 0x21d   : > { %7831 = vmatmul.mubr.msk.f32.gmra.mrb[14].mxu0 %vm225_vm1, %v11687_v26 }
 0x21e   : > { %7833 = vmatprep.mubr.msk.f32.mxu0 %vm225_vm1, %v11688_v27 }
 0x221   : > { %7834 = vmatmul.mubr.msk.f32.gmra.mrb[16].mxu0 %vm225_vm1, %v11689_v28 }
 0x222   : > { %7836 = vmatprep.mubr.msk.f32.mxu0 %vm225_vm1, %v11690_v37 }
 0x225   : > { %7837 = vmatmul.mubr.msk.f32.gmra.mrb[18].mxu0 %vm225_vm1, %v11691_v38 }
 0x226   : > { %7839 = vmatprep.mubr.msk.f32.mxu0 %vm225_vm1, %v11692_v46 }
 0x229   : > { %7840 = vmatmul.mubr.msk.f32.gmra.mrb[20].mxu0 %vm225_vm1, %v11693_v58 }
 0x22a   : > { %7842 = vmatprep.mubr.msk.f32.mxu0 %vm225_vm1, %v11694_v59 }
 0x22d   : > { %7843 = vmatmul.mubr.msk.f32.gmra.mrb[22].mxu0 %vm225_vm1, %v9462_v3  ;;  %v11698_v3 = vld [vmem:[#allocation32_spill] sm:$0xff] }
 0x22e   : > { %7845 = vmatprep.mubr.msk.f32.mxu0 %vm225_vm1, %v11695_v12 }
 0x231   : > { %7846 = vmatmul.mubr.msk.f32.gmra.mrb[24].mxu0 %vm225_vm1, %v11662_v44 }
 0x232   : > { %7848 = vmatprep.mubr.msk.f32.mxu0 %vm225_vm1, %v11663_v43 }
 0x235   : > { %7849 = vmatmul.mubr.msk.f32.gmra.mrb[26].mxu0 %vm225_vm1, %v11664_v63  ;;  %v10243_v63 = vld [vmem:[%s11453_s2] ss:$0 sm:$0xff] }
 0x236   : > { %7851 = vmatprep.mubr.msk.f32.mxu0 %vm225_vm1, %v9916_v21  ;;  %v10236_v21 = vld [vmem:[%s11454_s3 + $0x8] sm:$0xf] }
 0x239   : > { %7852 = vmatmul.mubr.msk.f32.gmra.mrb[28].mxu0 %vm225_vm1, %v9923_v32  ;;  %v11699_v32 = vld [vmem:[#allocation33_spill] sm:$0xff] }
 0x23a   : > { %7854 = vmatprep.mubr.msk.f32.mxu0 %vm225_vm1, %v2633_v31 }
 0x23d   : > { %7855 = vmatmul.mubr.msk.f32.gmra.mrb[30].mxu0 %vm225_vm1, %v2635_v4 }
 0x23e   : > { %7859 = vmatprep.mubr.msk.f32.mxu0 %vm225_vm1, %v9594_v18  ;;  %v11700_v18 = vld [vmem:[#allocation34_spill] sm:$0xff] }
 0x241   : > { %7860 = vmatmul.mubr.msk.f32.vlgmr.msra.gmra.mrb[0].mxu0 %vm225_vm1, %v9605_v16  ;;  %v11701_v16 = vld [vmem:[#allocation35_spill] sm:$0xff] }
 0x242   : > { %7862 = vmatprep.mubr.msk.f32.mxu0 %vm225_vm1, %v11665_v50 }
 0x245   : > { %7863 = vmatmul.mubr.msk.f32.gmra.mrb[2].mxu0 %vm225_vm1, %v9618_v9  ;;  %v11703_v9 = vld [vmem:[#allocation38_spill] sm:$0xff] }
 0x246   : > { %7865 = vmatprep.mubr.msk.f32.mxu0 %vm225_vm1, %v11696_v10 }
 0x249   : > { %7866 = vmatmul.mubr.msk.f32.gmra.mrb[4].mxu0 %vm225_vm1, %v9631_v19  ;;  %v11702_v19 = vld [vmem:[#allocation37_spill] sm:$0xff] }
 0x24a   : > { %7868 = vmatprep.mubr.msk.f32.mxu0 %vm225_vm1, %v11697_v20 }
 0x24d   : > { %7869 = vmatmul.mubr.msk.f32.gmra.mrb[6].mxu0 %vm225_vm1, %v9644_v51  ;;  %v11704_v51 = vld [vmem:[#allocation39_spill] sm:$0xff] }
 0x24e   : > { %7871 = vmatprep.mubr.msk.f32.mxu0 %vm225_vm1, %v11698_v3 }
 0x251   : > { %7872 = vmatmul.mubr.msk.f32.gmra.mrb[8].mxu0 %vm225_vm1, %v9657_v60  ;;  %v11705_v60 = vld [vmem:[#allocation40_spill] sm:$0xff] }
 0x252   : > { %7874 = vmatprep.mubr.msk.f32.mxu0 %vm225_vm1, %v11699_v32 }
 0x255   : > { %7875 = vmatmul.mubr.msk.f32.gmra.mrb[10].mxu0 %vm225_vm1, %v9670_v5  ;;  %v11706_v5 = vld [vmem:[#allocation42_spill] sm:$0xff] }
 0x256   : > { %7877 = vmatprep.mubr.msk.f32.mxu0 %vm225_vm1, %v11700_v18 }
 0x259   : > { %7878 = vmatmul.mubr.msk.f32.gmra.mrb[12].mxu0 %vm225_vm1, %v9683_v25  ;;  %v2901_v25 = vrot.slane %v10067_v39, 2 }
 0x25a   : > { %7880 = vmatprep.mubr.msk.f32.mxu0 %vm225_vm1, %v11701_v16 }
 0x25d   : > { %7881 = vmatmul.mubr.msk.f32.gmra.mrb[14].mxu0 %vm225_vm1, %v9696_v36  ;;  %v2902_v36 = vrot.slane %v10073_v40, 2 }
 0x25e   : > { %7883 = vmatprep.mubr.msk.f32.mxu0 %vm225_vm1, %v11672_v42 }
 0x25f   : > { %v2905_v23 = vsel %vm1149_vm5, %v2902_v36, %v2904_v56 }
 0x261   : > { %7884 = vmatmul.mubr.msk.f32.gmra.mrb[16].mxu0 %vm225_vm1, %v11702_v19 }
 0x262   : > { %7886 = vmatprep.mubr.msk.f32.mxu0 %vm225_vm1, %v11703_v9 }
 0x265   : > { %7887 = vmatmul.mubr.msk.f32.gmra.mrb[18].mxu0 %vm225_vm1, %v9722_v11  ;;  %v2903_v11 = vsel %vm1149_vm5, %v2901_v25, %v2902_v36 }
 0x266   : > { %7889 = vmatprep.mubr.msk.f32.mxu0 %vm225_vm1, %v11704_v51 }
 0x269   : > { %7890 = vmatmul.mubr.msk.f32.gmra.mrb[20].mxu0 %vm225_vm1, %v11705_v60 }
 0x26a   : > { %7892 = vmatprep.mubr.msk.f32.mxu0 %vm225_vm1, %v11675_v35 }
 0x26d   : > { %7893 = vmatmul.mubr.msk.f32.gmra.mrb[22].mxu0 %vm225_vm1, %v9748_v1  ;;  %v10210_v1 = vld [vmem:[#allocation3] sm:$0xff] }
 0x26e   : > { %7895 = vmatprep.mubr.msk.f32.mxu0 %vm225_vm1, %v11706_v5 }
 0x271   : > { %7896 = vmatmul.mubr.msk.f32.gmra.mrb[24].mxu0 %vm225_vm1, %v9761_v0  ;;  %v10212_v0 = vld [vmem:[#allocation3 + $0x8] sm:$0xff] }
 0x272   : > { %7898 = vmatprep.mubr.msk.f32.mxu0 %vm225_vm1, %v9765_v17  ;;  %v3378_v17 = vrot.slane %v10210_v1, 1 }
 0x275   : > { %7899 = vmatmul.mubr.msk.f32.gmra.mrb[26].mxu0 %vm225_vm1, %v9772_v6  ;;  %v3379_v6 = vrot.slane %v10212_v0, 1 }
 0x276   : > { %7901 = vmatprep.mubr.msk.f32.mxu0 %vm225_vm1, %v9993_v14 }
 0x277   : > { %v3380_v49 = vsel %vm482_vm4, %v3378_v17, %v3379_v6  ;;  %v3382_v43 = vsel %vm482_vm4, %v3379_v6, %v3381_v34 }
 0x278   : > { %7909 = vmatprep.mubr.msk.f32.mxu1 %vm225_vm1, %v3380_v49 }
 0x279   : > { %7902 = vmatmul.mubr.msk.f32.gmra.mrb[28].mxu0 %vm225_vm1, %v10000_v30  ;;  %v3458_v30 = vld [vmem:[%s11454_s3 + $0x4] sm:$0xf] }
 0x27a   : > { %7904 = vmatprep.mubr.msk.f32.mxu0 %vm225_vm1, %v2903_v11  ;;  %7907 = vmatprep.subr.msk.mxu1 %vm628_vm0, %v3458_v30 }
 0x27b   : > { %7908 = vmatpush3.msk.msra.mxu1 %vm628_vm0, %v3458_v30 }
 0x27c   : > { %7910 = vmatmul.mubr.msk.f32.vlgmr.msra.gmra.mrb[0].mxu1 %vm225_vm1, %v3382_v43  ;;  %7957 = vmatprep.subr.msk.mxu1 %vm628_vm0, %v3329_v48 }
 0x27d   : > { %7905 = vmatmul.mubr.msk.f32.gmra.mrb[30].mxu0 %vm225_vm1, %v2905_v23  ;;  %7958 = vmatpush3.msk.msra.mxu1 %vm628_vm0, %v3329_v48 }
 0x27e   : > { %8007 = vmatprep.subr.msk.mxu1 %vm628_vm0, %v10236_v21 }
 0x314   : > { %v7861_v44 = vpop.f32.mrb[0].mxu0 }
 0x315   : > { %v3179_v57 = vadd.f32 %v7861_v44, %v10243_v63  ;;  %v2980_v50 = vpop.f32.mrb[1].mxu0 }
 0x316   : > { %v3178_v14 = vadd.f32 %v10243_v63, %v2980_v50 }
 0x317   : > { %v3211_v35 = vmax.f32 %v3179_v57, 0.0 }
 0x318   : > { %v3210_v42 = vmax.f32 %v3178_v14, 0.0  ;;  %v7864_v22 = vpop.f32.mrb[2].mxu0 }
 0x319   : > { %3244 = vst.msk [vmem:[#allocation3 + $0x21] sm:$0xff] %vm225_vm1, %v3211_v35  ;;  %v3181_v47 = vadd.f32 %v7864_v22, %v10243_v63  ;;  %v2990_v39 = vpop.f32.mrb[3].mxu0 }
 0x31a   : > { %3243 = vst.msk [vmem:[#allocation3 + $0x19] sm:$0xff] %vm225_vm1, %v3210_v42  ;;  %v3180_v40 = vadd.f32 %v10243_v63, %v2990_v39 }
 0x31b   : > { %v3213_v41 = vmax.f32 %v3181_v47, 0.0 }
 0x31c   : > { %v3212_v45 = vmax.f32 %v3180_v40, 0.0  ;;  %v7867_v53 = vpop.f32.mrb[4].mxu0 }
 0x31d   : > { %3246 = vst.msk [vmem:[#allocation3 + $0x39] sm:$0xff] %vm225_vm1, %v3213_v41  ;;  %v3183_v54 = vadd.f32 %v7867_v53, %v10243_v63  ;;  %v3000_v52 = vpop.f32.mrb[5].mxu0 }
 0x31e   : > { %3245 = vst.msk [vmem:[#allocation3 + $0x31] sm:$0xff] %vm225_vm1, %v3212_v45  ;;  %v3182_v55 = vadd.f32 %v10243_v63, %v3000_v52 }
 0x31f   : > { %v3215_v61 = vmax.f32 %v3183_v54, 0.0 }
 0x320   : > { %v3214_v62 = vmax.f32 %v3182_v55, 0.0  ;;  %v7870_v2 = vpop.f32.mrb[6].mxu0  ;;  %v10255_v7 = vld [vmem:[#allocation3 + $0x28] sm:$0x3] }
 0x321   : > { %3248 = vst.msk [vmem:[#allocation3 + $0x51] sm:$0xff] %vm225_vm1, %v3215_v61  ;;  %v3185_v8 = vadd.f32 %v7870_v2, %v10243_v63  ;;  %v3010_v26 = vpop.f32.mrb[7].mxu0  ;;  %v10259_v27 = vld [vmem:[#allocation3 + $0x18] sm:$0xff]  ;;  %v10261_v28 = vld [vmem:[#allocation3 + $0x20] sm:$0xff]  ;;  %v3386_v37 = vrot.slane %v10255_v7, 1 }
 0x322   : > { %3247 = vst.msk [vmem:[#allocation3 + $0x49] sm:$0xff] %vm225_vm1, %v3214_v62  ;;  %v3184_v38 = vadd.f32 %v10243_v63, %v3010_v26  ;;  %v3383_v46 = vrot.slane %v10259_v27, 1  ;;  %v3384_v58 = vrot.slane %v10261_v28, 1 }
 0x323   : > { %v3217_v59 = vmax.f32 %v3185_v8, 0.0 }
 0x324   : > { %v3216_v12 = vmax.f32 %v3184_v38, 0.0  ;;  %v7873_v13 = vpop.f32.mrb[8].mxu0  ;;  %v10269_v15 = vsel %vm482_vm4, %v3383_v46, %v3384_v58  ;;  %v10272_v24 = vsel %vm482_vm4, %v3384_v58, %v3386_v37  ;;  %v10274_v29 = vld [vmem:[#allocation3 + $0x40] sm:$0x3] }
 0x325   : > { %3250 = vst.msk [vmem:[#allocation3 + $0x69] sm:$0xff] %vm225_vm1, %v3217_v59  ;;  %v3187_v31 = vadd.f32 %v7873_v13, %v10243_v63  ;;  %v3020_v4 = vpop.f32.mrb[9].mxu0  ;;  %7912 = vmatprep.mubr.msk.f32.mxu1 %vm225_vm1, %v10269_v15  ;;  %v10280_v10 = vld [vmem:[#allocation3 + $0x30] sm:$0xff]  ;;  %v10282_v20 = vld [vmem:[#allocation3 + $0x38] sm:$0xff]  ;;  %v3391_v3 = vrot.slane %v10274_v29, 1 }
 0x326   : > { %3249 = vst.msk [vmem:[#allocation3 + $0x61] sm:$0xff] %vm225_vm1, %v3216_v12  ;;  %v3186_v32 = vadd.f32 %v10243_v63, %v3020_v4  ;;  %7913 = vmatmul.mubr.msk.f32.gmra.mrb[2].mxu1 %vm225_vm1, %v10272_v24  ;;  %v3388_v18 = vrot.slane %v10280_v10, 1  ;;  %v3389_v16 = vrot.slane %v10282_v20, 1 }
 0x327   : > { %v3219_v19 = vmax.f32 %v3187_v31, 0.0 }
 0x328   : > { %v3218_v9 = vmax.f32 %v3186_v32, 0.0  ;;  %v7876_v51 = vpop.f32.mrb[10].mxu0  ;;  %v10292_v60 = vsel %vm482_vm4, %v3388_v18, %v3389_v16  ;;  %v10295_v5 = vsel %vm482_vm4, %v3389_v16, %v3391_v3  ;;  %v10297_v25 = vld [vmem:[#allocation3 + $0x58] sm:$0x3] }
 0x329   : > { %3252 = vst.msk [vmem:[#allocation3 + $0x81] sm:$0xff] %vm225_vm1, %v3219_v19  ;;  %v3189_v36 = vadd.f32 %v7876_v51, %v10243_v63  ;;  %v3030_v56 = vpop.f32.mrb[11].mxu0  ;;  %7915 = vmatprep.mubr.msk.f32.mxu1 %vm225_vm1, %v10292_v60  ;;  %v10303_v11 = vld [vmem:[#allocation3 + $0x48] sm:$0xff]  ;;  %v10305_v23 = vld [vmem:[#allocation3 + $0x50] sm:$0xff]  ;;  %v3396_v17 = vrot.slane %v10297_v25, 1 }
 0x32a   : > { %3251 = vst.msk [vmem:[#allocation3 + $0x79] sm:$0xff] %vm225_vm1, %v3218_v9  ;;  %v3188_v6 = vadd.f32 %v10243_v63, %v3030_v56  ;;  %7916 = vmatmul.mubr.msk.f32.gmra.mrb[4].mxu1 %vm225_vm1, %v10295_v5  ;;  %v3393_v30 = vrot.slane %v10303_v11, 1  ;;  %v3394_v34 = vrot.slane %v10305_v23, 1 }
 0x32b   : > { %v3221_v49 = vmax.f32 %v3189_v36, 0.0 }
 0x32c   : > { %v3220_v43 = vmax.f32 %v3188_v6, 0.0  ;;  %v7879_v48 = vpop.f32.mrb[12].mxu0  ;;  %v10315_v44 = vsel %vm482_vm4, %v3393_v30, %v3394_v34  ;;  %v10318_v57 = vsel %vm482_vm4, %v3394_v34, %v3396_v17  ;;  %v10320_v50 = vld [vmem:[#allocation3 + $0x70] sm:$0x3] }
 0x32d   : > { %3254 = vst.msk [vmem:[#allocation3 + $0x99] sm:$0xff] %vm225_vm1, %v3221_v49  ;;  %v3191_v14 = vadd.f32 %v7879_v48, %v10243_v63  ;;  %v3040_v35 = vpop.f32.mrb[13].mxu0  ;;  %7918 = vmatprep.mubr.msk.f32.mxu1 %vm225_vm1, %v10315_v44  ;;  %v10326_v42 = vld [vmem:[#allocation3 + $0x60] sm:$0xff]  ;;  %v10328_v22 = vld [vmem:[#allocation3 + $0x68] sm:$0xff]  ;;  %v3401_v47 = vrot.slane %v10320_v50, 1 }
 0x32e   : > { %3253 = vst.msk [vmem:[#allocation3 + $0x91] sm:$0xff] %vm225_vm1, %v3220_v43  ;;  %v3190_v39 = vadd.f32 %v10243_v63, %v3040_v35  ;;  %7919 = vmatmul.mubr.msk.f32.gmra.mrb[6].mxu1 %vm225_vm1, %v10318_v57  ;;  %v3398_v40 = vrot.slane %v10326_v42, 1  ;;  %v3399_v41 = vrot.slane %v10328_v22, 1 }
 0x32f   : > { %v3223_v45 = vmax.f32 %v3191_v14, 0.0 }
 0x330   : > { %v3222_v53 = vmax.f32 %v3190_v39, 0.0  ;;  %v7882_v54 = vpop.f32.mrb[14].mxu0  ;;  %v10338_v52 = vsel %vm482_vm4, %v3398_v40, %v3399_v41  ;;  %v10341_v55 = vsel %vm482_vm4, %v3399_v41, %v3401_v47  ;;  %v10343_v61 = vld [vmem:[#allocation3 + $0x88] sm:$0x3] }
 0x331   : > { %11707 = vst [vmem:[#allocation4_spill] sm:$0xff] %v10338_v52  ;;  %11708 = vst [vmem:[#allocation15_spill] sm:$0xff] %v10341_v55  ;;  %v3193_v62 = vadd.f32 %v7882_v54, %v10243_v63  ;;  %v3050_v2 = vpop.f32.mrb[15].mxu0  ;;  %7921 = vmatprep.mubr.msk.f32.mxu1 %vm225_vm1, %v10338_v52  ;;  %v10349_v8 = vld [vmem:[#allocation3 + $0x78] sm:$0xff]  ;;  %v10351_v26 = vld [vmem:[#allocation3 + $0x80] sm:$0xff]  ;;  %v3406_v37 = vrot.slane %v10343_v61, 1 }
 0x332   : > { %3256 = vst.msk [vmem:[#allocation3 + $0xb1] sm:$0xff] %vm225_vm1, %v3223_v45  ;;  %3255 = vst.msk [vmem:[#allocation3 + $0xa9] sm:$0xff] %vm225_vm1, %v3222_v53  ;;  %v3192_v38 = vadd.f32 %v10243_v63, %v3050_v2  ;;  %7922 = vmatmul.mubr.msk.f32.gmra.mrb[8].mxu1 %vm225_vm1, %v10341_v55  ;;  %v3403_v46 = vrot.slane %v10349_v8, 1  ;;  %v3404_v58 = vrot.slane %v10351_v26, 1 }
 0x333   : > { %v3225_v59 = vmax.f32 %v3193_v62, 0.0 }
 0x334   : > { %v3224_v12 = vmax.f32 %v3192_v38, 0.0  ;;  %v7885_v13 = vpop.f32.mrb[16].mxu0  ;;  %v10361_v31 = vsel %vm482_vm4, %v3403_v46, %v3404_v58  ;;  %v10364_v4 = vsel %vm482_vm4, %v3404_v58, %v3406_v37  ;;  %v10366_v3 = vld [vmem:[#allocation3 + $0xa0] sm:$0x3] }
 0x335   : > { %11709 = vst [vmem:[#allocation26_spill] sm:$0xff] %v10361_v31  ;;  %11710 = vst [vmem:[#allocation27_spill] sm:$0xff] %v10364_v4  ;;  %v3195_v32 = vadd.f32 %v7885_v13, %v10243_v63  ;;  %v3060_v18 = vpop.f32.mrb[17].mxu0  ;;  %7924 = vmatprep.mubr.msk.f32.mxu1 %vm225_vm1, %v10361_v31  ;;  %v10372_v16 = vld [vmem:[#allocation3 + $0x90] sm:$0xff]  ;;  %v10374_v19 = vld [vmem:[#allocation3 + $0x98] sm:$0xff]  ;;  %v3411_v9 = vrot.slane %v10366_v3, 1 }
 0x336   : > { %3258 = vst.msk [vmem:[#allocation3 + $0xc9] sm:$0xff] %vm225_vm1, %v3225_v59  ;;  %3257 = vst.msk [vmem:[#allocation3 + $0xc1] sm:$0xff] %vm225_vm1, %v3224_v12  ;;  %v3194_v51 = vadd.f32 %v10243_v63, %v3060_v18  ;;  %7925 = vmatmul.mubr.msk.f32.gmra.mrb[10].mxu1 %vm225_vm1, %v10364_v4  ;;  %v3408_v36 = vrot.slane %v10372_v16, 1  ;;  %v3409_v56 = vrot.slane %v10374_v19, 1 }
 0x337   : > { %v3227_v17 = vmax.f32 %v3195_v32, 0.0 }
 0x338   : > { %v3226_v6 = vmax.f32 %v3194_v51, 0.0  ;;  %v7888_v30 = vpop.f32.mrb[18].mxu0  ;;  %v10384_v34 = vsel %vm482_vm4, %v3408_v36, %v3409_v56  ;;  %v10387_v49 = vsel %vm482_vm4, %v3409_v56, %v3411_v9 }
 0x339   : > { %11711 = vst [vmem:[#allocation28_spill] sm:$0xff] %v10384_v34  ;;  %11712 = vst [vmem:[#allocation29_spill] sm:$0xff] %v10387_v49  ;;  %v10389_v43 = vld [vmem:[#allocation3 + $0xb8] sm:$0x3]  ;;  %v3197_v48 = vadd.f32 %v7888_v30, %v10243_v63  ;;  %v3070_v14 = vpop.f32.mrb[19].mxu0  ;;  %7927 = vmatprep.mubr.msk.f32.mxu1 %vm225_vm1, %v10384_v34  ;;  %v10395_v35 = vld [vmem:[#allocation3 + $0xa8] sm:$0xff] }
 0x33a   : > { %3260 = vst.msk [vmem:[#allocation3 + $0xe1] sm:$0xff] %vm225_vm1, %v3227_v17  ;;  %v10397_v47 = vld [vmem:[#allocation3 + $0xb0] sm:$0xff]  ;;  %v3416_v39 = vrot.slane %v10389_v43, 1  ;;  %3259 = vst.msk [vmem:[#allocation3 + $0xd9] sm:$0xff] %vm225_vm1, %v3226_v6  ;;  %v3196_v40 = vadd.f32 %v10243_v63, %v3070_v14  ;;  %7928 = vmatmul.mubr.msk.f32.gmra.mrb[12].mxu1 %vm225_vm1, %v10387_v49  ;;  %v3413_v41 = vrot.slane %v10395_v35, 1 }
 0x33b   : > { %v3414_v45 = vrot.slane %v10397_v47, 1  ;;  %v3229_v53 = vmax.f32 %v3197_v48, 0.0 }
 0x33c   : > { %v3228_v54 = vmax.f32 %v3196_v40, 0.0  ;;  %v7891_v62 = vpop.f32.mrb[20].mxu0 }
 0x33d   : > { %v10407_v2 = vsel %vm482_vm4, %v3413_v41, %v3414_v45  ;;  %v10410_v37 = vsel %vm482_vm4, %v3414_v45, %v3416_v39  ;;  %v10412_v38 = vld [vmem:[#allocation3 + $0xd0] sm:$0x3]  ;;  %3262 = vst.msk [vmem:[#allocation3 + $0xf9] sm:$0xff] %vm225_vm1, %v3229_v53  ;;  %v3199_v46 = vadd.f32 %v7891_v62, %v10243_v63  ;;  %v3080_v58 = vpop.f32.mrb[21].mxu0  ;;  %v10418_v59 = vld [vmem:[#allocation3 + $0xc0] sm:$0xff]  ;;  %v10420_v12 = vld [vmem:[#allocation3 + $0xc8] sm:$0xff] }
 0x33e   : > { %11713 = vst [vmem:[#allocation36_spill] sm:$0xff] %v10407_v2  ;;  %11714 = vst [vmem:[#allocation41_spill] sm:$0xff] %v10410_v37  ;;  %7930 = vmatprep.mubr.msk.f32.mxu1 %vm225_vm1, %v10407_v2  ;;  %v3421_v13 = vrot.slane %v10412_v38, 1  ;;  %v3198_v32 = vadd.f32 %v10243_v63, %v3080_v58  ;;  %v3418_v18 = vrot.slane %v10418_v59, 1  ;;  %v3419_v9 = vrot.slane %v10420_v12, 1 }
 0x33f   : > { %3261 = vst.msk [vmem:[#allocation3 + $0xf1] sm:$0xff] %vm225_vm1, %v3228_v54  ;;  %7931 = vmatmul.mubr.msk.f32.gmra.mrb[14].mxu1 %vm225_vm1, %v10410_v37  ;;  %v3231_v51 = vmax.f32 %v3199_v46, 0.0 }
 0x340   : > { %v3230_v36 = vmax.f32 %v3198_v32, 0.0  ;;  %v7894_v56 = vpop.f32.mrb[22].mxu0  ;;  %v10430_v17 = vsel %vm482_vm4, %v3418_v18, %v3419_v9  ;;  %v10433_v6 = vsel %vm482_vm4, %v3419_v9, %v3421_v13 }
 0x341   : > { %11715 = vst [vmem:[#allocation5_spill] sm:$0xff] %v10430_v17  ;;  %11716 = vst [vmem:[#allocation6_spill] sm:$0xff] %v10433_v6  ;;  %v10435_v30 = vld [vmem:[#allocation3 + $0xe8] sm:$0x3]  ;;  %v3201_v48 = vadd.f32 %v7894_v56, %v10243_v63  ;;  %v3090_v14 = vpop.f32.mrb[23].mxu0  ;;  %7933 = vmatprep.mubr.msk.f32.mxu1 %vm225_vm1, %v10430_v17  ;;  %v10441_v39 = vld [vmem:[#allocation3 + $0xd8] sm:$0xff] }
 0x342   : > { %3264 = vst.msk [vmem:[#allocation3 + $0x111] sm:$0xff] %vm225_vm1, %v3231_v51  ;;  %v10443_v40 = vld [vmem:[#allocation3 + $0xe0] sm:$0xff]  ;;  %v3426_v41 = vrot.slane %v10435_v30, 1  ;;  %3263 = vst.msk [vmem:[#allocation3 + $0x109] sm:$0xff] %vm225_vm1, %v3230_v36  ;;  %v3200_v45 = vadd.f32 %v10243_v63, %v3090_v14  ;;  %v3423_v53 = vrot.slane %v10441_v39, 1 }
 0x343   : > { %7934 = vmatmul.mubr.msk.f32.gmra.mrb[16].mxu1 %vm225_vm1, %v10433_v6  ;;  %v3424_v54 = vrot.slane %v10443_v40, 1  ;;  %v3233_v62 = vmax.f32 %v3201_v48, 0.0 }
 0x344   : > { %v3232_v46 = vmax.f32 %v3200_v45, 0.0  ;;  %v7897_v58 = vpop.f32.mrb[24].mxu0  ;;  %v10458_v18 = vld [vmem:[#allocation3 + $0x100] sm:$0x3] }
 0x345   : > { %v10453_v13 = vsel %vm482_vm4, %v3423_v53, %v3424_v54  ;;  %v10456_v32 = vsel %vm482_vm4, %v3424_v54, %v3426_v41  ;;  %3266 = vst.msk [vmem:[#allocation3 + $0x129] sm:$0xff] %vm225_vm1, %v3233_v62  ;;  %v3203_v9 = vadd.f32 %v7897_v58, %v10243_v63  ;;  %v3100_v51 = vpop.f32.mrb[25].mxu0  ;;  %v3431_v48 = vrot.slane %v10458_v18, 1 }
 0x346   : > { %11717 = vst [vmem:[#allocation7_spill] sm:$0xff] %v10453_v13  ;;  %11718 = vst [vmem:[#allocation8_spill] sm:$0xff] %v10456_v32  ;;  %7936 = vmatprep.mubr.msk.f32.mxu1 %vm225_vm1, %v10453_v13  ;;  %v10464_v36 = vld [vmem:[#allocation3 + $0xf0] sm:$0xff]  ;;  %v10466_v56 = vld [vmem:[#allocation3 + $0xf8] sm:$0xff]  ;;  %v3202_v14 = vadd.f32 %v10243_v63, %v3100_v51 }
 0x347   : > { %3265 = vst.msk [vmem:[#allocation3 + $0x121] sm:$0xff] %vm225_vm1, %v3232_v46  ;;  %7937 = vmatmul.mubr.msk.f32.gmra.mrb[18].mxu1 %vm225_vm1, %v10456_v32  ;;  %v3428_v41 = vrot.slane %v10464_v36, 1  ;;  %v3429_v45 = vrot.slane %v10466_v56, 1  ;;  %v3235_v53 = vmax.f32 %v3203_v9, 0.0 }
 0x348   : > { %v3234_v54 = vmax.f32 %v3202_v14, 0.0  ;;  %v7900_v62 = vpop.f32.mrb[26].mxu0 }
 0x349   : > { %v10476_v58 = vsel %vm482_vm4, %v3428_v41, %v3429_v45  ;;  %v10479_v13 = vsel %vm482_vm4, %v3429_v45, %v3431_v48  ;;  %v10481_v6 = vld [vmem:[#allocation3 + $0x118] sm:$0x3]  ;;  %3268 = vst.msk [vmem:[#allocation3 + $0x141] sm:$0xff] %vm225_vm1, %v3235_v53  ;;  %v3205_v46 = vadd.f32 %v7900_v62, %v10243_v63  ;;  %v3110_v51 = vpop.f32.mrb[27].mxu0  ;;  %v10487_v32 = vld [vmem:[#allocation3 + $0x108] sm:$0xff]  ;;  %v10489_v9 = vld [vmem:[#allocation3 + $0x110] sm:$0xff] }
 0x34a   : > { %11719 = vst [vmem:[#allocation9_spill] sm:$0xff] %v10476_v58  ;;  %11720 = vst [vmem:[#allocation10_spill] sm:$0xff] %v10479_v13  ;;  %7939 = vmatprep.mubr.msk.f32.mxu1 %vm225_vm1, %v10476_v58  ;;  %v3436_v14 = vrot.slane %v10481_v6, 1  ;;  %v3204_v48 = vadd.f32 %v10243_v63, %v3110_v51  ;;  %v3433_v41 = vrot.slane %v10487_v32, 1  ;;  %v3434_v45 = vrot.slane %v10489_v9, 1 }
 0x34b   : > { %3267 = vst.msk [vmem:[#allocation3 + $0x139] sm:$0xff] %vm225_vm1, %v3234_v54  ;;  %7940 = vmatmul.mubr.msk.f32.gmra.mrb[20].mxu1 %vm225_vm1, %v10479_v13  ;;  %v3237_v53 = vmax.f32 %v3205_v46, 0.0 }
 0x34c   : > { %v3236_v62 = vmax.f32 %v3204_v48, 0.0  ;;  %v7903_v58 = vpop.f32.mrb[28].mxu0  ;;  %v10499_v17 = vsel %vm482_vm4, %v3433_v41, %v3434_v45  ;;  %v10502_v37 = vsel %vm482_vm4, %v3434_v45, %v3436_v14  ;;  %v10504_v2 = vld [vmem:[#allocation3 + $0x130] sm:$0x3] }
 0x34d   : > { %11721 = vst [vmem:[#allocation11_spill] sm:$0xff] %v10499_v17  ;;  %11722 = vst [vmem:[#allocation12_spill] sm:$0xff] %v10502_v37  ;;  %v3207_v54 = vadd.f32 %v7903_v58, %v10243_v63  ;;  %v3120_v51 = vpop.f32.mrb[29].mxu0  ;;  %7942 = vmatprep.mubr.msk.f32.mxu1 %vm225_vm1, %v10499_v17  ;;  %v3441_v48 = vrot.slane %v10504_v2, 1 }
 0x34e   : > { %3270 = vst.msk [vmem:[#allocation3 + $0x159] sm:$0xff] %vm225_vm1, %v3237_v53  ;;  %v10510_v13 = vld [vmem:[#allocation3 + $0x120] sm:$0xff]  ;;  %v10512_v46 = vld [vmem:[#allocation3 + $0x128] sm:$0xff]  ;;  %3269 = vst.msk [vmem:[#allocation3 + $0x151] sm:$0xff] %vm225_vm1, %v3236_v62  ;;  %v3206_v14 = vadd.f32 %v10243_v63, %v3120_v51 }
 0x34f   : > { %7943 = vmatmul.mubr.msk.f32.gmra.mrb[22].mxu1 %vm225_vm1, %v10502_v37  ;;  %v3438_v41 = vrot.slane %v10510_v13, 1  ;;  %v3439_v58 = vrot.slane %v10512_v46, 1  ;;  %v3239_v45 = vmax.f32 %v3207_v54, 0.0 }
 0x350   : > { %v3238_v53 = vmax.f32 %v3206_v14, 0.0  ;;  %v7906_v17 = vpop.f32.mrb[30].mxu0  ;;  %v10527_v4 = vld [vmem:[#allocation3 + $0x148] sm:$0x3] }
 0x351   : > { %v10522_v49 = vsel %vm482_vm4, %v3438_v41, %v3439_v58  ;;  %v10525_v34 = vsel %vm482_vm4, %v3439_v58, %v3441_v48  ;;  %3272 = vst.msk [vmem:[#allocation3 + $0x171] sm:$0xff] %vm225_vm1, %v3239_v45  ;;  %v3209_v62 = vadd.f32 %v7906_v17, %v10243_v63  ;;  %v3130_v51 = vpop.f32.mrb[31].mxu0  ;;  %v3446_v14 = vrot.slane %v10527_v4, 1 }
 0x352   : > { %11723 = vst [vmem:[#allocation13_spill] sm:$0xff] %v10522_v49  ;;  %11724 = vst [vmem:[#allocation14_spill] sm:$0xff] %v10525_v34  ;;  %7945 = vmatprep.mubr.msk.f32.mxu1 %vm225_vm1, %v10522_v49  ;;  %v10533_v37 = vld [vmem:[#allocation3 + $0x138] sm:$0xff]  ;;  %v10535_v54 = vld [vmem:[#allocation3 + $0x140] sm:$0xff]  ;;  %v3208_v48 = vadd.f32 %v10243_v63, %v3130_v51 }
 0x353   : > { %3271 = vst.msk [vmem:[#allocation3 + $0x169] sm:$0xff] %vm225_vm1, %v3238_v53  ;;  %7946 = vmatmul.mubr.msk.f32.gmra.mrb[24].mxu1 %vm225_vm1, %v10525_v34  ;;  %v3443_v41 = vrot.slane %v10533_v37, 1  ;;  %v3444_v17 = vrot.slane %v10535_v54, 1  ;;  %v3241_v58 = vmax.f32 %v3209_v62, 0.0  ;;  %v4054_v34 = vrot.slane %v10282_v20, 2 }
 0x354   : > { %v3240_v45 = vmax.f32 %v3208_v48, 0.0 }
 0x355   : > { %v10545_v49 = vsel %vm482_vm4, %v3443_v41, %v3444_v17  ;;  %v10548_v31 = vsel %vm482_vm4, %v3444_v17, %v3446_v14  ;;  %v10550_v55 = vld [vmem:[#allocation3 + $0x160] sm:$0x3]  ;;  %3274 = vst.msk [vmem:[#allocation3 + $0x189] sm:$0xff] %vm225_vm1, %v3241_v58  ;;  %v10555_v63 = vld [vmem:[#allocation3 + $0x150] sm:$0xff]  ;;  %v10557_v53 = vld [vmem:[#allocation3 + $0x158] sm:$0xff] }
 0x356   : > { %11725 = vst [vmem:[#allocation16_spill] sm:$0xff] %v10545_v49  ;;  %11726 = vst [vmem:[#allocation17_spill] sm:$0xff] %v10548_v31  ;;  %7948 = vmatprep.mubr.msk.f32.mxu1 %vm225_vm1, %v10545_v49  ;;  %v3451_v62 = vrot.slane %v10550_v55, 1  ;;  %v3448_v51 = vrot.slane %v10555_v63, 1  ;;  %v3449_v14 = vrot.slane %v10557_v53, 1 }
 0x357   : > { %3273 = vst.msk [vmem:[#allocation3 + $0x181] sm:$0xff] %vm225_vm1, %v3240_v45  ;;  %7949 = vmatmul.mubr.msk.f32.gmra.mrb[26].mxu1 %vm225_vm1, %v10548_v31 }
 0x358   : > { %v10566_v48 = vsel %vm482_vm4, %v3448_v51, %v3449_v14  ;;  %v10569_v41 = vsel %vm482_vm4, %v3449_v14, %v3451_v62  ;;  %v10571_v17 = vld [vmem:[#allocation3 + $0x178] sm:$0x3] }
 0x359   : > { %11727 = vst [vmem:[#allocation18_spill] sm:$0xff] %v10566_v48  ;;  %11728 = vst [vmem:[#allocation19_spill] sm:$0xff] %v10569_v41  ;;  %7951 = vmatprep.mubr.msk.f32.mxu1 %vm225_vm1, %v10566_v48  ;;  %v3456_v31 = vrot.slane %v10571_v17, 1  ;;  %v4053_v48 = vrot.slane %v10280_v10, 2 }
 0x35a   : > { %v10575_v58 = vld [vmem:[#allocation3 + $0x168] sm:$0xff]  ;;  %v10577_v45 = vld [vmem:[#allocation3 + $0x170] sm:$0xff] }
 0x35b   : > { %7952 = vmatmul.mubr.msk.f32.gmra.mrb[28].mxu1 %vm225_vm1, %v10569_v41  ;;  %v3453_v51 = vrot.slane %v10575_v58, 1  ;;  %v3454_v49 = vrot.slane %v10577_v45, 1  ;;  %v4448_v41 = vld [vmem:[%s11454_s3 + $0xc] sm:$0xf] }
 0x35d   : > { %v10585_v62 = vsel %vm482_vm4, %v3453_v51, %v3454_v49  ;;  %v10588_v14 = vsel %vm482_vm4, %v3454_v49, %v3456_v31  ;;  %v4044_v31 = vrot.slane %v10212_v0, 2  ;;  %v4046_v49 = vrot.slane %v10216_v33, 2  ;;  %v10676_v33 = vld [vmem:[%s11454_s3 + $0x10] sm:$0xf] }
 0x35e   : > { %11729 = vst [vmem:[#allocation20_spill] sm:$0xff] %v10585_v62  ;;  %11730 = vst [vmem:[#allocation21_spill] sm:$0xff] %v10588_v14  ;;  %7954 = vmatprep.mubr.msk.f32.mxu1 %vm225_vm1, %v10585_v62  ;;  %v4049_v62 = vrot.slane %v10261_v28, 2 }
 0x35f   : > { %7955 = vmatmul.mubr.msk.f32.gmra.mrb[30].mxu1 %vm225_vm1, %v10588_v14  ;;  %v4048_v14 = vrot.slane %v10259_v27, 2 }
 0x360   : > { %7959 = vmatprep.mubr.msk.f32.mxu1 %vm225_vm1, %v10210_v1 }
 0x363   : > { %7960 = vmatmul.mubr.msk.f32.vlgmr.msra.gmra.mrb[0].mxu1 %vm225_vm1, %v10212_v0  ;;  %v4051_v0 = vrot.slane %v10255_v7, 2 }
 0x364   : > { %8008 = vmatpush3.msk.msra.mxu1 %vm628_vm0, %v10236_v21  ;;  %7962 = vmatprep.mubr.msk.f32.mxu1 %vm225_vm1, %v10259_v27  ;;  %v4043_v21 = vrot.slane %v10210_v1, 2  ;;  %v4047_v1 = vsel %vm1149_vm5, %v4044_v31, %v4046_v49  ;;  %v4058_v49 = vrot.slane %v10303_v11, 2 }
 0x365   : > { %8057 = vmatprep.subr.msk.mxu1 %vm628_vm0, %v4448_v41  ;;  %v10690_v7 = vsel %vm1149_vm5, %v4049_v62, %v4051_v0 }
 0x366   : > { %v4045_v51 = vsel %vm1149_vm5, %v4043_v21, %v4044_v31  ;;  %v10680_v21 = vsel %vm1149_vm5, %v4048_v14, %v4049_v62  ;;  %v4056_v31 = vrot.slane %v10274_v29, 2  ;;  %v10696_v14 = vsel %vm1149_vm5, %v4053_v48, %v4054_v34 }
 0x367   : > { %7963 = vmatmul.mubr.msk.f32.gmra.mrb[2].mxu1 %vm225_vm1, %v10261_v28  ;;  %v4061_v62 = vrot.slane %v10297_v25, 2  ;;  %v4063_v48 = vrot.slane %v10326_v42, 2 }
 0x368   : > { %7965 = vmatprep.mubr.msk.f32.mxu1 %vm225_vm1, %v10280_v10 }
 0x36b   : > { %7966 = vmatmul.mubr.msk.f32.gmra.mrb[4].mxu1 %vm225_vm1, %v10282_v20 }
 0x36c   : > { %7968 = vmatprep.mubr.msk.f32.mxu1 %vm225_vm1, %v10303_v11 }
 0x36f   : > { %7969 = vmatmul.mubr.msk.f32.gmra.mrb[6].mxu1 %vm225_vm1, %v10305_v23 }
 0x370   : > { %7971 = vmatprep.mubr.msk.f32.mxu1 %vm225_vm1, %v10326_v42 }
 0x373   : > { %7972 = vmatmul.mubr.msk.f32.gmra.mrb[8].mxu1 %vm225_vm1, %v10328_v22 }
 0x374   : > { %7974 = vmatprep.mubr.msk.f32.mxu1 %vm225_vm1, %v10349_v8 }
 0x377   : > { %7975 = vmatmul.mubr.msk.f32.gmra.mrb[10].mxu1 %vm225_vm1, %v10351_v26 }
 0x378   : > { %7977 = vmatprep.mubr.msk.f32.mxu1 %vm225_vm1, %v10372_v16 }
 0x37b   : > { %7978 = vmatmul.mubr.msk.f32.gmra.mrb[12].mxu1 %vm225_vm1, %v10374_v19 }
 0x37c   : > { %7980 = vmatprep.mubr.msk.f32.mxu1 %vm225_vm1, %v10395_v35 }
 0x37f   : > { %7981 = vmatmul.mubr.msk.f32.gmra.mrb[14].mxu1 %vm225_vm1, %v10397_v47 }
 0x380   : > { %7983 = vmatprep.mubr.msk.f32.mxu1 %vm225_vm1, %v10418_v59 }
 0x383   : > { %7984 = vmatmul.mubr.msk.f32.gmra.mrb[16].mxu1 %vm225_vm1, %v10420_v12 }
 0x384   : > { %7986 = vmatprep.mubr.msk.f32.mxu1 %vm225_vm1, %v10441_v39 }
 0x387   : > { %7987 = vmatmul.mubr.msk.f32.gmra.mrb[18].mxu1 %vm225_vm1, %v10443_v40 }
 0x388   : > { %7989 = vmatprep.mubr.msk.f32.mxu1 %vm225_vm1, %v10464_v36 }
 0x38b   : > { %7990 = vmatmul.mubr.msk.f32.gmra.mrb[20].mxu1 %vm225_vm1, %v10466_v56 }
 0x38c   : > { %7992 = vmatprep.mubr.msk.f32.mxu1 %vm225_vm1, %v10487_v32 }
 0x38f   : > { %7993 = vmatmul.mubr.msk.f32.gmra.mrb[22].mxu1 %vm225_vm1, %v10489_v9 }
 0x390   : > { %7995 = vmatprep.mubr.msk.f32.mxu1 %vm225_vm1, %v10510_v13 }
 0x393   : > { %7996 = vmatmul.mubr.msk.f32.gmra.mrb[24].mxu1 %vm225_vm1, %v10512_v46 }
 0x394   : > { %7998 = vmatprep.mubr.msk.f32.mxu1 %vm225_vm1, %v10533_v37 }
 0x397   : > { %7999 = vmatmul.mubr.msk.f32.gmra.mrb[26].mxu1 %vm225_vm1, %v10535_v54 }
 0x398   : > { %8001 = vmatprep.mubr.msk.f32.mxu1 %vm225_vm1, %v10555_v63 }
 0x39b   : > { %8002 = vmatmul.mubr.msk.f32.gmra.mrb[28].mxu1 %vm225_vm1, %v10557_v53 }
 0x39c   : > { %8004 = vmatprep.mubr.msk.f32.mxu1 %vm225_vm1, %v10575_v58 }
 0x39f   : > { %8005 = vmatmul.mubr.msk.f32.gmra.mrb[30].mxu1 %vm225_vm1, %v10577_v45 }
 0x3a0   : > { %8009 = vmatprep.mubr.msk.f32.mxu1 %vm225_vm1, %v4045_v51  ;;  %v10703_v51 = vsel %vm1149_vm5, %v4054_v34, %v4056_v31  ;;  %v4066_v34 = vrot.slane %v10320_v50, 2  ;;  %v4068_v31 = vrot.slane %v10349_v8, 2 }
 0x3a3   : > { %8010 = vmatmul.mubr.msk.f32.vlgmr.msra.gmra.mrb[0].mxu1 %vm225_vm1, %v4047_v1  ;;  %v4064_v1 = vrot.slane %v10328_v22, 2 }
 0x3a4   : > { %8058 = vmatpush3.msk.msra.mxu1 %vm628_vm0, %v4448_v41  ;;  %8012 = vmatprep.mubr.msk.f32.mxu1 %vm225_vm1, %v10680_v21  ;;  %v4059_v41 = vrot.slane %v10305_v23, 2 }
 0x3a5   : > { %8107 = vmatprep.subr.msk.mxu1 %vm628_vm0, %v10676_v33  ;;  %v10722_v25 = vsel %vm1149_vm5, %v4063_v48, %v4064_v1  ;;  %v4074_v48 = vrot.slane %v10374_v19, 2 }
 0x3a6   : > { %v10709_v29 = vsel %vm1149_vm5, %v4058_v49, %v4059_v41  ;;  %v10716_v0 = vsel %vm1149_vm5, %v4059_v41, %v4061_v62  ;;  %11732 = vst [vmem:[#allocation23_spill] sm:$0xff] %v10722_v25  ;;  %v4069_v49 = vrot.slane %v10351_v26, 2  ;;  %v4071_v41 = vrot.slane %v10343_v61, 2 }
 0x3a7   : > { %8013 = vmatmul.mubr.msk.f32.gmra.mrb[2].mxu1 %vm225_vm1, %v10690_v7  ;;  %11731 = vst [vmem:[#allocation22_spill] sm:$0xff] %v10709_v29  ;;  %v4073_v62 = vrot.slane %v10372_v16, 2 }
 0x3a8   : > { %8015 = vmatprep.mubr.msk.f32.mxu1 %vm225_vm1, %v10696_v14  ;;  %v10735_v50 = vsel %vm1149_vm5, %v4068_v31, %v4069_v49  ;;  %v4079_v31 = vrot.slane %v10397_v47, 2 }
 0x3a9   : > { %11733 = vst [vmem:[#allocation24_spill] sm:$0xff] %v10735_v50  ;;  %v10748_v61 = vsel %vm1149_vm5, %v4073_v62, %v4074_v48  ;;  %v4084_v62 = vrot.slane %v10420_v12, 2 }
 0x3aa   : > { %11734 = vst [vmem:[#allocation25_spill] sm:$0xff] %v10748_v61 }
 0x3ab   : > { %8016 = vmatmul.mubr.msk.f32.gmra.mrb[4].mxu1 %vm225_vm1, %v10703_v51 }
 0x3ac   : > { %8018 = vmatprep.mubr.msk.f32.mxu1 %vm225_vm1, %v10709_v29  ;;  %v10729_v29 = vsel %vm1149_vm5, %v4064_v1, %v4066_v34  ;;  %v4076_v1 = vrot.slane %v10366_v3, 2  ;;  %v4078_v34 = vrot.slane %v10395_v35, 2 }
 0x3ae   : > { %v10761_v3 = vsel %vm1149_vm5, %v4078_v34, %v4079_v31  ;;  %v4089_v34 = vrot.slane %v10443_v40, 2 }
 0x3af   : > { %8019 = vmatmul.mubr.msk.f32.gmra.mrb[6].mxu1 %vm225_vm1, %v10716_v0  ;;  %11735 = vst [vmem:[#allocation30_spill] sm:$0xff] %v10761_v3 }
 0x3b0   : > { %8021 = vmatprep.mubr.msk.f32.mxu1 %vm225_vm1, %v10722_v25  ;;  %v10742_v25 = vsel %vm1149_vm5, %v4069_v49, %v4071_v41  ;;  %v4081_v49 = vrot.slane %v10389_v43, 2  ;;  %v4083_v41 = vrot.slane %v10418_v59, 2 }
 0x3b2   : > { %v10774_v43 = vsel %vm1149_vm5, %v4083_v41, %v4084_v62  ;;  %v4094_v41 = vrot.slane %v10466_v56, 2 }
 0x3b3   : > { %8022 = vmatmul.mubr.msk.f32.gmra.mrb[8].mxu1 %vm225_vm1, %v10729_v29  ;;  %11736 = vst [vmem:[#allocation31_spill] sm:$0xff] %v10774_v43 }
 0x3b4   : > { %8024 = vmatprep.mubr.msk.f32.mxu1 %vm225_vm1, %v10735_v50  ;;  %v10755_v50 = vsel %vm1149_vm5, %v4074_v48, %v4076_v1  ;;  %v4086_v48 = vrot.slane %v10412_v38, 2  ;;  %v4088_v1 = vrot.slane %v10441_v39, 2 }
 0x3b6   : > { %v10787_v38 = vsel %vm1149_vm5, %v4088_v1, %v4089_v34  ;;  %v4099_v1 = vrot.slane %v10489_v9, 2 }
 0x3b7   : > { %8025 = vmatmul.mubr.msk.f32.gmra.mrb[10].mxu1 %vm225_vm1, %v10742_v25  ;;  %11737 = vst [vmem:[#allocation32_spill] sm:$0xff] %v10787_v38 }
 0x3b8   : > { %8027 = vmatprep.mubr.msk.f32.mxu1 %vm225_vm1, %v10748_v61  ;;  %v10768_v61 = vsel %vm1149_vm5, %v4079_v31, %v4081_v49  ;;  %v4091_v31 = vrot.slane %v10435_v30, 2  ;;  %v4093_v49 = vrot.slane %v10464_v36, 2 }
 0x3ba   : > { %v10800_v30 = vsel %vm1149_vm5, %v4093_v49, %v4094_v41  ;;  %v4104_v49 = vrot.slane %v10512_v46, 2 }
 0x3bb   : > { %8028 = vmatmul.mubr.msk.f32.gmra.mrb[12].mxu1 %vm225_vm1, %v10755_v50  ;;  %11738 = vst [vmem:[#allocation33_spill] sm:$0xff] %v10800_v30 }
 0x3bc   : > { %8030 = vmatprep.mubr.msk.f32.mxu1 %vm225_vm1, %v10761_v3  ;;  %v10781_v3 = vsel %vm1149_vm5, %v4084_v62, %v4086_v48  ;;  %v4096_v62 = vrot.slane %v10458_v18, 2  ;;  %v4098_v48 = vrot.slane %v10487_v32, 2 }
 0x3be   : > { %v10813_v18 = vsel %vm1149_vm5, %v4098_v48, %v4099_v1  ;;  %v4109_v48 = vrot.slane %v10535_v54, 2 }
 0x3bf   : > { %8031 = vmatmul.mubr.msk.f32.gmra.mrb[14].mxu1 %vm225_vm1, %v10768_v61  ;;  %11740 = vst [vmem:[#allocation35_spill] sm:$0xff] %v10813_v18 }
 0x3c0   : > { %8033 = vmatprep.mubr.msk.f32.mxu1 %vm225_vm1, %v10774_v43  ;;  %v10794_v43 = vsel %vm1149_vm5, %v4089_v34, %v4091_v31  ;;  %v4101_v34 = vrot.slane %v10481_v6, 2  ;;  %v4103_v31 = vrot.slane %v10510_v13, 2 }
 0x3c2   : > { %v10826_v6 = vsel %vm1149_vm5, %v4103_v31, %v4104_v49  ;;  %v4114_v31 = vrot.slane %v10557_v53, 2 }
 0x3c3   : > { %8034 = vmatmul.mubr.msk.f32.gmra.mrb[16].mxu1 %vm225_vm1, %v10781_v3  ;;  %11741 = vst [vmem:[#allocation37_spill] sm:$0xff] %v10826_v6 }
 0x3c4   : > { %8036 = vmatprep.mubr.msk.f32.mxu1 %vm225_vm1, %v10787_v38  ;;  %v10807_v38 = vsel %vm1149_vm5, %v4094_v41, %v4096_v62  ;;  %v4106_v41 = vrot.slane %v10504_v2, 2  ;;  %v4108_v62 = vrot.slane %v10533_v37, 2 }
 0x3c5   : > { %11739 = vst [vmem:[#allocation34_spill] sm:$0xff] %v10807_v38 }
 0x3c6   : > { %v10839_v2 = vsel %vm1149_vm5, %v4108_v62, %v4109_v48  ;;  %v4119_v62 = vrot.slane %v10577_v45, 2 }
 0x3c7   : > { %8037 = vmatmul.mubr.msk.f32.gmra.mrb[18].mxu1 %vm225_vm1, %v10794_v43  ;;  %11743 = vst [vmem:[#allocation39_spill] sm:$0xff] %v10839_v2 }
 0x3c8   : > { %8039 = vmatprep.mubr.msk.f32.mxu1 %vm225_vm1, %v10800_v30  ;;  %v10820_v30 = vsel %vm1149_vm5, %v4099_v1, %v4101_v34  ;;  %v4111_v1 = vrot.slane %v10527_v4, 2  ;;  %v4113_v34 = vrot.slane %v10555_v63, 2 }
 0x3ca   : > { %v10852_v4 = vsel %vm1149_vm5, %v4113_v34, %v4114_v31  ;;  %v11747_v34 = vld [vmem:[#allocation27_spill] sm:$0xff] }
 0x3cb   : > { %8040 = vmatmul.mubr.msk.f32.gmra.mrb[20].mxu1 %vm225_vm1, %v10807_v38  ;;  %11744 = vst [vmem:[#allocation40_spill] sm:$0xff] %v10852_v4 }
 0x3cc   : > { %8042 = vmatprep.mubr.msk.f32.mxu1 %vm225_vm1, %v10813_v18  ;;  %v10833_v18 = vsel %vm1149_vm5, %v4104_v49, %v4106_v41  ;;  %v4116_v49 = vrot.slane %v10550_v55, 2  ;;  %v4118_v41 = vrot.slane %v10575_v58, 2 }
 0x3cd   : > { %11742 = vst [vmem:[#allocation38_spill] sm:$0xff] %v10833_v18 }
 0x3ce   : > { %v10865_v55 = vsel %vm1149_vm5, %v4118_v41, %v4119_v62  ;;  %v11750_v41 = vld [vmem:[#allocation36_spill] sm:$0xff] }
 0x3cf   : > { %8043 = vmatmul.mubr.msk.f32.gmra.mrb[22].mxu1 %vm225_vm1, %v10820_v30 }
 0x3d0   : > { %8045 = vmatprep.mubr.msk.f32.mxu1 %vm225_vm1, %v10826_v6  ;;  %v10846_v6 = vsel %vm1149_vm5, %v4109_v48, %v4111_v1  ;;  %v4121_v48 = vrot.slane %v10571_v17, 2  ;;  %v4991_v17 = vld [vmem:[%s11454_s3 + $0x14] sm:$0xf] }
 0x3d2   : > { %v10870_v1 = vsel %vm1149_vm5, %v4119_v62, %v4121_v48  ;;  %v11751_v62 = vld [vmem:[#allocation41_spill] sm:$0xff] }
 0x3d3   : > { %8046 = vmatmul.mubr.msk.f32.gmra.mrb[24].mxu1 %vm225_vm1, %v10833_v18  ;;  %v11752_v48 = vld [vmem:[#allocation5_spill] sm:$0xff] }
 0x3d4   : > { %8048 = vmatprep.mubr.msk.f32.mxu1 %vm225_vm1, %v10839_v2  ;;  %v10859_v2 = vsel %vm1149_vm5, %v4114_v31, %v4116_v49  ;;  %v11748_v31 = vld [vmem:[#allocation28_spill] sm:$0xff]  ;;  %v11749_v49 = vld [vmem:[#allocation29_spill] sm:$0xff] }
 0x3d7   : > { %8049 = vmatmul.mubr.msk.f32.gmra.mrb[26].mxu1 %vm225_vm1, %v10846_v6 }
 0x3d8   : > { %8051 = vmatprep.mubr.msk.f32.mxu1 %vm225_vm1, %v10852_v4 }
 0x3db   : > { %8052 = vmatmul.mubr.msk.f32.gmra.mrb[28].mxu1 %vm225_vm1, %v10859_v2 }
 0x3dc   : > { %8054 = vmatprep.mubr.msk.f32.mxu1 %vm225_vm1, %v10865_v55 }
 0x3df   : > { %8055 = vmatmul.mubr.msk.f32.gmra.mrb[30].mxu1 %vm225_vm1, %v10870_v1 }
 0x3e0   : > { %8059 = vmatprep.mubr.msk.f32.mxu1 %vm225_vm1, %v10259_v27  ;;  %v10940_v27 = vld [vmem:[#allocation3 + $0x180] sm:$0xff] }
 0x3e3   : > { %8060 = vmatmul.mubr.msk.f32.vlgmr.msra.gmra.mrb[0].mxu1 %vm225_vm1, %v10261_v28  ;;  %v10944_v28 = vld [vmem:[#allocation3 + $0x188] sm:$0xff] }
 0x3e4   : > { %8108 = vmatpush3.msk.msra.mxu1 %vm628_vm0, %v10676_v33  ;;  %8062 = vmatprep.mubr.msk.f32.mxu1 %vm225_vm1, %v10280_v10  ;;  %v5256_v33 = vld [vmem:[%s11454_s3 + $0x18] sm:$0xf] }
 0x3e5   : > { %8157 = vmatprep.subr.msk.mxu1 %vm628_vm0, %v4991_v17 }
 0x3e7   : > { %8063 = vmatmul.mubr.msk.f32.gmra.mrb[2].mxu1 %vm225_vm1, %v10282_v20 }
 0x3e8   : > { %8065 = vmatprep.mubr.msk.f32.mxu1 %vm225_vm1, %v10303_v11 }
 0x3eb   : > { %8066 = vmatmul.mubr.msk.f32.gmra.mrb[4].mxu1 %vm225_vm1, %v10305_v23 }
 0x3ec   : > { %8068 = vmatprep.mubr.msk.f32.mxu1 %vm225_vm1, %v10326_v42 }
 0x3ef   : > { %8069 = vmatmul.mubr.msk.f32.gmra.mrb[6].mxu1 %vm225_vm1, %v10328_v22 }
 0x3f0   : > { %8071 = vmatprep.mubr.msk.f32.mxu1 %vm225_vm1, %v10349_v8 }
 0x3f3   : > { %8072 = vmatmul.mubr.msk.f32.gmra.mrb[8].mxu1 %vm225_vm1, %v10351_v26 }
 0x3f4   : > { %8074 = vmatprep.mubr.msk.f32.mxu1 %vm225_vm1, %v10372_v16 }
 0x3f7   : > { %8075 = vmatmul.mubr.msk.f32.gmra.mrb[10].mxu1 %vm225_vm1, %v10374_v19 }
 0x3f8   : > { %8077 = vmatprep.mubr.msk.f32.mxu1 %vm225_vm1, %v10395_v35 }
 0x3fb   : > { %8078 = vmatmul.mubr.msk.f32.gmra.mrb[12].mxu1 %vm225_vm1, %v10397_v47 }
 0x3fc   : > { %8080 = vmatprep.mubr.msk.f32.mxu1 %vm225_vm1, %v10418_v59 }
 0x3ff   : > { %8081 = vmatmul.mubr.msk.f32.gmra.mrb[14].mxu1 %vm225_vm1, %v10420_v12 }
 0x400   : > { %8083 = vmatprep.mubr.msk.f32.mxu1 %vm225_vm1, %v10441_v39 }
 0x403   : > { %8084 = vmatmul.mubr.msk.f32.gmra.mrb[16].mxu1 %vm225_vm1, %v10443_v40 }
 0x404   : > { %8086 = vmatprep.mubr.msk.f32.mxu1 %vm225_vm1, %v10464_v36 }
 0x407   : > { %8087 = vmatmul.mubr.msk.f32.gmra.mrb[18].mxu1 %vm225_vm1, %v10466_v56 }
 0x408   : > { %8089 = vmatprep.mubr.msk.f32.mxu1 %vm225_vm1, %v10487_v32 }
 0x40b   : > { %8090 = vmatmul.mubr.msk.f32.gmra.mrb[20].mxu1 %vm225_vm1, %v10489_v9 }
 0x40c   : > { %8092 = vmatprep.mubr.msk.f32.mxu1 %vm225_vm1, %v10510_v13 }
 0x40f   : > { %8093 = vmatmul.mubr.msk.f32.gmra.mrb[22].mxu1 %vm225_vm1, %v10512_v46 }
 0x410   : > { %8095 = vmatprep.mubr.msk.f32.mxu1 %vm225_vm1, %v10533_v37 }
 0x413   : > { %8096 = vmatmul.mubr.msk.f32.gmra.mrb[24].mxu1 %vm225_vm1, %v10535_v54 }
 0x414   : > { %8098 = vmatprep.mubr.msk.f32.mxu1 %vm225_vm1, %v10555_v63 }
 0x417   : > { %8099 = vmatmul.mubr.msk.f32.gmra.mrb[26].mxu1 %vm225_vm1, %v10557_v53 }
 0x418   : > { %8101 = vmatprep.mubr.msk.f32.mxu1 %vm225_vm1, %v10575_v58 }
 0x41b   : > { %8102 = vmatmul.mubr.msk.f32.gmra.mrb[28].mxu1 %vm225_vm1, %v10577_v45 }
 0x41c   : > { %8104 = vmatprep.mubr.msk.f32.mxu1 %vm225_vm1, %v10940_v27 }
 0x41f   : > { %8105 = vmatmul.mubr.msk.f32.gmra.mrb[30].mxu1 %vm225_vm1, %v10944_v28 }
 0x420   : > { %8109 = vmatprep.mubr.msk.f32.mxu1 %vm225_vm1, %v10269_v15  ;;  %v11745_v15 = vld [vmem:[#allocation15_spill] sm:$0xff] }
 0x423   : > { %8110 = vmatmul.mubr.msk.f32.vlgmr.msra.gmra.mrb[0].mxu1 %vm225_vm1, %v10272_v24  ;;  %v11746_v24 = vld [vmem:[#allocation26_spill] sm:$0xff] }
 0x424   : > { %8158 = vmatpush3.msk.msra.mxu1 %vm628_vm0, %v4991_v17  ;;  %8112 = vmatprep.mubr.msk.f32.mxu1 %vm225_vm1, %v10292_v60  ;;  %v11753_v17 = vld [vmem:[#allocation6_spill] sm:$0xff] }
 0x425   : > { %8207 = vmatprep.subr.msk.mxu1 %vm628_vm0, %v5256_v33 }
 0x427   : > { %8113 = vmatmul.mubr.msk.f32.gmra.mrb[2].mxu1 %vm225_vm1, %v10295_v5 }
 0x428   : > { %8115 = vmatprep.mubr.msk.f32.mxu1 %vm225_vm1, %v10315_v44 }
 0x42b   : > { %8116 = vmatmul.mubr.msk.f32.gmra.mrb[4].mxu1 %vm225_vm1, %v10318_v57 }
 0x42c   : > { %8118 = vmatprep.mubr.msk.f32.mxu1 %vm225_vm1, %v10338_v52  ;;  %v11767_v52 = vld [vmem:[#allocation21_spill] sm:$0xff] }
 0x42f   : > { %8119 = vmatmul.mubr.msk.f32.gmra.mrb[6].mxu1 %vm225_vm1, %v11745_v15  ;;  %v11766_v15 = vld [vmem:[#allocation20_spill] sm:$0xff] }
 0x430   : > { %8121 = vmatprep.mubr.msk.f32.mxu1 %vm225_vm1, %v11746_v24  ;;  %v11754_v24 = vld [vmem:[#allocation7_spill] sm:$0xff] }
 0x433   : > { %8122 = vmatmul.mubr.msk.f32.gmra.mrb[8].mxu1 %vm225_vm1, %v11747_v34  ;;  %v11755_v34 = vld [vmem:[#allocation8_spill] sm:$0xff] }
 0x434   : > { %8124 = vmatprep.mubr.msk.f32.mxu1 %vm225_vm1, %v11748_v31  ;;  %v11756_v31 = vld [vmem:[#allocation9_spill] sm:$0xff] }
 0x437   : > { %8125 = vmatmul.mubr.msk.f32.gmra.mrb[10].mxu1 %vm225_vm1, %v11749_v49  ;;  %v11757_v49 = vld [vmem:[#allocation10_spill] sm:$0xff] }
 0x438   : > { %8127 = vmatprep.mubr.msk.f32.mxu1 %vm225_vm1, %v11750_v41  ;;  %v11758_v41 = vld [vmem:[#allocation11_spill] sm:$0xff] }
 0x43b   : > { %8128 = vmatmul.mubr.msk.f32.gmra.mrb[12].mxu1 %vm225_vm1, %v11751_v62  ;;  %v11759_v62 = vld [vmem:[#allocation12_spill] sm:$0xff] }
 0x43c   : > { %8130 = vmatprep.mubr.msk.f32.mxu1 %vm225_vm1, %v11752_v48  ;;  %v11760_v48 = vld [vmem:[#allocation13_spill] sm:$0xff] }
 0x43f   : > { %8131 = vmatmul.mubr.msk.f32.gmra.mrb[14].mxu1 %vm225_vm1, %v11753_v17  ;;  %v11761_v17 = vld [vmem:[#allocation14_spill] sm:$0xff] }
 0x440   : > { %8133 = vmatprep.mubr.msk.f32.mxu1 %vm225_vm1, %v11754_v24  ;;  %v11762_v24 = vld [vmem:[#allocation16_spill] sm:$0xff] }
 0x443   : > { %8134 = vmatmul.mubr.msk.f32.gmra.mrb[16].mxu1 %vm225_vm1, %v11755_v34  ;;  %v11763_v34 = vld [vmem:[#allocation17_spill] sm:$0xff] }
 0x444   : > { %8136 = vmatprep.mubr.msk.f32.mxu1 %vm225_vm1, %v11756_v31  ;;  %v11764_v31 = vld [vmem:[#allocation18_spill] sm:$0xff] }
 0x447   : > { %8137 = vmatmul.mubr.msk.f32.gmra.mrb[18].mxu1 %vm225_vm1, %v11757_v49  ;;  %v4717_v49 = vrot.slane %v10944_v28, 1 }
 0x448   : > { %8139 = vmatprep.mubr.msk.f32.mxu1 %vm225_vm1, %v11758_v41  ;;  %v4716_v41 = vrot.slane %v10940_v27, 1 }
 0x44b   : > { %8140 = vmatmul.mubr.msk.f32.gmra.mrb[20].mxu1 %vm225_vm1, %v11759_v62  ;;  %v11765_v62 = vld [vmem:[#allocation19_spill] sm:$0xff] }
 0x44c   : > { %8142 = vmatprep.mubr.msk.f32.mxu1 %vm225_vm1, %v11760_v48  ;;  %v3325_v48 = vld [vmem:[#allocation3 + $0x190] sm:$0x3] }
 0x44f   : > { %8143 = vmatmul.mubr.msk.f32.gmra.mrb[22].mxu1 %vm225_vm1, %v11761_v17  ;;  %v4719_v17 = vrot.slane %v3325_v48, 1 }
 0x450   : > { %8145 = vmatprep.mubr.msk.f32.mxu1 %vm225_vm1, %v11762_v24 }
 0x453   : > { %8146 = vmatmul.mubr.msk.f32.gmra.mrb[24].mxu1 %vm225_vm1, %v11763_v34  ;;  %v11016_v34 = vsel %vm482_vm4, %v4716_v41, %v4717_v49  ;;  %v11772_v41 = vld [vmem:[#allocation30_spill] sm:$0xff] }
 0x454   : > { %8148 = vmatprep.mubr.msk.f32.mxu1 %vm225_vm1, %v11764_v31  ;;  %v11021_v31 = vsel %vm482_vm4, %v4717_v49, %v4719_v17  ;;  %v11768_v49 = vld [vmem:[#allocation22_spill] sm:$0xff]  ;;  %v11773_v17 = vld [vmem:[#allocation31_spill] sm:$0xff] }
 0x457   : > { %8149 = vmatmul.mubr.msk.f32.gmra.mrb[26].mxu1 %vm225_vm1, %v11765_v62 }
 0x458   : > { %8151 = vmatprep.mubr.msk.f32.mxu1 %vm225_vm1, %v11766_v15  ;;  %v5529_v15 = vld [vmem:[%s11454_s3 + $0x1c] sm:$0xf] }
 0x45b   : > { %8152 = vmatmul.mubr.msk.f32.gmra.mrb[28].mxu1 %vm225_vm1, %v11767_v52 }
 0x45c   : > { %8154 = vmatprep.mubr.msk.f32.mxu1 %vm225_vm1, %v11016_v34 }
 0x45f   : > { %8155 = vmatmul.mubr.msk.f32.gmra.mrb[30].mxu1 %vm225_vm1, %v11021_v31 }
 0x460   : > { %8159 = vmatprep.mubr.msk.f32.mxu1 %vm225_vm1, %v10680_v21  ;;  %v11769_v21 = vld [vmem:[#allocation23_spill] sm:$0xff] }
 0x463   : > { %8160 = vmatmul.mubr.msk.f32.vlgmr.msra.gmra.mrb[0].mxu1 %vm225_vm1, %v10690_v7  ;;  %v11770_v7 = vld [vmem:[#allocation24_spill] sm:$0xff] }
 0x464   : > { %8208 = vmatpush3.msk.msra.mxu1 %vm628_vm0, %v5256_v33  ;;  %8162 = vmatprep.mubr.msk.f32.mxu1 %vm225_vm1, %v10696_v14  ;;  %v11771_v33 = vld [vmem:[#allocation25_spill] sm:$0xff] }
 0x465   : > { %8257 = vmatprep.subr.msk.mxu1 %vm628_vm0, %v5529_v15 }
 0x467   : > { %8163 = vmatmul.mubr.msk.f32.gmra.mrb[2].mxu1 %vm225_vm1, %v10703_v51 }
 0x468   : > { %8165 = vmatprep.mubr.msk.f32.mxu1 %vm225_vm1, %v11768_v49 }
 0x46b   : > { %8166 = vmatmul.mubr.msk.f32.gmra.mrb[4].mxu1 %vm225_vm1, %v10716_v0 }
 0x46c   : > { %8168 = vmatprep.mubr.msk.f32.mxu1 %vm225_vm1, %v11769_v21 }
 0x46f   : > { %8169 = vmatmul.mubr.msk.f32.gmra.mrb[6].mxu1 %vm225_vm1, %v10729_v29 }
 0x470   : > { %8171 = vmatprep.mubr.msk.f32.mxu1 %vm225_vm1, %v11770_v7  ;;  %v11774_v7 = vld [vmem:[#allocation32_spill] sm:$0xff] }
 0x473   : > { %8172 = vmatmul.mubr.msk.f32.gmra.mrb[8].mxu1 %vm225_vm1, %v10742_v25 }
 0x474   : > { %8174 = vmatprep.mubr.msk.f32.mxu1 %vm225_vm1, %v11771_v33  ;;  %v11775_v33 = vld [vmem:[#allocation33_spill] sm:$0xff] }
 0x477   : > { %8175 = vmatmul.mubr.msk.f32.gmra.mrb[10].mxu1 %vm225_vm1, %v10755_v50 }
 0x478   : > { %8177 = vmatprep.mubr.msk.f32.mxu1 %vm225_vm1, %v11772_v41  ;;  %v11776_v41 = vld [vmem:[#allocation35_spill] sm:$0xff] }
 0x47b   : > { %8178 = vmatmul.mubr.msk.f32.gmra.mrb[12].mxu1 %vm225_vm1, %v10768_v61 }
 0x47c   : > { %8180 = vmatprep.mubr.msk.f32.mxu1 %vm225_vm1, %v11773_v17  ;;  %v11777_v17 = vld [vmem:[#allocation37_spill] sm:$0xff] }
 0x47f   : > { %8181 = vmatmul.mubr.msk.f32.gmra.mrb[14].mxu1 %vm225_vm1, %v10781_v3 }
 0x480   : > { %8183 = vmatprep.mubr.msk.f32.mxu1 %vm225_vm1, %v11774_v7  ;;  %v11778_v7 = vld [vmem:[#allocation39_spill] sm:$0xff] }
 0x483   : > { %8184 = vmatmul.mubr.msk.f32.gmra.mrb[16].mxu1 %vm225_vm1, %v10794_v43 }
 0x484   : > { %8186 = vmatprep.mubr.msk.f32.mxu1 %vm225_vm1, %v11775_v33 }
 0x487   : > { %8187 = vmatmul.mubr.msk.f32.gmra.mrb[18].mxu1 %vm225_vm1, %v10807_v38  ;;  %v4987_v38 = vrot.slane %v10944_v28, 2 }
 0x488   : > { %8189 = vmatprep.mubr.msk.f32.mxu1 %vm225_vm1, %v11776_v41  ;;  %v4986_v41 = vrot.slane %v10940_v27, 2 }
 0x48b   : > { %8190 = vmatmul.mubr.msk.f32.gmra.mrb[20].mxu1 %vm225_vm1, %v10820_v30 }
 0x48c   : > { %8192 = vmatprep.mubr.msk.f32.mxu1 %vm225_vm1, %v11777_v17 }
 0x48f   : > { %8193 = vmatmul.mubr.msk.f32.gmra.mrb[22].mxu1 %vm225_vm1, %v10833_v18  ;;  %v4989_v18 = vrot.slane %v3325_v48, 2  ;;  %v5799_v48 = vld [vmem:[%s11454_s3 + $0x20] sm:$0xf] }
 0x490   : > { %8195 = vmatprep.mubr.msk.f32.mxu1 %vm225_vm1, %v11778_v7  ;;  %v11093_v7 = vsel %vm1149_vm5, %v4986_v41, %v4987_v38 }
 0x493   : > { %8196 = vmatmul.mubr.msk.f32.gmra.mrb[24].mxu1 %vm225_vm1, %v10846_v6 }
 0x494   : > { %8198 = vmatprep.mubr.msk.f32.mxu1 %vm225_vm1, %v10852_v4  ;;  %v11098_v4 = vsel %vm1149_vm5, %v4987_v38, %v4989_v18  ;;  %v11311_v18 = vld [vmem:[%s11455_s4] ss:$0 sm:$0xff] }
 0x497   : > { %8199 = vmatmul.mubr.msk.f32.gmra.mrb[26].mxu1 %vm225_vm1, %v10859_v2 }
 0x498   : > { %8201 = vmatprep.mubr.msk.f32.mxu1 %vm225_vm1, %v10865_v55 }
 0x49b   : > { %8202 = vmatmul.mubr.msk.f32.gmra.mrb[28].mxu1 %vm225_vm1, %v10870_v1 }
 0x49c   : > { %8204 = vmatprep.mubr.msk.f32.mxu1 %vm225_vm1, %v11093_v7 }
 0x49f   : > { %8205 = vmatmul.mubr.msk.f32.gmra.mrb[30].mxu1 %vm225_vm1, %v11098_v4 }
 0x4a0   : > { %8209 = vmatprep.mubr.msk.f32.mxu1 %vm225_vm1, %v10280_v10  ;;  %v11165_v10 = vld [vmem:[#allocation3 + $0x198] sm:$0xff] }
 0x4a3   : > { %8210 = vmatmul.mubr.msk.f32.vlgmr.msra.gmra.mrb[0].mxu1 %vm225_vm1, %v10282_v20  ;;  %v11171_v20 = vld [vmem:[#allocation3 + $0x1a0] sm:$0xff] }
 0x4a4   : > { %8258 = vmatpush3.msk.msra.mxu1 %vm628_vm0, %v5529_v15  ;;  %8212 = vmatprep.mubr.msk.f32.mxu1 %vm225_vm1, %v10303_v11  ;;  %v11779_v11 = vld [vmem:[#allocation4_spill] sm:$0xff] }
 0x4a5   : > { %8307 = vmatprep.subr.msk.mxu1 %vm628_vm0, %v5799_v48 }
 0x4a7   : > { %8213 = vmatmul.mubr.msk.f32.gmra.mrb[2].mxu1 %vm225_vm1, %v10305_v23  ;;  %v11780_v23 = vld [vmem:[#allocation15_spill] sm:$0xff] }
 0x4a8   : > { %8215 = vmatprep.mubr.msk.f32.mxu1 %vm225_vm1, %v10326_v42  ;;  %v11781_v42 = vld [vmem:[#allocation26_spill] sm:$0xff] }
 0x4ab   : > { %8216 = vmatmul.mubr.msk.f32.gmra.mrb[4].mxu1 %vm225_vm1, %v10328_v22  ;;  %v11784_v22 = vld [vmem:[#allocation29_spill] sm:$0xff] }
 0x4ac   : > { %8218 = vmatprep.mubr.msk.f32.mxu1 %vm225_vm1, %v10349_v8  ;;  %v11787_v8 = vld [vmem:[#allocation5_spill] sm:$0xff] }
 0x4af   : > { %8219 = vmatmul.mubr.msk.f32.gmra.mrb[6].mxu1 %vm225_vm1, %v10351_v26  ;;  %v11788_v26 = vld [vmem:[#allocation6_spill] sm:$0xff] }
 0x4b0   : > { %8221 = vmatprep.mubr.msk.f32.mxu1 %vm225_vm1, %v10372_v16  ;;  %v11789_v16 = vld [vmem:[#allocation7_spill] sm:$0xff] }
 0x4b3   : > { %8222 = vmatmul.mubr.msk.f32.gmra.mrb[8].mxu1 %vm225_vm1, %v10374_v19  ;;  %v11790_v19 = vld [vmem:[#allocation8_spill] sm:$0xff] }
 0x4b4   : > { %8224 = vmatprep.mubr.msk.f32.mxu1 %vm225_vm1, %v10395_v35  ;;  %v11791_v35 = vld [vmem:[#allocation9_spill] sm:$0xff] }
 0x4b7   : > { %8225 = vmatmul.mubr.msk.f32.gmra.mrb[10].mxu1 %vm225_vm1, %v10397_v47  ;;  %v11792_v47 = vld [vmem:[#allocation10_spill] sm:$0xff] }
 0x4b8   : > { %8227 = vmatprep.mubr.msk.f32.mxu1 %vm225_vm1, %v10418_v59  ;;  %v11794_v59 = vld [vmem:[#allocation12_spill] sm:$0xff] }
 0x4bb   : > { %8228 = vmatmul.mubr.msk.f32.gmra.mrb[12].mxu1 %vm225_vm1, %v10420_v12  ;;  %v11795_v12 = vld [vmem:[#allocation13_spill] sm:$0xff] }
 0x4bc   : > { %8230 = vmatprep.mubr.msk.f32.mxu1 %vm225_vm1, %v10441_v39  ;;  %v11796_v39 = vld [vmem:[#allocation14_spill] sm:$0xff] }
 0x4bf   : > { %8231 = vmatmul.mubr.msk.f32.gmra.mrb[14].mxu1 %vm225_vm1, %v10443_v40  ;;  %v11797_v40 = vld [vmem:[#allocation17_spill] sm:$0xff] }
 0x4c0   : > { %8233 = vmatprep.mubr.msk.f32.mxu1 %vm225_vm1, %v10464_v36  ;;  %v5524_v36 = vrot.slane %v11165_v10, 1 }
 0x4c3   : > { %8234 = vmatmul.mubr.msk.f32.gmra.mrb[16].mxu1 %vm225_vm1, %v10466_v56  ;;  %v5525_v56 = vrot.slane %v11171_v20, 1 }
 0x4c4   : > { %8236 = vmatprep.mubr.msk.f32.mxu1 %vm225_vm1, %v10487_v32  ;;  %v11799_v32 = vld [vmem:[#allocation20_spill] sm:$0xff] }
 0x4c7   : > { %8237 = vmatmul.mubr.msk.f32.gmra.mrb[18].mxu1 %vm225_vm1, %v10489_v9  ;;  %v3328_v9 = vld [vmem:[#allocation3 + $0x1a8] sm:$0x3] }
 0x4c8   : > { %8239 = vmatprep.mubr.msk.f32.mxu1 %vm225_vm1, %v10510_v13  ;;  %v11798_v13 = vld [vmem:[#allocation18_spill] sm:$0xff] }
 0x4cb   : > { %8240 = vmatmul.mubr.msk.f32.gmra.mrb[20].mxu1 %vm225_vm1, %v10512_v46  ;;  %v5527_v46 = vrot.slane %v3328_v9, 1 }
 0x4cc   : > { %8242 = vmatprep.mubr.msk.f32.mxu1 %vm225_vm1, %v10533_v37  ;;  %v11793_v37 = vld [vmem:[#allocation11_spill] sm:$0xff] }
 0x4cf   : > { %8243 = vmatmul.mubr.msk.f32.gmra.mrb[22].mxu1 %vm225_vm1, %v10535_v54  ;;  %v5526_v54 = vsel %vm482_vm4, %v5524_v36, %v5525_v56 }
 0x4d0   : > { %8245 = vmatprep.mubr.msk.f32.mxu1 %vm225_vm1, %v10555_v63  ;;  %v5528_v63 = vsel %vm482_vm4, %v5525_v56, %v5527_v46 }
 0x4d3   : > { %8246 = vmatmul.mubr.msk.f32.gmra.mrb[24].mxu1 %vm225_vm1, %v10557_v53  ;;  %v11801_v53 = vld [vmem:[#allocation25_spill] sm:$0xff] }
 0x4d4   : > { %8248 = vmatprep.mubr.msk.f32.mxu1 %vm225_vm1, %v10575_v58  ;;  %v11802_v58 = vld [vmem:[#allocation30_spill] sm:$0xff] }
 0x4d7   : > { %8249 = vmatmul.mubr.msk.f32.gmra.mrb[26].mxu1 %vm225_vm1, %v10577_v45  ;;  %v11803_v45 = vld [vmem:[#allocation31_spill] sm:$0xff] }
 0x4d8   : > { %8251 = vmatprep.mubr.msk.f32.mxu1 %vm225_vm1, %v10940_v27  ;;  %v6103_v27 = vld [vmem:[%s9123_s28] sm:$0xff] }
 0x4db   : > { %8252 = vmatmul.mubr.msk.f32.gmra.mrb[28].mxu1 %vm225_vm1, %v10944_v28 }
 0x4dc   : > { %8254 = vmatprep.mubr.msk.f32.mxu1 %vm225_vm1, %v11165_v10 }
 0x4df   : > { %8255 = vmatmul.mubr.msk.f32.gmra.mrb[30].mxu1 %vm225_vm1, %v11171_v20 }
 0x4e0   : > { %8259 = vmatprep.mubr.msk.f32.mxu1 %vm225_vm1, %v10292_v60  ;;  %v11782_v60 = vld [vmem:[#allocation27_spill] sm:$0xff] }
 0x4e3   : > { %8260 = vmatmul.mubr.msk.f32.vlgmr.msra.gmra.mrb[0].mxu1 %vm225_vm1, %v10295_v5  ;;  %v11783_v5 = vld [vmem:[#allocation28_spill] sm:$0xff] }
 0x4e4   : > { %8308 = vmatpush3.msk.msra.mxu1 %vm628_vm0, %v5799_v48  ;;  %8262 = vmatprep.mubr.msk.f32.mxu1 %vm225_vm1, %v10315_v44  ;;  %v11785_v44 = vld [vmem:[#allocation36_spill] sm:$0xff] }
 0x4e7   : > { %8263 = vmatmul.mubr.msk.f32.gmra.mrb[2].mxu1 %vm225_vm1, %v10318_v57  ;;  %v11786_v57 = vld [vmem:[#allocation41_spill] sm:$0xff] }
 0x4e8   : > { %8265 = vmatprep.mubr.msk.f32.mxu1 %vm225_vm1, %v11779_v11 }
 0x4eb   : > { %8266 = vmatmul.mubr.msk.f32.gmra.mrb[4].mxu1 %vm225_vm1, %v11780_v23 }
 0x4ec   : > { %8268 = vmatprep.mubr.msk.f32.mxu1 %vm225_vm1, %v11781_v42 }
 0x4ef   : > { %8269 = vmatmul.mubr.msk.f32.gmra.mrb[6].mxu1 %vm225_vm1, %v11782_v60 }
 0x4f0   : > { %8271 = vmatprep.mubr.msk.f32.mxu1 %vm225_vm1, %v11783_v5  ;;  %v6110_v5 = vld [vmem:[%s9123_s28 + $0x38] sm:$0xff] }
 0x4f3   : > { %8272 = vmatmul.mubr.msk.f32.gmra.mrb[8].mxu1 %vm225_vm1, %v11784_v22 }
 0x4f4   : > { %8274 = vmatprep.mubr.msk.f32.mxu1 %vm225_vm1, %v11785_v44 }
 0x4f7   : > { %8275 = vmatmul.mubr.msk.f32.gmra.mrb[10].mxu1 %vm225_vm1, %v11786_v57  ;;  %v6109_v57 = vld [vmem:[%s9123_s28 + $0x30] sm:$0xff] }
 0x4f8   : > { %8277 = vmatprep.mubr.msk.f32.mxu1 %vm225_vm1, %v11787_v8 }
 0x4fb   : > { %8278 = vmatmul.mubr.msk.f32.gmra.mrb[12].mxu1 %vm225_vm1, %v11788_v26 }
 0x4fc   : > { %8280 = vmatprep.mubr.msk.f32.mxu1 %vm225_vm1, %v11789_v16 }
 0x4ff   : > { %8281 = vmatmul.mubr.msk.f32.gmra.mrb[14].mxu1 %vm225_vm1, %v11790_v19 }
 0x500   : > { %8283 = vmatprep.mubr.msk.f32.mxu1 %vm225_vm1, %v11791_v35  ;;  %v6112_v35 = vld [vmem:[%s9123_s28 + $0x48] sm:$0xff] }
 0x503   : > { %8284 = vmatmul.mubr.msk.f32.gmra.mrb[16].mxu1 %vm225_vm1, %v11792_v47 }
 0x504   : > { %8286 = vmatprep.mubr.msk.f32.mxu1 %vm225_vm1, %v11793_v37 }
 0x507   : > { %8287 = vmatmul.mubr.msk.f32.gmra.mrb[18].mxu1 %vm225_vm1, %v11794_v59  ;;  %v6111_v59 = vld [vmem:[%s9123_s28 + $0x40] sm:$0xff] }
 0x508   : > { %8289 = vmatprep.mubr.msk.f32.mxu1 %vm225_vm1, %v11795_v12 }
 0x50b   : > { %8290 = vmatmul.mubr.msk.f32.gmra.mrb[20].mxu1 %vm225_vm1, %v11796_v39 }
 0x50c   : > { %8292 = vmatprep.mubr.msk.f32.mxu1 %vm225_vm1, %v11762_v24 }
 0x50f   : > { %8293 = vmatmul.mubr.msk.f32.gmra.mrb[22].mxu1 %vm225_vm1, %v11797_v40 }
 0x510   : > { %8295 = vmatprep.mubr.msk.f32.mxu1 %vm225_vm1, %v11798_v13 }
 0x513   : > { %8296 = vmatmul.mubr.msk.f32.gmra.mrb[24].mxu1 %vm225_vm1, %v11765_v62 }
 0x514   : > { %8298 = vmatprep.mubr.msk.f32.mxu1 %vm225_vm1, %v11799_v32  ;;  %v6114_v32 = vld [vmem:[%s9123_s28 + $0x58] sm:$0xff] }
 0x517   : > { %8299 = vmatmul.mubr.msk.f32.gmra.mrb[26].mxu1 %vm225_vm1, %v11767_v52  ;;  %v11800_v52 = vld [vmem:[#allocation24_spill] sm:$0xff] }
 0x518   : > { %8301 = vmatprep.mubr.msk.f32.mxu1 %vm225_vm1, %v11016_v34  ;;  %v6106_v34 = vld [vmem:[%s9123_s28 + $0x18] sm:$0xff] }
 0x51b   : > { %8302 = vmatmul.mubr.msk.f32.gmra.mrb[28].mxu1 %vm225_vm1, %v11021_v31 }
 0x51c   : > { %8304 = vmatprep.mubr.msk.f32.mxu1 %vm225_vm1, %v5526_v54 }
 0x51f   : > { %8305 = vmatmul.mubr.msk.f32.gmra.mrb[30].mxu1 %vm225_vm1, %v5528_v63 }
 0x520   : > { %8309 = vmatprep.mubr.msk.f32.mxu1 %vm225_vm1, %v10696_v14  ;;  %v11804_v14 = vld [vmem:[#allocation32_spill] sm:$0xff] }
 0x523   : > { %8310 = vmatmul.mubr.msk.f32.vlgmr.msra.gmra.mrb[0].mxu1 %vm225_vm1, %v10703_v51  ;;  %v11805_v51 = vld [vmem:[#allocation34_spill] sm:$0xff] }
 0x524   : > { %8312 = vmatprep.mubr.msk.f32.mxu1 %vm225_vm1, %v11768_v49  ;;  %v6105_v49 = vld [vmem:[%s9123_s28 + $0x10] sm:$0xff] }
 0x527   : > { %8313 = vmatmul.mubr.msk.f32.gmra.mrb[2].mxu1 %vm225_vm1, %v10716_v0  ;;  %v11807_v0 = vld [vmem:[#allocation38_spill] sm:$0xff] }
 0x528   : > { %8315 = vmatprep.mubr.msk.f32.mxu1 %vm225_vm1, %v11769_v21 }
 0x52b   : > { %8316 = vmatmul.mubr.msk.f32.gmra.mrb[4].mxu1 %vm225_vm1, %v10729_v29  ;;  %v11806_v29 = vld [vmem:[#allocation35_spill] sm:$0xff] }
 0x52c   : > { %8318 = vmatprep.mubr.msk.f32.mxu1 %vm225_vm1, %v11800_v52 }
 0x52f   : > { %8319 = vmatmul.mubr.msk.f32.gmra.mrb[6].mxu1 %vm225_vm1, %v10742_v25  ;;  %v11808_v25 = vld [vmem:[#allocation39_spill] sm:$0xff] }
 0x530   : > { %8321 = vmatprep.mubr.msk.f32.mxu1 %vm225_vm1, %v11801_v53  ;;  %v6116_v53 = vld [vmem:[%s9123_s28 + $0x68] sm:$0xff] }
 0x533   : > { %8322 = vmatmul.mubr.msk.f32.gmra.mrb[8].mxu1 %vm225_vm1, %v10755_v50  ;;  %v11809_v50 = vld [vmem:[#allocation40_spill] sm:$0xff] }
 0x534   : > { %8324 = vmatprep.mubr.msk.f32.mxu1 %vm225_vm1, %v11802_v58 }
 0x537   : > { %8325 = vmatmul.mubr.msk.f32.gmra.mrb[10].mxu1 %vm225_vm1, %v10768_v61  ;;  %v5794_v61 = vrot.slane %v11165_v10, 2 }
 0x538   : > { %8327 = vmatprep.mubr.msk.f32.mxu1 %vm225_vm1, %v11803_v45 }
 0x53b   : > { %8328 = vmatmul.mubr.msk.f32.gmra.mrb[12].mxu1 %vm225_vm1, %v10781_v3  ;;  %v5795_v3 = vrot.slane %v11171_v20, 2  ;;  %v6107_v20 = vld [vmem:[%s9123_s28 + $0x20] sm:$0xff] }
 0x53c   : > { %8330 = vmatprep.mubr.msk.f32.mxu1 %vm225_vm1, %v11804_v14  ;;  %v6115_v14 = vld [vmem:[%s9123_s28 + $0x60] sm:$0xff] }
 0x53d   : > { %v5796_v38 = vsel %vm1149_vm5, %v5794_v61, %v5795_v3 }
 0x53f   : > { %8331 = vmatmul.mubr.msk.f32.gmra.mrb[14].mxu1 %vm225_vm1, %v10794_v43  ;;  %v5797_v43 = vrot.slane %v3328_v9, 2  ;;  %v6113_v9 = vld [vmem:[%s9123_s28 + $0x50] sm:$0xff] }
 0x540   : > { %8333 = vmatprep.mubr.msk.f32.mxu1 %vm225_vm1, %v11775_v33 }
 0x543   : > { %8334 = vmatmul.mubr.msk.f32.gmra.mrb[16].mxu1 %vm225_vm1, %v11805_v51 }
 0x544   : > { %8336 = vmatprep.mubr.msk.f32.mxu1 %vm225_vm1, %v11806_v29 }
 0x547   : > { %8337 = vmatmul.mubr.msk.f32.gmra.mrb[18].mxu1 %vm225_vm1, %v10820_v30  ;;  %v5798_v30 = vsel %vm1149_vm5, %v5795_v3, %v5797_v43  ;;  %v6117_v43 = vld [vmem:[%s9123_s28 + $0x70] sm:$0xff] }
 0x548   : > { %8339 = vmatprep.mubr.msk.f32.mxu1 %vm225_vm1, %v11777_v17  ;;  %v6108_v17 = vld [vmem:[%s9123_s28 + $0x28] sm:$0xff] }
 0x54b   : > { %8340 = vmatmul.mubr.msk.f32.gmra.mrb[20].mxu1 %vm225_vm1, %v11807_v0 }
 0x54c   : > { %8342 = vmatprep.mubr.msk.f32.mxu1 %vm225_vm1, %v11808_v25 }
 0x54f   : > { %8343 = vmatmul.mubr.msk.f32.gmra.mrb[22].mxu1 %vm225_vm1, %v10846_v6 }
 0x550   : > { %8345 = vmatprep.mubr.msk.f32.mxu1 %vm225_vm1, %v11809_v50  ;;  %v6118_v50 = vld [vmem:[%s9123_s28 + $0x78] sm:$0xff] }
 0x553   : > { %8346 = vmatmul.mubr.msk.f32.gmra.mrb[24].mxu1 %vm225_vm1, %v10859_v2  ;;  %v6104_v2 = vld [vmem:[%s9123_s28 + $0x8] sm:$0xff] }
 0x554   : > { %8348 = vmatprep.mubr.msk.f32.mxu1 %vm225_vm1, %v10865_v55 }
 0x557   : > { %8349 = vmatmul.mubr.msk.f32.gmra.mrb[26].mxu1 %vm225_vm1, %v10870_v1 }
 0x558   : > { %8351 = vmatprep.mubr.msk.f32.mxu1 %vm225_vm1, %v11093_v7 }
 0x55b   : > { %8352 = vmatmul.mubr.msk.f32.gmra.mrb[28].mxu1 %vm225_vm1, %v11098_v4 }
 0x55c   : > { %8354 = vmatprep.mubr.msk.f32.mxu1 %vm225_vm1, %v5796_v38 }
 0x55f   : > { %8355 = vmatmul.mubr.msk.f32.gmra.mrb[30].mxu1 %vm225_vm1, %v5798_v30 }
 0x5f6   : > { %v8311_v6 = vpop.f32.mrb[0].mxu1 }
 0x5f7   : > { %v6072_v55 = vadd.f32 %v8311_v6, %v11311_v18  ;;  %v5873_v1 = vpop.f32.mrb[1].mxu1 }
 0x5f8   : > { %v6071_v4 = vadd.f32 %v11311_v18, %v5873_v1 }
 0x5f9   : > { %v6136_v28 = vadd.f32 %v6104_v2, %v6072_v55  ;;  %v6120_v55 = vld [vmem:[%s9123_s28 + $0x88] sm:$0xff] }
 0x5fa   : > { %v6135_v15 = vadd.f32 %v6103_v27, %v6071_v4  ;;  %v8314_v24 = vpop.f32.mrb[2].mxu1  ;;  %v6119_v4 = vld [vmem:[%s9123_s28 + $0x80] sm:$0xff] }
 0x5fb   : > { %6168 = vst.msk [vmem:[%s11321_s23 + $0x8] sm:$0xff] %vm225_vm1, %v6136_v28  ;;  %v6074_v31 = vadd.f32 %v8314_v24, %v11311_v18  ;;  %v5883_v62 = vpop.f32.mrb[3].mxu1 }
 0x5fc   : > { %6167 = vst.msk [vmem:[%s11321_s23] sm:$0xff] %vm225_vm1, %v6135_v15  ;;  %v6073_v21 = vadd.f32 %v11311_v18, %v5883_v62 }
 0x5fd   : > { %v6138_v7 = vadd.f32 %v6106_v34, %v6074_v31  ;;  %v6122_v31 = vld [vmem:[%s9123_s28 + $0x98] sm:$0xff] }
 0x5fe   : > { %v6137_v33 = vadd.f32 %v6105_v49, %v6073_v21  ;;  %v8317_v41 = vpop.f32.mrb[4].mxu1  ;;  %v6121_v21 = vld [vmem:[%s9123_s28 + $0x90] sm:$0xff] }
 0x5ff   : > { %6170 = vst.msk [vmem:[%s11321_s23 + $0x18] sm:$0xff] %vm225_vm1, %v6138_v7  ;;  %v6076_v48 = vadd.f32 %v8317_v41, %v11311_v18  ;;  %v5893_v10 = vpop.f32.mrb[5].mxu1 }
 0x600   : > { %6169 = vst.msk [vmem:[%s11321_s23 + $0x10] sm:$0xff] %vm225_vm1, %v6137_v33  ;;  %v6075_v11 = vadd.f32 %v11311_v18, %v5893_v10 }
 0x601   : > { %v6140_v23 = vadd.f32 %v6108_v17, %v6076_v48  ;;  %v6124_v48 = vld [vmem:[%s9123_s28 + $0xa8] sm:$0xff] }
 0x602   : > { %v6139_v42 = vadd.f32 %v6107_v20, %v6075_v11  ;;  %v8320_v60 = vpop.f32.mrb[6].mxu1  ;;  %v6123_v11 = vld [vmem:[%s9123_s28 + $0xa0] sm:$0xff] }
 0x603   : > { %6172 = vst.msk [vmem:[%s11321_s23 + $0x28] sm:$0xff] %vm225_vm1, %v6140_v23  ;;  %v6078_v22 = vadd.f32 %v8320_v60, %v11311_v18  ;;  %v5903_v44 = vpop.f32.mrb[7].mxu1 }
 0x604   : > { %6171 = vst.msk [vmem:[%s11321_s23 + $0x20] sm:$0xff] %vm225_vm1, %v6139_v42  ;;  %v6077_v8 = vadd.f32 %v11311_v18, %v5903_v44 }
 0x605   : > { %v6142_v26 = vadd.f32 %v6110_v5, %v6078_v22  ;;  %v6126_v22 = vld [vmem:[%s9123_s28 + $0xb8] sm:$0xff] }
 0x606   : > { %v6141_v16 = vadd.f32 %v6109_v57, %v6077_v8  ;;  %v8323_v19 = vpop.f32.mrb[8].mxu1  ;;  %v6125_v8 = vld [vmem:[%s9123_s28 + $0xb0] sm:$0xff] }
 0x607   : > { %6174 = vst.msk [vmem:[%s11321_s23 + $0x38] sm:$0xff] %vm225_vm1, %v6142_v26  ;;  %v6080_v47 = vadd.f32 %v8323_v19, %v11311_v18  ;;  %v5913_v37 = vpop.f32.mrb[9].mxu1 }
 0x608   : > { %6173 = vst.msk [vmem:[%s11321_s23 + $0x30] sm:$0xff] %vm225_vm1, %v6141_v16  ;;  %v6079_v12 = vadd.f32 %v11311_v18, %v5913_v37 }
 0x609   : > { %v6144_v39 = vadd.f32 %v6112_v35, %v6080_v47  ;;  %v6128_v47 = vld [vmem:[%s9123_s28 + $0xc8] sm:$0xff] }
 0x60a   : > { %v6143_v40 = vadd.f32 %v6111_v59, %v6079_v12  ;;  %v8326_v13 = vpop.f32.mrb[10].mxu1  ;;  %v6127_v12 = vld [vmem:[%s9123_s28 + $0xc0] sm:$0xff] }
 0x60b   : > { %6176 = vst.msk [vmem:[%s11321_s23 + $0x48] sm:$0xff] %vm225_vm1, %v6144_v39  ;;  %v6082_v36 = vadd.f32 %v8326_v13, %v11311_v18  ;;  %v5923_v56 = vpop.f32.mrb[11].mxu1 }
 0x60c   : > { %6175 = vst.msk [vmem:[%s11321_s23 + $0x40] sm:$0xff] %vm225_vm1, %v6143_v40  ;;  %v6081_v46 = vadd.f32 %v11311_v18, %v5923_v56 }
 0x60d   : > { %v6146_v54 = vadd.f32 %v6114_v32, %v6082_v36  ;;  %v6130_v36 = vld [vmem:[%s9123_s28 + $0xd8] sm:$0xff] }
 0x60e   : > { %v6145_v63 = vadd.f32 %v6113_v9, %v6081_v46  ;;  %v8329_v52 = vpop.f32.mrb[12].mxu1  ;;  %v6129_v46 = vld [vmem:[%s9123_s28 + $0xd0] sm:$0xff] }
 0x60f   : > { %6178 = vst.msk [vmem:[%s11321_s23 + $0x58] sm:$0xff] %vm225_vm1, %v6146_v54  ;;  %v6084_v58 = vadd.f32 %v8329_v52, %v11311_v18  ;;  %v5933_v45 = vpop.f32.mrb[13].mxu1 }
 0x610   : > { %6177 = vst.msk [vmem:[%s11321_s23 + $0x50] sm:$0xff] %vm225_vm1, %v6145_v63  ;;  %v6083_v51 = vadd.f32 %v11311_v18, %v5933_v45 }
 0x611   : > { %v6148_v29 = vadd.f32 %v6116_v53, %v6084_v58  ;;  %v6132_v58 = vld [vmem:[%s9123_s28 + $0xe8] sm:$0xff] }
 0x612   : > { %v6147_v0 = vadd.f32 %v6115_v14, %v6083_v51  ;;  %v8332_v25 = vpop.f32.mrb[14].mxu1  ;;  %v6131_v51 = vld [vmem:[%s9123_s28 + $0xe0] sm:$0xff] }
 0x613   : > { %6180 = vst.msk [vmem:[%s11321_s23 + $0x68] sm:$0xff] %vm225_vm1, %v6148_v29  ;;  %v6086_v61 = vadd.f32 %v8332_v25, %v11311_v18  ;;  %v5943_v3 = vpop.f32.mrb[15].mxu1 }
 0x614   : > { %6179 = vst.msk [vmem:[%s11321_s23 + $0x60] sm:$0xff] %vm225_vm1, %v6147_v0  ;;  %v6085_v38 = vadd.f32 %v11311_v18, %v5943_v3 }
 0x615   : > { %v6150_v30 = vadd.f32 %v6118_v50, %v6086_v61  ;;  %v6134_v61 = vld [vmem:[%s9123_s28 + $0xf8] sm:$0xff] }
 0x616   : > { %v6149_v6 = vadd.f32 %v6117_v43, %v6085_v38  ;;  %v8335_v2 = vpop.f32.mrb[16].mxu1  ;;  %v6133_v38 = vld [vmem:[%s9123_s28 + $0xf0] sm:$0xff] }
 0x617   : > { %6182 = vst.msk [vmem:[%s11321_s23 + $0x78] sm:$0xff] %vm225_vm1, %v6150_v30  ;;  %v6088_v1 = vadd.f32 %v8335_v2, %v11311_v18  ;;  %v5953_v27 = vpop.f32.mrb[17].mxu1 }
 0x618   : > { %6181 = vst.msk [vmem:[%s11321_s23 + $0x70] sm:$0xff] %vm225_vm1, %v6149_v6  ;;  %v6087_v28 = vadd.f32 %v11311_v18, %v5953_v27 }
 0x619   : > { %v6152_v15 = vadd.f32 %v6120_v55, %v6088_v1 }
 0x61a   : > { %v6151_v24 = vadd.f32 %v6119_v4, %v6087_v28  ;;  %v8338_v34 = vpop.f32.mrb[18].mxu1 }
 0x61b   : > { %6184 = vst.msk [vmem:[%s11321_s23 + $0x88] sm:$0xff] %vm225_vm1, %v6152_v15  ;;  %v6090_v62 = vadd.f32 %v8338_v34, %v11311_v18  ;;  %v5963_v49 = vpop.f32.mrb[19].mxu1 }
 0x61c   : > { %6183 = vst.msk [vmem:[%s11321_s23 + $0x80] sm:$0xff] %vm225_vm1, %v6151_v24  ;;  %v6089_v7 = vadd.f32 %v11311_v18, %v5963_v49 }
 0x61d   : > { %v6154_v33 = vadd.f32 %v6122_v31, %v6090_v62 }
 0x61e   : > { %v6153_v41 = vadd.f32 %v6121_v21, %v6089_v7  ;;  %v8341_v17 = vpop.f32.mrb[20].mxu1 }
 0x61f   : > { %6186 = vst.msk [vmem:[%s11321_s23 + $0x98] sm:$0xff] %vm225_vm1, %v6154_v33  ;;  %v6092_v10 = vadd.f32 %v8341_v17, %v11311_v18  ;;  %v5973_v20 = vpop.f32.mrb[21].mxu1 }
 0x620   : > { %6185 = vst.msk [vmem:[%s11321_s23 + $0x90] sm:$0xff] %vm225_vm1, %v6153_v41  ;;  %v6091_v23 = vadd.f32 %v11311_v18, %v5973_v20 }
 0x621   : > { %v6156_v42 = vadd.f32 %v6124_v48, %v6092_v10 }
 0x622   : > { %v6155_v60 = vadd.f32 %v6123_v11, %v6091_v23  ;;  %v8344_v5 = vpop.f32.mrb[22].mxu1 }
 0x623   : > { %6188 = vst.msk [vmem:[%s11321_s23 + $0xa8] sm:$0xff] %vm225_vm1, %v6156_v42  ;;  %v6094_v44 = vadd.f32 %v8344_v5, %v11311_v18  ;;  %v5983_v57 = vpop.f32.mrb[23].mxu1 }
 0x624   : > { %6187 = vst.msk [vmem:[%s11321_s23 + $0xa0] sm:$0xff] %vm225_vm1, %v6155_v60  ;;  %v6093_v26 = vadd.f32 %v11311_v18, %v5983_v57 }
 0x625   : > { %v6158_v16 = vadd.f32 %v6126_v22, %v6094_v44 }
 0x626   : > { %v6157_v19 = vadd.f32 %v6125_v8, %v6093_v26  ;;  %v8347_v35 = vpop.f32.mrb[24].mxu1 }
 0x627   : > { %6190 = vst.msk [vmem:[%s11321_s23 + $0xb8] sm:$0xff] %vm225_vm1, %v6158_v16  ;;  %v6096_v37 = vadd.f32 %v8347_v35, %v11311_v18  ;;  %v5993_v59 = vpop.f32.mrb[25].mxu1 }
 0x628   : > { %6189 = vst.msk [vmem:[%s11321_s23 + $0xb0] sm:$0xff] %vm225_vm1, %v6157_v19  ;;  %v6095_v39 = vadd.f32 %v11311_v18, %v5993_v59 }
 0x629   : > { %v6160_v40 = vadd.f32 %v6128_v47, %v6096_v37 }
 0x62a   : > { %v6159_v13 = vadd.f32 %v6127_v12, %v6095_v39  ;;  %v8350_v32 = vpop.f32.mrb[26].mxu1 }
 0x62b   : > { %6192 = vst.msk [vmem:[%s11321_s23 + $0xc8] sm:$0xff] %vm225_vm1, %v6160_v40  ;;  %v6098_v56 = vadd.f32 %v8350_v32, %v11311_v18  ;;  %v6003_v9 = vpop.f32.mrb[27].mxu1 }
 0x62c   : > { %6191 = vst.msk [vmem:[%s11321_s23 + $0xc0] sm:$0xff] %vm225_vm1, %v6159_v13  ;;  %v6097_v54 = vadd.f32 %v11311_v18, %v6003_v9 }
 0x62d   : > { %v6162_v63 = vadd.f32 %v6130_v36, %v6098_v56 }
 0x62e   : > { %v6161_v52 = vadd.f32 %v6129_v46, %v6097_v54  ;;  %v8353_v53 = vpop.f32.mrb[28].mxu1 }
 0x62f   : > { %6194 = vst.msk [vmem:[%s11321_s23 + $0xd8] sm:$0xff] %vm225_vm1, %v6162_v63  ;;  %v6100_v45 = vadd.f32 %v8353_v53, %v11311_v18  ;;  %v6013_v14 = vpop.f32.mrb[29].mxu1 }
 0x630   : > { %6193 = vst.msk [vmem:[%s11321_s23 + $0xd0] sm:$0xff] %vm225_vm1, %v6161_v52  ;;  %v6099_v29 = vadd.f32 %v11311_v18, %v6013_v14 }
 0x631   : > { %v6164_v0 = vadd.f32 %v6132_v58, %v6100_v45 }
 0x632   : > { %v6163_v25 = vadd.f32 %v6131_v51, %v6099_v29  ;;  %v8356_v50 = vpop.f32.mrb[30].mxu1 }
 0x633   : > { %6196 = vst.msk [vmem:[%s11321_s23 + $0xe8] sm:$0xff] %vm225_vm1, %v6164_v0  ;;  %v6102_v3 = vadd.f32 %v8356_v50, %v11311_v18  ;;  %v6023_v43 = vpop.f32.mrb[31].mxu1 }
 0x634   : > { %6195 = vst.msk [vmem:[%s11321_s23 + $0xe0] sm:$0xff] %vm225_vm1, %v6163_v25  ;;  %v6101_v30 = vadd.f32 %v11311_v18, %v6023_v43 }
 0x635   : > { %v6166_v6 = vadd.f32 %v6134_v61, %v6102_v3 }
 0x636   : > { %v6165_v2 = vadd.f32 %v6133_v38, %v6101_v30 }
 0x637   : > { %6198 = vst.msk [vmem:[%s11321_s23 + $0xf8] sm:$0xff] %vm225_vm1, %v6166_v6 }
 0x638   : > { %6197 = vst.msk [vmem:[%s11321_s23 + $0xf0] sm:$0xff] %vm225_vm1, %v6165_v2 }
 0x639 PF: > { %s15_s18 = sadd.s32 1, %s8884_s18  }
 0x63a   : > { %p12_p4 = scmp.ge.s32.totalorder %s15_s18, 4  }
 0x63c   :  { %14 = sbr.rel (!%p12_p4) target bundleno = 1 (0x1), region = 74 }

</bundles_post_ra>
